<compile_context>
chip_gen: v5e
topology: v5e:2x2
jax: 0.10.0
libtpu: 0.0.40
codegen_flags: <defaults>
</compile_context>

<pallas_src>
import math

import numpy as np
import jax
import jax.numpy as jnp
from jax.experimental import pallas as pl
from jax.experimental.pallas import tpu as pltpu


_MS_WEIGHTS = (0.0448, 0.2856, 0.3001, 0.2363, 0.1333)
_LEVELS = len(_MS_WEIGHTS)
_OUT_W = 16          # per-image row: [ssim_0..4, cs_0..4, dice_inter, dice_psq, dice_tsq, pad]
_LANE = 128
_SUBLANE = 8


def _round_up(x, m):
    return ((x + m - 1) // m) * m


def _gaussian_1d(window_size, sigma=1.5):
    g = np.array(
        [math.exp(-((x - window_size // 2) ** 2) / (2.0 * sigma * sigma))
         for x in range(window_size)],
        dtype=np.float64)
    return (g / g.sum()).astype(np.float32)


def _band_A(H, Ho, Ho_p, K, g):
    """Row-pass band matrix, zero-padded to Ho_p (multiple of 8) rows."""
    A = np.zeros((Ho_p, H), np.float32)
    for p in range(Ho):
        A[p, p:p + K] = g
    return A


def _band_B_blockdiag(W, Wo, W_p, Wo_p, K, g, n_ops=5):
    """Block-diagonal column-pass band matrix; each block is (W_p, Wo_p), lane-padded."""
    Bb = np.zeros((n_ops * W_p, n_ops * Wo_p), np.float32)
    for m in range(n_ops):
        for q in range(Wo):
            Bb[m * W_p + q: m * W_p + q + K, m * Wo_p + q] = g
    return Bb


def _avg_pool_2x2(x):
    # F.avg_pool2d(x, (2, 2)) on (N, H, W): floor output size, trailing row/col dropped.
    N, H, W = x.shape
    H2, W2 = H // 2, W // 2
    x = x[:, :2 * H2, :2 * W2]
    return x.reshape(N, H2, 2, W2, 2).mean(axis=(2, 4))


def _vmem_limit_bytes():
    cap = None
    fn = getattr(pltpu, "get_tpu_info", None)
    if fn is not None:
        try:
            cap = getattr(fn(), "vmem_capacity_bytes", None)
        except Exception:
            cap = None
    if not cap:
        cap = 128 * 1024 * 1024
    # ~60% of physical VMEM, capped at 96 MiB: ~38 MiB on v7x, ~76 MiB on v5e/v6e.
    return max(16 * 1024 * 1024, min(int(cap) * 3 // 5, 96 * 1024 * 1024))


# --------------------------- fused per-image kernel ---------------------------

def _build_kernel(level_meta, dice_w0, dice_w1):
    L = len(level_meta)
    mxu_levels = [l for l, m in enumerate(level_meta) if m["mxu"]]
    red_levels = [l for l, m in enumerate(level_meta) if not m["mxu"]]
    n_mxu = len(mxu_levels)
    n_red = len(red_levels)

    def kernel(*refs):
        c2_ref = refs[0]                                   # (5,) f32 in SMEM
        img_refs = refs[1:1 + 2 * L]                       # per level: img1, img2 blocks
        p = 1 + 2 * L
        mat_refs = refs[p:p + 2 * n_mxu]; p += 2 * n_mxu   # per MXU level: A, B_blk
        w2d_refs = refs[p:p + n_red]; p += n_red           # per 1x1-map level: w2d
        out_ref = refs[p]; p += 1
        xs_refs = refs[p:p + n_mxu]                        # per MXU level: (H, 5*W_p) scratch

        ssim_sums, cs_sums = [], []
        dice_parts = None

        for l, meta in enumerate(level_meta):
            H, W, Ho, Wo = meta["H"], meta["W"], meta["Ho"], meta["Wo"]
            x1 = img_refs[2 * l][0].astype(jnp.float32)          # (H, W)
            x2 = img_refs[2 * l + 1][0].astype(jnp.float32)      # (H, W)

            # squared / cross products shared by the blur stacking and (l==0) dice
            x1sq = x1 * x1
            x2sq = x2 * x2
            x12 = x1 * x2

            if l == 0:
                # weighted dice partial sums reuse x1sq / x2sq / x12
                wmap = x2 * (dice_w1 - dice_w0) + dice_w0
                wsq = wmap * wmap
                dice_parts = (jnp.sum(wsq * x12),
                              jnp.sum(wsq * x1sq),
                              jnp.sum(wsq * x2sq))

            C2 = c2_ref[l]                                       # scalar from SMEM

            if meta["mxu"]:
                mi = mxu_levels.index(l)
                Ho_p, Wo_p, W_p = meta["Ho_p"], meta["Wo_p"], meta["W_p"]
                A = mat_refs[2 * mi][...]                        # (Ho_p, H)
                Bb = mat_refs[2 * mi + 1][...]                   # (5*W_p, 5*Wo_p)
                xs = xs_refs[mi]                                 # (H, 5*W_p) VMEM scratch

                # zero the lane-pad columns (0 * garbage-NaN guard), then place operands
                if W_p > W:
                    zpad = jnp.zeros((H, W_p - W), jnp.float32)
                    for m in range(5):
                        xs[:, m * W_p + W:(m + 1) * W_p] = zpad
                for m, src in enumerate((x1, x2, x1sq, x2sq, x12)):
                    xs[:, m * W_p:m * W_p + W] = src

                # two full-width MXU dots: row pass, then block-diagonal column pass
                t1 = jnp.dot(A, xs[...], preferred_element_type=jnp.float32)   # (Ho_p, 5*W_p)
                t2 = jnp.dot(t1, Bb, preferred_element_type=jnp.float32)       # (Ho_p, 5*Wo_p)

                # lane-aligned slices (offsets/widths are multiples of 128)
                mu1 = t2[:, 0 * Wo_p:1 * Wo_p]
                mu2 = t2[:, 1 * Wo_p:2 * Wo_p]
                s11 = t2[:, 2 * Wo_p:3 * Wo_p]
                s22 = t2[:, 3 * Wo_p:4 * Wo_p]
                s12 = t2[:, 4 * Wo_p:5 * Wo_p]

                sigma1_sq = s11 - mu1 * mu1
                sigma2_sq = s22 - mu2 * mu2
                sigma12 = s12 - mu1 * mu2

                v1 = 2.0 * sigma12 + C2
                v2 = sigma1_sq + sigma2_sq + C2
                cs_map = v1 * pl.reciprocal(v2, approx=True)

                # one sqrt instead of two; clamp avoids NaN from fp cancellation
                sig_prod = jnp.sqrt(jnp.maximum(sigma1_sq, 0.0) *
                                    jnp.maximum(sigma2_sq, 0.0))
                num = sigma12 + 0.5 * C2
                den = sig_prod + 0.5 * C2
                ssim_map = num * pl.reciprocal(den, approx=True)

                if Ho_p == Ho and Wo_p == Wo:
                    cs_sums.append(jnp.sum(cs_map))
                    ssim_sums.append(jnp.sum(ssim_map))
                else:
                    rows = jax.lax.broadcasted_iota(jnp.int32, (Ho_p, Wo_p), 0)
                    cols = jax.lax.broadcasted_iota(jnp.int32, (Ho_p, Wo_p), 1)
                    valid = (rows < Ho) & (cols < Wo)
                    cs_sums.append(jnp.sum(jnp.where(valid, cs_map, 0.0)))
                    ssim_sums.append(jnp.sum(jnp.where(valid, ssim_map, 0.0)))
            else:
                # Ho == Wo == 1: each blurred map collapses to one weighted reduction
                ri = red_levels.index(l)
                w2d = w2d_refs[ri][...]                           # (H, W), == outer(g, g)
                mu1 = jnp.sum(w2d * x1)
                mu2 = jnp.sum(w2d * x2)
                s11 = jnp.sum(w2d * x1sq)
                s22 = jnp.sum(w2d * x2sq)
                s12 = jnp.sum(w2d * x12)
                sigma1_sq = s11 - mu1 * mu1
                sigma2_sq = s22 - mu2 * mu2
                sigma12 = s12 - mu1 * mu2
                cs_sums.append((2.0 * sigma12 + C2) / (sigma1_sq + sigma2_sq + C2))
                sig_prod = jnp.sqrt(jnp.maximum(sigma1_sq, 0.0) *
                                    jnp.maximum(sigma2_sq, 0.0))
                ssim_sums.append((sigma12 + 0.5 * C2) / (sig_prod + 0.5 * C2))

        # assemble per-image partial-sum row (tiny lane-masked store is fine here)
        vals = ssim_sums + cs_sums + list(dice_parts)
        col = jax.lax.broadcasted_iota(jnp.int32, (1, 1, _OUT_W), 2)
        row = jnp.zeros((1, 1, _OUT_W), jnp.float32)
        for idx, v in enumerate(vals):
            row = row + jnp.where(col == idx, v, 0.0)
        out_ref[...] = row

    return kernel


# --------------------------- DiceMSSSIM forward ---------------------------

def dice_msssim_loss(inputs, targets, dice_weight=1.0, msssim_weight=1.0,
                     window_size=11, dice_weights=(0.5, 0.5), smooth=1e-5):
    assert inputs.ndim == 4 and inputs.shape[1] == 1, \
        "reference ssim() is only shape-consistent for a single channel"
    img1 = inputs[:, 0, :, :].astype(jnp.float32)
    img2 = targets.astype(jnp.float32)
    assert img1.shape == img2.shape
    N, H, W = img1.shape

    # ---- image pyramid (plain XLA; sequentially dependent, small vs level 0) ----
    lv1, lv2 = [img1], [img2]
    for _ in range(_LEVELS - 1):
        lv1.append(_avg_pool_2x2(lv1[-1]))
        lv2.append(_avg_pool_2x2(lv2[-1]))

    # data-dependent dynamic range L per level, exactly as reference ssim()
    c2_list = []
    for x in lv1:
        max_val = jnp.where(jnp.max(x) > 128.0, 255.0, 1.0)
        min_val = jnp.where(jnp.min(x) < -0.5, -1.0, 0.0)
        Ldyn = max_val - min_val
        c2_list.append((0.03 * Ldyn) ** 2)
    c2 = jnp.stack(c2_list).astype(jnp.float32)                  # (5,) -> SMEM

    # ---- static per-level metadata + padded banded gaussian matrices ----
    level_meta, mats, w2ds = [], [], []
    for l in range(_LEVELS):
        Hl, Wl = int(lv1[l].shape[1]), int(lv1[l].shape[2])
        K = min(window_size, Hl, Wl)                             # real_size in the reference
        Ho, Wo = Hl - K + 1, Wl - K + 1
        g = _gaussian_1d(K)
        use_mxu = (Ho * Wo) > 1
        meta = dict(H=Hl, W=Wl, K=K, Ho=Ho, Wo=Wo, mxu=use_mxu)
        if use_mxu:
            Ho_p = _round_up(Ho, _SUBLANE)
            Wo_p = _round_up(Wo, _LANE)
            W_p = _round_up(Wl, _LANE)
            meta.update(Ho_p=Ho_p, Wo_p=Wo_p, W_p=W_p)
            A = _band_A(Hl, Ho, Ho_p, K, g)
            Bb = _band_B_blockdiag(Wl, Wo, W_p, Wo_p, K, g)
            mats.append((jnp.asarray(A), jnp.asarray(Bb)))
        else:
            # Ho == Wo == 1  =>  K == Hl == Wl, the blur is a single weighted reduction
            w2ds.append(jnp.asarray(np.outer(g, g).astype(np.float32)))
        level_meta.append(meta)

    kernel = _build_kernel(tuple(level_meta),
                           float(dice_weights[0]), float(dice_weights[1]))

    # ---- specs: grid over batch ("parallel") ----
    in_specs = [pl.BlockSpec(memory_space=pltpu.MemorySpace.SMEM)]   # c2 scalars
    call_args = [c2]
    for l in range(_LEVELS):
        Hl, Wl = level_meta[l]["H"], level_meta[l]["W"]
        spec = pl.BlockSpec((1, Hl, Wl), lambda n: (n, 0, 0))
        in_specs += [spec, spec]
        call_args += [lv1[l], lv2[l]]
    for A, Bb in mats:
        in_specs.append(pl.BlockSpec(A.shape, lambda n: (0, 0)))    # constant blocks,
        in_specs.append(pl.BlockSpec(Bb.shape, lambda n: (0, 0)))   # same index every step
        call_args += [A, Bb]
    for w2d in w2ds:
        in_specs.append(pl.BlockSpec(w2d.shape, lambda n: (0, 0)))
        call_args.append(w2d)

    scratch_shapes = [pltpu.VMEM((m["H"], 5 * m["W_p"]), jnp.float32)
                      for m in level_meta if m["mxu"]]

    parts = pl.pallas_call(
        kernel,
        out_shape=jax.ShapeDtypeStruct((N, 1, _OUT_W), jnp.float32),
        grid=(N,),
        in_specs=in_specs,
        out_specs=pl.BlockSpec((1, 1, _OUT_W), lambda n: (n, 0, 0)),
        scratch_shapes=scratch_shapes,
        compiler_params=pltpu.CompilerParams(
            dimension_semantics=("parallel",),
            vmem_limit_bytes=_vmem_limit_bytes()),
    )(*call_args)

    parts = parts[:, 0, :]                                           # (N, _OUT_W)

    # ---- MS-SSIM combine (normalize=True); bug-for-bug with the torch reference ----
    counts = jnp.asarray([N * m["Ho"] * m["Wo"] for m in level_meta], jnp.float32)
    sim = jnp.sum(parts[:, 0:_LEVELS], axis=0) / counts              # per-level means
    cs = jnp.sum(parts[:, _LEVELS:2 * _LEVELS], axis=0) / counts
    mssim = (sim + 1.0) / 2.0
    mcs = (cs + 1.0) / 2.0
    weights = jnp.asarray(_MS_WEIGHTS, jnp.float32)
    pow1 = mcs ** weights
    pow2 = mssim ** weights
    ms = jnp.prod(pow1[:-1] * pow2[-1])

    # ---- weighted dice from the fused partial sums ----
    inter = parts[:, 2 * _LEVELS]
    psq = parts[:, 2 * _LEVELS + 1]
    tsq = parts[:, 2 * _LEVELS + 2]
    dice = 1.0 - (2.0 * inter + smooth) / (psq + tsq + smooth)
    dice_loss = jnp.mean(dice)

    return dice_weight * dice_loss + msssim_weight * ms


if __name__ == "__main__":
    key = jax.random.PRNGKey(0)
    k1, k2 = jax.random.split(key)
    N, C, H, W = 2, 1, 32, 32
    inputs = jax.random.uniform(k1, (N, C, H, W), dtype=jnp.float32)       # predictions in [0, 1)
    targets = (jax.random.uniform(k2, (N, H, W), dtype=jnp.float32) > 0.5).astype(jnp.float32)

    loss = jax.jit(dice_msssim_loss)(inputs, targets)
    jax.block_until_ready(loss)
    print("KERNEL_OK")
</pallas_src>

<mosaic_0001>
module attributes {stable_mosaic.version = 11 : i64} {
  func.func @kernel(%arg0: i32, %arg1: memref<5xf32, #tpu.memory_space<smem>>, %arg2: memref<1x32x32xf32, #tpu.memory_space<vmem>>, %arg3: memref<1x32x32xf32, #tpu.memory_space<vmem>>, %arg4: memref<1x16x16xf32, #tpu.memory_space<vmem>>, %arg5: memref<1x16x16xf32, #tpu.memory_space<vmem>>, %arg6: memref<1x8x8xf32, #tpu.memory_space<vmem>>, %arg7: memref<1x8x8xf32, #tpu.memory_space<vmem>>, %arg8: memref<1x4x4xf32, #tpu.memory_space<vmem>>, %arg9: memref<1x4x4xf32, #tpu.memory_space<vmem>>, %arg10: memref<1x2x2xf32, #tpu.memory_space<vmem>>, %arg11: memref<1x2x2xf32, #tpu.memory_space<vmem>>, %arg12: memref<24x32xf32, #tpu.memory_space<vmem>>, %arg13: memref<640x640xf32, #tpu.memory_space<vmem>>, %arg14: memref<8x16xf32, #tpu.memory_space<vmem>>, %arg15: memref<640x640xf32, #tpu.memory_space<vmem>>, %arg16: memref<8x8xf32, #tpu.memory_space<vmem>>, %arg17: memref<4x4xf32, #tpu.memory_space<vmem>>, %arg18: memref<2x2xf32, #tpu.memory_space<vmem>>, %arg19: memref<1x1x16xf32, #tpu.memory_space<vmem>>, %arg20: memref<32x640xf32, #tpu.memory_space<vmem>>, %arg21: memref<16x640xf32, #tpu.memory_space<vmem>>) attributes {dimension_semantics = [#tpu.dimension_semantics<parallel>], iteration_bounds = array<i64: 2>, scalar_prefetch = 0 : i64, scratch_operands = 2 : i64, tpu.core_type = #tpu.core_type<tc>, window_params = [{transform_indices = @transform_0, window_bounds = array<i64: 5>}, {transform_indices = @transform_1, window_bounds = array<i64: 1, 32, 32>}, {transform_indices = @transform_2, window_bounds = array<i64: 1, 32, 32>}, {transform_indices = @transform_3, window_bounds = array<i64: 1, 16, 16>}, {transform_indices = @transform_4, window_bounds = array<i64: 1, 16, 16>}, {transform_indices = @transform_5, window_bounds = array<i64: 1, 8, 8>}, {transform_indices = @transform_6, window_bounds = array<i64: 1, 8, 8>}, {transform_indices = @transform_7, window_bounds = array<i64: 1, 4, 4>}, {transform_indices = @transform_8, window_bounds = array<i64: 1, 4, 4>}, {transform_indices = @transform_9, window_bounds = array<i64: 1, 2, 2>}, {transform_indices = @transform_10, window_bounds = array<i64: 1, 2, 2>}, {pipeline_mode = #tpu.pipeline_mode<synchronous>, transform_indices = @transform_11, window_bounds = array<i64: 24, 32>}, {pipeline_mode = #tpu.pipeline_mode<synchronous>, transform_indices = @transform_12, window_bounds = array<i64: 640, 640>}, {pipeline_mode = #tpu.pipeline_mode<synchronous>, transform_indices = @transform_13, window_bounds = array<i64: 8, 16>}, {pipeline_mode = #tpu.pipeline_mode<synchronous>, transform_indices = @transform_14, window_bounds = array<i64: 640, 640>}, {pipeline_mode = #tpu.pipeline_mode<synchronous>, transform_indices = @transform_15, window_bounds = array<i64: 8, 8>}, {pipeline_mode = #tpu.pipeline_mode<synchronous>, transform_indices = @transform_16, window_bounds = array<i64: 4, 4>}, {pipeline_mode = #tpu.pipeline_mode<synchronous>, transform_indices = @transform_17, window_bounds = array<i64: 2, 2>}, {transform_indices = @transform_18, window_bounds = array<i64: 1, 1, 16>}]} {
    %c0 = arith.constant 0 : index
    %c0_0 = arith.constant 0 : index
    %c0_1 = arith.constant 0 : index
    %0 = vector.load %arg2[%c0, %c0_0, %c0_1] : memref<1x32x32xf32, #tpu.memory_space<vmem>>, vector<1x32x32xf32>
    %1 = vector.shape_cast %0 : vector<1x32x32xf32> to vector<32x32xf32>
    %c0_2 = arith.constant 0 : index
    %c0_3 = arith.constant 0 : index
    %c0_4 = arith.constant 0 : index
    %2 = vector.load %arg3[%c0_2, %c0_3, %c0_4] : memref<1x32x32xf32, #tpu.memory_space<vmem>>, vector<1x32x32xf32>
    %3 = vector.shape_cast %2 : vector<1x32x32xf32> to vector<32x32xf32>
    %4 = arith.mulf %1, %1 : vector<32x32xf32>
    %5 = arith.mulf %3, %3 : vector<32x32xf32>
    %6 = arith.mulf %1, %3 : vector<32x32xf32>
    %cst = arith.constant 0.000000e+00 : f32
    %7 = vector.broadcast %cst : f32 to vector<32x32xf32>
    %8 = arith.mulf %3, %7 : vector<32x32xf32>
    %cst_5 = arith.constant 5.000000e-01 : f32
    %9 = vector.broadcast %cst_5 : f32 to vector<32x32xf32>
    %10 = arith.addf %8, %9 : vector<32x32xf32>
    %11 = arith.mulf %10, %10 : vector<32x32xf32>
    %12 = arith.mulf %11, %6 : vector<32x32xf32>
    %13 = vector.shape_cast %12 : vector<32x32xf32> to vector<1x32x32xf32>
    %cst_6 = arith.constant dense<0.000000e+00> : vector<1xf32>
    %14 = vector.multi_reduction <add>, %13, %cst_6 [1, 2] : vector<1x32x32xf32> to vector<1xf32>
    %15 = vector.shape_cast %14 : vector<1xf32> to vector<1x1x1xf32>
    %16 = vector.extract %15[0, 0, 0] : f32 from vector<1x1x1xf32>
    %17 = arith.mulf %11, %4 : vector<32x32xf32>
    %18 = vector.shape_cast %17 : vector<32x32xf32> to vector<1x32x32xf32>
    %cst_7 = arith.constant dense<0.000000e+00> : vector<1xf32>
    %19 = vector.multi_reduction <add>, %18, %cst_7 [1, 2] : vector<1x32x32xf32> to vector<1xf32>
    %20 = vector.shape_cast %19 : vector<1xf32> to vector<1x1x1xf32>
    %21 = vector.extract %20[0, 0, 0] : f32 from vector<1x1x1xf32>
    %22 = arith.mulf %11, %5 : vector<32x32xf32>
    %23 = vector.shape_cast %22 : vector<32x32xf32> to vector<1x32x32xf32>
    %cst_8 = arith.constant dense<0.000000e+00> : vector<1xf32>
    %24 = vector.multi_reduction <add>, %23, %cst_8 [1, 2] : vector<1x32x32xf32> to vector<1xf32>
    %25 = vector.shape_cast %24 : vector<1xf32> to vector<1x1x1xf32>
    %26 = vector.extract %25[0, 0, 0] : f32 from vector<1x1x1xf32>
    %c0_9 = arith.constant 0 : index
    %27 = memref.load %arg1[%c0_9] : memref<5xf32, #tpu.memory_space<smem>>
    %c0_10 = arith.constant 0 : index
    %c0_11 = arith.constant 0 : index
    %28 = vector.load %arg12[%c0_10, %c0_11] : memref<24x32xf32, #tpu.memory_space<vmem>>, vector<24x32xf32>
    %c0_12 = arith.constant 0 : index
    %c0_13 = arith.constant 0 : index
    %29 = vector.load %arg13[%c0_12, %c0_13] : memref<640x640xf32, #tpu.memory_space<vmem>>, vector<640x640xf32>
    %cst_14 = arith.constant 0.000000e+00 : f32
    %30 = vector.broadcast %cst_14 : f32 to vector<32x96xf32>
    %c0_15 = arith.constant 0 : index
    %c32 = arith.constant 32 : index
    %31 = vector.load %arg20[%c0_15, %c32] : memref<32x640xf32, #tpu.memory_space<vmem>>, vector<32x96xf32>
    tpu.vector_store %arg20[%c0_15, %c32], %30 {strides = array<i32>} : memref<32x640xf32, #tpu.memory_space<vmem>>, vector<32x96xf32>,
    %c0_16 = arith.constant 0 : index
    %c160 = arith.constant 160 : index
    %32 = vector.load %arg20[%c0_16, %c160] : memref<32x640xf32, #tpu.memory_space<vmem>>, vector<32x96xf32>
    tpu.vector_store %arg20[%c0_16, %c160], %30 {strides = array<i32>} : memref<32x640xf32, #tpu.memory_space<vmem>>, vector<32x96xf32>,
    %c0_17 = arith.constant 0 : index
    %c288 = arith.constant 288 : index
    %33 = vector.load %arg20[%c0_17, %c288] : memref<32x640xf32, #tpu.memory_space<vmem>>, vector<32x96xf32>
    tpu.vector_store %arg20[%c0_17, %c288], %30 {strides = array<i32>} : memref<32x640xf32, #tpu.memory_space<vmem>>, vector<32x96xf32>,
    %c0_18 = arith.constant 0 : index
    %c416 = arith.constant 416 : index
    %34 = vector.load %arg20[%c0_18, %c416] : memref<32x640xf32, #tpu.memory_space<vmem>>, vector<32x96xf32>
    tpu.vector_store %arg20[%c0_18, %c416], %30 {strides = array<i32>} : memref<32x640xf32, #tpu.memory_space<vmem>>, vector<32x96xf32>,
    %c0_19 = arith.constant 0 : index
    %c544 = arith.constant 544 : index
    %35 = vector.load %arg20[%c0_19, %c544] : memref<32x640xf32, #tpu.memory_space<vmem>>, vector<32x96xf32>
    tpu.vector_store %arg20[%c0_19, %c544], %30 {strides = array<i32>} : memref<32x640xf32, #tpu.memory_space<vmem>>, vector<32x96xf32>,
    %c0_20 = arith.constant 0 : index
    %c0_21 = arith.constant 0 : index
    %36 = vector.load %arg20[%c0_20, %c0_21] : memref<32x640xf32, #tpu.memory_space<vmem>>, vector<32x32xf32>
    tpu.vector_store %arg20[%c0_20, %c0_21], %1 {strides = array<i32>} : memref<32x640xf32, #tpu.memory_space<vmem>>, vector<32x32xf32>,
    %c0_22 = arith.constant 0 : index
    %c128 = arith.constant 128 : index
    %37 = vector.load %arg20[%c0_22, %c128] : memref<32x640xf32, #tpu.memory_space<vmem>>, vector<32x32xf32>
    tpu.vector_store %arg20[%c0_22, %c128], %3 {strides = array<i32>} : memref<32x640xf32, #tpu.memory_space<vmem>>, vector<32x32xf32>,
    %c0_23 = arith.constant 0 : index
    %c256 = arith.constant 256 : index
    %38 = vector.load %arg20[%c0_23, %c256] : memref<32x640xf32, #tpu.memory_space<vmem>>, vector<32x32xf32>
    tpu.vector_store %arg20[%c0_23, %c256], %4 {strides = array<i32>} : memref<32x640xf32, #tpu.memory_space<vmem>>, vector<32x32xf32>,
    %c0_24 = arith.constant 0 : index
    %c384 = arith.constant 384 : index
    %39 = vector.load %arg20[%c0_24, %c384] : memref<32x640xf32, #tpu.memory_space<vmem>>, vector<32x32xf32>
    tpu.vector_store %arg20[%c0_24, %c384], %5 {strides = array<i32>} : memref<32x640xf32, #tpu.memory_space<vmem>>, vector<32x32xf32>,
    %c0_25 = arith.constant 0 : index
    %c512 = arith.constant 512 : index
    %40 = vector.load %arg20[%c0_25, %c512] : memref<32x640xf32, #tpu.memory_space<vmem>>, vector<32x32xf32>
    tpu.vector_store %arg20[%c0_25, %c512], %6 {strides = array<i32>} : memref<32x640xf32, #tpu.memory_space<vmem>>, vector<32x32xf32>,
    %c0_26 = arith.constant 0 : index
    %c0_27 = arith.constant 0 : index
    %41 = vector.load %arg20[%c0_26, %c0_27] : memref<32x640xf32, #tpu.memory_space<vmem>>, vector<32x640xf32>
    %cst_28 = arith.constant dense<0.000000e+00> : vector<24x640xf32>
    %42 = tpu.matmul %28, %41, %cst_28 {dimension_numbers = #tpu.dot_dimension_numbers<[1], [0], [0], [1], [0, 0, 1, 1], [], []>} : vector<24x32xf32>, vector<32x640xf32>, vector<24x640xf32> -> vector<24x640xf32>
    %cst_29 = arith.constant dense<0.000000e+00> : vector<24x640xf32>
    %43 = tpu.matmul %42, %29, %cst_29 {dimension_numbers = #tpu.dot_dimension_numbers<[1], [0], [0], [1], [0, 0, 1, 1], [], []>} : vector<24x640xf32>, vector<640x640xf32>, vector<24x640xf32> -> vector<24x640xf32>
    %44 = vector.extract_strided_slice %43 {offsets = [0, 0], sizes = [24, 128], strides = [1, 1]} : vector<24x640xf32> to vector<24x128xf32>
    %45 = vector.extract_strided_slice %43 {offsets = [0, 128], sizes = [24, 128], strides = [1, 1]} : vector<24x640xf32> to vector<24x128xf32>
    %46 = vector.extract_strided_slice %43 {offsets = [0, 256], sizes = [24, 128], strides = [1, 1]} : vector<24x640xf32> to vector<24x128xf32>
    %47 = vector.extract_strided_slice %43 {offsets = [0, 384], sizes = [24, 128], strides = [1, 1]} : vector<24x640xf32> to vector<24x128xf32>
    %48 = vector.extract_strided_slice %43 {offsets = [0, 512], sizes = [24, 128], strides = [1, 1]} : vector<24x640xf32> to vector<24x128xf32>
    %49 = arith.mulf %44, %44 : vector<24x128xf32>
    %50 = arith.subf %46, %49 : vector<24x128xf32>
    %51 = arith.mulf %45, %45 : vector<24x128xf32>
    %52 = arith.subf %47, %51 : vector<24x128xf32>
    %53 = arith.mulf %44, %45 : vector<24x128xf32>
    %54 = arith.subf %48, %53 : vector<24x128xf32>
    %cst_30 = arith.constant 2.000000e+00 : f32
    %55 = vector.broadcast %cst_30 : f32 to vector<24x128xf32>
    %56 = arith.mulf %55, %54 : vector<24x128xf32>
    %57 = vector.broadcast %27 : f32 to vector<24x128xf32>
    %58 = arith.addf %56, %57 : vector<24x128xf32>
    %59 = arith.addf %50, %52 : vector<24x128xf32>
    %60 = vector.broadcast %27 : f32 to vector<24x128xf32>
    %61 = arith.addf %59, %60 : vector<24x128xf32>
    %62 = tpu.reciprocal %61 {approx = true} : vector<24x128xf32> -> vector<24x128xf32>
    %63 = arith.mulf %58, %62 : vector<24x128xf32>
    %cst_31 = arith.constant 0.000000e+00 : f32
    %64 = vector.broadcast %cst_31 : f32 to vector<24x128xf32>
    %65 = arith.maximumf %50, %64 : vector<24x128xf32>
    %cst_32 = arith.constant 0.000000e+00 : f32
    %66 = vector.broadcast %cst_32 : f32 to vector<24x128xf32>
    %67 = arith.maximumf %52, %66 : vector<24x128xf32>
    %68 = arith.mulf %65, %67 : vector<24x128xf32>
    %69 = math.sqrt %68 : vector<24x128xf32>
    %cst_33 = arith.constant 5.000000e-01 : f32
    %70 = arith.mulf %cst_33, %27 : f32
    %71 = vector.broadcast %70 : f32 to vector<24x128xf32>
    %72 = arith.addf %54, %71 : vector<24x128xf32>
    %cst_34 = arith.constant 5.000000e-01 : f32
    %73 = arith.mulf %cst_34, %27 : f32
    %74 = vector.broadcast %73 : f32 to vector<24x128xf32>
    %75 = arith.addf %69, %74 : vector<24x128xf32>
    %76 = tpu.reciprocal %75 {approx = true} : vector<24x128xf32> -> vector<24x128xf32>
    %77 = arith.mulf %72, %76 : vector<24x128xf32>
    %78 = tpu.iota {dimensions = array<i32: 0>} : vector<24x128xi32>
    %79 = tpu.iota {dimensions = array<i32: 1>} : vector<24x128xi32>
    %c22_i32 = arith.constant 22 : i32
    %80 = vector.broadcast %c22_i32 : i32 to vector<24x128xi32>
    %81 = arith.cmpi slt, %78, %80 : vector<24x128xi32>
    %c22_i32_35 = arith.constant 22 : i32
    %82 = vector.broadcast %c22_i32_35 : i32 to vector<24x128xi32>
    %83 = arith.cmpi slt, %79, %82 : vector<24x128xi32>
    %84 = arith.andi %81, %83 : vector<24x128xi1>
    %cst_36 = arith.constant 0.000000e+00 : f32
    %85 = vector.broadcast %cst_36 : f32 to vector<24x128xf32>
    %86 = arith.select %84, %63, %85 : vector<24x128xi1>, vector<24x128xf32>
    %87 = vector.shape_cast %86 : vector<24x128xf32> to vector<1x24x128xf32>
    %cst_37 = arith.constant dense<0.000000e+00> : vector<1xf32>
    %88 = vector.multi_reduction <add>, %87, %cst_37 [1, 2] : vector<1x24x128xf32> to vector<1xf32>
    %89 = vector.shape_cast %88 : vector<1xf32> to vector<1x1x1xf32>
    %90 = vector.extract %89[0, 0, 0] : f32 from vector<1x1x1xf32>
    %cst_38 = arith.constant 0.000000e+00 : f32
    %91 = vector.broadcast %cst_38 : f32 to vector<24x128xf32>
    %92 = arith.select %84, %77, %91 : vector<24x128xi1>, vector<24x128xf32>
    %93 = vector.shape_cast %92 : vector<24x128xf32> to vector<1x24x128xf32>
    %cst_39 = arith.constant dense<0.000000e+00> : vector<1xf32>
    %94 = vector.multi_reduction <add>, %93, %cst_39 [1, 2] : vector<1x24x128xf32> to vector<1xf32>
    %95 = vector.shape_cast %94 : vector<1xf32> to vector<1x1x1xf32>
    %96 = vector.extract %95[0, 0, 0] : f32 from vector<1x1x1xf32>
    %c0_40 = arith.constant 0 : index
    %c0_41 = arith.constant 0 : index
    %c0_42 = arith.constant 0 : index
    %97 = vector.load %arg4[%c0_40, %c0_41, %c0_42] : memref<1x16x16xf32, #tpu.memory_space<vmem>>, vector<1x16x16xf32>
    %98 = vector.shape_cast %97 : vector<1x16x16xf32> to vector<16x16xf32>
    %c0_43 = arith.constant 0 : index
    %c0_44 = arith.constant 0 : index
    %c0_45 = arith.constant 0 : index
    %99 = vector.load %arg5[%c0_43, %c0_44, %c0_45] : memref<1x16x16xf32, #tpu.memory_space<vmem>>, vector<1x16x16xf32>
    %100 = vector.shape_cast %99 : vector<1x16x16xf32> to vector<16x16xf32>
    %101 = arith.mulf %98, %98 : vector<16x16xf32>
    %102 = arith.mulf %100, %100 : vector<16x16xf32>
    %103 = arith.mulf %98, %100 : vector<16x16xf32>
    %c1 = arith.constant 1 : index
    %104 = memref.load %arg1[%c1] : memref<5xf32, #tpu.memory_space<smem>>
    %c0_46 = arith.constant 0 : index
    %c0_47 = arith.constant 0 : index
    %105 = vector.load %arg14[%c0_46, %c0_47] : memref<8x16xf32, #tpu.memory_space<vmem>>, vector<8x16xf32>
    %c0_48 = arith.constant 0 : index
    %c0_49 = arith.constant 0 : index
    %106 = vector.load %arg15[%c0_48, %c0_49] : memref<640x640xf32, #tpu.memory_space<vmem>>, vector<640x640xf32>
    %cst_50 = arith.constant 0.000000e+00 : f32
    %107 = vector.broadcast %cst_50 : f32 to vector<16x112xf32>
    %c0_51 = arith.constant 0 : index
    %c16 = arith.constant 16 : index
    %108 = vector.load %arg21[%c0_51, %c16] : memref<16x640xf32, #tpu.memory_space<vmem>>, vector<16x112xf32>
    tpu.vector_store %arg21[%c0_51, %c16], %107 {strides = array<i32>} : memref<16x640xf32, #tpu.memory_space<vmem>>, vector<16x112xf32>,
    %c0_52 = arith.constant 0 : index
    %c144 = arith.constant 144 : index
    %109 = vector.load %arg21[%c0_52, %c144] : memref<16x640xf32, #tpu.memory_space<vmem>>, vector<16x112xf32>
    tpu.vector_store %arg21[%c0_52, %c144], %107 {strides = array<i32>} : memref<16x640xf32, #tpu.memory_space<vmem>>, vector<16x112xf32>,
    %c0_53 = arith.constant 0 : index
    %c272 = arith.constant 272 : index
    %110 = vector.load %arg21[%c0_53, %c272] : memref<16x640xf32, #tpu.memory_space<vmem>>, vector<16x112xf32>
    tpu.vector_store %arg21[%c0_53, %c272], %107 {strides = array<i32>} : memref<16x640xf32, #tpu.memory_space<vmem>>, vector<16x112xf32>,
    %c0_54 = arith.constant 0 : index
    %c400 = arith.constant 400 : index
    %111 = vector.load %arg21[%c0_54, %c400] : memref<16x640xf32, #tpu.memory_space<vmem>>, vector<16x112xf32>
    tpu.vector_store %arg21[%c0_54, %c400], %107 {strides = array<i32>} : memref<16x640xf32, #tpu.memory_space<vmem>>, vector<16x112xf32>,
    %c0_55 = arith.constant 0 : index
    %c528 = arith.constant 528 : index
    %112 = vector.load %arg21[%c0_55, %c528] : memref<16x640xf32, #tpu.memory_space<vmem>>, vector<16x112xf32>
    tpu.vector_store %arg21[%c0_55, %c528], %107 {strides = array<i32>} : memref<16x640xf32, #tpu.memory_space<vmem>>, vector<16x112xf32>,
    %c0_56 = arith.constant 0 : index
    %c0_57 = arith.constant 0 : index
    %113 = vector.load %arg21[%c0_56, %c0_57] : memref<16x640xf32, #tpu.memory_space<vmem>>, vector<16x16xf32>
    tpu.vector_store %arg21[%c0_56, %c0_57], %98 {strides = array<i32>} : memref<16x640xf32, #tpu.memory_space<vmem>>, vector<16x16xf32>,
    %c0_58 = arith.constant 0 : index
    %c128_59 = arith.constant 128 : index
    %114 = vector.load %arg21[%c0_58, %c128_59] : memref<16x640xf32, #tpu.memory_space<vmem>>, vector<16x16xf32>
    tpu.vector_store %arg21[%c0_58, %c128_59], %100 {strides = array<i32>} : memref<16x640xf32, #tpu.memory_space<vmem>>, vector<16x16xf32>,
    %c0_60 = arith.constant 0 : index
    %c256_61 = arith.constant 256 : index
    %115 = vector.load %arg21[%c0_60, %c256_61] : memref<16x640xf32, #tpu.memory_space<vmem>>, vector<16x16xf32>
    tpu.vector_store %arg21[%c0_60, %c256_61], %101 {strides = array<i32>} : memref<16x640xf32, #tpu.memory_space<vmem>>, vector<16x16xf32>,
    %c0_62 = arith.constant 0 : index
    %c384_63 = arith.constant 384 : index
    %116 = vector.load %arg21[%c0_62, %c384_63] : memref<16x640xf32, #tpu.memory_space<vmem>>, vector<16x16xf32>
    tpu.vector_store %arg21[%c0_62, %c384_63], %102 {strides = array<i32>} : memref<16x640xf32, #tpu.memory_space<vmem>>, vector<16x16xf32>,
    %c0_64 = arith.constant 0 : index
    %c512_65 = arith.constant 512 : index
    %117 = vector.load %arg21[%c0_64, %c512_65] : memref<16x640xf32, #tpu.memory_space<vmem>>, vector<16x16xf32>
    tpu.vector_store %arg21[%c0_64, %c512_65], %103 {strides = array<i32>} : memref<16x640xf32, #tpu.memory_space<vmem>>, vector<16x16xf32>,
    %c0_66 = arith.constant 0 : index
    %c0_67 = arith.constant 0 : index
    %118 = vector.load %arg21[%c0_66, %c0_67] : memref<16x640xf32, #tpu.memory_space<vmem>>, vector<16x640xf32>
    %cst_68 = arith.constant dense<0.000000e+00> : vector<8x640xf32>
    %119 = tpu.matmul %105, %118, %cst_68 {dimension_numbers = #tpu.dot_dimension_numbers<[1], [0], [0], [1], [0, 0, 1, 1], [], []>} : vector<8x16xf32>, vector<16x640xf32>, vector<8x640xf32> -> vector<8x640xf32>
    %cst_69 = arith.constant dense<0.000000e+00> : vector<8x640xf32>
    %120 = tpu.matmul %119, %106, %cst_69 {dimension_numbers = #tpu.dot_dimension_numbers<[1], [0], [0], [1], [0, 0, 1, 1], [], []>} : vector<8x640xf32>, vector<640x640xf32>, vector<8x640xf32> -> vector<8x640xf32>
    %121 = vector.extract_strided_slice %120 {offsets = [0, 0], sizes = [8, 128], strides = [1, 1]} : vector<8x640xf32> to vector<8x128xf32>
    %122 = vector.extract_strided_slice %120 {offsets = [0, 128], sizes = [8, 128], strides = [1, 1]} : vector<8x640xf32> to vector<8x128xf32>
    %123 = vector.extract_strided_slice %120 {offsets = [0, 256], sizes = [8, 128], strides = [1, 1]} : vector<8x640xf32> to vector<8x128xf32>
    %124 = vector.extract_strided_slice %120 {offsets = [0, 384], sizes = [8, 128], strides = [1, 1]} : vector<8x640xf32> to vector<8x128xf32>
    %125 = vector.extract_strided_slice %120 {offsets = [0, 512], sizes = [8, 128], strides = [1, 1]} : vector<8x640xf32> to vector<8x128xf32>
    %126 = arith.mulf %121, %121 : vector<8x128xf32>
    %127 = arith.subf %123, %126 : vector<8x128xf32>
    %128 = arith.mulf %122, %122 : vector<8x128xf32>
    %129 = arith.subf %124, %128 : vector<8x128xf32>
    %130 = arith.mulf %121, %122 : vector<8x128xf32>
    %131 = arith.subf %125, %130 : vector<8x128xf32>
    %cst_70 = arith.constant 2.000000e+00 : f32
    %132 = vector.broadcast %cst_70 : f32 to vector<8x128xf32>
    %133 = arith.mulf %132, %131 : vector<8x128xf32>
    %134 = vector.broadcast %104 : f32 to vector<8x128xf32>
    %135 = arith.addf %133, %134 : vector<8x128xf32>
    %136 = arith.addf %127, %129 : vector<8x128xf32>
    %137 = vector.broadcast %104 : f32 to vector<8x128xf32>
    %138 = arith.addf %136, %137 : vector<8x128xf32>
    %139 = tpu.reciprocal %138 {approx = true} : vector<8x128xf32> -> vector<8x128xf32>
    %140 = arith.mulf %135, %139 : vector<8x128xf32>
    %cst_71 = arith.constant 0.000000e+00 : f32
    %141 = vector.broadcast %cst_71 : f32 to vector<8x128xf32>
    %142 = arith.maximumf %127, %141 : vector<8x128xf32>
    %cst_72 = arith.constant 0.000000e+00 : f32
    %143 = vector.broadcast %cst_72 : f32 to vector<8x128xf32>
    %144 = arith.maximumf %129, %143 : vector<8x128xf32>
    %145 = arith.mulf %142, %144 : vector<8x128xf32>
    %146 = math.sqrt %145 : vector<8x128xf32>
    %cst_73 = arith.constant 5.000000e-01 : f32
    %147 = arith.mulf %cst_73, %104 : f32
    %148 = vector.broadcast %147 : f32 to vector<8x128xf32>
    %149 = arith.addf %131, %148 : vector<8x128xf32>
    %cst_74 = arith.constant 5.000000e-01 : f32
    %150 = arith.mulf %cst_74, %104 : f32
    %151 = vector.broadcast %150 : f32 to vector<8x128xf32>
    %152 = arith.addf %146, %151 : vector<8x128xf32>
    %153 = tpu.reciprocal %152 {approx = true} : vector<8x128xf32> -> vector<8x128xf32>
    %154 = arith.mulf %149, %153 : vector<8x128xf32>
    %155 = tpu.iota {dimensions = array<i32: 0>} : vector<8x128xi32>
    %156 = tpu.iota {dimensions = array<i32: 1>} : vector<8x128xi32>
    %c6_i32 = arith.constant 6 : i32
    %157 = vector.broadcast %c6_i32 : i32 to vector<8x128xi32>
    %158 = arith.cmpi slt, %155, %157 : vector<8x128xi32>
    %c6_i32_75 = arith.constant 6 : i32
    %159 = vector.broadcast %c6_i32_75 : i32 to vector<8x128xi32>
    %160 = arith.cmpi slt, %156, %159 : vector<8x128xi32>
    %161 = arith.andi %158, %160 : vector<8x128xi1>
    %cst_76 = arith.constant 0.000000e+00 : f32
    %162 = vector.broadcast %cst_76 : f32 to vector<8x128xf32>
    %163 = arith.select %161, %140, %162 : vector<8x128xi1>, vector<8x128xf32>
    %164 = vector.shape_cast %163 : vector<8x128xf32> to vector<1x8x128xf32>
    %cst_77 = arith.constant dense<0.000000e+00> : vector<1xf32>
    %165 = vector.multi_reduction <add>, %164, %cst_77 [1, 2] : vector<1x8x128xf32> to vector<1xf32>
    %166 = vector.shape_cast %165 : vector<1xf32> to vector<1x1x1xf32>
    %167 = vector.extract %166[0, 0, 0] : f32 from vector<1x1x1xf32>
    %cst_78 = arith.constant 0.000000e+00 : f32
    %168 = vector.broadcast %cst_78 : f32 to vector<8x128xf32>
    %169 = arith.select %161, %154, %168 : vector<8x128xi1>, vector<8x128xf32>
    %170 = vector.shape_cast %169 : vector<8x128xf32> to vector<1x8x128xf32>
    %cst_79 = arith.constant dense<0.000000e+00> : vector<1xf32>
    %171 = vector.multi_reduction <add>, %170, %cst_79 [1, 2] : vector<1x8x128xf32> to vector<1xf32>
    %172 = vector.shape_cast %171 : vector<1xf32> to vector<1x1x1xf32>
    %173 = vector.extract %172[0, 0, 0] : f32 from vector<1x1x1xf32>
    %c0_80 = arith.constant 0 : index
    %c0_81 = arith.constant 0 : index
    %c0_82 = arith.constant 0 : index
    %174 = vector.load %arg6[%c0_80, %c0_81, %c0_82] : memref<1x8x8xf32, #tpu.memory_space<vmem>>, vector<1x8x8xf32>
    %175 = vector.shape_cast %174 : vector<1x8x8xf32> to vector<8x8xf32>
    %c0_83 = arith.constant 0 : index
    %c0_84 = arith.constant 0 : index
    %c0_85 = arith.constant 0 : index
    %176 = vector.load %arg7[%c0_83, %c0_84, %c0_85] : memref<1x8x8xf32, #tpu.memory_space<vmem>>, vector<1x8x8xf32>
    %177 = vector.shape_cast %176 : vector<1x8x8xf32> to vector<8x8xf32>
    %178 = arith.mulf %175, %175 : vector<8x8xf32>
    %179 = arith.mulf %177, %177 : vector<8x8xf32>
    %180 = arith.mulf %175, %177 : vector<8x8xf32>
    %c2 = arith.constant 2 : index
    %181 = memref.load %arg1[%c2] : memref<5xf32, #tpu.memory_space<smem>>
    %c0_86 = arith.constant 0 : index
    %c0_87 = arith.constant 0 : index
    %182 = vector.load %arg16[%c0_86, %c0_87] : memref<8x8xf32, #tpu.memory_space<vmem>>, vector<8x8xf32>
    %183 = arith.mulf %182, %175 : vector<8x8xf32>
    %184 = vector.shape_cast %183 : vector<8x8xf32> to vector<1x8x8xf32>
    %cst_88 = arith.constant dense<0.000000e+00> : vector<1xf32>
    %185 = vector.multi_reduction <add>, %184, %cst_88 [1, 2] : vector<1x8x8xf32> to vector<1xf32>
    %186 = vector.shape_cast %185 : vector<1xf32> to vector<1x1x1xf32>
    %187 = vector.extract %186[0, 0, 0] : f32 from vector<1x1x1xf32>
    %188 = arith.mulf %182, %177 : vector<8x8xf32>
    %189 = vector.shape_cast %188 : vector<8x8xf32> to vector<1x8x8xf32>
    %cst_89 = arith.constant dense<0.000000e+00> : vector<1xf32>
    %190 = vector.multi_reduction <add>, %189, %cst_89 [1, 2] : vector<1x8x8xf32> to vector<1xf32>
    %191 = vector.shape_cast %190 : vector<1xf32> to vector<1x1x1xf32>
    %192 = vector.extract %191[0, 0, 0] : f32 from vector<1x1x1xf32>
    %193 = arith.mulf %182, %178 : vector<8x8xf32>
    %194 = vector.shape_cast %193 : vector<8x8xf32> to vector<1x8x8xf32>
    %cst_90 = arith.constant dense<0.000000e+00> : vector<1xf32>
    %195 = vector.multi_reduction <add>, %194, %cst_90 [1, 2] : vector<1x8x8xf32> to vector<1xf32>
    %196 = vector.shape_cast %195 : vector<1xf32> to vector<1x1x1xf32>
    %197 = vector.extract %196[0, 0, 0] : f32 from vector<1x1x1xf32>
    %198 = arith.mulf %182, %179 : vector<8x8xf32>
    %199 = vector.shape_cast %198 : vector<8x8xf32> to vector<1x8x8xf32>
    %cst_91 = arith.constant dense<0.000000e+00> : vector<1xf32>
    %200 = vector.multi_reduction <add>, %199, %cst_91 [1, 2] : vector<1x8x8xf32> to vector<1xf32>
    %201 = vector.shape_cast %200 : vector<1xf32> to vector<1x1x1xf32>
    %202 = vector.extract %201[0, 0, 0] : f32 from vector<1x1x1xf32>
    %203 = arith.mulf %182, %180 : vector<8x8xf32>
    %204 = vector.shape_cast %203 : vector<8x8xf32> to vector<1x8x8xf32>
    %cst_92 = arith.constant dense<0.000000e+00> : vector<1xf32>
    %205 = vector.multi_reduction <add>, %204, %cst_92 [1, 2] : vector<1x8x8xf32> to vector<1xf32>
    %206 = vector.shape_cast %205 : vector<1xf32> to vector<1x1x1xf32>
    %207 = vector.extract %206[0, 0, 0] : f32 from vector<1x1x1xf32>
    %208 = arith.mulf %187, %187 : f32
    %209 = arith.subf %197, %208 : f32
    %210 = arith.mulf %192, %192 : f32
    %211 = arith.subf %202, %210 : f32
    %212 = arith.mulf %187, %192 : f32
    %213 = arith.subf %207, %212 : f32
    %cst_93 = arith.constant 2.000000e+00 : f32
    %214 = arith.mulf %cst_93, %213 : f32
    %215 = arith.addf %214, %181 : f32
    %216 = arith.addf %209, %211 : f32
    %217 = arith.addf %216, %181 : f32
    %218 = arith.divf %215, %217 : f32
    %cst_94 = arith.constant 0.000000e+00 : f32
    %219 = arith.maximumf %209, %cst_94 : f32
    %cst_95 = arith.constant 0.000000e+00 : f32
    %220 = arith.maximumf %211, %cst_95 : f32
    %221 = arith.mulf %219, %220 : f32
    %222 = math.sqrt %221 : f32
    %cst_96 = arith.constant 5.000000e-01 : f32
    %223 = arith.mulf %cst_96, %181 : f32
    %224 = arith.addf %213, %223 : f32
    %cst_97 = arith.constant 5.000000e-01 : f32
    %225 = arith.mulf %cst_97, %181 : f32
    %226 = arith.addf %222, %225 : f32
    %227 = arith.divf %224, %226 : f32
    %c0_98 = arith.constant 0 : index
    %c0_99 = arith.constant 0 : index
    %c0_100 = arith.constant 0 : index
    %228 = vector.load %arg8[%c0_98, %c0_99, %c0_100] : memref<1x4x4xf32, #tpu.memory_space<vmem>>, vector<1x4x4xf32>
    %229 = vector.shape_cast %228 : vector<1x4x4xf32> to vector<4x4xf32>
    %c0_101 = arith.constant 0 : index
    %c0_102 = arith.constant 0 : index
    %c0_103 = arith.constant 0 : index
    %230 = vector.load %arg9[%c0_101, %c0_102, %c0_103] : memref<1x4x4xf32, #tpu.memory_space<vmem>>, vector<1x4x4xf32>
    %231 = vector.shape_cast %230 : vector<1x4x4xf32> to vector<4x4xf32>
    %232 = arith.mulf %229, %229 : vector<4x4xf32>
    %233 = arith.mulf %231, %231 : vector<4x4xf32>
    %234 = arith.mulf %229, %231 : vector<4x4xf32>
    %c3 = arith.constant 3 : index
    %235 = memref.load %arg1[%c3] : memref<5xf32, #tpu.memory_space<smem>>
    %c0_104 = arith.constant 0 : index
    %c0_105 = arith.constant 0 : index
    %236 = vector.load %arg17[%c0_104, %c0_105] : memref<4x4xf32, #tpu.memory_space<vmem>>, vector<4x4xf32>
    %237 = arith.mulf %236, %229 : vector<4x4xf32>
    %238 = vector.shape_cast %237 : vector<4x4xf32> to vector<1x4x4xf32>
    %cst_106 = arith.constant dense<0.000000e+00> : vector<1xf32>
    %239 = vector.multi_reduction <add>, %238, %cst_106 [1, 2] : vector<1x4x4xf32> to vector<1xf32>
    %240 = vector.shape_cast %239 : vector<1xf32> to vector<1x1x1xf32>
    %241 = vector.extract %240[0, 0, 0] : f32 from vector<1x1x1xf32>
    %242 = arith.mulf %236, %231 : vector<4x4xf32>
    %243 = vector.shape_cast %242 : vector<4x4xf32> to vector<1x4x4xf32>
    %cst_107 = arith.constant dense<0.000000e+00> : vector<1xf32>
    %244 = vector.multi_reduction <add>, %243, %cst_107 [1, 2] : vector<1x4x4xf32> to vector<1xf32>
    %245 = vector.shape_cast %244 : vector<1xf32> to vector<1x1x1xf32>
    %246 = vector.extract %245[0, 0, 0] : f32 from vector<1x1x1xf32>
    %247 = arith.mulf %236, %232 : vector<4x4xf32>
    %248 = vector.shape_cast %247 : vector<4x4xf32> to vector<1x4x4xf32>
    %cst_108 = arith.constant dense<0.000000e+00> : vector<1xf32>
    %249 = vector.multi_reduction <add>, %248, %cst_108 [1, 2] : vector<1x4x4xf32> to vector<1xf32>
    %250 = vector.shape_cast %249 : vector<1xf32> to vector<1x1x1xf32>
    %251 = vector.extract %250[0, 0, 0] : f32 from vector<1x1x1xf32>
    %252 = arith.mulf %236, %233 : vector<4x4xf32>
    %253 = vector.shape_cast %252 : vector<4x4xf32> to vector<1x4x4xf32>
    %cst_109 = arith.constant dense<0.000000e+00> : vector<1xf32>
    %254 = vector.multi_reduction <add>, %253, %cst_109 [1, 2] : vector<1x4x4xf32> to vector<1xf32>
    %255 = vector.shape_cast %254 : vector<1xf32> to vector<1x1x1xf32>
    %256 = vector.extract %255[0, 0, 0] : f32 from vector<1x1x1xf32>
    %257 = arith.mulf %236, %234 : vector<4x4xf32>
    %258 = vector.shape_cast %257 : vector<4x4xf32> to vector<1x4x4xf32>
    %cst_110 = arith.constant dense<0.000000e+00> : vector<1xf32>
    %259 = vector.multi_reduction <add>, %258, %cst_110 [1, 2] : vector<1x4x4xf32> to vector<1xf32>
    %260 = vector.shape_cast %259 : vector<1xf32> to vector<1x1x1xf32>
    %261 = vector.extract %260[0, 0, 0] : f32 from vector<1x1x1xf32>
    %262 = arith.mulf %241, %241 : f32
    %263 = arith.subf %251, %262 : f32
    %264 = arith.mulf %246, %246 : f32
    %265 = arith.subf %256, %264 : f32
    %266 = arith.mulf %241, %246 : f32
    %267 = arith.subf %261, %266 : f32
    %cst_111 = arith.constant 2.000000e+00 : f32
    %268 = arith.mulf %cst_111, %267 : f32
    %269 = arith.addf %268, %235 : f32
    %270 = arith.addf %263, %265 : f32
    %271 = arith.addf %270, %235 : f32
    %272 = arith.divf %269, %271 : f32
    %cst_112 = arith.constant 0.000000e+00 : f32
    %273 = arith.maximumf %263, %cst_112 : f32
    %cst_113 = arith.constant 0.000000e+00 : f32
    %274 = arith.maximumf %265, %cst_113 : f32
    %275 = arith.mulf %273, %274 : f32
    %276 = math.sqrt %275 : f32
    %cst_114 = arith.constant 5.000000e-01 : f32
    %277 = arith.mulf %cst_114, %235 : f32
    %278 = arith.addf %267, %277 : f32
    %cst_115 = arith.constant 5.000000e-01 : f32
    %279 = arith.mulf %cst_115, %235 : f32
    %280 = arith.addf %276, %279 : f32
    %281 = arith.divf %278, %280 : f32
    %c0_116 = arith.constant 0 : index
    %c0_117 = arith.constant 0 : index
    %c0_118 = arith.constant 0 : index
    %282 = vector.load %arg10[%c0_116, %c0_117, %c0_118] : memref<1x2x2xf32, #tpu.memory_space<vmem>>, vector<1x2x2xf32>
    %283 = vector.shape_cast %282 : vector<1x2x2xf32> to vector<2x2xf32>
    %c0_119 = arith.constant 0 : index
    %c0_120 = arith.constant 0 : index
    %c0_121 = arith.constant 0 : index
    %284 = vector.load %arg11[%c0_119, %c0_120, %c0_121] : memref<1x2x2xf32, #tpu.memory_space<vmem>>, vector<1x2x2xf32>
    %285 = vector.shape_cast %284 : vector<1x2x2xf32> to vector<2x2xf32>
    %286 = arith.mulf %283, %283 : vector<2x2xf32>
    %287 = arith.mulf %285, %285 : vector<2x2xf32>
    %288 = arith.mulf %283, %285 : vector<2x2xf32>
    %c4 = arith.constant 4 : index
    %289 = memref.load %arg1[%c4] : memref<5xf32, #tpu.memory_space<smem>>
    %c0_122 = arith.constant 0 : index
    %c0_123 = arith.constant 0 : index
    %290 = vector.load %arg18[%c0_122, %c0_123] : memref<2x2xf32, #tpu.memory_space<vmem>>, vector<2x2xf32>
    %291 = arith.mulf %290, %283 : vector<2x2xf32>
    %292 = vector.shape_cast %291 : vector<2x2xf32> to vector<1x2x2xf32>
    %cst_124 = arith.constant dense<0.000000e+00> : vector<1xf32>
    %293 = vector.multi_reduction <add>, %292, %cst_124 [1, 2] : vector<1x2x2xf32> to vector<1xf32>
    %294 = vector.shape_cast %293 : vector<1xf32> to vector<1x1x1xf32>
    %295 = vector.extract %294[0, 0, 0] : f32 from vector<1x1x1xf32>
    %296 = arith.mulf %290, %285 : vector<2x2xf32>
    %297 = vector.shape_cast %296 : vector<2x2xf32> to vector<1x2x2xf32>
    %cst_125 = arith.constant dense<0.000000e+00> : vector<1xf32>
    %298 = vector.multi_reduction <add>, %297, %cst_125 [1, 2] : vector<1x2x2xf32> to vector<1xf32>
    %299 = vector.shape_cast %298 : vector<1xf32> to vector<1x1x1xf32>
    %300 = vector.extract %299[0, 0, 0] : f32 from vector<1x1x1xf32>
    %301 = arith.mulf %290, %286 : vector<2x2xf32>
    %302 = vector.shape_cast %301 : vector<2x2xf32> to vector<1x2x2xf32>
    %cst_126 = arith.constant dense<0.000000e+00> : vector<1xf32>
    %303 = vector.multi_reduction <add>, %302, %cst_126 [1, 2] : vector<1x2x2xf32> to vector<1xf32>
    %304 = vector.shape_cast %303 : vector<1xf32> to vector<1x1x1xf32>
    %305 = vector.extract %304[0, 0, 0] : f32 from vector<1x1x1xf32>
    %306 = arith.mulf %290, %287 : vector<2x2xf32>
    %307 = vector.shape_cast %306 : vector<2x2xf32> to vector<1x2x2xf32>
    %cst_127 = arith.constant dense<0.000000e+00> : vector<1xf32>
    %308 = vector.multi_reduction <add>, %307, %cst_127 [1, 2] : vector<1x2x2xf32> to vector<1xf32>
    %309 = vector.shape_cast %308 : vector<1xf32> to vector<1x1x1xf32>
    %310 = vector.extract %309[0, 0, 0] : f32 from vector<1x1x1xf32>
    %311 = arith.mulf %290, %288 : vector<2x2xf32>
    %312 = vector.shape_cast %311 : vector<2x2xf32> to vector<1x2x2xf32>
    %cst_128 = arith.constant dense<0.000000e+00> : vector<1xf32>
    %313 = vector.multi_reduction <add>, %312, %cst_128 [1, 2] : vector<1x2x2xf32> to vector<1xf32>
    %314 = vector.shape_cast %313 : vector<1xf32> to vector<1x1x1xf32>
    %315 = vector.extract %314[0, 0, 0] : f32 from vector<1x1x1xf32>
    %316 = arith.mulf %295, %295 : f32
    %317 = arith.subf %305, %316 : f32
    %318 = arith.mulf %300, %300 : f32
    %319 = arith.subf %310, %318 : f32
    %320 = arith.mulf %295, %300 : f32
    %321 = arith.subf %315, %320 : f32
    %cst_129 = arith.constant 2.000000e+00 : f32
    %322 = arith.mulf %cst_129, %321 : f32
    %323 = arith.addf %322, %289 : f32
    %324 = arith.addf %317, %319 : f32
    %325 = arith.addf %324, %289 : f32
    %326 = arith.divf %323, %325 : f32
    %cst_130 = arith.constant 0.000000e+00 : f32
    %327 = arith.maximumf %317, %cst_130 : f32
    %cst_131 = arith.constant 0.000000e+00 : f32
    %328 = arith.maximumf %319, %cst_131 : f32
    %329 = arith.mulf %327, %328 : f32
    %330 = math.sqrt %329 : f32
    %cst_132 = arith.constant 5.000000e-01 : f32
    %331 = arith.mulf %cst_132, %289 : f32
    %332 = arith.addf %321, %331 : f32
    %cst_133 = arith.constant 5.000000e-01 : f32
    %333 = arith.mulf %cst_133, %289 : f32
    %334 = arith.addf %330, %333 : f32
    %335 = arith.divf %332, %334 : f32
    %336 = tpu.iota {dimensions = array<i32: 2>} : vector<1x1x16xi32>
    %cst_134 = arith.constant 0.000000e+00 : f32
    %337 = vector.broadcast %cst_134 : f32 to vector<1x1x16xf32>
    %c0_i32 = arith.constant 0 : i32
    %338 = vector.broadcast %c0_i32 : i32 to vector<1x1x16xi32>
    %339 = arith.cmpi eq, %336, %338 : vector<1x1x16xi32>
    %cst_135 = arith.constant 0.000000e+00 : f32
    %340 = vector.broadcast %96 : f32 to vector<1x1x16xf32>
    %341 = vector.broadcast %cst_135 : f32 to vector<1x1x16xf32>
    %342 = arith.select %339, %340, %341 : vector<1x1x16xi1>, vector<1x1x16xf32>
    %343 = arith.addf %337, %342 : vector<1x1x16xf32>
    %c1_i32 = arith.constant 1 : i32
    %344 = vector.broadcast %c1_i32 : i32 to vector<1x1x16xi32>
    %345 = arith.cmpi eq, %336, %344 : vector<1x1x16xi32>
    %cst_136 = arith.constant 0.000000e+00 : f32
    %346 = vector.broadcast %173 : f32 to vector<1x1x16xf32>
    %347 = vector.broadcast %cst_136 : f32 to vector<1x1x16xf32>
    %348 = arith.select %345, %346, %347 : vector<1x1x16xi1>, vector<1x1x16xf32>
    %349 = arith.addf %343, %348 : vector<1x1x16xf32>
    %c2_i32 = arith.constant 2 : i32
    %350 = vector.broadcast %c2_i32 : i32 to vector<1x1x16xi32>
    %351 = arith.cmpi eq, %336, %350 : vector<1x1x16xi32>
    %cst_137 = arith.constant 0.000000e+00 : f32
    %352 = vector.broadcast %227 : f32 to vector<1x1x16xf32>
    %353 = vector.broadcast %cst_137 : f32 to vector<1x1x16xf32>
    %354 = arith.select %351, %352, %353 : vector<1x1x16xi1>, vector<1x1x16xf32>
    %355 = arith.addf %349, %354 : vector<1x1x16xf32>
    %c3_i32 = arith.constant 3 : i32
    %356 = vector.broadcast %c3_i32 : i32 to vector<1x1x16xi32>
    %357 = arith.cmpi eq, %336, %356 : vector<1x1x16xi32>
    %cst_138 = arith.constant 0.000000e+00 : f32
    %358 = vector.broadcast %281 : f32 to vector<1x1x16xf32>
    %359 = vector.broadcast %cst_138 : f32 to vector<1x1x16xf32>
    %360 = arith.select %357, %358, %359 : vector<1x1x16xi1>, vector<1x1x16xf32>
    %361 = arith.addf %355, %360 : vector<1x1x16xf32>
    %c4_i32 = arith.constant 4 : i32
    %362 = vector.broadcast %c4_i32 : i32 to vector<1x1x16xi32>
    %363 = arith.cmpi eq, %336, %362 : vector<1x1x16xi32>
    %cst_139 = arith.constant 0.000000e+00 : f32
    %364 = vector.broadcast %335 : f32 to vector<1x1x16xf32>
    %365 = vector.broadcast %cst_139 : f32 to vector<1x1x16xf32>
    %366 = arith.select %363, %364, %365 : vector<1x1x16xi1>, vector<1x1x16xf32>
    %367 = arith.addf %361, %366 : vector<1x1x16xf32>
    %c5_i32 = arith.constant 5 : i32
    %368 = vector.broadcast %c5_i32 : i32 to vector<1x1x16xi32>
    %369 = arith.cmpi eq, %336, %368 : vector<1x1x16xi32>
    %cst_140 = arith.constant 0.000000e+00 : f32
    %370 = vector.broadcast %90 : f32 to vector<1x1x16xf32>
    %371 = vector.broadcast %cst_140 : f32 to vector<1x1x16xf32>
    %372 = arith.select %369, %370, %371 : vector<1x1x16xi1>, vector<1x1x16xf32>
    %373 = arith.addf %367, %372 : vector<1x1x16xf32>
    %c6_i32_141 = arith.constant 6 : i32
    %374 = vector.broadcast %c6_i32_141 : i32 to vector<1x1x16xi32>
    %375 = arith.cmpi eq, %336, %374 : vector<1x1x16xi32>
    %cst_142 = arith.constant 0.000000e+00 : f32
    %376 = vector.broadcast %167 : f32 to vector<1x1x16xf32>
    %377 = vector.broadcast %cst_142 : f32 to vector<1x1x16xf32>
    %378 = arith.select %375, %376, %377 : vector<1x1x16xi1>, vector<1x1x16xf32>
    %379 = arith.addf %373, %378 : vector<1x1x16xf32>
    %c7_i32 = arith.constant 7 : i32
    %380 = vector.broadcast %c7_i32 : i32 to vector<1x1x16xi32>
    %381 = arith.cmpi eq, %336, %380 : vector<1x1x16xi32>
    %cst_143 = arith.constant 0.000000e+00 : f32
    %382 = vector.broadcast %218 : f32 to vector<1x1x16xf32>
    %383 = vector.broadcast %cst_143 : f32 to vector<1x1x16xf32>
    %384 = arith.select %381, %382, %383 : vector<1x1x16xi1>, vector<1x1x16xf32>
    %385 = arith.addf %379, %384 : vector<1x1x16xf32>
    %c8_i32 = arith.constant 8 : i32
    %386 = vector.broadcast %c8_i32 : i32 to vector<1x1x16xi32>
    %387 = arith.cmpi eq, %336, %386 : vector<1x1x16xi32>
    %cst_144 = arith.constant 0.000000e+00 : f32
    %388 = vector.broadcast %272 : f32 to vector<1x1x16xf32>
    %389 = vector.broadcast %cst_144 : f32 to vector<1x1x16xf32>
    %390 = arith.select %387, %388, %389 : vector<1x1x16xi1>, vector<1x1x16xf32>
    %391 = arith.addf %385, %390 : vector<1x1x16xf32>
    %c9_i32 = arith.constant 9 : i32
    %392 = vector.broadcast %c9_i32 : i32 to vector<1x1x16xi32>
    %393 = arith.cmpi eq, %336, %392 : vector<1x1x16xi32>
    %cst_145 = arith.constant 0.000000e+00 : f32
    %394 = vector.broadcast %326 : f32 to vector<1x1x16xf32>
    %395 = vector.broadcast %cst_145 : f32 to vector<1x1x16xf32>
    %396 = arith.select %393, %394, %395 : vector<1x1x16xi1>, vector<1x1x16xf32>
    %397 = arith.addf %391, %396 : vector<1x1x16xf32>
    %c10_i32 = arith.constant 10 : i32
    %398 = vector.broadcast %c10_i32 : i32 to vector<1x1x16xi32>
    %399 = arith.cmpi eq, %336, %398 : vector<1x1x16xi32>
    %cst_146 = arith.constant 0.000000e+00 : f32
    %400 = vector.broadcast %16 : f32 to vector<1x1x16xf32>
    %401 = vector.broadcast %cst_146 : f32 to vector<1x1x16xf32>
    %402 = arith.select %399, %400, %401 : vector<1x1x16xi1>, vector<1x1x16xf32>
    %403 = arith.addf %397, %402 : vector<1x1x16xf32>
    %c11_i32 = arith.constant 11 : i32
    %404 = vector.broadcast %c11_i32 : i32 to vector<1x1x16xi32>
    %405 = arith.cmpi eq, %336, %404 : vector<1x1x16xi32>
    %cst_147 = arith.constant 0.000000e+00 : f32
    %406 = vector.broadcast %21 : f32 to vector<1x1x16xf32>
    %407 = vector.broadcast %cst_147 : f32 to vector<1x1x16xf32>
    %408 = arith.select %405, %406, %407 : vector<1x1x16xi1>, vector<1x1x16xf32>
    %409 = arith.addf %403, %408 : vector<1x1x16xf32>
    %c12_i32 = arith.constant 12 : i32
    %410 = vector.broadcast %c12_i32 : i32 to vector<1x1x16xi32>
    %411 = arith.cmpi eq, %336, %410 : vector<1x1x16xi32>
    %cst_148 = arith.constant 0.000000e+00 : f32
    %412 = vector.broadcast %26 : f32 to vector<1x1x16xf32>
    %413 = vector.broadcast %cst_148 : f32 to vector<1x1x16xf32>
    %414 = arith.select %411, %412, %413 : vector<1x1x16xi1>, vector<1x1x16xf32>
    %415 = arith.addf %409, %414 : vector<1x1x16xf32>
    %c0_149 = arith.constant 0 : index
    %c0_150 = arith.constant 0 : index
    %c0_151 = arith.constant 0 : index
    %416 = vector.load %arg19[%c0_149, %c0_150, %c0_151] : memref<1x1x16xf32, #tpu.memory_space<vmem>>, vector<1x1x16xf32>
    tpu.vector_store %arg19[%c0_149, %c0_150, %c0_151], %415 {strides = array<i32>} : memref<1x1x16xf32, #tpu.memory_space<vmem>>, vector<1x1x16xf32>,
    return
  }
  func.func @transform_0(%arg0: i32) -> i32 {
    %c0_i32 = arith.constant 0 : i32
    %c0_i32_0 = arith.constant 0 : i32
    return %c0_i32 : i32
  }
  func.func @transform_1(%arg0: i32) -> (i32, i32, i32) {
    %c0_i32 = arith.constant 0 : i32
    %c0_i32_0 = arith.constant 0 : i32
    %c0_i32_1 = arith.constant 0 : i32
    return %arg0, %c0_i32, %c0_i32_0 : i32, i32, i32
  }
  func.func @transform_2(%arg0: i32) -> (i32, i32, i32) {
    %c0_i32 = arith.constant 0 : i32
    %c0_i32_0 = arith.constant 0 : i32
    %c0_i32_1 = arith.constant 0 : i32
    return %arg0, %c0_i32, %c0_i32_0 : i32, i32, i32
  }
  func.func @transform_3(%arg0: i32) -> (i32, i32, i32) {
    %c0_i32 = arith.constant 0 : i32
    %c0_i32_0 = arith.constant 0 : i32
    %c0_i32_1 = arith.constant 0 : i32
    return %arg0, %c0_i32, %c0_i32_0 : i32, i32, i32
  }
  func.func @transform_4(%arg0: i32) -> (i32, i32, i32) {
    %c0_i32 = arith.constant 0 : i32
    %c0_i32_0 = arith.constant 0 : i32
    %c0_i32_1 = arith.constant 0 : i32
    return %arg0, %c0_i32, %c0_i32_0 : i32, i32, i32
  }
  func.func @transform_5(%arg0: i32) -> (i32, i32, i32) {
    %c0_i32 = arith.constant 0 : i32
    %c0_i32_0 = arith.constant 0 : i32
    %c0_i32_1 = arith.constant 0 : i32
    return %arg0, %c0_i32, %c0_i32_0 : i32, i32, i32
  }
  func.func @transform_6(%arg0: i32) -> (i32, i32, i32) {
    %c0_i32 = arith.constant 0 : i32
    %c0_i32_0 = arith.constant 0 : i32
    %c0_i32_1 = arith.constant 0 : i32
    return %arg0, %c0_i32, %c0_i32_0 : i32, i32, i32
  }
  func.func @transform_7(%arg0: i32) -> (i32, i32, i32) {
    %c0_i32 = arith.constant 0 : i32
    %c0_i32_0 = arith.constant 0 : i32
    %c0_i32_1 = arith.constant 0 : i32
    return %arg0, %c0_i32, %c0_i32_0 : i32, i32, i32
  }
  func.func @transform_8(%arg0: i32) -> (i32, i32, i32) {
    %c0_i32 = arith.constant 0 : i32
    %c0_i32_0 = arith.constant 0 : i32
    %c0_i32_1 = arith.constant 0 : i32
    return %arg0, %c0_i32, %c0_i32_0 : i32, i32, i32
  }
  func.func @transform_9(%arg0: i32) -> (i32, i32, i32) {
    %c0_i32 = arith.constant 0 : i32
    %c0_i32_0 = arith.constant 0 : i32
    %c0_i32_1 = arith.constant 0 : i32
    return %arg0, %c0_i32, %c0_i32_0 : i32, i32, i32
  }
  func.func @transform_10(%arg0: i32) -> (i32, i32, i32) {
    %c0_i32 = arith.constant 0 : i32
    %c0_i32_0 = arith.constant 0 : i32
    %c0_i32_1 = arith.constant 0 : i32
    return %arg0, %c0_i32, %c0_i32_0 : i32, i32, i32
  }
  func.func @transform_11(%arg0: i32) -> (i32, i32) {
    %c0_i32 = arith.constant 0 : i32
    %c0_i32_0 = arith.constant 0 : i32
    %c0_i32_1 = arith.constant 0 : i32
    return %c0_i32, %c0_i32_0 : i32, i32
  }
  func.func @transform_12(%arg0: i32) -> (i32, i32) {
    %c0_i32 = arith.constant 0 : i32
    %c0_i32_0 = arith.constant 0 : i32
    %c0_i32_1 = arith.constant 0 : i32
    return %c0_i32, %c0_i32_0 : i32, i32
  }
  func.func @transform_13(%arg0: i32) -> (i32, i32) {
    %c0_i32 = arith.constant 0 : i32
    %c0_i32_0 = arith.constant 0 : i32
    %c0_i32_1 = arith.constant 0 : i32
    return %c0_i32, %c0_i32_0 : i32, i32
  }
  func.func @transform_14(%arg0: i32) -> (i32, i32) {
    %c0_i32 = arith.constant 0 : i32
    %c0_i32_0 = arith.constant 0 : i32
    %c0_i32_1 = arith.constant 0 : i32
    return %c0_i32, %c0_i32_0 : i32, i32
  }
  func.func @transform_15(%arg0: i32) -> (i32, i32) {
    %c0_i32 = arith.constant 0 : i32
    %c0_i32_0 = arith.constant 0 : i32
    %c0_i32_1 = arith.constant 0 : i32
    return %c0_i32, %c0_i32_0 : i32, i32
  }
  func.func @transform_16(%arg0: i32) -> (i32, i32) {
    %c0_i32 = arith.constant 0 : i32
    %c0_i32_0 = arith.constant 0 : i32
    %c0_i32_1 = arith.constant 0 : i32
    return %c0_i32, %c0_i32_0 : i32, i32
  }
  func.func @transform_17(%arg0: i32) -> (i32, i32) {
    %c0_i32 = arith.constant 0 : i32
    %c0_i32_0 = arith.constant 0 : i32
    %c0_i32_1 = arith.constant 0 : i32
    return %c0_i32, %c0_i32_0 : i32, i32
  }
  func.func @transform_18(%arg0: i32) -> (i32, i32, i32) {
    %c0_i32 = arith.constant 0 : i32
    %c0_i32_0 = arith.constant 0 : i32
    %c0_i32_1 = arith.constant 0 : i32
    return %arg0, %c0_i32, %c0_i32_0 : i32, i32, i32
  }
}

</mosaic_0001>

<bundles_post_ra>
// kernel: squeeze.8
= control target key start
LH: loop header
LB: loop body
LE: loop exit
PB: predicated region body
PF: predicated region fallthrough
CT: control target
= control target key end

     0   :  { %2 = vsyncpa [#allocation1], 0  ;;  %s2193_s8 = smov [#allocation0]   ;;  %s4516_s0 = inlined_call_operand.hbm [shape: f32[2,1,32,32], index: 0, kind: input, shape index: {}]   ;;  %s4517_s1 = inlined_call_operand.vmem [shape: f32[2,16,2,16,2], index: 1, kind: output, shape index: {}]  }
   0x1   :  { %s6_s0 = sshll.u32 %s4516_s0, 4  ;;  %s8_s9 = sshll.u32 %s2193_s8, 4  ;;  %s7_s0 = int_to_ptr.hbm [resolvable:$true] %s6_s0  ;;  %s9_s9 = int_to_ptr.vmem [resolvable:$true] %s8_s9 }
   0x2   :  { %11 = dma.hbm_to_vmem [thread:$0]  %s7_s0, 1024, %s9_s9, [#allocation1]  }
   0x3   :  { %2191 = dma.done.wait [#allocation1], 1024  }
   0x4   :  { %2192 = vsyncadd [#allocation1], 4294966272  ;;  %v2222_v0 = vld [vmem:[#allocation0 + $0x10] sm:$0xff]   ;;  %v2224_v1 = vld [vmem:[#allocation0] sm:$0xff]   ;;  %s2194_s10 = smov 126   ;;  %s2195_s11 = smov 124  }
   0x5   :  { %124 = vrot.lane.b32.xlu1 %v2222_v0, %s2194_s10  ;;  %98 = vrot.lane.b32.xlu0 %v2224_v1, %s2194_s10  ;;  %v2228_v2 = vld [vmem:[#allocation0 + $0x20] sm:$0xff]   ;;  %v2231_v3 = vld [vmem:[#allocation0 + $0x18] sm:$0xff]   ;;  %v2233_v4 = vld [vmem:[#allocation0 + $0x8] sm:$0xff]   ;;  %s2196_s12 = smov 122   ;;  %s2197_s13 = smov 120   ;;  %vm15_vm0 = vcmask 15360  }
   0x6   :  { %150 = vrot.lane.b32.xlu2 %v2228_v2, %s2194_s10  ;;  %v2235_v5 = vld [vmem:[#allocation0 + $0x28] sm:$0xff]   ;;  %v2240_v6 = vld [vmem:[#allocation0 + $0x38] sm:$0xff]   ;;  %v2242_v7 = vld [vmem:[#allocation0 + $0x30] sm:$0xff]   ;;  %s2198_s14 = smov 118   ;;  %s2199_s29 = smov 116  }
   0x7   :  { %s2200_s8 = smov 114   ;;  %s2201_s15 = smov 112  }
   0x8   :  { %s2202_s2 = smov 110   ;;  %s2203_s20 = smov 108  }
   0x9   :  { %s2204_s27 = smov 106   ;;  %s2206_s3 = smov 102  }
   0xa   :  { %s2207_s21 = smov 100  }
   0xd   :  { %137 = vrot.lane.b32.xlu1 %v2231_v3, %s2194_s10  ;;  %111 = vrot.lane.b32.xlu0 %v2233_v4, %s2194_s10 }
   0xe   :  { %163 = vrot.lane.b32.xlu2 %v2235_v5, %s2194_s10 }
  0x15   :  { %189 = vrot.lane.b32.xlu1 %v2240_v6, %s2194_s10  ;;  %176 = vrot.lane.b32.xlu0 %v2242_v7, %s2194_s10 }
  0x16   :  { %201 = vrot.lane.b32.xlu2 %v2224_v1, %s2195_s11 }
  0x1d   :  { %227 = vrot.lane.b32.xlu1 %v2222_v0, %s2195_s11  ;;  %214 = vrot.lane.b32.xlu0 %v2233_v4, %s2195_s11 }
  0x1e   :  { %240 = vrot.lane.b32.xlu2 %v2231_v3, %s2195_s11 }
  0x25   :  { %266 = vrot.lane.b32.xlu1 %v2235_v5, %s2195_s11  ;;  %253 = vrot.lane.b32.xlu0 %v2228_v2, %s2195_s11 }
  0x26   :  { %279 = vrot.lane.b32.xlu2 %v2242_v7, %s2195_s11 }
  0x2d   :  { %304 = vrot.lane.b32.xlu1 %v2224_v1, %s2196_s12  ;;  %292 = vrot.lane.b32.xlu0 %v2240_v6, %s2195_s11 }
  0x2e   :  { %317 = vrot.lane.b32.xlu2 %v2233_v4, %s2196_s12 }
  0x35   :  { %343 = vrot.lane.b32.xlu1 %v2231_v3, %s2196_s12  ;;  %330 = vrot.lane.b32.xlu0 %v2222_v0, %s2196_s12 }
  0x36   :  { %356 = vrot.lane.b32.xlu2 %v2228_v2, %s2196_s12 }
  0x3d   :  { %382 = vrot.lane.b32.xlu1 %v2242_v7, %s2196_s12  ;;  %369 = vrot.lane.b32.xlu0 %v2235_v5, %s2196_s12 }
  0x3e   :  { %395 = vrot.lane.b32.xlu2 %v2240_v6, %s2196_s12  ;;  %s2205_s12 = smov 104  }
  0x45   :  { %420 = vrot.lane.b32.xlu1 %v2233_v4, %s2197_s13  ;;  %407 = vrot.lane.b32.xlu0 %v2224_v1, %s2197_s13 }
  0x46   :  { %433 = vrot.lane.b32.xlu2 %v2222_v0, %s2197_s13 }
  0x4d   :  { %459 = vrot.lane.b32.xlu1 %v2228_v2, %s2197_s13  ;;  %446 = vrot.lane.b32.xlu0 %v2231_v3, %s2197_s13 }
  0x4e   :  { %472 = vrot.lane.b32.xlu2 %v2235_v5, %s2197_s13 }
  0x55   :  { %498 = vrot.lane.b32.xlu1 %v2240_v6, %s2197_s13  ;;  %485 = vrot.lane.b32.xlu0 %v2242_v7, %s2197_s13 }
  0x56   :  { %510 = vrot.lane.b32.xlu2 %v2224_v1, %s2198_s14 }
  0x5d   :  { %536 = vrot.lane.b32.xlu1 %v2222_v0, %s2198_s14  ;;  %523 = vrot.lane.b32.xlu0 %v2233_v4, %s2198_s14 }
  0x5e   :  { %549 = vrot.lane.b32.xlu2 %v2231_v3, %s2198_s14 }
  0x60   :  { %v151_v8 = vpop.permute.xlu2 %150  }
  0x61   :  { %1687 = vst.msk [vmem:[%s4517_s1 + $0x201] ss:$16 sm:$0x3] %vm15_vm0, %v151_v8  }
  0x62   :  { %1688 = vst.msk [vmem:[%s4517_s1 + $0x201] ss:$16 sm:$0xc] %vm15_vm0, %v151_v8  }
  0x63   :  { %1689 = vst.msk [vmem:[%s4517_s1 + $0x201] ss:$16 sm:$0x30] %vm15_vm0, %v151_v8  }
  0x64   :  { %1690 = vst.msk [vmem:[%s4517_s1 + $0x201] ss:$16 sm:$0xc0] %vm15_vm0, %v151_v8   ;;  %v3262_v8 = vld [vmem:[#allocation0 + $0x8] sm:$0xff]  }
  0x65   :  { %575 = vrot.lane.b32.xlu1 %v2235_v5, %s2198_s14  ;;  %562 = vrot.lane.b32.xlu0 %v2228_v2, %s2198_s14  ;;  %1643 = vst.msk [vmem:[%s4517_s1 + $0x80] ss:$16 sm:$0x3] %vm15_vm0, %v3262_v8  }
  0x66   :  { %588 = vrot.lane.b32.xlu2 %v2242_v7, %s2198_s14  ;;  %1644 = vst.msk [vmem:[%s4517_s1 + $0x80] ss:$16 sm:$0xc] %vm15_vm0, %v3262_v8  }
  0x67   :  { %1645 = vst.msk [vmem:[%s4517_s1 + $0x80] ss:$16 sm:$0x30] %vm15_vm0, %v3262_v8  }
  0x68   :  { %v164_v9 = vpop.permute.xlu2 %163   ;;  %1646 = vst.msk [vmem:[%s4517_s1 + $0x80] ss:$16 sm:$0xc0] %vm15_vm0, %v3262_v8  }
  0x69   :  { %1691 = vst.msk [vmem:[%s4517_s1 + $0x281] ss:$16 sm:$0x3] %vm15_vm0, %v164_v9  }
  0x6a   :  { %1692 = vst.msk [vmem:[%s4517_s1 + $0x281] ss:$16 sm:$0xc] %vm15_vm0, %v164_v9  }
  0x6b   :  { %1693 = vst.msk [vmem:[%s4517_s1 + $0x281] ss:$16 sm:$0x30] %vm15_vm0, %v164_v9  }
  0x6c   :  { %1694 = vst.msk [vmem:[%s4517_s1 + $0x281] ss:$16 sm:$0xc0] %vm15_vm0, %v164_v9  }
  0x6d   :  { %613 = vrot.lane.b32.xlu1 %v2224_v1, %s2199_s29  ;;  %601 = vrot.lane.b32.xlu0 %v2240_v6, %s2198_s14 }
  0x6e   :  { %626 = vrot.lane.b32.xlu2 %v2233_v4, %s2199_s29 }
  0x70   :  { %v202_v10 = vpop.permute.xlu2 %201  }
  0x71   :  { %1703 = vst.msk [vmem:[%s4517_s1 + $0x2] ss:$16 sm:$0x3] %vm15_vm0, %v202_v10  }
  0x72   :  { %1704 = vst.msk [vmem:[%s4517_s1 + $0x2] ss:$16 sm:$0xc] %vm15_vm0, %v202_v10  }
  0x73   :  { %1705 = vst.msk [vmem:[%s4517_s1 + $0x2] ss:$16 sm:$0x30] %vm15_vm0, %v202_v10  }
  0x74   :  { %1706 = vst.msk [vmem:[%s4517_s1 + $0x2] ss:$16 sm:$0xc0] %vm15_vm0, %v202_v10  }
  0x75   :  { %652 = vrot.lane.b32.xlu1 %v2231_v3, %s2199_s29  ;;  %639 = vrot.lane.b32.xlu0 %v2222_v0, %s2199_s29 }
  0x76   :  { %665 = vrot.lane.b32.xlu2 %v2228_v2, %s2199_s29 }
  0x77   :  { %v125_v11 = vpop.permute.xlu1 %124   ;;  %v99_v12 = vpop.permute.xlu0 %98  }
  0x78   :  { %1679 = vst.msk [vmem:[%s4517_s1 + $0x101] ss:$16 sm:$0x3] %vm15_vm0, %v125_v11   ;;  %v241_v13 = vpop.permute.xlu2 %240  }
  0x79   :  { %1680 = vst.msk [vmem:[%s4517_s1 + $0x101] ss:$16 sm:$0xc] %vm15_vm0, %v125_v11  }
  0x7a   :  { %1681 = vst.msk [vmem:[%s4517_s1 + $0x101] ss:$16 sm:$0x30] %vm15_vm0, %v125_v11  }
  0x7b   :  { %1682 = vst.msk [vmem:[%s4517_s1 + $0x101] ss:$16 sm:$0xc0] %vm15_vm0, %v125_v11  }
  0x7c   :  { %1671 = vst.msk [vmem:[%s4517_s1 + $0x1] ss:$16 sm:$0x3] %vm15_vm0, %v99_v12  }
  0x7d   :  { %1672 = vst.msk [vmem:[%s4517_s1 + $0x1] ss:$16 sm:$0xc] %vm15_vm0, %v99_v12   ;;  %691 = vrot.lane.b32.xlu1 %v2242_v7, %s2199_s29  ;;  %678 = vrot.lane.b32.xlu0 %v2235_v5, %s2199_s29 }
  0x7e   :  { %1673 = vst.msk [vmem:[%s4517_s1 + $0x1] ss:$16 sm:$0x30] %vm15_vm0, %v99_v12   ;;  %704 = vrot.lane.b32.xlu2 %v2240_v6, %s2199_s29 }
  0x7f   :  { %1674 = vst.msk [vmem:[%s4517_s1 + $0x1] ss:$16 sm:$0xc0] %vm15_vm0, %v99_v12   ;;  %v138_v14 = vpop.permute.xlu1 %137   ;;  %v112_v15 = vpop.permute.xlu0 %111   ;;  %v3318_v12 = vld [vmem:[#allocation0 + $0x28] sm:$0xff]  }
  0x80   :  { %1683 = vst.msk [vmem:[%s4517_s1 + $0x181] ss:$16 sm:$0x3] %vm15_vm0, %v138_v14   ;;  %v280_v16 = vpop.permute.xlu2 %279  }
  0x81   :  { %1684 = vst.msk [vmem:[%s4517_s1 + $0x181] ss:$16 sm:$0xc] %vm15_vm0, %v138_v14  }
  0x82   :  { %1685 = vst.msk [vmem:[%s4517_s1 + $0x181] ss:$16 sm:$0x30] %vm15_vm0, %v138_v14  }
  0x83   :  { %1686 = vst.msk [vmem:[%s4517_s1 + $0x181] ss:$16 sm:$0xc0] %vm15_vm0, %v138_v14  }
  0x84   :  { %1675 = vst.msk [vmem:[%s4517_s1 + $0x81] ss:$16 sm:$0x3] %vm15_vm0, %v112_v15  }
  0x85   :  { %1676 = vst.msk [vmem:[%s4517_s1 + $0x81] ss:$16 sm:$0xc] %vm15_vm0, %v112_v15   ;;  %729 = vrot.lane.b32.xlu1 %v2233_v4, %s2200_s8  ;;  %716 = vrot.lane.b32.xlu0 %v2224_v1, %s2200_s8 }
  0x86   :  { %1677 = vst.msk [vmem:[%s4517_s1 + $0x81] ss:$16 sm:$0x30] %vm15_vm0, %v112_v15   ;;  %742 = vrot.lane.b32.xlu2 %v2222_v0, %s2200_s8 }
  0x87   :  { %1678 = vst.msk [vmem:[%s4517_s1 + $0x81] ss:$16 sm:$0xc0] %vm15_vm0, %v112_v15   ;;  %v190_v17 = vpop.permute.xlu1 %189   ;;  %v177_v18 = vpop.permute.xlu0 %176  }
  0x88   :  { %1699 = vst.msk [vmem:[%s4517_s1 + $0x381] ss:$16 sm:$0x3] %vm15_vm0, %v190_v17   ;;  %v318_v19 = vpop.permute.xlu2 %317  }
  0x89   :  { %1700 = vst.msk [vmem:[%s4517_s1 + $0x381] ss:$16 sm:$0xc] %vm15_vm0, %v190_v17  }
  0x8a   :  { %1701 = vst.msk [vmem:[%s4517_s1 + $0x381] ss:$16 sm:$0x30] %vm15_vm0, %v190_v17  }
  0x8b   :  { %1702 = vst.msk [vmem:[%s4517_s1 + $0x381] ss:$16 sm:$0xc0] %vm15_vm0, %v190_v17   ;;  %v3376_v17 = vld [vmem:[#allocation0] sm:$0xff]  }
  0x8c   :  { %1695 = vst.msk [vmem:[%s4517_s1 + $0x301] ss:$16 sm:$0x3] %vm15_vm0, %v177_v18  }
  0x8d   :  { %1696 = vst.msk [vmem:[%s4517_s1 + $0x301] ss:$16 sm:$0xc] %vm15_vm0, %v177_v18   ;;  %768 = vrot.lane.b32.xlu1 %v2228_v2, %s2200_s8  ;;  %755 = vrot.lane.b32.xlu0 %v2231_v3, %s2200_s8 }
  0x8e   :  { %1697 = vst.msk [vmem:[%s4517_s1 + $0x301] ss:$16 sm:$0x30] %vm15_vm0, %v177_v18   ;;  %781 = vrot.lane.b32.xlu2 %v2235_v5, %s2200_s8 }
  0x8f   :  { %1698 = vst.msk [vmem:[%s4517_s1 + $0x301] ss:$16 sm:$0xc0] %vm15_vm0, %v177_v18   ;;  %v228_v20 = vpop.permute.xlu1 %227   ;;  %v215_v21 = vpop.permute.xlu0 %214   ;;  %v3378_v18 = vld [vmem:[#allocation0 + $0x38] sm:$0xff]  }
  0x90   :  { %1715 = vst.msk [vmem:[%s4517_s1 + $0x182] ss:$16 sm:$0x3] %vm15_vm0, %v241_v13   ;;  %v357_v22 = vpop.permute.xlu2 %356  }
  0x91   :  { %1716 = vst.msk [vmem:[%s4517_s1 + $0x182] ss:$16 sm:$0xc] %vm15_vm0, %v241_v13  }
  0x92   :  { %1717 = vst.msk [vmem:[%s4517_s1 + $0x182] ss:$16 sm:$0x30] %vm15_vm0, %v241_v13  }
  0x93   :  { %1718 = vst.msk [vmem:[%s4517_s1 + $0x182] ss:$16 sm:$0xc0] %vm15_vm0, %v241_v13   ;;  %v3320_v13 = vld [vmem:[#allocation0 + $0x20] sm:$0xff]  }
  0x94   :  { %1711 = vst.msk [vmem:[%s4517_s1 + $0x102] ss:$16 sm:$0x3] %vm15_vm0, %v228_v20  }
  0x95   :  { %1712 = vst.msk [vmem:[%s4517_s1 + $0x102] ss:$16 sm:$0xc] %vm15_vm0, %v228_v20   ;;  %807 = vrot.lane.b32.xlu1 %v2240_v6, %s2200_s8  ;;  %794 = vrot.lane.b32.xlu0 %v2242_v7, %s2200_s8  ;;  %s2208_s8 = smov 98  }
  0x96   :  { %1713 = vst.msk [vmem:[%s4517_s1 + $0x102] ss:$16 sm:$0x30] %vm15_vm0, %v228_v20   ;;  %819 = vrot.lane.b32.xlu2 %v2224_v1, %s2201_s15 }
  0x97   :  { %1714 = vst.msk [vmem:[%s4517_s1 + $0x102] ss:$16 sm:$0xc0] %vm15_vm0, %v228_v20   ;;  %v267_v23 = vpop.permute.xlu1 %266   ;;  %v254_v24 = vpop.permute.xlu0 %253  }
  0x98   :  { %1707 = vst.msk [vmem:[%s4517_s1 + $0x82] ss:$16 sm:$0x3] %vm15_vm0, %v215_v21   ;;  %v396_v27 = vpop.permute.xlu2 %395  }
  0x99   :  { %1708 = vst.msk [vmem:[%s4517_s1 + $0x82] ss:$16 sm:$0xc] %vm15_vm0, %v215_v21  }
  0x9a   :  { %1709 = vst.msk [vmem:[%s4517_s1 + $0x82] ss:$16 sm:$0x30] %vm15_vm0, %v215_v21  }
  0x9b   :  { %1710 = vst.msk [vmem:[%s4517_s1 + $0x82] ss:$16 sm:$0xc0] %vm15_vm0, %v215_v21  }
  0x9c   :  { %1727 = vst.msk [vmem:[%s4517_s1 + $0x302] ss:$16 sm:$0x3] %vm15_vm0, %v280_v16  }
  0x9d   :  { %1728 = vst.msk [vmem:[%s4517_s1 + $0x302] ss:$16 sm:$0xc] %vm15_vm0, %v280_v16   ;;  %845 = vrot.lane.b32.xlu1 %v2222_v0, %s2201_s15  ;;  %832 = vrot.lane.b32.xlu0 %v2233_v4, %s2201_s15 }
  0x9e   :  { %1729 = vst.msk [vmem:[%s4517_s1 + $0x302] ss:$16 sm:$0x30] %vm15_vm0, %v280_v16   ;;  %858 = vrot.lane.b32.xlu2 %v2231_v3, %s2201_s15 }
  0x9f   :  { %1730 = vst.msk [vmem:[%s4517_s1 + $0x302] ss:$16 sm:$0xc0] %vm15_vm0, %v280_v16   ;;  %v305_v25 = vpop.permute.xlu1 %304   ;;  %v293_v26 = vpop.permute.xlu0 %292  }
  0xa0   :  { %1723 = vst.msk [vmem:[%s4517_s1 + $0x282] ss:$16 sm:$0x3] %vm15_vm0, %v267_v23   ;;  %v434_v30 = vpop.permute.xlu2 %433  }
  0xa1   :  { %1724 = vst.msk [vmem:[%s4517_s1 + $0x282] ss:$16 sm:$0xc] %vm15_vm0, %v267_v23  }
  0xa2   :  { %1725 = vst.msk [vmem:[%s4517_s1 + $0x282] ss:$16 sm:$0x30] %vm15_vm0, %v267_v23  }
  0xa3   :  { %1726 = vst.msk [vmem:[%s4517_s1 + $0x282] ss:$16 sm:$0xc0] %vm15_vm0, %v267_v23  }
  0xa4   :  { %1719 = vst.msk [vmem:[%s4517_s1 + $0x202] ss:$16 sm:$0x3] %vm15_vm0, %v254_v24  }
  0xa5   :  { %1720 = vst.msk [vmem:[%s4517_s1 + $0x202] ss:$16 sm:$0xc] %vm15_vm0, %v254_v24   ;;  %884 = vrot.lane.b32.xlu1 %v2235_v5, %s2201_s15  ;;  %871 = vrot.lane.b32.xlu0 %v2228_v2, %s2201_s15 }
  0xa6   :  { %1721 = vst.msk [vmem:[%s4517_s1 + $0x202] ss:$16 sm:$0x30] %vm15_vm0, %v254_v24   ;;  %897 = vrot.lane.b32.xlu2 %v2242_v7, %s2201_s15 }
  0xa7   :  { %1722 = vst.msk [vmem:[%s4517_s1 + $0x202] ss:$16 sm:$0xc0] %vm15_vm0, %v254_v24   ;;  %v344_v28 = vpop.permute.xlu1 %343   ;;  %v331_v29 = vpop.permute.xlu0 %330  }
  0xa8   :  { %1739 = vst.msk [vmem:[%s4517_s1 + $0x83] ss:$16 sm:$0x3] %vm15_vm0, %v318_v19   ;;  %v473_v35 = vpop.permute.xlu2 %472  }
  0xa9   :  { %1740 = vst.msk [vmem:[%s4517_s1 + $0x83] ss:$16 sm:$0xc] %vm15_vm0, %v318_v19  }
  0xaa   :  { %1741 = vst.msk [vmem:[%s4517_s1 + $0x83] ss:$16 sm:$0x30] %vm15_vm0, %v318_v19  }
  0xab   :  { %1742 = vst.msk [vmem:[%s4517_s1 + $0x83] ss:$16 sm:$0xc0] %vm15_vm0, %v318_v19  }
  0xac   :  { %1735 = vst.msk [vmem:[%s4517_s1 + $0x3] ss:$16 sm:$0x3] %vm15_vm0, %v305_v25  }
  0xad   :  { %1736 = vst.msk [vmem:[%s4517_s1 + $0x3] ss:$16 sm:$0xc] %vm15_vm0, %v305_v25   ;;  %922 = vrot.lane.b32.xlu1 %v2224_v1, %s2202_s2  ;;  %910 = vrot.lane.b32.xlu0 %v2240_v6, %s2201_s15 }
  0xae   :  { %1737 = vst.msk [vmem:[%s4517_s1 + $0x3] ss:$16 sm:$0x30] %vm15_vm0, %v305_v25   ;;  %935 = vrot.lane.b32.xlu2 %v2233_v4, %s2202_s2 }
  0xaf   :  { %1738 = vst.msk [vmem:[%s4517_s1 + $0x3] ss:$16 sm:$0xc0] %vm15_vm0, %v305_v25   ;;  %v383_v31 = vpop.permute.xlu1 %382   ;;  %v370_v32 = vpop.permute.xlu0 %369  }
  0xb0   :  { %1731 = vst.msk [vmem:[%s4517_s1 + $0x382] ss:$16 sm:$0x3] %vm15_vm0, %v293_v26   ;;  %v511_v38 = vpop.permute.xlu2 %510  }
  0xb1   :  { %1732 = vst.msk [vmem:[%s4517_s1 + $0x382] ss:$16 sm:$0xc] %vm15_vm0, %v293_v26  }
  0xb2   :  { %1733 = vst.msk [vmem:[%s4517_s1 + $0x382] ss:$16 sm:$0x30] %vm15_vm0, %v293_v26  }
  0xb3   :  { %1734 = vst.msk [vmem:[%s4517_s1 + $0x382] ss:$16 sm:$0xc0] %vm15_vm0, %v293_v26   ;;  %v3496_v26 = vld [vmem:[#allocation0 + $0x30] sm:$0xff]  }
  0xb4   :  { %1751 = vst.msk [vmem:[%s4517_s1 + $0x203] ss:$16 sm:$0x3] %vm15_vm0, %v357_v22  }
  0xb5   :  { %1752 = vst.msk [vmem:[%s4517_s1 + $0x203] ss:$16 sm:$0xc] %vm15_vm0, %v357_v22   ;;  %961 = vrot.lane.b32.xlu1 %v2231_v3, %s2202_s2  ;;  %948 = vrot.lane.b32.xlu0 %v2222_v0, %s2202_s2 }
  0xb6   :  { %1753 = vst.msk [vmem:[%s4517_s1 + $0x203] ss:$16 sm:$0x30] %vm15_vm0, %v357_v22   ;;  %974 = vrot.lane.b32.xlu2 %v2228_v2, %s2202_s2 }
  0xb7   :  { %1754 = vst.msk [vmem:[%s4517_s1 + $0x203] ss:$16 sm:$0xc0] %vm15_vm0, %v357_v22   ;;  %v421_v33 = vpop.permute.xlu1 %420   ;;  %v408_v34 = vpop.permute.xlu0 %407   ;;  %v3440_v22 = vld [vmem:[#allocation0 + $0x18] sm:$0xff]  }
  0xb8   :  { %1747 = vst.msk [vmem:[%s4517_s1 + $0x183] ss:$16 sm:$0x3] %vm15_vm0, %v344_v28   ;;  %v550_v41 = vpop.permute.xlu2 %549  }
  0xb9   :  { %1748 = vst.msk [vmem:[%s4517_s1 + $0x183] ss:$16 sm:$0xc] %vm15_vm0, %v344_v28  }
  0xba   :  { %1749 = vst.msk [vmem:[%s4517_s1 + $0x183] ss:$16 sm:$0x30] %vm15_vm0, %v344_v28  }
  0xbb   :  { %1750 = vst.msk [vmem:[%s4517_s1 + $0x183] ss:$16 sm:$0xc0] %vm15_vm0, %v344_v28  }
  0xbc   :  { %1743 = vst.msk [vmem:[%s4517_s1 + $0x103] ss:$16 sm:$0x3] %vm15_vm0, %v331_v29  }
  0xbd   :  { %1744 = vst.msk [vmem:[%s4517_s1 + $0x103] ss:$16 sm:$0xc] %vm15_vm0, %v331_v29   ;;  %1000 = vrot.lane.b32.xlu1 %v2242_v7, %s2202_s2  ;;  %987 = vrot.lane.b32.xlu0 %v2235_v5, %s2202_s2 }
  0xbe   :  { %1745 = vst.msk [vmem:[%s4517_s1 + $0x103] ss:$16 sm:$0x30] %vm15_vm0, %v331_v29   ;;  %1013 = vrot.lane.b32.xlu2 %v2240_v6, %s2202_s2 }
  0xbf   :  { %1746 = vst.msk [vmem:[%s4517_s1 + $0x103] ss:$16 sm:$0xc0] %vm15_vm0, %v331_v29   ;;  %v460_v36 = vpop.permute.xlu1 %459   ;;  %v447_v37 = vpop.permute.xlu0 %446  }
  0xc0   :  { %1763 = vst.msk [vmem:[%s4517_s1 + $0x383] ss:$16 sm:$0x3] %vm15_vm0, %v396_v27   ;;  %v589_v44 = vpop.permute.xlu2 %588  }
  0xc1   :  { %1764 = vst.msk [vmem:[%s4517_s1 + $0x383] ss:$16 sm:$0xc] %vm15_vm0, %v396_v27  }
  0xc2   :  { %1765 = vst.msk [vmem:[%s4517_s1 + $0x383] ss:$16 sm:$0x30] %vm15_vm0, %v396_v27  }
  0xc3   :  { %1766 = vst.msk [vmem:[%s4517_s1 + $0x383] ss:$16 sm:$0xc0] %vm15_vm0, %v396_v27  }
  0xc4   :  { %1759 = vst.msk [vmem:[%s4517_s1 + $0x303] ss:$16 sm:$0x3] %vm15_vm0, %v383_v31  }
  0xc5   :  { %1760 = vst.msk [vmem:[%s4517_s1 + $0x303] ss:$16 sm:$0xc] %vm15_vm0, %v383_v31   ;;  %1038 = vrot.lane.b32.xlu1 %v2233_v4, %s2203_s20  ;;  %1025 = vrot.lane.b32.xlu0 %v2224_v1, %s2203_s20 }
  0xc6   :  { %1761 = vst.msk [vmem:[%s4517_s1 + $0x303] ss:$16 sm:$0x30] %vm15_vm0, %v383_v31   ;;  %1051 = vrot.lane.b32.xlu2 %v2222_v0, %s2203_s20 }
  0xc7   :  { %1762 = vst.msk [vmem:[%s4517_s1 + $0x303] ss:$16 sm:$0xc0] %vm15_vm0, %v383_v31   ;;  %v499_v39 = vpop.permute.xlu1 %498   ;;  %v486_v40 = vpop.permute.xlu0 %485  }
  0xc8   :  { %1755 = vst.msk [vmem:[%s4517_s1 + $0x283] ss:$16 sm:$0x3] %vm15_vm0, %v370_v32   ;;  %v627_v47 = vpop.permute.xlu2 %626  }
  0xc9   :  { %1756 = vst.msk [vmem:[%s4517_s1 + $0x283] ss:$16 sm:$0xc] %vm15_vm0, %v370_v32  }
  0xca   :  { %1757 = vst.msk [vmem:[%s4517_s1 + $0x283] ss:$16 sm:$0x30] %vm15_vm0, %v370_v32  }
  0xcb   :  { %1758 = vst.msk [vmem:[%s4517_s1 + $0x283] ss:$16 sm:$0xc0] %vm15_vm0, %v370_v32  }
  0xcc   :  { %1775 = vst.msk [vmem:[%s4517_s1 + $0x104] ss:$16 sm:$0x3] %vm15_vm0, %v434_v30  }
  0xcd   :  { %1776 = vst.msk [vmem:[%s4517_s1 + $0x104] ss:$16 sm:$0xc] %vm15_vm0, %v434_v30   ;;  %1077 = vrot.lane.b32.xlu1 %v2228_v2, %s2203_s20  ;;  %1064 = vrot.lane.b32.xlu0 %v2231_v3, %s2203_s20 }
  0xce   :  { %1777 = vst.msk [vmem:[%s4517_s1 + $0x104] ss:$16 sm:$0x30] %vm15_vm0, %v434_v30   ;;  %1090 = vrot.lane.b32.xlu2 %v2235_v5, %s2203_s20 }
  0xcf   :  { %1778 = vst.msk [vmem:[%s4517_s1 + $0x104] ss:$16 sm:$0xc0] %vm15_vm0, %v434_v30   ;;  %v537_v42 = vpop.permute.xlu1 %536   ;;  %v524_v43 = vpop.permute.xlu0 %523  }
  0xd0   :  { %1771 = vst.msk [vmem:[%s4517_s1 + $0x84] ss:$16 sm:$0x3] %vm15_vm0, %v421_v33   ;;  %v666_v50 = vpop.permute.xlu2 %665  }
  0xd1   :  { %1772 = vst.msk [vmem:[%s4517_s1 + $0x84] ss:$16 sm:$0xc] %vm15_vm0, %v421_v33  }
  0xd2   :  { %1773 = vst.msk [vmem:[%s4517_s1 + $0x84] ss:$16 sm:$0x30] %vm15_vm0, %v421_v33  }
  0xd3   :  { %1774 = vst.msk [vmem:[%s4517_s1 + $0x84] ss:$16 sm:$0xc0] %vm15_vm0, %v421_v33  }
  0xd4   :  { %1767 = vst.msk [vmem:[%s4517_s1 + $0x4] ss:$16 sm:$0x3] %vm15_vm0, %v408_v34  }
  0xd5   :  { %1768 = vst.msk [vmem:[%s4517_s1 + $0x4] ss:$16 sm:$0xc] %vm15_vm0, %v408_v34   ;;  %1116 = vrot.lane.b32.xlu1 %v2240_v6, %s2203_s20  ;;  %1103 = vrot.lane.b32.xlu0 %v2242_v7, %s2203_s20 }
  0xd6   :  { %1769 = vst.msk [vmem:[%s4517_s1 + $0x4] ss:$16 sm:$0x30] %vm15_vm0, %v408_v34   ;;  %1128 = vrot.lane.b32.xlu2 %v2224_v1, %s2204_s27 }
  0xd7   :  { %1770 = vst.msk [vmem:[%s4517_s1 + $0x4] ss:$16 sm:$0xc0] %vm15_vm0, %v408_v34   ;;  %v576_v45 = vpop.permute.xlu1 %575   ;;  %v563_v46 = vpop.permute.xlu0 %562  }
  0xd8   :  { %1787 = vst.msk [vmem:[%s4517_s1 + $0x284] ss:$16 sm:$0x3] %vm15_vm0, %v473_v35   ;;  %v705_v53 = vpop.permute.xlu2 %704  }
  0xd9   :  { %1788 = vst.msk [vmem:[%s4517_s1 + $0x284] ss:$16 sm:$0xc] %vm15_vm0, %v473_v35  }
  0xda   :  { %1789 = vst.msk [vmem:[%s4517_s1 + $0x284] ss:$16 sm:$0x30] %vm15_vm0, %v473_v35  }
  0xdb   :  { %1790 = vst.msk [vmem:[%s4517_s1 + $0x284] ss:$16 sm:$0xc0] %vm15_vm0, %v473_v35  }
  0xdc   :  { %1783 = vst.msk [vmem:[%s4517_s1 + $0x204] ss:$16 sm:$0x3] %vm15_vm0, %v460_v36  }
  0xdd   :  { %1784 = vst.msk [vmem:[%s4517_s1 + $0x204] ss:$16 sm:$0xc] %vm15_vm0, %v460_v36   ;;  %1154 = vrot.lane.b32.xlu1 %v2222_v0, %s2204_s27  ;;  %1141 = vrot.lane.b32.xlu0 %v2233_v4, %s2204_s27 }
  0xde   :  { %1785 = vst.msk [vmem:[%s4517_s1 + $0x204] ss:$16 sm:$0x30] %vm15_vm0, %v460_v36   ;;  %1167 = vrot.lane.b32.xlu2 %v2231_v3, %s2204_s27 }
  0xdf   :  { %1786 = vst.msk [vmem:[%s4517_s1 + $0x204] ss:$16 sm:$0xc0] %vm15_vm0, %v460_v36   ;;  %v614_v48 = vpop.permute.xlu1 %613   ;;  %v602_v49 = vpop.permute.xlu0 %601  }
  0xe0   :  { %1779 = vst.msk [vmem:[%s4517_s1 + $0x184] ss:$16 sm:$0x3] %vm15_vm0, %v447_v37   ;;  %v743_v56 = vpop.permute.xlu2 %742  }
  0xe1   :  { %1780 = vst.msk [vmem:[%s4517_s1 + $0x184] ss:$16 sm:$0xc] %vm15_vm0, %v447_v37  }
  0xe2   :  { %1781 = vst.msk [vmem:[%s4517_s1 + $0x184] ss:$16 sm:$0x30] %vm15_vm0, %v447_v37  }
  0xe3   :  { %1782 = vst.msk [vmem:[%s4517_s1 + $0x184] ss:$16 sm:$0xc0] %vm15_vm0, %v447_v37  }
  0xe4   :  { %1799 = vst.msk [vmem:[%s4517_s1 + $0x5] ss:$16 sm:$0x3] %vm15_vm0, %v511_v38  }
  0xe5   :  { %1800 = vst.msk [vmem:[%s4517_s1 + $0x5] ss:$16 sm:$0xc] %vm15_vm0, %v511_v38   ;;  %1193 = vrot.lane.b32.xlu1 %v2235_v5, %s2204_s27  ;;  %1180 = vrot.lane.b32.xlu0 %v2228_v2, %s2204_s27 }
  0xe6   :  { %1801 = vst.msk [vmem:[%s4517_s1 + $0x5] ss:$16 sm:$0x30] %vm15_vm0, %v511_v38   ;;  %1206 = vrot.lane.b32.xlu2 %v2242_v7, %s2204_s27 }
  0xe7   :  { %1802 = vst.msk [vmem:[%s4517_s1 + $0x5] ss:$16 sm:$0xc0] %vm15_vm0, %v511_v38   ;;  %v653_v51 = vpop.permute.xlu1 %652   ;;  %v640_v52 = vpop.permute.xlu0 %639  }
  0xe8   :  { %1795 = vst.msk [vmem:[%s4517_s1 + $0x384] ss:$16 sm:$0x3] %vm15_vm0, %v499_v39   ;;  %v782_v59 = vpop.permute.xlu2 %781  }
  0xe9   :  { %1796 = vst.msk [vmem:[%s4517_s1 + $0x384] ss:$16 sm:$0xc] %vm15_vm0, %v499_v39  }
  0xea   :  { %1797 = vst.msk [vmem:[%s4517_s1 + $0x384] ss:$16 sm:$0x30] %vm15_vm0, %v499_v39  }
  0xeb   :  { %1798 = vst.msk [vmem:[%s4517_s1 + $0x384] ss:$16 sm:$0xc0] %vm15_vm0, %v499_v39  }
  0xec   :  { %1791 = vst.msk [vmem:[%s4517_s1 + $0x304] ss:$16 sm:$0x3] %vm15_vm0, %v486_v40  }
  0xed   :  { %1792 = vst.msk [vmem:[%s4517_s1 + $0x304] ss:$16 sm:$0xc] %vm15_vm0, %v486_v40   ;;  %1231 = vrot.lane.b32.xlu1 %v2224_v1, %s2205_s12  ;;  %1219 = vrot.lane.b32.xlu0 %v2240_v6, %s2204_s27 }
  0xee   :  { %1793 = vst.msk [vmem:[%s4517_s1 + $0x304] ss:$16 sm:$0x30] %vm15_vm0, %v486_v40   ;;  %1244 = vrot.lane.b32.xlu2 %v2233_v4, %s2205_s12 }
  0xef   :  { %1794 = vst.msk [vmem:[%s4517_s1 + $0x304] ss:$16 sm:$0xc0] %vm15_vm0, %v486_v40   ;;  %v692_v54 = vpop.permute.xlu1 %691   ;;  %v679_v55 = vpop.permute.xlu0 %678  }
  0xf0   :  { %1811 = vst.msk [vmem:[%s4517_s1 + $0x185] ss:$16 sm:$0x3] %vm15_vm0, %v550_v41   ;;  %v820_v62 = vpop.permute.xlu2 %819  }
  0xf1   :  { %1812 = vst.msk [vmem:[%s4517_s1 + $0x185] ss:$16 sm:$0xc] %vm15_vm0, %v550_v41  }
  0xf2   :  { %1813 = vst.msk [vmem:[%s4517_s1 + $0x185] ss:$16 sm:$0x30] %vm15_vm0, %v550_v41  }
  0xf3   :  { %1814 = vst.msk [vmem:[%s4517_s1 + $0x185] ss:$16 sm:$0xc0] %vm15_vm0, %v550_v41  }
  0xf4   :  { %1807 = vst.msk [vmem:[%s4517_s1 + $0x105] ss:$16 sm:$0x3] %vm15_vm0, %v537_v42  }
  0xf5   :  { %1808 = vst.msk [vmem:[%s4517_s1 + $0x105] ss:$16 sm:$0xc] %vm15_vm0, %v537_v42   ;;  %1270 = vrot.lane.b32.xlu1 %v2231_v3, %s2205_s12  ;;  %1257 = vrot.lane.b32.xlu0 %v2222_v0, %s2205_s12 }
  0xf6   :  { %1809 = vst.msk [vmem:[%s4517_s1 + $0x105] ss:$16 sm:$0x30] %vm15_vm0, %v537_v42   ;;  %1283 = vrot.lane.b32.xlu2 %v2228_v2, %s2205_s12 }
  0xf7   :  { %1810 = vst.msk [vmem:[%s4517_s1 + $0x105] ss:$16 sm:$0xc0] %vm15_vm0, %v537_v42   ;;  %v730_v57 = vpop.permute.xlu1 %729   ;;  %v717_v58 = vpop.permute.xlu0 %716  }
  0xf8   :  { %1803 = vst.msk [vmem:[%s4517_s1 + $0x85] ss:$16 sm:$0x3] %vm15_vm0, %v524_v43  }
  0xf9   :  { %1804 = vst.msk [vmem:[%s4517_s1 + $0x85] ss:$16 sm:$0xc] %vm15_vm0, %v524_v43  }
  0xfa   :  { %1805 = vst.msk [vmem:[%s4517_s1 + $0x85] ss:$16 sm:$0x30] %vm15_vm0, %v524_v43  }
  0xfb   :  { %1806 = vst.msk [vmem:[%s4517_s1 + $0x85] ss:$16 sm:$0xc0] %vm15_vm0, %v524_v43  }
  0xfc   :  { %1823 = vst.msk [vmem:[%s4517_s1 + $0x305] ss:$16 sm:$0x3] %vm15_vm0, %v589_v44  }
  0xfd   :  { %1824 = vst.msk [vmem:[%s4517_s1 + $0x305] ss:$16 sm:$0xc] %vm15_vm0, %v589_v44   ;;  %1309 = vrot.lane.b32.xlu1 %v2242_v7, %s2205_s12  ;;  %1296 = vrot.lane.b32.xlu0 %v2235_v5, %s2205_s12 }
  0xfe   :  { %1825 = vst.msk [vmem:[%s4517_s1 + $0x305] ss:$16 sm:$0x30] %vm15_vm0, %v589_v44   ;;  %1322 = vrot.lane.b32.xlu2 %v2240_v6, %s2205_s12 }
  0xff   :  { %1826 = vst.msk [vmem:[%s4517_s1 + $0x305] ss:$16 sm:$0xc0] %vm15_vm0, %v589_v44   ;;  %v769_v60 = vpop.permute.xlu1 %768   ;;  %v756_v61 = vpop.permute.xlu0 %755  }
 0x100   :  { %1819 = vst.msk [vmem:[%s4517_s1 + $0x285] ss:$16 sm:$0x3] %vm15_vm0, %v576_v45  }
 0x101   :  { %1820 = vst.msk [vmem:[%s4517_s1 + $0x285] ss:$16 sm:$0xc] %vm15_vm0, %v576_v45  }
 0x102   :  { %1821 = vst.msk [vmem:[%s4517_s1 + $0x285] ss:$16 sm:$0x30] %vm15_vm0, %v576_v45  }
 0x103   :  { %1822 = vst.msk [vmem:[%s4517_s1 + $0x285] ss:$16 sm:$0xc0] %vm15_vm0, %v576_v45  }
 0x104   :  { %1815 = vst.msk [vmem:[%s4517_s1 + $0x205] ss:$16 sm:$0x3] %vm15_vm0, %v563_v46  }
 0x105   :  { %1816 = vst.msk [vmem:[%s4517_s1 + $0x205] ss:$16 sm:$0xc] %vm15_vm0, %v563_v46   ;;  %1347 = vrot.lane.b32.xlu1 %v2233_v4, %s2206_s3  ;;  %1334 = vrot.lane.b32.xlu0 %v2224_v1, %s2206_s3  ;;  %v859_v1 = vpop.permute.xlu2 %858  }
 0x106   :  { %1817 = vst.msk [vmem:[%s4517_s1 + $0x205] ss:$16 sm:$0x30] %vm15_vm0, %v563_v46  }
 0x107   :  { %1818 = vst.msk [vmem:[%s4517_s1 + $0x205] ss:$16 sm:$0xc0] %vm15_vm0, %v563_v46   ;;  %v808_v63 = vpop.permute.xlu1 %807   ;;  %v795_v0 = vpop.permute.xlu0 %794  }
 0x108   :  { %1835 = vst.msk [vmem:[%s4517_s1 + $0x86] ss:$16 sm:$0x3] %vm15_vm0, %v627_v47  }
 0x109   :  { %1836 = vst.msk [vmem:[%s4517_s1 + $0x86] ss:$16 sm:$0xc] %vm15_vm0, %v627_v47  }
 0x10a   :  { %1837 = vst.msk [vmem:[%s4517_s1 + $0x86] ss:$16 sm:$0x30] %vm15_vm0, %v627_v47  }
 0x10b   :  { %1838 = vst.msk [vmem:[%s4517_s1 + $0x86] ss:$16 sm:$0xc0] %vm15_vm0, %v627_v47  }
 0x10c   :  { %1831 = vst.msk [vmem:[%s4517_s1 + $0x6] ss:$16 sm:$0x3] %vm15_vm0, %v614_v48  }
 0x10d   :  { %1832 = vst.msk [vmem:[%s4517_s1 + $0x6] ss:$16 sm:$0xc] %vm15_vm0, %v614_v48   ;;  %1386 = vrot.lane.b32.xlu1 %v2228_v2, %s2206_s3  ;;  %1373 = vrot.lane.b32.xlu0 %v2231_v3, %s2206_s3  ;;  %v898_v4 = vpop.permute.xlu2 %897  }
 0x10e   :  { %1833 = vst.msk [vmem:[%s4517_s1 + $0x6] ss:$16 sm:$0x30] %vm15_vm0, %v614_v48  }
 0x10f   :  { %1834 = vst.msk [vmem:[%s4517_s1 + $0x6] ss:$16 sm:$0xc0] %vm15_vm0, %v614_v48   ;;  %v846_v2 = vpop.permute.xlu1 %845   ;;  %v833_v3 = vpop.permute.xlu0 %832  }
 0x110   :  { %1827 = vst.msk [vmem:[%s4517_s1 + $0x385] ss:$16 sm:$0x3] %vm15_vm0, %v602_v49  }
 0x111   :  { %1828 = vst.msk [vmem:[%s4517_s1 + $0x385] ss:$16 sm:$0xc] %vm15_vm0, %v602_v49  }
 0x112   :  { %1829 = vst.msk [vmem:[%s4517_s1 + $0x385] ss:$16 sm:$0x30] %vm15_vm0, %v602_v49  }
 0x113   :  { %1830 = vst.msk [vmem:[%s4517_s1 + $0x385] ss:$16 sm:$0xc0] %vm15_vm0, %v602_v49  }
 0x114   :  { %1847 = vst.msk [vmem:[%s4517_s1 + $0x206] ss:$16 sm:$0x3] %vm15_vm0, %v666_v50  }
 0x115   :  { %1848 = vst.msk [vmem:[%s4517_s1 + $0x206] ss:$16 sm:$0xc] %vm15_vm0, %v666_v50   ;;  %1425 = vrot.lane.b32.xlu1 %v2240_v6, %s2206_s3  ;;  %1412 = vrot.lane.b32.xlu0 %v2242_v7, %s2206_s3  ;;  %v3260_v7 = vld [vmem:[#allocation0 + $0x10] sm:$0xff]   ;;  %v936_v9 = vpop.permute.xlu2 %935  }
 0x116   :  { %1849 = vst.msk [vmem:[%s4517_s1 + $0x206] ss:$16 sm:$0x30] %vm15_vm0, %v666_v50   ;;  %1360 = vrot.lane.b32.xlu2 %v3260_v7, %s2206_s3 }
 0x117   :  { %1850 = vst.msk [vmem:[%s4517_s1 + $0x206] ss:$16 sm:$0xc0] %vm15_vm0, %v666_v50   ;;  %v885_v5 = vpop.permute.xlu1 %884   ;;  %v3238_v6 = vpop.permute.xlu0 %871  }
 0x118   :  { %1843 = vst.msk [vmem:[%s4517_s1 + $0x186] ss:$16 sm:$0x3] %vm15_vm0, %v653_v51  }
 0x119   :  { %1844 = vst.msk [vmem:[%s4517_s1 + $0x186] ss:$16 sm:$0xc] %vm15_vm0, %v653_v51  }
 0x11a   :  { %1845 = vst.msk [vmem:[%s4517_s1 + $0x186] ss:$16 sm:$0x30] %vm15_vm0, %v653_v51  }
 0x11b   :  { %1846 = vst.msk [vmem:[%s4517_s1 + $0x186] ss:$16 sm:$0xc0] %vm15_vm0, %v653_v51  }
 0x11c   :  { %1839 = vst.msk [vmem:[%s4517_s1 + $0x106] ss:$16 sm:$0x3] %vm15_vm0, %v640_v52  }
 0x11d   :  { %1840 = vst.msk [vmem:[%s4517_s1 + $0x106] ss:$16 sm:$0xc] %vm15_vm0, %v640_v52   ;;  %1463 = vrot.lane.b32.xlu1 %v3260_v7, %s2207_s21  ;;  %1450 = vrot.lane.b32.xlu0 %v3262_v8, %s2207_s21  ;;  %v975_v14 = vpop.permute.xlu2 %974  }
 0x11e   :  { %1841 = vst.msk [vmem:[%s4517_s1 + $0x106] ss:$16 sm:$0x30] %vm15_vm0, %v640_v52   ;;  %1399 = vrot.lane.b32.xlu2 %v3318_v12, %s2206_s3 }
 0x11f   :  { %1842 = vst.msk [vmem:[%s4517_s1 + $0x106] ss:$16 sm:$0xc0] %vm15_vm0, %v640_v52   ;;  %v923_v10 = vpop.permute.xlu1 %922   ;;  %v911_v11 = vpop.permute.xlu0 %910  }
 0x120   :  { %1859 = vst.msk [vmem:[%s4517_s1 + $0x386] ss:$16 sm:$0x3] %vm15_vm0, %v705_v53  }
 0x121   :  { %1860 = vst.msk [vmem:[%s4517_s1 + $0x386] ss:$16 sm:$0xc] %vm15_vm0, %v705_v53  }
 0x122   :  { %1861 = vst.msk [vmem:[%s4517_s1 + $0x386] ss:$16 sm:$0x30] %vm15_vm0, %v705_v53  }
 0x123   :  { %1862 = vst.msk [vmem:[%s4517_s1 + $0x386] ss:$16 sm:$0xc0] %vm15_vm0, %v705_v53  }
 0x124   :  { %1855 = vst.msk [vmem:[%s4517_s1 + $0x306] ss:$16 sm:$0x3] %vm15_vm0, %v692_v54  }
 0x125   :  { %1856 = vst.msk [vmem:[%s4517_s1 + $0x306] ss:$16 sm:$0xc] %vm15_vm0, %v692_v54   ;;  %1502 = vrot.lane.b32.xlu1 %v3318_v12, %s2207_s21  ;;  %1489 = vrot.lane.b32.xlu0 %v3320_v13, %s2207_s21  ;;  %v1014_v19 = vpop.permute.xlu2 %1013  }
 0x126   :  { %1857 = vst.msk [vmem:[%s4517_s1 + $0x306] ss:$16 sm:$0x30] %vm15_vm0, %v692_v54   ;;  %1437 = vrot.lane.b32.xlu2 %v3376_v17, %s2207_s21 }
 0x127   :  { %1858 = vst.msk [vmem:[%s4517_s1 + $0x306] ss:$16 sm:$0xc0] %vm15_vm0, %v692_v54   ;;  %v962_v15 = vpop.permute.xlu1 %961   ;;  %v949_v16 = vpop.permute.xlu0 %948  }
 0x128   :  { %1851 = vst.msk [vmem:[%s4517_s1 + $0x286] ss:$16 sm:$0x3] %vm15_vm0, %v679_v55  }
 0x129   :  { %1852 = vst.msk [vmem:[%s4517_s1 + $0x286] ss:$16 sm:$0xc] %vm15_vm0, %v679_v55  }
 0x12a   :  { %1853 = vst.msk [vmem:[%s4517_s1 + $0x286] ss:$16 sm:$0x30] %vm15_vm0, %v679_v55  }
 0x12b   :  { %1854 = vst.msk [vmem:[%s4517_s1 + $0x286] ss:$16 sm:$0xc0] %vm15_vm0, %v679_v55  }
 0x12c   :  { %1871 = vst.msk [vmem:[%s4517_s1 + $0x107] ss:$16 sm:$0x3] %vm15_vm0, %v743_v56  }
 0x12d   :  { %1872 = vst.msk [vmem:[%s4517_s1 + $0x107] ss:$16 sm:$0xc] %vm15_vm0, %v743_v56   ;;  %1540 = vrot.lane.b32.xlu1 %v3376_v17, %s2208_s8  ;;  %1528 = vrot.lane.b32.xlu0 %v3378_v18, %s2207_s21  ;;  %v1052_v23 = vpop.permute.xlu2 %1051  }
 0x12e   :  { %1873 = vst.msk [vmem:[%s4517_s1 + $0x107] ss:$16 sm:$0x30] %vm15_vm0, %v743_v56   ;;  %1476 = vrot.lane.b32.xlu2 %v3440_v22, %s2207_s21 }
 0x12f   :  { %1874 = vst.msk [vmem:[%s4517_s1 + $0x107] ss:$16 sm:$0xc0] %vm15_vm0, %v743_v56   ;;  %v1001_v20 = vpop.permute.xlu1 %1000   ;;  %v988_v21 = vpop.permute.xlu0 %987  }
 0x130   :  { %1867 = vst.msk [vmem:[%s4517_s1 + $0x87] ss:$16 sm:$0x3] %vm15_vm0, %v730_v57  }
 0x131   :  { %1868 = vst.msk [vmem:[%s4517_s1 + $0x87] ss:$16 sm:$0xc] %vm15_vm0, %v730_v57  }
 0x132   :  { %1869 = vst.msk [vmem:[%s4517_s1 + $0x87] ss:$16 sm:$0x30] %vm15_vm0, %v730_v57  }
 0x133   :  { %1870 = vst.msk [vmem:[%s4517_s1 + $0x87] ss:$16 sm:$0xc0] %vm15_vm0, %v730_v57  }
 0x134   :  { %1863 = vst.msk [vmem:[%s4517_s1 + $0x7] ss:$16 sm:$0x3] %vm15_vm0, %v717_v58  }
 0x135   :  { %1864 = vst.msk [vmem:[%s4517_s1 + $0x7] ss:$16 sm:$0xc] %vm15_vm0, %v717_v58   ;;  %1566 = vrot.lane.b32.xlu0 %v3260_v7, %s2208_s8  ;;  %1579 = vrot.lane.b32.xlu1 %v3440_v22, %s2208_s8  ;;  %v1091_v27 = vpop.permute.xlu2 %1090  }
 0x136   :  { %1865 = vst.msk [vmem:[%s4517_s1 + $0x7] ss:$16 sm:$0x30] %vm15_vm0, %v717_v58   ;;  %1515 = vrot.lane.b32.xlu2 %v3496_v26, %s2207_s21 }
 0x137   :  { %1866 = vst.msk [vmem:[%s4517_s1 + $0x7] ss:$16 sm:$0xc0] %vm15_vm0, %v717_v58   ;;  %v1039_v24 = vpop.permute.xlu1 %1038   ;;  %v1026_v25 = vpop.permute.xlu0 %1025  }
 0x138   :  { %1883 = vst.msk [vmem:[%s4517_s1 + $0x287] ss:$16 sm:$0x3] %vm15_vm0, %v782_v59  }
 0x139   :  { %1884 = vst.msk [vmem:[%s4517_s1 + $0x287] ss:$16 sm:$0xc] %vm15_vm0, %v782_v59  }
 0x13a   :  { %1885 = vst.msk [vmem:[%s4517_s1 + $0x287] ss:$16 sm:$0x30] %vm15_vm0, %v782_v59  }
 0x13b   :  { %1886 = vst.msk [vmem:[%s4517_s1 + $0x287] ss:$16 sm:$0xc0] %vm15_vm0, %v782_v59  }
 0x13c   :  { %1879 = vst.msk [vmem:[%s4517_s1 + $0x207] ss:$16 sm:$0x3] %vm15_vm0, %v769_v60  }
 0x13d   :  { %1880 = vst.msk [vmem:[%s4517_s1 + $0x207] ss:$16 sm:$0xc] %vm15_vm0, %v769_v60   ;;  %1605 = vrot.lane.b32.xlu0 %v3318_v12, %s2208_s8  ;;  %1618 = vrot.lane.b32.xlu1 %v3496_v26, %s2208_s8  ;;  %v1129_v30 = vpop.permute.xlu2 %1128  }
 0x13e   :  { %1881 = vst.msk [vmem:[%s4517_s1 + $0x207] ss:$16 sm:$0x30] %vm15_vm0, %v769_v60   ;;  %1553 = vrot.lane.b32.xlu2 %v3262_v8, %s2208_s8 }
 0x13f   :  { %1882 = vst.msk [vmem:[%s4517_s1 + $0x207] ss:$16 sm:$0xc0] %vm15_vm0, %v769_v60   ;;  %v1078_v28 = vpop.permute.xlu1 %1077   ;;  %v1065_v29 = vpop.permute.xlu0 %1064  }
 0x140   :  { %1875 = vst.msk [vmem:[%s4517_s1 + $0x187] ss:$16 sm:$0x3] %vm15_vm0, %v756_v61  }
 0x141   :  { %1876 = vst.msk [vmem:[%s4517_s1 + $0x187] ss:$16 sm:$0xc] %vm15_vm0, %v756_v61  }
 0x142   :  { %1877 = vst.msk [vmem:[%s4517_s1 + $0x187] ss:$16 sm:$0x30] %vm15_vm0, %v756_v61  }
 0x143   :  { %1878 = vst.msk [vmem:[%s4517_s1 + $0x187] ss:$16 sm:$0xc0] %vm15_vm0, %v756_v61  }
 0x144   :  { %1895 = vst.msk [vmem:[%s4517_s1 + $0x8] ss:$16 sm:$0x3] %vm15_vm0, %v820_v62  }
 0x145   :  { %1896 = vst.msk [vmem:[%s4517_s1 + $0x8] ss:$16 sm:$0xc] %vm15_vm0, %v820_v62   ;;  %v1168_v33 = vpop.permute.xlu2 %1167  }
 0x146   :  { %1897 = vst.msk [vmem:[%s4517_s1 + $0x8] ss:$16 sm:$0x30] %vm15_vm0, %v820_v62   ;;  %1592 = vrot.lane.b32.xlu2 %v3320_v13, %s2208_s8 }
 0x147   :  { %1898 = vst.msk [vmem:[%s4517_s1 + $0x8] ss:$16 sm:$0xc0] %vm15_vm0, %v820_v62   ;;  %v1117_v31 = vpop.permute.xlu1 %1116   ;;  %v1104_v32 = vpop.permute.xlu0 %1103  }
 0x148   :  { %1891 = vst.msk [vmem:[%s4517_s1 + $0x387] ss:$16 sm:$0x3] %vm15_vm0, %v808_v63  }
 0x149   :  { %1892 = vst.msk [vmem:[%s4517_s1 + $0x387] ss:$16 sm:$0xc] %vm15_vm0, %v808_v63  }
 0x14a   :  { %1893 = vst.msk [vmem:[%s4517_s1 + $0x387] ss:$16 sm:$0x30] %vm15_vm0, %v808_v63  }
 0x14b   :  { %1894 = vst.msk [vmem:[%s4517_s1 + $0x387] ss:$16 sm:$0xc0] %vm15_vm0, %v808_v63  }
 0x14c   :  { %1887 = vst.msk [vmem:[%s4517_s1 + $0x307] ss:$16 sm:$0x3] %vm15_vm0, %v795_v0  }
 0x14d   :  { %1888 = vst.msk [vmem:[%s4517_s1 + $0x307] ss:$16 sm:$0xc] %vm15_vm0, %v795_v0   ;;  %v1207_v36 = vpop.permute.xlu2 %1206  }
 0x14e   :  { %1889 = vst.msk [vmem:[%s4517_s1 + $0x307] ss:$16 sm:$0x30] %vm15_vm0, %v795_v0   ;;  %1631 = vrot.lane.b32.xlu2 %v3378_v18, %s2208_s8 }
 0x14f   :  { %1890 = vst.msk [vmem:[%s4517_s1 + $0x307] ss:$16 sm:$0xc0] %vm15_vm0, %v795_v0   ;;  %v1155_v34 = vpop.permute.xlu1 %1154   ;;  %v1142_v35 = vpop.permute.xlu0 %1141  }
 0x150   :  { %1907 = vst.msk [vmem:[%s4517_s1 + $0x188] ss:$16 sm:$0x3] %vm15_vm0, %v859_v1  }
 0x151   :  { %1908 = vst.msk [vmem:[%s4517_s1 + $0x188] ss:$16 sm:$0xc] %vm15_vm0, %v859_v1  }
 0x152   :  { %1909 = vst.msk [vmem:[%s4517_s1 + $0x188] ss:$16 sm:$0x30] %vm15_vm0, %v859_v1  }
 0x153   :  { %1910 = vst.msk [vmem:[%s4517_s1 + $0x188] ss:$16 sm:$0xc0] %vm15_vm0, %v859_v1  }
 0x154   :  { %1903 = vst.msk [vmem:[%s4517_s1 + $0x108] ss:$16 sm:$0x3] %vm15_vm0, %v846_v2  }
 0x155   :  { %1904 = vst.msk [vmem:[%s4517_s1 + $0x108] ss:$16 sm:$0xc] %vm15_vm0, %v846_v2   ;;  %v1245_v39 = vpop.permute.xlu2 %1244  }
 0x156   :  { %1905 = vst.msk [vmem:[%s4517_s1 + $0x108] ss:$16 sm:$0x30] %vm15_vm0, %v846_v2  }
 0x157   :  { %1906 = vst.msk [vmem:[%s4517_s1 + $0x108] ss:$16 sm:$0xc0] %vm15_vm0, %v846_v2   ;;  %v1194_v37 = vpop.permute.xlu1 %1193   ;;  %v1181_v38 = vpop.permute.xlu0 %1180  }
 0x158   :  { %1899 = vst.msk [vmem:[%s4517_s1 + $0x88] ss:$16 sm:$0x3] %vm15_vm0, %v833_v3  }
 0x159   :  { %1900 = vst.msk [vmem:[%s4517_s1 + $0x88] ss:$16 sm:$0xc] %vm15_vm0, %v833_v3  }
 0x15a   :  { %1901 = vst.msk [vmem:[%s4517_s1 + $0x88] ss:$16 sm:$0x30] %vm15_vm0, %v833_v3  }
 0x15b   :  { %1902 = vst.msk [vmem:[%s4517_s1 + $0x88] ss:$16 sm:$0xc0] %vm15_vm0, %v833_v3  }
 0x15c   :  { %1919 = vst.msk [vmem:[%s4517_s1 + $0x308] ss:$16 sm:$0x3] %vm15_vm0, %v898_v4  }
 0x15d   :  { %1920 = vst.msk [vmem:[%s4517_s1 + $0x308] ss:$16 sm:$0xc] %vm15_vm0, %v898_v4   ;;  %v1284_v42 = vpop.permute.xlu2 %1283  }
 0x15e   :  { %1921 = vst.msk [vmem:[%s4517_s1 + $0x308] ss:$16 sm:$0x30] %vm15_vm0, %v898_v4  }
 0x15f   :  { %1922 = vst.msk [vmem:[%s4517_s1 + $0x308] ss:$16 sm:$0xc0] %vm15_vm0, %v898_v4   ;;  %v1232_v40 = vpop.permute.xlu1 %1231   ;;  %v1220_v41 = vpop.permute.xlu0 %1219  }
 0x160   :  { %1915 = vst.msk [vmem:[%s4517_s1 + $0x288] ss:$16 sm:$0x3] %vm15_vm0, %v885_v5  }
 0x161   :  { %1916 = vst.msk [vmem:[%s4517_s1 + $0x288] ss:$16 sm:$0xc] %vm15_vm0, %v885_v5  }
 0x162   :  { %1917 = vst.msk [vmem:[%s4517_s1 + $0x288] ss:$16 sm:$0x30] %vm15_vm0, %v885_v5  }
 0x163   :  { %1918 = vst.msk [vmem:[%s4517_s1 + $0x288] ss:$16 sm:$0xc0] %vm15_vm0, %v885_v5  }
 0x164   :  { %1911 = vst.msk [vmem:[%s4517_s1 + $0x208] ss:$16 sm:$0x3] %vm15_vm0, %v3238_v6  }
 0x165   :  { %1912 = vst.msk [vmem:[%s4517_s1 + $0x208] ss:$16 sm:$0xc] %vm15_vm0, %v3238_v6   ;;  %v1323_v45 = vpop.permute.xlu2 %1322  }
 0x166   :  { %1913 = vst.msk [vmem:[%s4517_s1 + $0x208] ss:$16 sm:$0x30] %vm15_vm0, %v3238_v6  }
 0x167   :  { %1914 = vst.msk [vmem:[%s4517_s1 + $0x208] ss:$16 sm:$0xc0] %vm15_vm0, %v3238_v6   ;;  %v1271_v43 = vpop.permute.xlu1 %1270   ;;  %v1258_v44 = vpop.permute.xlu0 %1257  }
 0x168   :  { %1931 = vst.msk [vmem:[%s4517_s1 + $0x89] ss:$16 sm:$0x3] %vm15_vm0, %v936_v9  }
 0x169   :  { %1932 = vst.msk [vmem:[%s4517_s1 + $0x89] ss:$16 sm:$0xc] %vm15_vm0, %v936_v9  }
 0x16a   :  { %1933 = vst.msk [vmem:[%s4517_s1 + $0x89] ss:$16 sm:$0x30] %vm15_vm0, %v936_v9  }
 0x16b   :  { %1934 = vst.msk [vmem:[%s4517_s1 + $0x89] ss:$16 sm:$0xc0] %vm15_vm0, %v936_v9  }
 0x16c   :  { %1927 = vst.msk [vmem:[%s4517_s1 + $0x9] ss:$16 sm:$0x3] %vm15_vm0, %v923_v10  }
 0x16d   :  { %1928 = vst.msk [vmem:[%s4517_s1 + $0x9] ss:$16 sm:$0xc] %vm15_vm0, %v923_v10  }
 0x16e   :  { %1929 = vst.msk [vmem:[%s4517_s1 + $0x9] ss:$16 sm:$0x30] %vm15_vm0, %v923_v10  }
 0x16f   :  { %1930 = vst.msk [vmem:[%s4517_s1 + $0x9] ss:$16 sm:$0xc0] %vm15_vm0, %v923_v10   ;;  %v1310_v46 = vpop.permute.xlu1 %1309   ;;  %v1297_v47 = vpop.permute.xlu0 %1296  }
 0x170   :  { %1923 = vst.msk [vmem:[%s4517_s1 + $0x388] ss:$16 sm:$0x3] %vm15_vm0, %v911_v11   ;;  %v1361_v48 = vpop.permute.xlu2 %1360  }
 0x171   :  { %1924 = vst.msk [vmem:[%s4517_s1 + $0x388] ss:$16 sm:$0xc] %vm15_vm0, %v911_v11  }
 0x172   :  { %1925 = vst.msk [vmem:[%s4517_s1 + $0x388] ss:$16 sm:$0x30] %vm15_vm0, %v911_v11  }
 0x173   :  { %1926 = vst.msk [vmem:[%s4517_s1 + $0x388] ss:$16 sm:$0xc0] %vm15_vm0, %v911_v11  }
 0x174   :  { %1943 = vst.msk [vmem:[%s4517_s1 + $0x209] ss:$16 sm:$0x3] %vm15_vm0, %v975_v14  }
 0x175   :  { %1944 = vst.msk [vmem:[%s4517_s1 + $0x209] ss:$16 sm:$0xc] %vm15_vm0, %v975_v14  }
 0x176   :  { %1945 = vst.msk [vmem:[%s4517_s1 + $0x209] ss:$16 sm:$0x30] %vm15_vm0, %v975_v14  }
 0x177   :  { %1946 = vst.msk [vmem:[%s4517_s1 + $0x209] ss:$16 sm:$0xc0] %vm15_vm0, %v975_v14   ;;  %v1348_v49 = vpop.permute.xlu1 %1347   ;;  %v1335_v50 = vpop.permute.xlu0 %1334  }
 0x178   :  { %1939 = vst.msk [vmem:[%s4517_s1 + $0x189] ss:$16 sm:$0x3] %vm15_vm0, %v962_v15   ;;  %v1400_v51 = vpop.permute.xlu2 %1399  }
 0x179   :  { %1940 = vst.msk [vmem:[%s4517_s1 + $0x189] ss:$16 sm:$0xc] %vm15_vm0, %v962_v15  }
 0x17a   :  { %1941 = vst.msk [vmem:[%s4517_s1 + $0x189] ss:$16 sm:$0x30] %vm15_vm0, %v962_v15  }
 0x17b   :  { %1942 = vst.msk [vmem:[%s4517_s1 + $0x189] ss:$16 sm:$0xc0] %vm15_vm0, %v962_v15  }
 0x17c   :  { %1935 = vst.msk [vmem:[%s4517_s1 + $0x109] ss:$16 sm:$0x3] %vm15_vm0, %v949_v16  }
 0x17d   :  { %1936 = vst.msk [vmem:[%s4517_s1 + $0x109] ss:$16 sm:$0xc] %vm15_vm0, %v949_v16  }
 0x17e   :  { %1937 = vst.msk [vmem:[%s4517_s1 + $0x109] ss:$16 sm:$0x30] %vm15_vm0, %v949_v16  }
 0x17f   :  { %1938 = vst.msk [vmem:[%s4517_s1 + $0x109] ss:$16 sm:$0xc0] %vm15_vm0, %v949_v16   ;;  %v1387_v52 = vpop.permute.xlu1 %1386   ;;  %v1374_v53 = vpop.permute.xlu0 %1373  }
 0x180   :  { %1955 = vst.msk [vmem:[%s4517_s1 + $0x389] ss:$16 sm:$0x3] %vm15_vm0, %v1014_v19   ;;  %v1438_v54 = vpop.permute.xlu2 %1437  }
 0x181   :  { %1956 = vst.msk [vmem:[%s4517_s1 + $0x389] ss:$16 sm:$0xc] %vm15_vm0, %v1014_v19  }
 0x182   :  { %1957 = vst.msk [vmem:[%s4517_s1 + $0x389] ss:$16 sm:$0x30] %vm15_vm0, %v1014_v19  }
 0x183   :  { %1958 = vst.msk [vmem:[%s4517_s1 + $0x389] ss:$16 sm:$0xc0] %vm15_vm0, %v1014_v19  }
 0x184   :  { %1951 = vst.msk [vmem:[%s4517_s1 + $0x309] ss:$16 sm:$0x3] %vm15_vm0, %v1001_v20  }
 0x185   :  { %1952 = vst.msk [vmem:[%s4517_s1 + $0x309] ss:$16 sm:$0xc] %vm15_vm0, %v1001_v20  }
 0x186   :  { %1953 = vst.msk [vmem:[%s4517_s1 + $0x309] ss:$16 sm:$0x30] %vm15_vm0, %v1001_v20  }
 0x187   :  { %1954 = vst.msk [vmem:[%s4517_s1 + $0x309] ss:$16 sm:$0xc0] %vm15_vm0, %v1001_v20   ;;  %v1426_v55 = vpop.permute.xlu1 %1425   ;;  %v1413_v56 = vpop.permute.xlu0 %1412  }
 0x188   :  { %1947 = vst.msk [vmem:[%s4517_s1 + $0x289] ss:$16 sm:$0x3] %vm15_vm0, %v988_v21   ;;  %v1477_v57 = vpop.permute.xlu2 %1476  }
 0x189   :  { %1948 = vst.msk [vmem:[%s4517_s1 + $0x289] ss:$16 sm:$0xc] %vm15_vm0, %v988_v21  }
 0x18a   :  { %1949 = vst.msk [vmem:[%s4517_s1 + $0x289] ss:$16 sm:$0x30] %vm15_vm0, %v988_v21  }
 0x18b   :  { %1950 = vst.msk [vmem:[%s4517_s1 + $0x289] ss:$16 sm:$0xc0] %vm15_vm0, %v988_v21  }
 0x18c   :  { %1967 = vst.msk [vmem:[%s4517_s1 + $0x10a] ss:$16 sm:$0x3] %vm15_vm0, %v1052_v23  }
 0x18d   :  { %1968 = vst.msk [vmem:[%s4517_s1 + $0x10a] ss:$16 sm:$0xc] %vm15_vm0, %v1052_v23  }
 0x18e   :  { %1969 = vst.msk [vmem:[%s4517_s1 + $0x10a] ss:$16 sm:$0x30] %vm15_vm0, %v1052_v23  }
 0x18f   :  { %1970 = vst.msk [vmem:[%s4517_s1 + $0x10a] ss:$16 sm:$0xc0] %vm15_vm0, %v1052_v23   ;;  %v1464_v58 = vpop.permute.xlu1 %1463   ;;  %v1451_v59 = vpop.permute.xlu0 %1450  }
 0x190   :  { %1963 = vst.msk [vmem:[%s4517_s1 + $0x8a] ss:$16 sm:$0x3] %vm15_vm0, %v1039_v24   ;;  %v1516_v60 = vpop.permute.xlu2 %1515  }
 0x191   :  { %1964 = vst.msk [vmem:[%s4517_s1 + $0x8a] ss:$16 sm:$0xc] %vm15_vm0, %v1039_v24  }
 0x192   :  { %1965 = vst.msk [vmem:[%s4517_s1 + $0x8a] ss:$16 sm:$0x30] %vm15_vm0, %v1039_v24  }
 0x193   :  { %1966 = vst.msk [vmem:[%s4517_s1 + $0x8a] ss:$16 sm:$0xc0] %vm15_vm0, %v1039_v24  }
 0x194   :  { %1959 = vst.msk [vmem:[%s4517_s1 + $0xa] ss:$16 sm:$0x3] %vm15_vm0, %v1026_v25  }
 0x195   :  { %1960 = vst.msk [vmem:[%s4517_s1 + $0xa] ss:$16 sm:$0xc] %vm15_vm0, %v1026_v25  }
 0x196   :  { %1961 = vst.msk [vmem:[%s4517_s1 + $0xa] ss:$16 sm:$0x30] %vm15_vm0, %v1026_v25  }
 0x197   :  { %1962 = vst.msk [vmem:[%s4517_s1 + $0xa] ss:$16 sm:$0xc0] %vm15_vm0, %v1026_v25   ;;  %v1503_v61 = vpop.permute.xlu1 %1502   ;;  %v1490_v62 = vpop.permute.xlu0 %1489  }
 0x198   :  { %1979 = vst.msk [vmem:[%s4517_s1 + $0x28a] ss:$16 sm:$0x3] %vm15_vm0, %v1091_v27   ;;  %v1554_v63 = vpop.permute.xlu2 %1553  }
 0x199   :  { %1980 = vst.msk [vmem:[%s4517_s1 + $0x28a] ss:$16 sm:$0xc] %vm15_vm0, %v1091_v27  }
 0x19a   :  { %1981 = vst.msk [vmem:[%s4517_s1 + $0x28a] ss:$16 sm:$0x30] %vm15_vm0, %v1091_v27  }
 0x19b   :  { %1982 = vst.msk [vmem:[%s4517_s1 + $0x28a] ss:$16 sm:$0xc0] %vm15_vm0, %v1091_v27  }
 0x19c   :  { %1975 = vst.msk [vmem:[%s4517_s1 + $0x20a] ss:$16 sm:$0x3] %vm15_vm0, %v1078_v28  }
 0x19d   :  { %1976 = vst.msk [vmem:[%s4517_s1 + $0x20a] ss:$16 sm:$0xc] %vm15_vm0, %v1078_v28  }
 0x19e   :  { %1977 = vst.msk [vmem:[%s4517_s1 + $0x20a] ss:$16 sm:$0x30] %vm15_vm0, %v1078_v28  }
 0x19f   :  { %1978 = vst.msk [vmem:[%s4517_s1 + $0x20a] ss:$16 sm:$0xc0] %vm15_vm0, %v1078_v28   ;;  %v1541_v0 = vpop.permute.xlu1 %1540   ;;  %v1529_v1 = vpop.permute.xlu0 %1528  }
 0x1a0   :  { %1971 = vst.msk [vmem:[%s4517_s1 + $0x18a] ss:$16 sm:$0x3] %vm15_vm0, %v1065_v29   ;;  %v1593_v2 = vpop.permute.xlu2 %1592  }
 0x1a1   :  { %1972 = vst.msk [vmem:[%s4517_s1 + $0x18a] ss:$16 sm:$0xc] %vm15_vm0, %v1065_v29  }
 0x1a2   :  { %1973 = vst.msk [vmem:[%s4517_s1 + $0x18a] ss:$16 sm:$0x30] %vm15_vm0, %v1065_v29  }
 0x1a3   :  { %1974 = vst.msk [vmem:[%s4517_s1 + $0x18a] ss:$16 sm:$0xc0] %vm15_vm0, %v1065_v29  }
 0x1a4   :  { %1991 = vst.msk [vmem:[%s4517_s1 + $0xb] ss:$16 sm:$0x3] %vm15_vm0, %v1129_v30  }
 0x1a5   :  { %1992 = vst.msk [vmem:[%s4517_s1 + $0xb] ss:$16 sm:$0xc] %vm15_vm0, %v1129_v30  }
 0x1a6   :  { %1993 = vst.msk [vmem:[%s4517_s1 + $0xb] ss:$16 sm:$0x30] %vm15_vm0, %v1129_v30  }
 0x1a7   :  { %1994 = vst.msk [vmem:[%s4517_s1 + $0xb] ss:$16 sm:$0xc0] %vm15_vm0, %v1129_v30   ;;  %v1580_v3 = vpop.permute.xlu1 %1579   ;;  %v1567_v4 = vpop.permute.xlu0 %1566  }
 0x1a8   :  { %1987 = vst.msk [vmem:[%s4517_s1 + $0x38a] ss:$16 sm:$0x3] %vm15_vm0, %v1117_v31   ;;  %v1632_v5 = vpop.permute.xlu2 %1631  }
 0x1a9   :  { %1988 = vst.msk [vmem:[%s4517_s1 + $0x38a] ss:$16 sm:$0xc] %vm15_vm0, %v1117_v31  }
 0x1aa   :  { %1989 = vst.msk [vmem:[%s4517_s1 + $0x38a] ss:$16 sm:$0x30] %vm15_vm0, %v1117_v31  }
 0x1ab   :  { %1990 = vst.msk [vmem:[%s4517_s1 + $0x38a] ss:$16 sm:$0xc0] %vm15_vm0, %v1117_v31  }
 0x1ac   :  { %1983 = vst.msk [vmem:[%s4517_s1 + $0x30a] ss:$16 sm:$0x3] %vm15_vm0, %v1104_v32  }
 0x1ad   :  { %1984 = vst.msk [vmem:[%s4517_s1 + $0x30a] ss:$16 sm:$0xc] %vm15_vm0, %v1104_v32  }
 0x1ae   :  { %1985 = vst.msk [vmem:[%s4517_s1 + $0x30a] ss:$16 sm:$0x30] %vm15_vm0, %v1104_v32  }
 0x1af   :  { %1986 = vst.msk [vmem:[%s4517_s1 + $0x30a] ss:$16 sm:$0xc0] %vm15_vm0, %v1104_v32   ;;  %v1619_v6 = vpop.permute.xlu1 %1618   ;;  %v1606_v9 = vpop.permute.xlu0 %1605  }
 0x1b0   :  { %2003 = vst.msk [vmem:[%s4517_s1 + $0x18b] ss:$16 sm:$0x3] %vm15_vm0, %v1168_v33  }
 0x1b1   :  { %2004 = vst.msk [vmem:[%s4517_s1 + $0x18b] ss:$16 sm:$0xc] %vm15_vm0, %v1168_v33  }
 0x1b2   :  { %2005 = vst.msk [vmem:[%s4517_s1 + $0x18b] ss:$16 sm:$0x30] %vm15_vm0, %v1168_v33  }
 0x1b3   :  { %2006 = vst.msk [vmem:[%s4517_s1 + $0x18b] ss:$16 sm:$0xc0] %vm15_vm0, %v1168_v33  }
 0x1b4   :  { %1999 = vst.msk [vmem:[%s4517_s1 + $0x10b] ss:$16 sm:$0x3] %vm15_vm0, %v1155_v34  }
 0x1b5   :  { %2000 = vst.msk [vmem:[%s4517_s1 + $0x10b] ss:$16 sm:$0xc] %vm15_vm0, %v1155_v34  }
 0x1b6   :  { %2001 = vst.msk [vmem:[%s4517_s1 + $0x10b] ss:$16 sm:$0x30] %vm15_vm0, %v1155_v34  }
 0x1b7   :  { %2002 = vst.msk [vmem:[%s4517_s1 + $0x10b] ss:$16 sm:$0xc0] %vm15_vm0, %v1155_v34  }
 0x1b8   :  { %1995 = vst.msk [vmem:[%s4517_s1 + $0x8b] ss:$16 sm:$0x3] %vm15_vm0, %v1142_v35  }
 0x1b9   :  { %1996 = vst.msk [vmem:[%s4517_s1 + $0x8b] ss:$16 sm:$0xc] %vm15_vm0, %v1142_v35  }
 0x1ba   :  { %1997 = vst.msk [vmem:[%s4517_s1 + $0x8b] ss:$16 sm:$0x30] %vm15_vm0, %v1142_v35  }
 0x1bb   :  { %1998 = vst.msk [vmem:[%s4517_s1 + $0x8b] ss:$16 sm:$0xc0] %vm15_vm0, %v1142_v35  }
 0x1bc   :  { %2015 = vst.msk [vmem:[%s4517_s1 + $0x30b] ss:$16 sm:$0x3] %vm15_vm0, %v1207_v36  }
 0x1bd   :  { %2016 = vst.msk [vmem:[%s4517_s1 + $0x30b] ss:$16 sm:$0xc] %vm15_vm0, %v1207_v36  }
 0x1be   :  { %2017 = vst.msk [vmem:[%s4517_s1 + $0x30b] ss:$16 sm:$0x30] %vm15_vm0, %v1207_v36  }
 0x1bf   :  { %2018 = vst.msk [vmem:[%s4517_s1 + $0x30b] ss:$16 sm:$0xc0] %vm15_vm0, %v1207_v36  }
 0x1c0   :  { %2011 = vst.msk [vmem:[%s4517_s1 + $0x28b] ss:$16 sm:$0x3] %vm15_vm0, %v1194_v37  }
 0x1c1   :  { %2012 = vst.msk [vmem:[%s4517_s1 + $0x28b] ss:$16 sm:$0xc] %vm15_vm0, %v1194_v37  }
 0x1c2   :  { %2013 = vst.msk [vmem:[%s4517_s1 + $0x28b] ss:$16 sm:$0x30] %vm15_vm0, %v1194_v37  }
 0x1c3   :  { %2014 = vst.msk [vmem:[%s4517_s1 + $0x28b] ss:$16 sm:$0xc0] %vm15_vm0, %v1194_v37  }
 0x1c4   :  { %2007 = vst.msk [vmem:[%s4517_s1 + $0x20b] ss:$16 sm:$0x3] %vm15_vm0, %v1181_v38  }
 0x1c5   :  { %2008 = vst.msk [vmem:[%s4517_s1 + $0x20b] ss:$16 sm:$0xc] %vm15_vm0, %v1181_v38  }
 0x1c6   :  { %2009 = vst.msk [vmem:[%s4517_s1 + $0x20b] ss:$16 sm:$0x30] %vm15_vm0, %v1181_v38  }
 0x1c7   :  { %2010 = vst.msk [vmem:[%s4517_s1 + $0x20b] ss:$16 sm:$0xc0] %vm15_vm0, %v1181_v38  }
 0x1c8   :  { %2027 = vst.msk [vmem:[%s4517_s1 + $0x8c] ss:$16 sm:$0x3] %vm15_vm0, %v1245_v39  }
 0x1c9   :  { %2028 = vst.msk [vmem:[%s4517_s1 + $0x8c] ss:$16 sm:$0xc] %vm15_vm0, %v1245_v39  }
 0x1ca   :  { %2029 = vst.msk [vmem:[%s4517_s1 + $0x8c] ss:$16 sm:$0x30] %vm15_vm0, %v1245_v39  }
 0x1cb   :  { %2030 = vst.msk [vmem:[%s4517_s1 + $0x8c] ss:$16 sm:$0xc0] %vm15_vm0, %v1245_v39  }
 0x1cc   :  { %2023 = vst.msk [vmem:[%s4517_s1 + $0xc] ss:$16 sm:$0x3] %vm15_vm0, %v1232_v40  }
 0x1cd   :  { %2024 = vst.msk [vmem:[%s4517_s1 + $0xc] ss:$16 sm:$0xc] %vm15_vm0, %v1232_v40  }
 0x1ce   :  { %2025 = vst.msk [vmem:[%s4517_s1 + $0xc] ss:$16 sm:$0x30] %vm15_vm0, %v1232_v40  }
 0x1cf   :  { %2026 = vst.msk [vmem:[%s4517_s1 + $0xc] ss:$16 sm:$0xc0] %vm15_vm0, %v1232_v40  }
 0x1d0   :  { %2019 = vst.msk [vmem:[%s4517_s1 + $0x38b] ss:$16 sm:$0x3] %vm15_vm0, %v1220_v41  }
 0x1d1   :  { %2020 = vst.msk [vmem:[%s4517_s1 + $0x38b] ss:$16 sm:$0xc] %vm15_vm0, %v1220_v41  }
 0x1d2   :  { %2021 = vst.msk [vmem:[%s4517_s1 + $0x38b] ss:$16 sm:$0x30] %vm15_vm0, %v1220_v41  }
 0x1d3   :  { %2022 = vst.msk [vmem:[%s4517_s1 + $0x38b] ss:$16 sm:$0xc0] %vm15_vm0, %v1220_v41  }
 0x1d4   :  { %2039 = vst.msk [vmem:[%s4517_s1 + $0x20c] ss:$16 sm:$0x3] %vm15_vm0, %v1284_v42  }
 0x1d5   :  { %2040 = vst.msk [vmem:[%s4517_s1 + $0x20c] ss:$16 sm:$0xc] %vm15_vm0, %v1284_v42  }
 0x1d6   :  { %2041 = vst.msk [vmem:[%s4517_s1 + $0x20c] ss:$16 sm:$0x30] %vm15_vm0, %v1284_v42  }
 0x1d7   :  { %2042 = vst.msk [vmem:[%s4517_s1 + $0x20c] ss:$16 sm:$0xc0] %vm15_vm0, %v1284_v42  }
 0x1d8   :  { %2035 = vst.msk [vmem:[%s4517_s1 + $0x18c] ss:$16 sm:$0x3] %vm15_vm0, %v1271_v43  }
 0x1d9   :  { %2036 = vst.msk [vmem:[%s4517_s1 + $0x18c] ss:$16 sm:$0xc] %vm15_vm0, %v1271_v43  }
 0x1da   :  { %2037 = vst.msk [vmem:[%s4517_s1 + $0x18c] ss:$16 sm:$0x30] %vm15_vm0, %v1271_v43  }
 0x1db   :  { %2038 = vst.msk [vmem:[%s4517_s1 + $0x18c] ss:$16 sm:$0xc0] %vm15_vm0, %v1271_v43  }
 0x1dc   :  { %2031 = vst.msk [vmem:[%s4517_s1 + $0x10c] ss:$16 sm:$0x3] %vm15_vm0, %v1258_v44  }
 0x1dd   :  { %2032 = vst.msk [vmem:[%s4517_s1 + $0x10c] ss:$16 sm:$0xc] %vm15_vm0, %v1258_v44  }
 0x1de   :  { %2033 = vst.msk [vmem:[%s4517_s1 + $0x10c] ss:$16 sm:$0x30] %vm15_vm0, %v1258_v44  }
 0x1df   :  { %2034 = vst.msk [vmem:[%s4517_s1 + $0x10c] ss:$16 sm:$0xc0] %vm15_vm0, %v1258_v44  }
 0x1e0   :  { %2051 = vst.msk [vmem:[%s4517_s1 + $0x38c] ss:$16 sm:$0x3] %vm15_vm0, %v1323_v45  }
 0x1e1   :  { %2052 = vst.msk [vmem:[%s4517_s1 + $0x38c] ss:$16 sm:$0xc] %vm15_vm0, %v1323_v45  }
 0x1e2   :  { %2053 = vst.msk [vmem:[%s4517_s1 + $0x38c] ss:$16 sm:$0x30] %vm15_vm0, %v1323_v45  }
 0x1e3   :  { %2054 = vst.msk [vmem:[%s4517_s1 + $0x38c] ss:$16 sm:$0xc0] %vm15_vm0, %v1323_v45  }
 0x1e4   :  { %2047 = vst.msk [vmem:[%s4517_s1 + $0x30c] ss:$16 sm:$0x3] %vm15_vm0, %v1310_v46  }
 0x1e5   :  { %2048 = vst.msk [vmem:[%s4517_s1 + $0x30c] ss:$16 sm:$0xc] %vm15_vm0, %v1310_v46  }
 0x1e6   :  { %2049 = vst.msk [vmem:[%s4517_s1 + $0x30c] ss:$16 sm:$0x30] %vm15_vm0, %v1310_v46  }
 0x1e7   :  { %2050 = vst.msk [vmem:[%s4517_s1 + $0x30c] ss:$16 sm:$0xc0] %vm15_vm0, %v1310_v46  }
 0x1e8   :  { %2043 = vst.msk [vmem:[%s4517_s1 + $0x28c] ss:$16 sm:$0x3] %vm15_vm0, %v1297_v47  }
 0x1e9   :  { %2044 = vst.msk [vmem:[%s4517_s1 + $0x28c] ss:$16 sm:$0xc] %vm15_vm0, %v1297_v47  }
 0x1ea   :  { %2045 = vst.msk [vmem:[%s4517_s1 + $0x28c] ss:$16 sm:$0x30] %vm15_vm0, %v1297_v47  }
 0x1eb   :  { %2046 = vst.msk [vmem:[%s4517_s1 + $0x28c] ss:$16 sm:$0xc0] %vm15_vm0, %v1297_v47  }
 0x1ec   :  { %2063 = vst.msk [vmem:[%s4517_s1 + $0x10d] ss:$16 sm:$0x3] %vm15_vm0, %v1361_v48  }
 0x1ed   :  { %2064 = vst.msk [vmem:[%s4517_s1 + $0x10d] ss:$16 sm:$0xc] %vm15_vm0, %v1361_v48  }
 0x1ee   :  { %2065 = vst.msk [vmem:[%s4517_s1 + $0x10d] ss:$16 sm:$0x30] %vm15_vm0, %v1361_v48  }
 0x1ef   :  { %2066 = vst.msk [vmem:[%s4517_s1 + $0x10d] ss:$16 sm:$0xc0] %vm15_vm0, %v1361_v48  }
 0x1f0   :  { %2059 = vst.msk [vmem:[%s4517_s1 + $0x8d] ss:$16 sm:$0x3] %vm15_vm0, %v1348_v49  }
 0x1f1   :  { %2060 = vst.msk [vmem:[%s4517_s1 + $0x8d] ss:$16 sm:$0xc] %vm15_vm0, %v1348_v49  }
 0x1f2   :  { %2061 = vst.msk [vmem:[%s4517_s1 + $0x8d] ss:$16 sm:$0x30] %vm15_vm0, %v1348_v49  }
 0x1f3   :  { %2062 = vst.msk [vmem:[%s4517_s1 + $0x8d] ss:$16 sm:$0xc0] %vm15_vm0, %v1348_v49  }
 0x1f4   :  { %2055 = vst.msk [vmem:[%s4517_s1 + $0xd] ss:$16 sm:$0x3] %vm15_vm0, %v1335_v50  }
 0x1f5   :  { %2056 = vst.msk [vmem:[%s4517_s1 + $0xd] ss:$16 sm:$0xc] %vm15_vm0, %v1335_v50  }
 0x1f6   :  { %2057 = vst.msk [vmem:[%s4517_s1 + $0xd] ss:$16 sm:$0x30] %vm15_vm0, %v1335_v50  }
 0x1f7   :  { %2058 = vst.msk [vmem:[%s4517_s1 + $0xd] ss:$16 sm:$0xc0] %vm15_vm0, %v1335_v50  }
 0x1f8   :  { %2075 = vst.msk [vmem:[%s4517_s1 + $0x28d] ss:$16 sm:$0x3] %vm15_vm0, %v1400_v51  }
 0x1f9   :  { %2076 = vst.msk [vmem:[%s4517_s1 + $0x28d] ss:$16 sm:$0xc] %vm15_vm0, %v1400_v51  }
 0x1fa   :  { %2077 = vst.msk [vmem:[%s4517_s1 + $0x28d] ss:$16 sm:$0x30] %vm15_vm0, %v1400_v51  }
 0x1fb   :  { %2078 = vst.msk [vmem:[%s4517_s1 + $0x28d] ss:$16 sm:$0xc0] %vm15_vm0, %v1400_v51  }
 0x1fc   :  { %2071 = vst.msk [vmem:[%s4517_s1 + $0x20d] ss:$16 sm:$0x3] %vm15_vm0, %v1387_v52  }
 0x1fd   :  { %2072 = vst.msk [vmem:[%s4517_s1 + $0x20d] ss:$16 sm:$0xc] %vm15_vm0, %v1387_v52  }
 0x1fe   :  { %2073 = vst.msk [vmem:[%s4517_s1 + $0x20d] ss:$16 sm:$0x30] %vm15_vm0, %v1387_v52  }
 0x1ff   :  { %2074 = vst.msk [vmem:[%s4517_s1 + $0x20d] ss:$16 sm:$0xc0] %vm15_vm0, %v1387_v52  }
 0x200   :  { %2067 = vst.msk [vmem:[%s4517_s1 + $0x18d] ss:$16 sm:$0x3] %vm15_vm0, %v1374_v53  }
 0x201   :  { %2068 = vst.msk [vmem:[%s4517_s1 + $0x18d] ss:$16 sm:$0xc] %vm15_vm0, %v1374_v53  }
 0x202   :  { %2069 = vst.msk [vmem:[%s4517_s1 + $0x18d] ss:$16 sm:$0x30] %vm15_vm0, %v1374_v53  }
 0x203   :  { %2070 = vst.msk [vmem:[%s4517_s1 + $0x18d] ss:$16 sm:$0xc0] %vm15_vm0, %v1374_v53  }
 0x204   :  { %2087 = vst.msk [vmem:[%s4517_s1 + $0xe] ss:$16 sm:$0x3] %vm15_vm0, %v1438_v54  }
 0x205   :  { %2088 = vst.msk [vmem:[%s4517_s1 + $0xe] ss:$16 sm:$0xc] %vm15_vm0, %v1438_v54  }
 0x206   :  { %2089 = vst.msk [vmem:[%s4517_s1 + $0xe] ss:$16 sm:$0x30] %vm15_vm0, %v1438_v54  }
 0x207   :  { %2090 = vst.msk [vmem:[%s4517_s1 + $0xe] ss:$16 sm:$0xc0] %vm15_vm0, %v1438_v54  }
 0x208   :  { %2083 = vst.msk [vmem:[%s4517_s1 + $0x38d] ss:$16 sm:$0x3] %vm15_vm0, %v1426_v55  }
 0x209   :  { %2084 = vst.msk [vmem:[%s4517_s1 + $0x38d] ss:$16 sm:$0xc] %vm15_vm0, %v1426_v55  }
 0x20a   :  { %2085 = vst.msk [vmem:[%s4517_s1 + $0x38d] ss:$16 sm:$0x30] %vm15_vm0, %v1426_v55  }
 0x20b   :  { %2086 = vst.msk [vmem:[%s4517_s1 + $0x38d] ss:$16 sm:$0xc0] %vm15_vm0, %v1426_v55  }
 0x20c   :  { %2079 = vst.msk [vmem:[%s4517_s1 + $0x30d] ss:$16 sm:$0x3] %vm15_vm0, %v1413_v56  }
 0x20d   :  { %2080 = vst.msk [vmem:[%s4517_s1 + $0x30d] ss:$16 sm:$0xc] %vm15_vm0, %v1413_v56  }
 0x20e   :  { %2081 = vst.msk [vmem:[%s4517_s1 + $0x30d] ss:$16 sm:$0x30] %vm15_vm0, %v1413_v56  }
 0x20f   :  { %2082 = vst.msk [vmem:[%s4517_s1 + $0x30d] ss:$16 sm:$0xc0] %vm15_vm0, %v1413_v56  }
 0x210   :  { %2099 = vst.msk [vmem:[%s4517_s1 + $0x18e] ss:$16 sm:$0x3] %vm15_vm0, %v1477_v57  }
 0x211   :  { %2100 = vst.msk [vmem:[%s4517_s1 + $0x18e] ss:$16 sm:$0xc] %vm15_vm0, %v1477_v57  }
 0x212   :  { %2101 = vst.msk [vmem:[%s4517_s1 + $0x18e] ss:$16 sm:$0x30] %vm15_vm0, %v1477_v57  }
 0x213   :  { %2102 = vst.msk [vmem:[%s4517_s1 + $0x18e] ss:$16 sm:$0xc0] %vm15_vm0, %v1477_v57  }
 0x214   :  { %2095 = vst.msk [vmem:[%s4517_s1 + $0x10e] ss:$16 sm:$0x3] %vm15_vm0, %v1464_v58  }
 0x215   :  { %2096 = vst.msk [vmem:[%s4517_s1 + $0x10e] ss:$16 sm:$0xc] %vm15_vm0, %v1464_v58  }
 0x216   :  { %2097 = vst.msk [vmem:[%s4517_s1 + $0x10e] ss:$16 sm:$0x30] %vm15_vm0, %v1464_v58  }
 0x217   :  { %2098 = vst.msk [vmem:[%s4517_s1 + $0x10e] ss:$16 sm:$0xc0] %vm15_vm0, %v1464_v58  }
 0x218   :  { %2091 = vst.msk [vmem:[%s4517_s1 + $0x8e] ss:$16 sm:$0x3] %vm15_vm0, %v1451_v59  }
 0x219   :  { %2092 = vst.msk [vmem:[%s4517_s1 + $0x8e] ss:$16 sm:$0xc] %vm15_vm0, %v1451_v59  }
 0x21a   :  { %2093 = vst.msk [vmem:[%s4517_s1 + $0x8e] ss:$16 sm:$0x30] %vm15_vm0, %v1451_v59  }
 0x21b   :  { %2094 = vst.msk [vmem:[%s4517_s1 + $0x8e] ss:$16 sm:$0xc0] %vm15_vm0, %v1451_v59  }
 0x21c   :  { %2111 = vst.msk [vmem:[%s4517_s1 + $0x30e] ss:$16 sm:$0x3] %vm15_vm0, %v1516_v60  }
 0x21d   :  { %2112 = vst.msk [vmem:[%s4517_s1 + $0x30e] ss:$16 sm:$0xc] %vm15_vm0, %v1516_v60  }
 0x21e   :  { %2113 = vst.msk [vmem:[%s4517_s1 + $0x30e] ss:$16 sm:$0x30] %vm15_vm0, %v1516_v60  }
 0x21f   :  { %2114 = vst.msk [vmem:[%s4517_s1 + $0x30e] ss:$16 sm:$0xc0] %vm15_vm0, %v1516_v60  }
 0x220   :  { %2107 = vst.msk [vmem:[%s4517_s1 + $0x28e] ss:$16 sm:$0x3] %vm15_vm0, %v1503_v61  }
 0x221   :  { %2108 = vst.msk [vmem:[%s4517_s1 + $0x28e] ss:$16 sm:$0xc] %vm15_vm0, %v1503_v61  }
 0x222   :  { %2109 = vst.msk [vmem:[%s4517_s1 + $0x28e] ss:$16 sm:$0x30] %vm15_vm0, %v1503_v61  }
 0x223   :  { %2110 = vst.msk [vmem:[%s4517_s1 + $0x28e] ss:$16 sm:$0xc0] %vm15_vm0, %v1503_v61  }
 0x224   :  { %2103 = vst.msk [vmem:[%s4517_s1 + $0x20e] ss:$16 sm:$0x3] %vm15_vm0, %v1490_v62  }
 0x225   :  { %2104 = vst.msk [vmem:[%s4517_s1 + $0x20e] ss:$16 sm:$0xc] %vm15_vm0, %v1490_v62  }
 0x226   :  { %2105 = vst.msk [vmem:[%s4517_s1 + $0x20e] ss:$16 sm:$0x30] %vm15_vm0, %v1490_v62  }
 0x227   :  { %2106 = vst.msk [vmem:[%s4517_s1 + $0x20e] ss:$16 sm:$0xc0] %vm15_vm0, %v1490_v62  }
 0x228   :  { %2123 = vst.msk [vmem:[%s4517_s1 + $0x8f] ss:$16 sm:$0x3] %vm15_vm0, %v1554_v63  }
 0x229   :  { %2124 = vst.msk [vmem:[%s4517_s1 + $0x8f] ss:$16 sm:$0xc] %vm15_vm0, %v1554_v63  }
 0x22a   :  { %2125 = vst.msk [vmem:[%s4517_s1 + $0x8f] ss:$16 sm:$0x30] %vm15_vm0, %v1554_v63  }
 0x22b   :  { %2126 = vst.msk [vmem:[%s4517_s1 + $0x8f] ss:$16 sm:$0xc0] %vm15_vm0, %v1554_v63  }
 0x22c   :  { %2119 = vst.msk [vmem:[%s4517_s1 + $0xf] ss:$16 sm:$0x3] %vm15_vm0, %v1541_v0  }
 0x22d   :  { %2120 = vst.msk [vmem:[%s4517_s1 + $0xf] ss:$16 sm:$0xc] %vm15_vm0, %v1541_v0  }
 0x22e   :  { %2121 = vst.msk [vmem:[%s4517_s1 + $0xf] ss:$16 sm:$0x30] %vm15_vm0, %v1541_v0  }
 0x22f   :  { %2122 = vst.msk [vmem:[%s4517_s1 + $0xf] ss:$16 sm:$0xc0] %vm15_vm0, %v1541_v0  }
 0x230   :  { %2115 = vst.msk [vmem:[%s4517_s1 + $0x38e] ss:$16 sm:$0x3] %vm15_vm0, %v1529_v1  }
 0x231   :  { %2116 = vst.msk [vmem:[%s4517_s1 + $0x38e] ss:$16 sm:$0xc] %vm15_vm0, %v1529_v1  }
 0x232   :  { %2117 = vst.msk [vmem:[%s4517_s1 + $0x38e] ss:$16 sm:$0x30] %vm15_vm0, %v1529_v1  }
 0x233   :  { %2118 = vst.msk [vmem:[%s4517_s1 + $0x38e] ss:$16 sm:$0xc0] %vm15_vm0, %v1529_v1  }
 0x234   :  { %2135 = vst.msk [vmem:[%s4517_s1 + $0x20f] ss:$16 sm:$0x3] %vm15_vm0, %v1593_v2  }
 0x235   :  { %2136 = vst.msk [vmem:[%s4517_s1 + $0x20f] ss:$16 sm:$0xc] %vm15_vm0, %v1593_v2  }
 0x236   :  { %2137 = vst.msk [vmem:[%s4517_s1 + $0x20f] ss:$16 sm:$0x30] %vm15_vm0, %v1593_v2  }
 0x237   :  { %2138 = vst.msk [vmem:[%s4517_s1 + $0x20f] ss:$16 sm:$0xc0] %vm15_vm0, %v1593_v2  }
 0x238   :  { %2131 = vst.msk [vmem:[%s4517_s1 + $0x18f] ss:$16 sm:$0x3] %vm15_vm0, %v1580_v3  }
 0x239   :  { %2132 = vst.msk [vmem:[%s4517_s1 + $0x18f] ss:$16 sm:$0xc] %vm15_vm0, %v1580_v3  }
 0x23a   :  { %2133 = vst.msk [vmem:[%s4517_s1 + $0x18f] ss:$16 sm:$0x30] %vm15_vm0, %v1580_v3  }
 0x23b   :  { %2134 = vst.msk [vmem:[%s4517_s1 + $0x18f] ss:$16 sm:$0xc0] %vm15_vm0, %v1580_v3  }
 0x23c   :  { %2127 = vst.msk [vmem:[%s4517_s1 + $0x10f] ss:$16 sm:$0x3] %vm15_vm0, %v1567_v4  }
 0x23d   :  { %2128 = vst.msk [vmem:[%s4517_s1 + $0x10f] ss:$16 sm:$0xc] %vm15_vm0, %v1567_v4  }
 0x23e   :  { %2129 = vst.msk [vmem:[%s4517_s1 + $0x10f] ss:$16 sm:$0x30] %vm15_vm0, %v1567_v4  }
 0x23f   :  { %2130 = vst.msk [vmem:[%s4517_s1 + $0x10f] ss:$16 sm:$0xc0] %vm15_vm0, %v1567_v4  }
 0x240   :  { %2147 = vst.msk [vmem:[%s4517_s1 + $0x38f] ss:$16 sm:$0x3] %vm15_vm0, %v1632_v5  }
 0x241   :  { %2148 = vst.msk [vmem:[%s4517_s1 + $0x38f] ss:$16 sm:$0xc] %vm15_vm0, %v1632_v5  }
 0x242   :  { %2149 = vst.msk [vmem:[%s4517_s1 + $0x38f] ss:$16 sm:$0x30] %vm15_vm0, %v1632_v5  }
 0x243   :  { %2150 = vst.msk [vmem:[%s4517_s1 + $0x38f] ss:$16 sm:$0xc0] %vm15_vm0, %v1632_v5  }
 0x244   :  { %2143 = vst.msk [vmem:[%s4517_s1 + $0x30f] ss:$16 sm:$0x3] %vm15_vm0, %v1619_v6  }
 0x245   :  { %2144 = vst.msk [vmem:[%s4517_s1 + $0x30f] ss:$16 sm:$0xc] %vm15_vm0, %v1619_v6  }
 0x246   :  { %2145 = vst.msk [vmem:[%s4517_s1 + $0x30f] ss:$16 sm:$0x30] %vm15_vm0, %v1619_v6  }
 0x247   :  { %2146 = vst.msk [vmem:[%s4517_s1 + $0x30f] ss:$16 sm:$0xc0] %vm15_vm0, %v1619_v6  }
 0x248   :  { %2139 = vst.msk [vmem:[%s4517_s1 + $0x28f] ss:$16 sm:$0x3] %vm15_vm0, %v1606_v9  }
 0x249   :  { %2140 = vst.msk [vmem:[%s4517_s1 + $0x28f] ss:$16 sm:$0xc] %vm15_vm0, %v1606_v9  }
 0x24a   :  { %2141 = vst.msk [vmem:[%s4517_s1 + $0x28f] ss:$16 sm:$0x30] %vm15_vm0, %v1606_v9  }
 0x24b   :  { %2142 = vst.msk [vmem:[%s4517_s1 + $0x28f] ss:$16 sm:$0xc0] %vm15_vm0, %v1606_v9  }
 0x24c   :  { %16 = vst.msk [vmem:[%s4517_s1] ss:$16 sm:$0x3] %vm15_vm0, %v3376_v17  }
 0x24d   :  { %17 = vst.msk [vmem:[%s4517_s1] ss:$16 sm:$0xc] %vm15_vm0, %v3376_v17  }
 0x24e   :  { %18 = vst.msk [vmem:[%s4517_s1] ss:$16 sm:$0x30] %vm15_vm0, %v3376_v17  }
 0x24f   :  { %19 = vst.msk [vmem:[%s4517_s1] ss:$16 sm:$0xc0] %vm15_vm0, %v3376_v17  }
 0x250   :  { %1647 = vst.msk [vmem:[%s4517_s1 + $0x100] ss:$16 sm:$0x3] %vm15_vm0, %v3260_v7  }
 0x251   :  { %1648 = vst.msk [vmem:[%s4517_s1 + $0x100] ss:$16 sm:$0xc] %vm15_vm0, %v3260_v7  }
 0x252   :  { %1649 = vst.msk [vmem:[%s4517_s1 + $0x100] ss:$16 sm:$0x30] %vm15_vm0, %v3260_v7  }
 0x253   :  { %1650 = vst.msk [vmem:[%s4517_s1 + $0x100] ss:$16 sm:$0xc0] %vm15_vm0, %v3260_v7  }
 0x254   :  { %1651 = vst.msk [vmem:[%s4517_s1 + $0x180] ss:$16 sm:$0x3] %vm15_vm0, %v3440_v22  }
 0x255   :  { %1652 = vst.msk [vmem:[%s4517_s1 + $0x180] ss:$16 sm:$0xc] %vm15_vm0, %v3440_v22  }
 0x256   :  { %1653 = vst.msk [vmem:[%s4517_s1 + $0x180] ss:$16 sm:$0x30] %vm15_vm0, %v3440_v22  }
 0x257   :  { %1654 = vst.msk [vmem:[%s4517_s1 + $0x180] ss:$16 sm:$0xc0] %vm15_vm0, %v3440_v22  }
 0x258   :  { %1655 = vst.msk [vmem:[%s4517_s1 + $0x200] ss:$16 sm:$0x3] %vm15_vm0, %v3320_v13  }
 0x259   :  { %1656 = vst.msk [vmem:[%s4517_s1 + $0x200] ss:$16 sm:$0xc] %vm15_vm0, %v3320_v13  }
 0x25a   :  { %1657 = vst.msk [vmem:[%s4517_s1 + $0x200] ss:$16 sm:$0x30] %vm15_vm0, %v3320_v13  }
 0x25b   :  { %1658 = vst.msk [vmem:[%s4517_s1 + $0x200] ss:$16 sm:$0xc0] %vm15_vm0, %v3320_v13  }
 0x25c   :  { %1659 = vst.msk [vmem:[%s4517_s1 + $0x280] ss:$16 sm:$0x3] %vm15_vm0, %v3318_v12  }
 0x25d   :  { %1660 = vst.msk [vmem:[%s4517_s1 + $0x280] ss:$16 sm:$0xc] %vm15_vm0, %v3318_v12  }
 0x25e   :  { %1661 = vst.msk [vmem:[%s4517_s1 + $0x280] ss:$16 sm:$0x30] %vm15_vm0, %v3318_v12  }
 0x25f   :  { %1662 = vst.msk [vmem:[%s4517_s1 + $0x280] ss:$16 sm:$0xc0] %vm15_vm0, %v3318_v12  }
 0x260   :  { %1663 = vst.msk [vmem:[%s4517_s1 + $0x300] ss:$16 sm:$0x3] %vm15_vm0, %v3496_v26  }
 0x261   :  { %1664 = vst.msk [vmem:[%s4517_s1 + $0x300] ss:$16 sm:$0xc] %vm15_vm0, %v3496_v26  }
 0x262   :  { %1665 = vst.msk [vmem:[%s4517_s1 + $0x300] ss:$16 sm:$0x30] %vm15_vm0, %v3496_v26  }
 0x263   :  { %1666 = vst.msk [vmem:[%s4517_s1 + $0x300] ss:$16 sm:$0xc0] %vm15_vm0, %v3496_v26  }
 0x264   :  { %1667 = vst.msk [vmem:[%s4517_s1 + $0x380] ss:$16 sm:$0x3] %vm15_vm0, %v3378_v18  }
 0x265   :  { %1668 = vst.msk [vmem:[%s4517_s1 + $0x380] ss:$16 sm:$0xc] %vm15_vm0, %v3378_v18  }
 0x266   :  { %1669 = vst.msk [vmem:[%s4517_s1 + $0x380] ss:$16 sm:$0x30] %vm15_vm0, %v3378_v18  }
 0x267   :  { %1670 = vst.msk [vmem:[%s4517_s1 + $0x380] ss:$16 sm:$0xc0] %vm15_vm0, %v3378_v18  }
 0x268   :  { %1642 = vsyncpa [#allocation1], 1 }

// kernel: dice_msssim_loss.1
= control target key start
LH: loop header
LB: loop body
LE: loop exit
PB: predicated region body
PF: predicated region fallthrough
CT: control target
= control target key end

     0   :  { %s6383_s0 = inlined_call_operand.vmem [shape: f32[5], index: 0, kind: input, shape index: {}]   ;;  %s6384_s1 = inlined_call_operand.vmem [shape: f32[2,32,32], index: 1, kind: input, shape index: {}]   ;;  %s6385_s2 = inlined_call_operand.vmem [shape: f32[2,32,32], index: 2, kind: input, shape index: {}]   ;;  %s6386_s3 = inlined_call_operand.vmem [shape: f32[2,16,16], index: 3, kind: input, shape index: {}]   ;;  %s6387_s4 = inlined_call_operand.vmem [shape: f32[2,16,16], index: 4, kind: input, shape index: {}]   ;;  %s6388_s5 = inlined_call_operand.vmem [shape: f32[2,8,8], index: 5, kind: input, shape index: {}]   ;;  %s6389_s6 = inlined_call_operand.vmem [shape: f32[2,8,8], index: 6, kind: input, shape index: {}]   ;;  %s6390_s7 = inlined_call_operand.vmem [shape: f32[2,4,4], index: 7, kind: input, shape index: {}]   ;;  %s6391_s8 = inlined_call_operand.vmem [shape: f32[2,4,4], index: 8, kind: input, shape index: {}]   ;;  %s6392_s9 = inlined_call_operand.vmem [shape: f32[2,2,2], index: 9, kind: input, shape index: {}]   ;;  %s6393_s10 = inlined_call_operand.vmem [shape: f32[2,2,2], index: 10, kind: input, shape index: {}]   ;;  %s6394_s11 = inlined_call_operand.vmem [shape: f32[24,32], index: 11, kind: input, shape index: {}]   ;;  %s6395_s12 = inlined_call_operand.hbm [shape: f32[640,640], index: 12, kind: input, shape index: {}]   ;;  %s6396_s13 = inlined_call_operand.vmem [shape: f32[8,16], index: 13, kind: input, shape index: {}]   ;;  %s6397_s14 = inlined_call_operand.vmem [shape: f32[640,640], index: 14, kind: input, shape index: {}]   ;;  %s6398_s15 = inlined_call_operand.vmem [shape: f32[8,8], index: 15, kind: input, shape index: {}]   ;;  %s6399_s16 = inlined_call_operand.vmem [shape: f32[4,4], index: 16, kind: input, shape index: {}]   ;;  %s6400_s17 = inlined_call_operand.vmem [shape: f32[2,2], index: 17, kind: input, shape index: {}]   ;;  %s6401_s18 = inlined_call_operand.vmem [shape: f32[2,1,16], index: 18, kind: output, shape index: {}]  }
   0x1   :  { %6404 = sst [smem:[#allocation10_spill]] %s6383_s0 }
   0x2   :  { %6405 = sst [smem:[#allocation11_spill]] %s6384_s1 }
   0x3   :  { %6406 = sst [smem:[#allocation12_spill]] %s6385_s2 }
   0x4   :  { %6407 = sst [smem:[#allocation13_spill]] %s6386_s3 }
   0x5   :  { %6408 = sst [smem:[#allocation14_spill]] %s6387_s4 }
   0x6   :  { %6409 = sst [smem:[#allocation15_spill]] %s6388_s5 }
   0x7   :  { %6410 = sst [smem:[#allocation16_spill]] %s6389_s6 }
   0x8   :  { %6411 = sst [smem:[#allocation17_spill]] %s6390_s7 }
   0x9   :  { %6412 = sst [smem:[#allocation18_spill]] %s6391_s8 }
   0xa   :  { %6413 = sst [smem:[#allocation19_spill]] %s6392_s9 }
   0xb   :  { %6414 = sst [smem:[#allocation20_spill]] %s6393_s10 }
   0xc   :  { %6415 = sst [smem:[#allocation21_spill]] %s6394_s11 }
   0xd   :  { %6416 = sst [smem:[#allocation22_spill]] %s6395_s12 }
   0xe   :  { %6417 = sst [smem:[#allocation23_spill]] %s6396_s13 }
   0xf   :  { %6418 = sst [smem:[#allocation24_spill]] %s6397_s14 }
  0x10   :  { %6419 = sst [smem:[#allocation25_spill]] %s6398_s15 }
  0x11   :  { %23 = vsyncpa [#allocation6], 0 }
  0x12   :  { %24 = vsyncpa [#allocation5], 0  ;;  %s4329_s27 = smov 0  }
  0x13 LB: > { %s6420_s30 = sld [smem:[#allocation10_spill]]  ;;  %s3967_s19 = sadd.s32 4294967295, %s4226_s27   ;;  %s4226_s27 = sphi %s4329_s27, %s30_s27  }
  0x14   : > { %p3969_p0 = scmp.ge.s32.totalorder %s4226_s27, 1  ;;  %p489_p1 = scmp.lt.s32.totalorder %s4226_s27, 3 }
  0x15   : > { %p4105_p2 = scmp.eq.s32.totalorder %s3967_s19, 0  ;;  %s6422_s12 = sld [smem:[#allocation22_spill]] }
  0x16   : > { %p4340_p3 = pnand %p3969_p0, %p489_p1  ;;  %s4228_s2 = smov [#allocation7]  }
  0x17   : > { %s515_s23 = sshll.u32 %s4228_s2, 4  ;;  %s4229_s24 = smov [#allocation4]   ;;  %s516_s23 = int_to_ptr.vmem [resolvable:$true] %s515_s23 }
  0x18   : > { %p4098_p4 = pneg %p4340_p3  ;;  %s4230_s25 = smov 640  }
  0x19   : > { %s501_s0 = sshll.u32 %s6420_s30, 4  ;;  %s4231_s26 = smov 40   ;;  %s502_s0 = int_to_ptr.vmem [resolvable:$true] %s501_s0 }
  0x1a   : > { %p4099_p5 = pnand %p4105_p2, %p4098_p4  ;;  %620 = sbr.rel (%p4340_p3) target bundleno = 1491 (0x5d3), region = 92 }
  0x1b   : > { %s513_s22 = sshll.u32 %s6422_s12, 4  ;;  %s514_s22 = int_to_ptr.hbm [resolvable:$true] %s513_s22 }
  0x1c   : > { %4101 = dma.vmem_to_smem (!%p4099_p5), %s502_s0, 16, %s4229_s24, [#allocation6]  }
  0x1d   : > { %4104 = dma.hbm_to_vmem [thread:$0]  (!%p4099_p5), %s514_s22, 51200, %s516_s23, [#allocation5], %s4230_s25, %s4230_s25, %s4231_s26  }
  0x1f   : > { %4217 = dma.done.wait (%p4105_p2), [#allocation6], 16  }
  0x20   : > { %4219 = vsyncadd (%p4105_p2), [#allocation6], 4294967280 }
  0x21   : > { %4221 = dma.done.wait (%p4105_p2), [#allocation5], 51200  }
  0x22   : > { %4223 = vsyncadd (%p4105_p2), [#allocation5], 4294916096 }
  0x23   : > { %632 = sfence }
  0x24   : > { %p718_p6 = scmp.lt.s32.totalorder %s3967_s19, 1  ;;  %vm1262_vm0 = vcmask 1047808   ;;  %v4232_v0 = vmov 0.0   ;;  %vm801_vm1 = vcmask 261120   ;;  %s6423_s0 = sld [smem:[#allocation11_spill]]  ;;  %v1017_v35 = vld [vmem:[#allocation7 + $0x4d8] sm:$0xff] }
  0x25   : > { %1266 = vst.msk [vmem:[#allocation2 + $0x78] sm:$0xff] %vm1262_vm0, %v4232_v0  ;;  %s6424_s22 = sld [smem:[#allocation12_spill]]  ;;  %v1012_v38 = vld [vmem:[#allocation7 + $0x4b0] sm:$0xff]  ;;  %v937_v42 = vld [vmem:[#allocation7 + $0x258] sm:$0xff]  ;;  %v1007_v49 = vld [vmem:[#allocation7 + $0x488] sm:$0xff]  ;;  %vm2661_vm2 = vcmask 1047680  }
  0x26   : > { %s6443_s19 = smov (!%p718_p6, %s3967_s19), 1  ;;  %1263 = vst.msk [vmem:[#allocation2] sm:$0xff] %vm1262_vm0, %v4232_v0  ;;  %s6425_s11 = sld [smem:[#allocation21_spill]]  ;;  %v1097_v43 = vld [vmem:[#allocation7 + $0x758] sm:$0xff]  ;;  %v932_v46 = vld [vmem:[#allocation7 + $0x230] sm:$0xff]  ;;  %v927_v50 = vld [vmem:[#allocation7 + $0x208] sm:$0xff] }
  0x27   : > { %1264 = vst.msk [vmem:[#allocation2 + $0x28] sm:$0xff] %vm1262_vm0, %v4232_v0  ;;  %s4016_s28 = sshll.u32 %s6443_s19, 5  ;;  %v1092_v47 = vld [vmem:[#allocation7 + $0x730] sm:$0xff]  ;;  %v1087_v51 = vld [vmem:[#allocation7 + $0x708] sm:$0xff]  ;;  %v1002_v53 = vld [vmem:[#allocation7 + $0x460] sm:$0xff]  ;;  %s4018_s30 = sshll.u32 %s6443_s19, 4 }
  0x28   : > { %1265 = vst.msk [vmem:[#allocation2 + $0x50] sm:$0xff] %vm1262_vm0, %v4232_v0  ;;  %v922_v54 = vld [vmem:[#allocation7 + $0x1e0] sm:$0xff]  ;;  %v1177_v56 = vld [vmem:[#allocation7 + $0x9d8] sm:$0xff]  ;;  %v912_v60 = vld [vmem:[#allocation7 + $0x190] sm:$0xff]  ;;  %s6426_s3 = sld [smem:[#allocation13_spill]]  ;;  %vm2672_vm3 = vcmask 130048  }
  0x29   : > { %1267 = vst.msk [vmem:[#allocation2 + $0x8] sm:$0xff] %vm1262_vm0, %v4232_v0  ;;  %v1082_v55 = vld [vmem:[#allocation7 + $0x6e0] sm:$0xff]  ;;  %v917_v57 = vld [vmem:[#allocation7 + $0x1b8] sm:$0xff]  ;;  %v1172_v61 = vld [vmem:[#allocation7 + $0x9b0] sm:$0xff]  ;;  %s6427_s4 = sld [smem:[#allocation14_spill]]  ;;  %s3984_s23 = sshll.u32 %s6443_s19, 3 }
  0x2a   : > { %s722_s1 = scalar_lea.vmem %s6423_s0, %s4016_s28  ;;  %1268 = vst.msk [vmem:[#allocation2 + $0x30] sm:$0xff] %vm1262_vm0, %v4232_v0  ;;  %v997_v58 = vld [vmem:[#allocation7 + $0x438] sm:$0xff]  ;;  %v992_v62 = vld [vmem:[#allocation7 + $0x410] sm:$0xff]  ;;  %s6428_s13 = sld [smem:[#allocation23_spill]]  ;;  %vm3361_vm4 = vcmask 64512  }
  0x2b   : > { %v4372_v1 = vld [vmem:[%s722_s1 + $0x18] sm:$0xff]  ;;  %1269 = vst.msk [vmem:[#allocation2 + $0x58] sm:$0xff] %vm1262_vm0, %v4232_v0  ;;  %v767_v3 = vld [vmem:[%s722_s1 + $0x10] sm:$0xff]  ;;  %v766_v5 = vld [vmem:[%s722_s1 + $0x8] sm:$0xff]  ;;  %s727_s2 = scalar_lea.vmem %s6424_s22, %s4016_s28  ;;  %s6429_s14 = sld [smem:[#allocation24_spill]] }
  0x2c   : > { %1286 = vst.msk [vmem:[#allocation2 + $0x78] sm:$0xff] %vm801_vm1, %v4372_v1  ;;  %v4404_v4 = vmul.f32 %v4372_v1, %v4372_v1  ;;  %v4413_v6 = vmul.f32 %v767_v3, %v767_v3  ;;  %v765_v7 = vld [vmem:[%s722_s1] sm:$0xff]  ;;  %v4418_v8 = vmul.f32 %v766_v5, %v766_v5  ;;  %v4420_v9 = vld [vmem:[%s727_s2 + $0x18] sm:$0xff]  ;;  %v4427_v11 = vld [vmem:[%s727_s2 + $0x10] sm:$0xff]  ;;  %s6430_s5 = sld [smem:[#allocation15_spill]] }
  0x2d   : > { %1270 = vst.msk [vmem:[#allocation2 + $0x80] sm:$0xff] %vm1262_vm0, %v4232_v0  ;;  %v4425_v10 = vmul.f32 %v765_v7, %v765_v7  ;;  %v4432_v12 = vmul.f32 %v4420_v9, %v4420_v9  ;;  %v4436_v13 = vld [vmem:[%s727_s2 + $0x8] sm:$0xff]  ;;  %v4442_v14 = vmul.f32 %v4427_v11, %v4427_v11  ;;  %v4446_v16 = vld [vmem:[%s727_s2] sm:$0xff]  ;;  %v4476_v25 = vmul.f32 %v4420_v9, %v4372_v1  ;;  %v4481_v27 = vld [vmem:[%s6425_s11 + $0x10] sm:$0xff]  ;;  %s6431_s15 = sld [smem:[#allocation25_spill]] }
  0x2e   : > { %1271 = vst.msk [vmem:[#allocation2 + $0x10] sm:$0xff] %vm1262_vm0, %v4232_v0  ;;  %v4452_v18 = vmul.f32 %v4436_v13, %v4436_v13  ;;  %v4460_v21 = vmul.f32 %v4446_v16, %v4446_v16  ;;  %v4465_v23 = vld [vmem:[%s6425_s11] sm:$0xff]  ;;  %v4470_v24 = vld [vmem:[%s6425_s11 + $0x8] sm:$0xff]  ;;  %v4486_v28 = vmul.f32 %v4427_v11, %v767_v3  ;;  %v4491_v30 = vmul.f32 %v4436_v13, %v766_v5  ;;  %v907_v1 = vld [vmem:[#allocation7 + $0x168] sm:$0xff]  ;;  %s4640_s20 = scalar_lea.vmem %s6426_s3, %s4018_s30  ;;  %s5227_s26 = sld [smem:[#allocation4]] }
  0x2f   : > { %1272 = vst.msk [vmem:[#allocation2 + $0x38] sm:$0xff] %vm1262_vm0, %v4232_v0  ;;  %v4500_v32 = vmul.f32 %v4446_v16, %v765_v7  ;;  %v1077_v59 = vld [vmem:[#allocation7 + $0x6b8] sm:$0xff]  ;;  %v1072_v63 = vld [vmem:[#allocation7 + $0x690] sm:$0xff]  ;;  %s737_s2 = scalar_lea.vmem %s6427_s4, %s4018_s30  ;;  %s6434_s6 = sld [smem:[#allocation16_spill]] }
  0x30   : > { %1273 = vst.msk [vmem:[#allocation2 + $0x60] sm:$0xff] %vm1262_vm0, %v4232_v0  ;;  %s6435_s7 = sld [smem:[#allocation17_spill]] }
  0x31   : > { %1274 = vst.msk [vmem:[#allocation2 + $0x88] sm:$0xff] %vm1262_vm0, %v4232_v0  ;;  %s6436_s8 = sld [smem:[#allocation18_spill]] }
  0x32   : > { %1275 = vst.msk [vmem:[#allocation2 + $0x18] sm:$0xff] %vm1262_vm0, %v4232_v0  ;;  %s5189_s22 = scalar_lea.vmem %s6430_s5, %s3984_s23  ;;  %s6234_s24 = sld [smem:[#allocation4 + $0x2]] }
  0x33   : > { %v1318_v2 = vld [vmem:[#allocation2 + $0x78] sm:$0xff]  ;;  %1276 = vst.msk [vmem:[#allocation2 + $0x40] sm:$0xff] %vm1262_vm0, %v4232_v0  ;;  %s6437_s9 = sld [smem:[#allocation19_spill]] }
  0x34   : > { %1344 = vmatpush.msra.mxu0 %v1318_v2  ;;  %4020 = vmatpush.msra.mxu1 %v1318_v2  ;;  %1277 = vst.msk [vmem:[#allocation2 + $0x68] sm:$0xff] %vm1262_vm0, %v4232_v0  ;;  %s2194_s1 = smul.f32 0.5, %s5227_s26  ;;  %s6438_s10 = sld [smem:[#allocation20_spill]] }
  0x35   : > { %4021 = vmatpush.msra.mxu3 %v1318_v2  ;;  %1278 = vst.msk [vmem:[#allocation2 + $0x90] sm:$0xff] %vm1262_vm0, %v4232_v0  ;;  %v1167_v2 = vld [vmem:[#allocation7 + $0x988] sm:$0xff]  ;;  %s745_s29 = scalar_lea.vmem %s6434_s6, %s3984_s23 }
  0x36   : > { %1279 = vst.msk [vmem:[#allocation2 + $0x20] sm:$0xff] %vm1262_vm0, %v4232_v0 }
  0x37   : > { %1280 = vst.msk [vmem:[#allocation2 + $0x48] sm:$0xff] %vm1262_vm0, %v4232_v0 }
  0x38   : > { %1281 = vst.msk [vmem:[#allocation2 + $0x70] sm:$0xff] %vm1262_vm0, %v4232_v0 }
  0x39   : > { %1282 = vst.msk [vmem:[#allocation2 + $0x98] sm:$0xff] %vm1262_vm0, %v4232_v0 }
  0x3a   : > { %1285 = vst.msk [vmem:[#allocation2 + $0x50] sm:$0xff] %vm801_vm1, %v767_v3  ;;  %v902_v3 = vld [vmem:[#allocation7 + $0x140] sm:$0xff] }
  0x3b   : > { %1294 = vst.msk [vmem:[#allocation2 + $0x88] sm:$0xff] %vm801_vm1, %v4404_v4 }
  0x3c   : > { %1284 = vst.msk [vmem:[#allocation2 + $0x28] sm:$0xff] %vm801_vm1, %v766_v5  ;;  %v987_v5 = vld [vmem:[#allocation7 + $0x3e8] sm:$0xff] }
  0x3d   : > { %1293 = vst.msk [vmem:[#allocation2 + $0x60] sm:$0xff] %vm801_vm1, %v4413_v6 }
  0x3e   : > { %1283 = vst.msk [vmem:[#allocation2] sm:$0xff] %vm801_vm1, %v765_v7  ;;  %v1067_v7 = vld [vmem:[#allocation7 + $0x668] sm:$0xff] }
  0x3f   : > { %1292 = vst.msk [vmem:[#allocation2 + $0x38] sm:$0xff] %vm801_vm1, %v4418_v8 }
  0x40   : > { %1290 = vst.msk [vmem:[#allocation2 + $0x80] sm:$0xff] %vm801_vm1, %v4420_v9 }
  0x41   : > { %v1313_v15 = vld [vmem:[#allocation2 + $0x50] sm:$0xff]  ;;  %1291 = vst.msk [vmem:[#allocation2 + $0x10] sm:$0xff] %vm801_vm1, %v4425_v10 }
  0x42   : > { %1345 = vmatpush.msra.mxu0 %v1313_v15  ;;  %4022 = vmatpush.msra.mxu1 %v1313_v15  ;;  %v1320_v17 = vld [vmem:[#allocation2 + $0x88] sm:$0xff]  ;;  %1298 = vst.msk [vmem:[#allocation2 + $0x90] sm:$0xff] %vm801_vm1, %v4432_v12 }
  0x43   : > { %4023 = vmatpush.msra.mxu3 %v1313_v15  ;;  %1396 = vmatpush.msra.mxu2 %v1320_v17  ;;  %v1308_v19 = vld [vmem:[#allocation2 + $0x28] sm:$0xff]  ;;  %1289 = vst.msk [vmem:[#allocation2 + $0x58] sm:$0xff] %vm801_vm1, %v4427_v11  ;;  %v1162_v17 = vld [vmem:[#allocation7 + $0x960] sm:$0xff] }
  0x44   : > { %1346 = vmatpush.msra.mxu0 %v1308_v19  ;;  %4024 = vmatpush.msra.mxu1 %v1308_v19  ;;  %v1315_v20 = vld [vmem:[#allocation2 + $0x60] sm:$0xff]  ;;  %1297 = vst.msk [vmem:[#allocation2 + $0x68] sm:$0xff] %vm801_vm1, %v4442_v14  ;;  %v897_v15 = vld [vmem:[#allocation7 + $0x118] sm:$0xff] }
  0x45   : > { %4025 = vmatpush.msra.mxu3 %v1308_v19  ;;  %1397 = vmatpush.msra.mxu2 %v1315_v20  ;;  %v1303_v22 = vld [vmem:[#allocation2] sm:$0xff]  ;;  %1288 = vst.msk [vmem:[#allocation2 + $0x30] sm:$0xff] %vm801_vm1, %v4436_v13  ;;  %v982_v19 = vld [vmem:[#allocation7 + $0x3c0] sm:$0xff] }
  0x46   : > { %1347 = vmatpush.msra.mxu0 %v1303_v22  ;;  %4026 = vmatpush.msra.mxu1 %v1303_v22  ;;  %v1310_v26 = vld [vmem:[#allocation2 + $0x38] sm:$0xff]  ;;  %1296 = vst.msk [vmem:[#allocation2 + $0x40] sm:$0xff] %vm801_vm1, %v4452_v18  ;;  %v1062_v20 = vld [vmem:[#allocation7 + $0x640] sm:$0xff] }
  0x47   : > { %4027 = vmatpush.msra.mxu3 %v1303_v22  ;;  %1398 = vmatpush.msra.mxu2 %v1310_v26  ;;  %v1319_v29 = vld [vmem:[#allocation2 + $0x80] sm:$0xff]  ;;  %1287 = vst.msk [vmem:[#allocation2 + $0x8] sm:$0xff] %vm801_vm1, %v4446_v16  ;;  %v977_v26 = vld [vmem:[#allocation7 + $0x398] sm:$0xff] }
  0x48   : > { %3990 = vmatmul.msk.f32.vlgmr.msra.gmra.mxu0 %vm801_vm1, %v4465_v23  ;;  %3991 = vmatmul.msk.f32.vlgmr.msra.gmra.mxu1 %vm801_vm1, %v4470_v24  ;;  %v1305_v31 = vld [vmem:[#allocation2 + $0x10] sm:$0xff]  ;;  %1295 = vst.msk [vmem:[#allocation2 + $0x18] sm:$0xff] %vm801_vm1, %v4460_v21  ;;  %v892_v22 = vld [vmem:[#allocation7 + $0xf0] sm:$0xff] }
  0x49   : > { %3992 = vmatmul.msk.f32.vlgmr.msra.gmra.mxu3 %vm801_vm1, %v4481_v27  ;;  %1370 = vmatpush.msrb.mxu1 %v1319_v29  ;;  %v1321_v33 = vld [vmem:[#allocation2 + $0x90] sm:$0xff]  ;;  %1302 = vst.msk [vmem:[#allocation2 + $0x98] sm:$0xff] %vm801_vm1, %v4476_v25  ;;  %v1057_v29 = vld [vmem:[#allocation7 + $0x618] sm:$0xff] }
  0x4a   : > { %1399 = vmatpush.msra.mxu2 %v1305_v31  ;;  %1422 = vmatpush.msrb.mxu3 %v1321_v33  ;;  %v1314_v34 = vld [vmem:[#allocation2 + $0x58] sm:$0xff]  ;;  %1301 = vst.msk [vmem:[#allocation2 + $0x70] sm:$0xff] %vm801_vm1, %v4486_v28  ;;  %v972_v33 = vld [vmem:[#allocation7 + $0x370] sm:$0xff] }
  0x4b   : > { %3996 = vmatmul.msk.f32.vlgmr.msra.gmra.mxu2 %vm801_vm1, %v4465_v23  ;;  %1371 = vmatpush.msrb.mxu1 %v1314_v34  ;;  %v1316_v36 = vld [vmem:[#allocation2 + $0x68] sm:$0xff]  ;;  %1300 = vst.msk [vmem:[#allocation2 + $0x48] sm:$0xff] %vm801_vm1, %v4491_v30  ;;  %v887_v31 = vld [vmem:[#allocation7 + $0xc8] sm:$0xff]  ;;  %v882_v34 = vld [vmem:[#allocation7 + $0xa0] sm:$0xff] }
  0x4c   : > { %1423 = vmatpush.msrb.mxu3 %v1316_v36  ;;  %v1309_v37 = vld [vmem:[#allocation2 + $0x30] sm:$0xff]  ;;  %1299 = vst.msk [vmem:[#allocation2 + $0x20] sm:$0xff] %vm801_vm1, %v4500_v32  ;;  %1488 = vmatpush.msrb.mxu2 %v1017_v35  ;;  %v1052_v35 = vld [vmem:[#allocation7 + $0x5f0] sm:$0xff]  ;;  %v1147_v36 = vld [vmem:[#allocation7 + $0x8e8] sm:$0xff] }
  0x4d   : > { %1372 = vmatpush.msrb.mxu1 %v1309_v37  ;;  %v1311_v39 = vld [vmem:[#allocation2 + $0x40] sm:$0xff]  ;;  %v967_v37 = vld [vmem:[#allocation7 + $0x348] sm:$0xff]  ;;  %2663 = vst.msk [vmem:[#allocation3 + $0x28] sm:$0xff] %vm2661_vm2, %v4232_v0 }
  0x4e   : > { %1424 = vmatpush.msrb.mxu3 %v1311_v39  ;;  %v1304_v40 = vld [vmem:[#allocation2 + $0x8] sm:$0xff]  ;;  %1489 = vmatpush.msrb.mxu2 %v1012_v38  ;;  %v1047_v39 = vld [vmem:[#allocation7 + $0x5c8] sm:$0xff]  ;;  %2662 = vst.msk [vmem:[#allocation3] sm:$0xff] %vm2661_vm2, %v4232_v0 }
  0x4f   : > { %1373 = vmatpush.msrb.mxu1 %v1304_v40  ;;  %v1306_v41 = vld [vmem:[#allocation2 + $0x18] sm:$0xff]  ;;  %v877_v38 = vld [vmem:[#allocation7 + $0x78] sm:$0xff]  ;;  %v1142_v40 = vld [vmem:[#allocation7 + $0x8c0] sm:$0xff]  ;;  %2664 = vst.msk [vmem:[#allocation3 + $0x8] sm:$0xff] %vm2661_vm2, %v4232_v0 }
  0x50   : > { %1425 = vmatpush.msrb.mxu3 %v1306_v41  ;;  %3993 = vmatmul.msk.f32.vlgmr.msrb.gmra.mxu1 %vm801_vm1, %v4465_v23  ;;  %v1322_v44 = vld [vmem:[#allocation2 + $0x98] sm:$0xff]  ;;  %v962_v41 = vld [vmem:[#allocation7 + $0x320] sm:$0xff]  ;;  %2665 = vst.msk [vmem:[#allocation3 + $0x30] sm:$0xff] %vm2661_vm2, %v4232_v0 }
  0x51   : > { %3999 = vmatmul.msk.f32.vlgmr.msrb.gmra.mxu3 %vm801_vm1, %v4465_v23  ;;  %1448 = vmatpush.msrb.mxu0 %v1322_v44  ;;  %v1317_v45 = vld [vmem:[#allocation2 + $0x70] sm:$0xff]  ;;  %v1137_v44 = vld [vmem:[#allocation7 + $0x898] sm:$0xff]  ;;  %2666 = vst.msk [vmem:[#allocation3 + $0x10] sm:$0xff] %vm2661_vm2, %v4232_v0 }
  0x52   : > { %v1312_v48 = vld [vmem:[#allocation2 + $0x48] sm:$0xff]  ;;  %1462 = vmatpush.msra.mxu1 %v937_v42  ;;  %1514 = vmatpush.msra.mxu3 %v1097_v43  ;;  %v872_v42 = vld [vmem:[#allocation7 + $0x50] sm:$0xff]  ;;  %v1042_v43 = vld [vmem:[#allocation7 + $0x5a0] sm:$0xff]  ;;  %2667 = vst.msk [vmem:[#allocation3 + $0x38] sm:$0xff] %vm2661_vm2, %v4232_v0 }
  0x53   : > { %3997 = vmatmul.msk.f32.gmra.mxu2 %vm801_vm1, %v4470_v24  ;;  %1449 = vmatpush.msrb.mxu0 %v1317_v45  ;;  %v1307_v52 = vld [vmem:[#allocation2 + $0x20] sm:$0xff]  ;;  %v957_v45 = vld [vmem:[#allocation7 + $0x2f8] sm:$0xff]  ;;  %2668 = vst.msk [vmem:[#allocation3 + $0x18] sm:$0xff] %vm2661_vm2, %v4232_v0 }
  0x54   : > { %1463 = vmatpush.msra.mxu1 %v932_v46  ;;  %1515 = vmatpush.msra.mxu3 %v1092_v47  ;;  %v867_v46 = vld [vmem:[#allocation7 + $0x28] sm:$0xff]  ;;  %v1037_v47 = vld [vmem:[#allocation7 + $0x578] sm:$0xff]  ;;  %2669 = vst.msk [vmem:[#allocation3 + $0x40] sm:$0xff] %vm2661_vm2, %v4232_v0 }
  0x55   : > { %1450 = vmatpush.msrb.mxu0 %v1312_v48  ;;  %1490 = vmatpush.msrb.mxu2 %v1007_v49  ;;  %v952_v48 = vld [vmem:[#allocation7 + $0x2d0] sm:$0xff]  ;;  %v862_v49 = vld [vmem:[#allocation7] sm:$0xff]  ;;  %2670 = vst.msk [vmem:[#allocation3 + $0x20] sm:$0xff] %vm2661_vm2, %v4232_v0 }
  0x56   : > { %1464 = vmatpush.msra.mxu1 %v927_v50  ;;  %1516 = vmatpush.msra.mxu3 %v1087_v51  ;;  %v1032_v50 = vld [vmem:[#allocation7 + $0x550] sm:$0xff]  ;;  %v1257_v51 = vld [vmem:[#allocation7 + $0xc58] sm:$0xff]  ;;  %2671 = vst.msk [vmem:[#allocation3 + $0x48] sm:$0xff] %vm2661_vm2, %v4232_v0 }
  0x57   : > { %1451 = vmatpush.msrb.mxu0 %v1307_v52  ;;  %1491 = vmatpush.msrb.mxu2 %v1002_v53  ;;  %v1127_v52 = vld [vmem:[#allocation7 + $0x848] sm:$0xff] }
  0x58   : > { %3994 = vmatmul.msk.f32.gmra.mxu1 %vm801_vm1, %v4470_v24  ;;  %4002 = vmatmul.msk.f32.vlgmr.msrb.gmra.mxu0 %vm801_vm1, %v4465_v23  ;;  %v1157_v23 = vld [vmem:[#allocation7 + $0x938] sm:$0xff]  ;;  %v947_v53 = vld [vmem:[#allocation7 + $0x2a8] sm:$0xff] }
  0x59   : > { %4000 = vmatmul.msk.f32.gmra.mxu3 %vm801_vm1, %v4470_v24  ;;  %1465 = vmatpush.msra.mxu1 %v922_v54  ;;  %v1027_v54 = vld [vmem:[#allocation7 + $0x528] sm:$0xff] }
  0x5a   : > { %1517 = vmatpush.msra.mxu3 %v1082_v55  ;;  %1540 = vmatpush.msra.mxu0 %v1177_v56  ;;  %v1252_v55 = vld [vmem:[#allocation7 + $0xc30] sm:$0xff]  ;;  %v1122_v56 = vld [vmem:[#allocation7 + $0x820] sm:$0xff] }
  0x5b   : > { %3998 = vmatmul.msk.f32.gmra.mxu2 %vm801_vm1, %v4481_v27  ;;  %1466 = vmatpush.msra.mxu1 %v917_v57  ;;  %v942_v57 = vld [vmem:[#allocation7 + $0x280] sm:$0xff] }
  0x5c   : > { %1492 = vmatpush.msrb.mxu2 %v997_v58  ;;  %1518 = vmatpush.msra.mxu3 %v1077_v59  ;;  %v1022_v58 = vld [vmem:[#allocation7 + $0x500] sm:$0xff]  ;;  %v1247_v59 = vld [vmem:[#allocation7 + $0xc08] sm:$0xff] }
  0x5d   : > { %1467 = vmatpush.msra.mxu1 %v912_v60  ;;  %1541 = vmatpush.msra.mxu0 %v1172_v61  ;;  %v1117_v60 = vld [vmem:[#allocation7 + $0x7f8] sm:$0xff]  ;;  %v938_v61 = vld [vmem:[#allocation7 + $0x260] sm:$0xff] }
  0x5e   : > { %1493 = vmatpush.msrb.mxu2 %v992_v62  ;;  %1519 = vmatpush.msra.mxu3 %v1072_v63  ;;  %v1018_v62 = vld [vmem:[#allocation7 + $0x4e0] sm:$0xff] }
  0x5f   : > { %1468 = vmatpush.msra.mxu1 %v907_v1  ;;  %1542 = vmatpush.msra.mxu0 %v1167_v2  ;;  %v1242_v63 = vld [vmem:[#allocation7 + $0xbe0] sm:$0xff]  ;;  %v1112_v1 = vld [vmem:[#allocation7 + $0x7d0] sm:$0xff]  ;;  %v933_v2 = vld [vmem:[#allocation7 + $0x238] sm:$0xff] }
  0x60   : > { %3995 = vmatmul.msk.f32.gmra.mxu1 %vm801_vm1, %v4481_v27  ;;  %4003 = vmatmul.msk.f32.gmra.mxu0 %vm801_vm1, %v4470_v24  ;;  %v1152_v24 = vld [vmem:[#allocation7 + $0x910] sm:$0xff] }
  0x61   : > { %4001 = vmatmul.msk.f32.gmra.mxu3 %vm801_vm1, %v4481_v27  ;;  %1469 = vmatpush.msra.mxu1 %v902_v3  ;;  %v1013_v3 = vld [vmem:[#allocation7 + $0x4b8] sm:$0xff] }
  0x62   : > { %1494 = vmatpush.msrb.mxu2 %v987_v5  ;;  %1520 = vmatpush.msra.mxu3 %v1067_v7  ;;  %v1237_v5 = vld [vmem:[#allocation7 + $0xbb8] sm:$0xff]  ;;  %v1107_v7 = vld [vmem:[#allocation7 + $0x7a8] sm:$0xff] }
  0x63   : > { %1470 = vmatpush.msra.mxu1 %v897_v15  ;;  %1543 = vmatpush.msra.mxu0 %v1162_v17  ;;  %v928_v15 = vld [vmem:[#allocation7 + $0x210] sm:$0xff] }
  0x64   : > { %1495 = vmatpush.msrb.mxu2 %v982_v19  ;;  %1521 = vmatpush.msra.mxu3 %v1062_v20  ;;  %v1008_v17 = vld [vmem:[#allocation7 + $0x490] sm:$0xff]  ;;  %v1102_v20 = vld [vmem:[#allocation7 + $0x780] sm:$0xff] }
  0x65   : > { %1471 = vmatpush.msra.mxu1 %v892_v22  ;;  %1544 = vmatpush.msra.mxu0 %v1157_v23  ;;  %v1232_v19 = vld [vmem:[#allocation7 + $0xb90] sm:$0xff]  ;;  %v923_v22 = vld [vmem:[#allocation7 + $0x1e8] sm:$0xff] }
  0x66   : > { %1496 = vmatpush.msrb.mxu2 %v977_v26  ;;  %1522 = vmatpush.msra.mxu3 %v1057_v29  ;;  %v1003_v23 = vld [vmem:[#allocation7 + $0x468] sm:$0xff]  ;;  %v1098_v29 = vld [vmem:[#allocation7 + $0x760] sm:$0xff] }
  0x67   : > { %1472 = vmatpush.msra.mxu1 %v887_v31  ;;  %1545 = vmatpush.msra.mxu0 %v1152_v24  ;;  %v1227_v26 = vld [vmem:[#allocation7 + $0xb68] sm:$0xff]  ;;  %v918_v31 = vld [vmem:[#allocation7 + $0x1c0] sm:$0xff] }
  0x68   : > { %4004 = vmatmul.msk.f32.gmra.mxu0 %vm801_vm1, %v4481_v27  ;;  %1497 = vmatpush.msrb.mxu2 %v972_v33  ;;  %v1132_v27 = vld [vmem:[#allocation7 + $0x870] sm:$0xff]  ;;  %v998_v24 = vld [vmem:[#allocation7 + $0x440] sm:$0xff] }
  0x69   : > { %1473 = vmatpush.msra.mxu1 %v882_v34  ;;  %1523 = vmatpush.msra.mxu3 %v1052_v35  ;;  %v1222_v33 = vld [vmem:[#allocation7 + $0xb40] sm:$0xff]  ;;  %v1093_v34 = vld [vmem:[#allocation7 + $0x738] sm:$0xff] }
  0x6a   : > { %1546 = vmatpush.msra.mxu0 %v1147_v36  ;;  %1498 = vmatpush.msrb.mxu2 %v967_v37  ;;  %v913_v35 = vld [vmem:[#allocation7 + $0x198] sm:$0xff] }
  0x6b   : > { %1474 = vmatpush.msra.mxu1 %v877_v38  ;;  %1524 = vmatpush.msra.mxu3 %v1047_v39  ;;  %v993_v36 = vld [vmem:[#allocation7 + $0x418] sm:$0xff]  ;;  %v1088_v38 = vld [vmem:[#allocation7 + $0x710] sm:$0xff] }
  0x6c   : > { %1547 = vmatpush.msra.mxu0 %v1142_v40  ;;  %1499 = vmatpush.msrb.mxu2 %v962_v41  ;;  %v1217_v37 = vld [vmem:[#allocation7 + $0xb18] sm:$0xff]  ;;  %v908_v39 = vld [vmem:[#allocation7 + $0x170] sm:$0xff] }
  0x6d   : > { %1475 = vmatpush.msra.mxu1 %v872_v42  ;;  %1525 = vmatpush.msra.mxu3 %v1042_v43  ;;  %v988_v40 = vld [vmem:[#allocation7 + $0x3f0] sm:$0xff]  ;;  %v1083_v42 = vld [vmem:[#allocation7 + $0x6e8] sm:$0xff] }
  0x6e   : > { %1548 = vmatpush.msra.mxu0 %v1137_v44  ;;  %1500 = vmatpush.msrb.mxu2 %v957_v45  ;;  %v1212_v41 = vld [vmem:[#allocation7 + $0xaf0] sm:$0xff]  ;;  %v903_v43 = vld [vmem:[#allocation7 + $0x148] sm:$0xff] }
  0x6f   : > { %1476 = vmatpush.msra.mxu1 %v867_v46  ;;  %1526 = vmatpush.msra.mxu3 %v1037_v47  ;;  %v983_v44 = vld [vmem:[#allocation7 + $0x3c8] sm:$0xff]  ;;  %v1078_v46 = vld [vmem:[#allocation7 + $0x6c0] sm:$0xff] }
  0x70   : > { %1549 = vmatpush.msra.mxu0 %v1132_v27  ;;  %1501 = vmatpush.msrb.mxu2 %v952_v48  ;;  %v1207_v45 = vld [vmem:[#allocation7 + $0xac8] sm:$0xff]  ;;  %v898_v47 = vld [vmem:[#allocation7 + $0x120] sm:$0xff] }
  0x71   : > { %1477 = vmatpush.msra.mxu1 %v862_v49  ;;  %1527 = vmatpush.msra.mxu3 %v1032_v50  ;;  %v978_v27 = vld [vmem:[#allocation7 + $0x3a0] sm:$0xff]  ;;  %v1073_v49 = vld [vmem:[#allocation7 + $0x698] sm:$0xff] }
  0x72   : > { %1550 = vmatpush.msra.mxu0 %v1127_v52  ;;  %1502 = vmatpush.msrb.mxu2 %v947_v53  ;;  %v1202_v48 = vld [vmem:[#allocation7 + $0xaa0] sm:$0xff]  ;;  %v893_v50 = vld [vmem:[#allocation7 + $0xf8] sm:$0xff]  ;;  %v1068_v53 = vld [vmem:[#allocation7 + $0x670] sm:$0xff] }
  0x73   : > { %1566 = vmatpush.msrb.mxu1 %v1257_v51  ;;  %1528 = vmatpush.msra.mxu3 %v1027_v54  ;;  %v973_v51 = vld [vmem:[#allocation7 + $0x378] sm:$0xff]  ;;  %v888_v54 = vld [vmem:[#allocation7 + $0xd0] sm:$0xff] }
  0x74   : > { %1551 = vmatpush.msra.mxu0 %v1122_v56  ;;  %1503 = vmatpush.msrb.mxu2 %v942_v57  ;;  %v1197_v52 = vld [vmem:[#allocation7 + $0xa78] sm:$0xff]  ;;  %v1192_v56 = vld [vmem:[#allocation7 + $0xa50] sm:$0xff]  ;;  %v1063_v57 = vld [vmem:[#allocation7 + $0x648] sm:$0xff] }
  0x75   : > { %1567 = vmatpush.msrb.mxu1 %v1252_v55  ;;  %1529 = vmatpush.msra.mxu3 %v1022_v58  ;;  %v968_v55 = vld [vmem:[#allocation7 + $0x350] sm:$0xff]  ;;  %v1187_v58 = vld [vmem:[#allocation7 + $0xa28] sm:$0xff] }
  0x76   : > { %1552 = vmatpush.msra.mxu0 %v1117_v60  ;;  %1592 = vmatpush.msra.mxu2 %v938_v61  ;;  %v883_v60 = vld [vmem:[#allocation7 + $0xa8] sm:$0xff] }
  0x77   : > { %1568 = vmatpush.msrb.mxu1 %v1247_v59  ;;  %1618 = vmatpush.msrb.mxu3 %v1018_v62  ;;  %v1182_v59 = vld [vmem:[#allocation7 + $0xa00] sm:$0xff]  ;;  %v963_v61 = vld [vmem:[#allocation7 + $0x328] sm:$0xff] }
  0x78   : > { %1553 = vmatpush.msra.mxu0 %v1112_v1  ;;  %1593 = vmatpush.msra.mxu2 %v933_v2  ;;  %v1058_v62 = vld [vmem:[#allocation7 + $0x620] sm:$0xff]  ;;  %v1053_v2 = vld [vmem:[#allocation7 + $0x5f8] sm:$0xff] }
  0x79   : > { %1569 = vmatpush.msrb.mxu1 %v1242_v63  ;;  %1619 = vmatpush.msrb.mxu3 %v1013_v3  ;;  %v878_v63 = vld [vmem:[#allocation7 + $0x80] sm:$0xff]  ;;  %v873_v3 = vld [vmem:[#allocation7 + $0x58] sm:$0xff] }
  0x7a   : > { %1554 = vmatpush.msra.mxu0 %v1107_v7  ;;  %1594 = vmatpush.msra.mxu2 %v928_v15  ;;  %v958_v1 = vld [vmem:[#allocation7 + $0x300] sm:$0xff]  ;;  %v1048_v7 = vld [vmem:[#allocation7 + $0x5d0] sm:$0xff] }
  0x7b   : > { %1570 = vmatpush.msrb.mxu1 %v1237_v5  ;;  %1620 = vmatpush.msrb.mxu3 %v1008_v17  ;;  %v953_v5 = vld [vmem:[#allocation7 + $0x2d8] sm:$0xff]  ;;  %v868_v15 = vld [vmem:[#allocation7 + $0x30] sm:$0xff] }
  0x7c   : > { %1555 = vmatpush.msra.mxu0 %v1102_v20  ;;  %1595 = vmatpush.msra.mxu2 %v923_v22  ;;  %v948_v17 = vld [vmem:[#allocation7 + $0x2b0] sm:$0xff]  ;;  %v863_v20 = vld [vmem:[#allocation7 + $0x8] sm:$0xff] }
  0x7d   : > { %1571 = vmatpush.msrb.mxu1 %v1232_v19  ;;  %1621 = vmatpush.msrb.mxu3 %v1003_v23  ;;  %v1043_v19 = vld [vmem:[#allocation7 + $0x5a8] sm:$0xff]  ;;  %v1038_v23 = vld [vmem:[#allocation7 + $0x580] sm:$0xff] }
  0x7e   : > { %1644 = vmatpush.msrb.mxu0 %v1098_v29  ;;  %1596 = vmatpush.msra.mxu2 %v918_v31  ;;  %v943_v22 = vld [vmem:[#allocation7 + $0x288] sm:$0xff]  ;;  %v1028_v29 = vld [vmem:[#allocation7 + $0x530] sm:$0xff] }
  0x7f   : > { %1572 = vmatpush.msrb.mxu1 %v1227_v26  ;;  %1622 = vmatpush.msrb.mxu3 %v998_v24  ;;  %v1033_v26 = vld [vmem:[#allocation7 + $0x558] sm:$0xff]  ;;  %v1023_v31 = vld [vmem:[#allocation7 + $0x508] sm:$0xff]  ;;  %v1178_v24 = vld [vmem:[#allocation7 + $0x9e0] sm:$0xff] }
  0x80   : > { %1645 = vmatpush.msrb.mxu0 %v1093_v34  ;;  %1597 = vmatpush.msra.mxu2 %v913_v35  ;;  %v1173_v35 = vld [vmem:[#allocation7 + $0x9b8] sm:$0xff] }
  0x81   : > { %1573 = vmatpush.msrb.mxu1 %v1222_v33  ;;  %1623 = vmatpush.msrb.mxu3 %v993_v36  ;;  %v1168_v36 = vld [vmem:[#allocation7 + $0x990] sm:$0xff] }
  0x82   : > { %1646 = vmatpush.msrb.mxu0 %v1088_v38  ;;  %1598 = vmatpush.msra.mxu2 %v908_v39  ;;  %v1158_v39 = vld [vmem:[#allocation7 + $0x940] sm:$0xff] }
  0x83   : > { %1574 = vmatpush.msrb.mxu1 %v1217_v37  ;;  %1624 = vmatpush.msrb.mxu3 %v988_v40  ;;  %v1163_v37 = vld [vmem:[#allocation7 + $0x968] sm:$0xff] }
  0x84   : > { %1647 = vmatpush.msrb.mxu0 %v1083_v42  ;;  %1599 = vmatpush.msra.mxu2 %v903_v43  ;;  %v939_v42 = vld [vmem:[#allocation7 + $0x268] sm:$0xff] }
  0x85   : > { %1575 = vmatpush.msrb.mxu1 %v1212_v41  ;;  %1625 = vmatpush.msrb.mxu3 %v983_v44  ;;  %v1258_v41 = vld [vmem:[#allocation7 + $0xc60] sm:$0xff]  ;;  %v1153_v44 = vld [vmem:[#allocation7 + $0x918] sm:$0xff] }
  0x86   : > { %1648 = vmatpush.msrb.mxu0 %v1078_v46  ;;  %1600 = vmatpush.msra.mxu2 %v898_v47  ;;  %v934_v46 = vld [vmem:[#allocation7 + $0x240] sm:$0xff]  ;;  %v1148_v47 = vld [vmem:[#allocation7 + $0x8f0] sm:$0xff] }
  0x87   : > { %1576 = vmatpush.msrb.mxu1 %v1207_v45  ;;  %1626 = vmatpush.msrb.mxu3 %v978_v27  ;;  %v1253_v45 = vld [vmem:[#allocation7 + $0xc38] sm:$0xff]  ;;  %v1248_v27 = vld [vmem:[#allocation7 + $0xc10] sm:$0xff] }
  0x88   : > { %1649 = vmatpush.msrb.mxu0 %v1073_v49  ;;  %1601 = vmatpush.msra.mxu2 %v893_v50  ;;  %v1143_v49 = vld [vmem:[#allocation7 + $0x8c8] sm:$0xff] }
  0x89   : > { %1577 = vmatpush.msrb.mxu1 %v1202_v48  ;;  %1627 = vmatpush.msrb.mxu3 %v973_v51  ;;  %v929_v48 = vld [vmem:[#allocation7 + $0x218] sm:$0xff]  ;;  %v1243_v50 = vld [vmem:[#allocation7 + $0xbe8] sm:$0xff]  ;;  %v924_v51 = vld [vmem:[#allocation7 + $0x1f0] sm:$0xff] }
  0x8a   : > { %1650 = vmatpush.msrb.mxu0 %v1068_v53  ;;  %1602 = vmatpush.msra.mxu2 %v888_v54  ;;  %v1019_v53 = vld [vmem:[#allocation7 + $0x4e8] sm:$0xff] }
  0x8b   : > { %1578 = vmatpush.msrb.mxu1 %v1197_v52  ;;  %1628 = vmatpush.msrb.mxu3 %v968_v55 }
  0x8c   : > { %1651 = vmatpush.msrb.mxu0 %v1063_v57  ;;  %1603 = vmatpush.msra.mxu2 %v883_v60  ;;  %v1238_v57 = vld [vmem:[#allocation7 + $0xbc0] sm:$0xff]  ;;  %v1133_v60 = vld [vmem:[#allocation7 + $0x878] sm:$0xff] }
  0x8d   : > { %1579 = vmatpush.msrb.mxu1 %v1192_v56  ;;  %1629 = vmatpush.msrb.mxu3 %v963_v61  ;;  %v1138_v56 = vld [vmem:[#allocation7 + $0x8a0] sm:$0xff]  ;;  %v1233_v61 = vld [vmem:[#allocation7 + $0xb98] sm:$0xff] }
  0x8e   : > { %1652 = vmatpush.msrb.mxu0 %v1058_v62  ;;  %1604 = vmatpush.msra.mxu2 %v878_v63  ;;  %v914_v62 = vld [vmem:[#allocation7 + $0x1a0] sm:$0xff]  ;;  %v1009_v63 = vld [vmem:[#allocation7 + $0x498] sm:$0xff] }
  0x8f   : > { %1580 = vmatpush.msrb.mxu1 %v1187_v58  ;;  %1630 = vmatpush.msrb.mxu3 %v958_v1  ;;  %v919_v58 = vld [vmem:[#allocation7 + $0x1c8] sm:$0xff]  ;;  %v1128_v1 = vld [vmem:[#allocation7 + $0x850] sm:$0xff] }
  0x90   : > { %1653 = vmatpush.msrb.mxu0 %v1053_v2  ;;  %1605 = vmatpush.msra.mxu2 %v873_v3  ;;  %v1228_v2 = vld [vmem:[#allocation7 + $0xb70] sm:$0xff]  ;;  %v909_v3 = vld [vmem:[#allocation7 + $0x178] sm:$0xff] }
  0x91   : > { %1581 = vmatpush.msrb.mxu1 %v1182_v59  ;;  %1631 = vmatpush.msrb.mxu3 %v953_v5  ;;  %v1014_v59 = vld [vmem:[#allocation7 + $0x4c0] sm:$0xff]  ;;  %v1004_v5 = vld [vmem:[#allocation7 + $0x470] sm:$0xff] }
  0x92   : > { %1654 = vmatpush.msrb.mxu0 %v1048_v7  ;;  %1606 = vmatpush.msra.mxu2 %v868_v15  ;;  %v1123_v15 = vld [vmem:[#allocation7 + $0x828] sm:$0xff] }
  0x93   : > { %1632 = vmatpush.msrb.mxu3 %v948_v17  ;;  %v1223_v17 = vld [vmem:[#allocation7 + $0xb48] sm:$0xff] }
  0x94   : > { %1655 = vmatpush.msrb.mxu0 %v1043_v19  ;;  %1607 = vmatpush.msra.mxu2 %v863_v20  ;;  %v904_v19 = vld [vmem:[#allocation7 + $0x150] sm:$0xff]  ;;  %v999_v20 = vld [vmem:[#allocation7 + $0x448] sm:$0xff] }
  0x95   : > { %1633 = vmatpush.msrb.mxu3 %v943_v22 }
  0x96   : > { %1656 = vmatpush.msrb.mxu0 %v1038_v23 }
  0x98   : > { %1657 = vmatpush.msrb.mxu0 %v1033_v26 }
  0x9a   : > { %1658 = vmatpush.msrb.mxu0 %v1028_v29  ;;  %v1118_v29 = vld [vmem:[#allocation7 + $0x800] sm:$0xff] }
  0x9c   : > { %1659 = vmatpush.msrb.mxu0 %v1023_v31  ;;  %v1218_v31 = vld [vmem:[#allocation7 + $0xb20] sm:$0xff] }
  0xc5   : > { %v4536_v33 = vpop.f32.mrf.mxu0  ;;  %v4538_v34 = vpop.f32.mrf.mxu1 }
  0xc6   : > { %1478 = vmatmul.f32.vlgmr.msra.gmra.mxu1 %v4536_v33 }
  0xc7   : > { %1670 = vmatpush.msra.mxu1 %v1178_v24  ;;  %v899_v24 = vld [vmem:[#allocation7 + $0x128] sm:$0xff] }
  0xc9   : > { %1671 = vmatpush.msra.mxu1 %v1173_v35  ;;  %v994_v35 = vld [vmem:[#allocation7 + $0x420] sm:$0xff] }
  0xcb   : > { %1672 = vmatpush.msra.mxu1 %v1168_v36  ;;  %v1113_v36 = vld [vmem:[#allocation7 + $0x7d8] sm:$0xff] }
  0xcc   : > { %v4541_v38 = vpop.f32.mrf.mxu3 }
  0xcd   : > { %1673 = vmatpush.msra.mxu1 %v1163_v37  ;;  %v4543_v40 = vpop.f32.mrf.mxu1  ;;  %v1213_v37 = vld [vmem:[#allocation7 + $0xaf8] sm:$0xff] }
  0xce   : > { %v4545_v43 = vpop.f32.mrf.mxu2  ;;  %1481 = vmatmul.f32.gmra.mxu1 %v4538_v34  ;;  %1504 = vmatmul.f32.vlgmr.msrb.gmra.mxu2 %v4543_v40 }
  0xcf   : > { %1530 = vmatmul.f32.vlgmr.msra.gmra.mxu3 %v4545_v43  ;;  %1674 = vmatpush.msra.mxu1 %v1158_v39  ;;  %v894_v39 = vld [vmem:[#allocation7 + $0x100] sm:$0xff] }
  0xd0   : > { %1696 = vmatpush.msrb.mxu2 %v1258_v41  ;;  %1722 = vmatpush.msra.mxu3 %v939_v42  ;;  %v989_v41 = vld [vmem:[#allocation7 + $0x3f8] sm:$0xff]  ;;  %v1108_v42 = vld [vmem:[#allocation7 + $0x7b0] sm:$0xff] }
  0xd1   : > { %1675 = vmatpush.msra.mxu1 %v1153_v44  ;;  %v1208_v44 = vld [vmem:[#allocation7 + $0xad0] sm:$0xff] }
  0xd2   : > { %1697 = vmatpush.msrb.mxu2 %v1253_v45  ;;  %1723 = vmatpush.msra.mxu3 %v934_v46  ;;  %v889_v45 = vld [vmem:[#allocation7 + $0xd8] sm:$0xff]  ;;  %v984_v46 = vld [vmem:[#allocation7 + $0x3d0] sm:$0xff] }
  0xd3   : > { %1676 = vmatpush.msra.mxu1 %v1148_v47 }
  0xd4   : > { %1698 = vmatpush.msrb.mxu2 %v1248_v27  ;;  %1724 = vmatpush.msra.mxu3 %v929_v48  ;;  %v4550_v52 = vpop.f32.mrf.mxu3  ;;  %v1103_v27 = vld [vmem:[#allocation7 + $0x788] sm:$0xff] }
  0xd5   : > { %1556 = vmatmul.f32.vlgmr.msra.gmra.mxu0 %v4550_v52  ;;  %1677 = vmatpush.msra.mxu1 %v1143_v49  ;;  %v4553_v54 = vpop.f32.mrf.mxu1  ;;  %v4567_v26 = vpop.f32.mrf.mxu0  ;;  %v1203_v48 = vld [vmem:[#allocation7 + $0xaa8] sm:$0xff]  ;;  %v884_v49 = vld [vmem:[#allocation7 + $0xb0] sm:$0xff] }
  0xd6   : > { %1699 = vmatpush.msrb.mxu2 %v1243_v50  ;;  %1725 = vmatpush.msra.mxu3 %v924_v51  ;;  %v4555_v55 = vpop.f32.mrf.mxu2  ;;  %v979_v50 = vld [vmem:[#allocation7 + $0x3a8] sm:$0xff] }
  0xd7   : > { %1748 = vmatpush.msra.mxu0 %v1019_v53  ;;  %1484 = vmatmul.f32.gmra.mxu1 %v4541_v38  ;;  %v1099_v51 = vld [vmem:[#allocation7 + $0x768] sm:$0xff] }
  0xd8   : > { %1507 = vmatmul.f32.gmra.mxu2 %v4553_v54  ;;  %1533 = vmatmul.f32.gmra.mxu3 %v4555_v55 }
  0xd9   : > { %1678 = vmatpush.msra.mxu1 %v1138_v56  ;;  %1700 = vmatpush.msrb.mxu2 %v1238_v57  ;;  %v1198_v56 = vld [vmem:[#allocation7 + $0xa80] sm:$0xff]  ;;  %v879_v57 = vld [vmem:[#allocation7 + $0x88] sm:$0xff] }
  0xda   : > { %1726 = vmatpush.msra.mxu3 %v919_v58  ;;  %1749 = vmatpush.msra.mxu0 %v1014_v59  ;;  %v974_v58 = vld [vmem:[#allocation7 + $0x380] sm:$0xff] }
  0xdb   : > { %1679 = vmatpush.msra.mxu1 %v1133_v60  ;;  %1701 = vmatpush.msrb.mxu2 %v1233_v61  ;;  %v1094_v59 = vld [vmem:[#allocation7 + $0x740] sm:$0xff]  ;;  %v1193_v60 = vld [vmem:[#allocation7 + $0xa58] sm:$0xff] }
  0xdc   : > { %1727 = vmatpush.msra.mxu3 %v914_v62  ;;  %1750 = vmatpush.msra.mxu0 %v1009_v63  ;;  %v4560_v7 = vpop.f32.mrf.mxu3  ;;  %v874_v61 = vld [vmem:[#allocation7 + $0x60] sm:$0xff]  ;;  %v969_v62 = vld [vmem:[#allocation7 + $0x358] sm:$0xff] }
  0xdd   : > { %1680 = vmatpush.msra.mxu1 %v1128_v1  ;;  %1702 = vmatpush.msrb.mxu2 %v1228_v2  ;;  %v4562_v22 = vpop.f32.mrf.mxu1  ;;  %v4575_v53 = vpop.f32.mrf.mxu0  ;;  %v1089_v63 = vld [vmem:[#allocation7 + $0x718] sm:$0xff]  ;;  %v1188_v1 = vld [vmem:[#allocation7 + $0xa30] sm:$0xff] }
  0xde   : > { %1728 = vmatpush.msra.mxu3 %v909_v3  ;;  %1751 = vmatpush.msra.mxu0 %v1004_v5  ;;  %v4565_v23 = vpop.f32.mrf.mxu2  ;;  %v869_v2 = vld [vmem:[#allocation7 + $0x38] sm:$0xff]  ;;  %v964_v3 = vld [vmem:[#allocation7 + $0x330] sm:$0xff] }
  0xdf   : > { %1559 = vmatmul.f32.gmra.mxu0 %v4560_v7  ;;  %1681 = vmatpush.msra.mxu1 %v1123_v15  ;;  %v1084_v5 = vld [vmem:[#allocation7 + $0x6f0] sm:$0xff]  ;;  %v1183_v15 = vld [vmem:[#allocation7 + $0xa08] sm:$0xff] }
  0xe0   : > { %1703 = vmatpush.msrb.mxu2 %v1223_v17  ;;  %1729 = vmatpush.msra.mxu3 %v904_v19  ;;  %v864_v17 = vld [vmem:[#allocation7 + $0x10] sm:$0xff]  ;;  %v959_v19 = vld [vmem:[#allocation7 + $0x308] sm:$0xff] }
  0xe1   : > { %1752 = vmatpush.msra.mxu0 %v999_v20  ;;  %1510 = vmatmul.f32.gmra.mxu2 %v4562_v22  ;;  %v1079_v20 = vld [vmem:[#allocation7 + $0x6c8] sm:$0xff] }
  0xe2   : > { %1536 = vmatmul.f32.gmra.mxu3 %v4565_v23  ;;  %1582 = vmatmul.f32.vlgmr.msrb.gmra.mxu1 %v4567_v26 }
  0xe3   : > { %1682 = vmatpush.msra.mxu1 %v1118_v29  ;;  %1704 = vmatpush.msrb.mxu2 %v1218_v31  ;;  %v1179_v29 = vld [vmem:[#allocation7 + $0x9e8] sm:$0xff] }
  0xe4   : > { %1730 = vmatpush.msra.mxu3 %v899_v24  ;;  %1753 = vmatpush.msra.mxu0 %v994_v35  ;;  %v4572_v47 = vpop.f32.mrf.mxu3  ;;  %v1259_v31 = vld [vmem:[#allocation7 + $0xc68] sm:$0xff]  ;;  %v954_v35 = vld [vmem:[#allocation7 + $0x2e0] sm:$0xff] }
  0xe5   : > { %1683 = vmatpush.msra.mxu1 %v1113_v36  ;;  %1705 = vmatpush.msrb.mxu2 %v1213_v37  ;;  %v4581_v24 = vpop.f32.mrf.mxu0  ;;  %v1074_v36 = vld [vmem:[#allocation7 + $0x6a0] sm:$0xff] }
  0xe6   : > { %1731 = vmatpush.msra.mxu3 %v894_v39  ;;  %1754 = vmatpush.msra.mxu0 %v989_v41  ;;  %v1174_v37 = vld [vmem:[#allocation7 + $0x9c0] sm:$0xff]  ;;  %v949_v41 = vld [vmem:[#allocation7 + $0x2b8] sm:$0xff] }
  0xe7   : > { %1684 = vmatpush.msra.mxu1 %v1108_v42  ;;  %1706 = vmatpush.msrb.mxu2 %v1208_v44  ;;  %v1254_v39 = vld [vmem:[#allocation7 + $0xc40] sm:$0xff]  ;;  %v1069_v42 = vld [vmem:[#allocation7 + $0x678] sm:$0xff] }
  0xe8   : > { %1732 = vmatpush.msra.mxu3 %v889_v45  ;;  %1755 = vmatpush.msra.mxu0 %v984_v46  ;;  %v1169_v44 = vld [vmem:[#allocation7 + $0x998] sm:$0xff]  ;;  %v944_v46 = vld [vmem:[#allocation7 + $0x290] sm:$0xff] }
  0xe9   : > { %1562 = vmatmul.f32.gmra.mxu0 %v4572_v47  ;;  %1685 = vmatpush.msra.mxu1 %v1103_v27  ;;  %v1249_v45 = vld [vmem:[#allocation7 + $0xc18] sm:$0xff]  ;;  %v1064_v27 = vld [vmem:[#allocation7 + $0x650] sm:$0xff] }
  0xea   : > { %1707 = vmatpush.msrb.mxu2 %v1203_v48  ;;  %1733 = vmatpush.msra.mxu3 %v884_v49  ;;  %v1164_v48 = vld [vmem:[#allocation7 + $0x970] sm:$0xff] }
  0xeb   : > { %1756 = vmatpush.msra.mxu0 %v979_v50  ;;  %1774 = vmatpush.msrb.mxu1 %v1099_v51  ;;  %v1244_v49 = vld [vmem:[#allocation7 + $0xbf0] sm:$0xff]  ;;  %v1059_v51 = vld [vmem:[#allocation7 + $0x628] sm:$0xff] }
  0xec   : > { %1585 = vmatmul.f32.gmra.mxu1 %v4575_v53  ;;  %1608 = vmatmul.f32.vlgmr.msra.gmra.mxu2 %v4536_v33  ;;  %v940_v50 = vld [vmem:[#allocation7 + $0x270] sm:$0xff] }
  0xed   : > { %1634 = vmatmul.f32.vlgmr.msrb.gmra.mxu3 %v4543_v40  ;;  %1708 = vmatpush.msrb.mxu2 %v1198_v56  ;;  %v1159_v56 = vld [vmem:[#allocation7 + $0x948] sm:$0xff] }
  0xee   : > { %1734 = vmatpush.msra.mxu3 %v879_v57  ;;  %1757 = vmatpush.msra.mxu0 %v974_v58  ;;  %v1239_v57 = vld [vmem:[#allocation7 + $0xbc8] sm:$0xff] }
  0xef   : > { %1775 = vmatpush.msrb.mxu1 %v1094_v59  ;;  %1709 = vmatpush.msrb.mxu2 %v1193_v60  ;;  %v935_v58 = vld [vmem:[#allocation7 + $0x248] sm:$0xff]  ;;  %v1054_v59 = vld [vmem:[#allocation7 + $0x600] sm:$0xff] }
  0xf0   : > { %1735 = vmatpush.msra.mxu3 %v874_v61  ;;  %1758 = vmatpush.msra.mxu0 %v969_v62  ;;  %v1154_v60 = vld [vmem:[#allocation7 + $0x920] sm:$0xff] }
  0xf1   : > { %1776 = vmatpush.msrb.mxu1 %v1089_v63  ;;  %1710 = vmatpush.msrb.mxu2 %v1188_v1  ;;  %v1234_v61 = vld [vmem:[#allocation7 + $0xba0] sm:$0xff]  ;;  %v1049_v63 = vld [vmem:[#allocation7 + $0x5d8] sm:$0xff] }
  0xf2   : > { %1736 = vmatpush.msra.mxu3 %v869_v2  ;;  %1759 = vmatpush.msra.mxu0 %v964_v3  ;;  %v930_v62 = vld [vmem:[#allocation7 + $0x220] sm:$0xff]  ;;  %v1149_v1 = vld [vmem:[#allocation7 + $0x8f8] sm:$0xff] }
  0xf3   : > { %1777 = vmatpush.msrb.mxu1 %v1084_v5  ;;  %1660 = vmatmul.f32.vlgmr.msrb.gmra.mxu0 %v4545_v43  ;;  %v1229_v2 = vld [vmem:[#allocation7 + $0xb78] sm:$0xff]  ;;  %v1044_v5 = vld [vmem:[#allocation7 + $0x5b0] sm:$0xff] }
  0xf4   : > { %1711 = vmatpush.msrb.mxu2 %v1183_v15  ;;  %1737 = vmatpush.msra.mxu3 %v864_v17  ;;  %v925_v3 = vld [vmem:[#allocation7 + $0x1f8] sm:$0xff]  ;;  %v1144_v15 = vld [vmem:[#allocation7 + $0x8d0] sm:$0xff] }
  0xf5   : > { %1760 = vmatpush.msra.mxu0 %v959_v19  ;;  %1778 = vmatpush.msrb.mxu1 %v1079_v20  ;;  %v1224_v17 = vld [vmem:[#allocation7 + $0xb50] sm:$0xff]  ;;  %v1039_v20 = vld [vmem:[#allocation7 + $0x588] sm:$0xff] }
  0xf6   : > { %1800 = vmatpush.msra.mxu2 %v1179_v29  ;;  %1826 = vmatpush.msrb.mxu3 %v1259_v31  ;;  %v920_v19 = vld [vmem:[#allocation7 + $0x1d0] sm:$0xff]  ;;  %v1139_v29 = vld [vmem:[#allocation7 + $0x8a8] sm:$0xff] }
  0xf7   : > { %1588 = vmatmul.f32.gmra.mxu1 %v4581_v24  ;;  %1611 = vmatmul.f32.gmra.mxu2 %v4538_v34  ;;  %v1219_v31 = vld [vmem:[#allocation7 + $0xb28] sm:$0xff] }
  0xf8   : > { %1637 = vmatmul.f32.gmra.mxu3 %v4553_v54  ;;  %1761 = vmatpush.msra.mxu0 %v954_v35  ;;  %v915_v35 = vld [vmem:[#allocation7 + $0x1a8] sm:$0xff] }
  0xf9   : > { %1779 = vmatpush.msrb.mxu1 %v1074_v36  ;;  %1801 = vmatpush.msra.mxu2 %v1174_v37  ;;  %v1034_v36 = vld [vmem:[#allocation7 + $0x560] sm:$0xff] }
  0xfa   : > { %1827 = vmatpush.msrb.mxu3 %v1254_v39  ;;  %1762 = vmatpush.msra.mxu0 %v949_v41  ;;  %v1134_v37 = vld [vmem:[#allocation7 + $0x880] sm:$0xff] }
  0xfb   : > { %1780 = vmatpush.msrb.mxu1 %v1069_v42  ;;  %1802 = vmatpush.msra.mxu2 %v1169_v44  ;;  %v1214_v39 = vld [vmem:[#allocation7 + $0xb00] sm:$0xff]  ;;  %v1029_v42 = vld [vmem:[#allocation7 + $0x538] sm:$0xff] }
  0xfc   : > { %1828 = vmatpush.msrb.mxu3 %v1249_v45  ;;  %1763 = vmatpush.msra.mxu0 %v944_v46  ;;  %v910_v41 = vld [vmem:[#allocation7 + $0x180] sm:$0xff]  ;;  %v1129_v44 = vld [vmem:[#allocation7 + $0x858] sm:$0xff] }
  0xfd   : > { %1781 = vmatpush.msrb.mxu1 %v1064_v27  ;;  %1803 = vmatpush.msra.mxu2 %v1164_v48  ;;  %v1209_v45 = vld [vmem:[#allocation7 + $0xad8] sm:$0xff]  ;;  %v1024_v27 = vld [vmem:[#allocation7 + $0x510] sm:$0xff] }
  0xfe   : > { %1829 = vmatpush.msrb.mxu3 %v1244_v49  ;;  %1852 = vmatpush.msrb.mxu0 %v940_v50  ;;  %v905_v46 = vld [vmem:[#allocation7 + $0x158] sm:$0xff]  ;;  %v1124_v48 = vld [vmem:[#allocation7 + $0x830] sm:$0xff] }
  0xff   : > { %1663 = vmatmul.f32.gmra.mxu0 %v4555_v55  ;;  %1782 = vmatpush.msrb.mxu1 %v1059_v51  ;;  %v1204_v49 = vld [vmem:[#allocation7 + $0xab0] sm:$0xff] }
 0x100   : > { %1804 = vmatpush.msra.mxu2 %v1159_v56  ;;  %1830 = vmatpush.msrb.mxu3 %v1239_v57  ;;  %v900_v50 = vld [vmem:[#allocation7 + $0x130] sm:$0xff]  ;;  %v1119_v56 = vld [vmem:[#allocation7 + $0x808] sm:$0xff] }
 0x101   : > { %1853 = vmatpush.msrb.mxu0 %v935_v58  ;;  %1614 = vmatmul.f32.gmra.mxu2 %v4541_v38  ;;  %v1020_v51 = vld [vmem:[#allocation7 + $0x4f0] sm:$0xff]  ;;  %v1199_v57 = vld [vmem:[#allocation7 + $0xa88] sm:$0xff] }
 0x102   : > { %1640 = vmatmul.f32.gmra.mxu3 %v4562_v22  ;;  %1686 = vmatmul.f32.vlgmr.msra.gmra.mxu1 %v4550_v52  ;;  %v895_v58 = vld [vmem:[#allocation7 + $0x108] sm:$0xff] }
 0x103   : > { %1783 = vmatpush.msrb.mxu1 %v1054_v59  ;;  %1805 = vmatpush.msra.mxu2 %v1154_v60  ;;  %v1015_v59 = vld [vmem:[#allocation7 + $0x4c8] sm:$0xff]  ;;  %v1114_v60 = vld [vmem:[#allocation7 + $0x7e0] sm:$0xff] }
 0x104   : > { %1831 = vmatpush.msrb.mxu3 %v1234_v61  ;;  %1854 = vmatpush.msrb.mxu0 %v930_v62  ;;  %v1194_v61 = vld [vmem:[#allocation7 + $0xa60] sm:$0xff] }
 0x105   : > { %1784 = vmatpush.msrb.mxu1 %v1049_v63  ;;  %1806 = vmatpush.msra.mxu2 %v1149_v1  ;;  %v890_v62 = vld [vmem:[#allocation7 + $0xe0] sm:$0xff]  ;;  %v1109_v1 = vld [vmem:[#allocation7 + $0x7b8] sm:$0xff] }
 0x106   : > { %1832 = vmatpush.msrb.mxu3 %v1229_v2  ;;  %1855 = vmatpush.msrb.mxu0 %v925_v3  ;;  %v1010_v63 = vld [vmem:[#allocation7 + $0x4a0] sm:$0xff]  ;;  %v1189_v2 = vld [vmem:[#allocation7 + $0xa38] sm:$0xff] }
 0x107   : > { %1785 = vmatpush.msrb.mxu1 %v1044_v5  ;;  %1807 = vmatpush.msra.mxu2 %v1144_v15  ;;  %v885_v3 = vld [vmem:[#allocation7 + $0xb8] sm:$0xff]  ;;  %v1104_v15 = vld [vmem:[#allocation7 + $0x790] sm:$0xff] }
 0x108   : > { %1833 = vmatpush.msrb.mxu3 %v1224_v17  ;;  %1856 = vmatpush.msrb.mxu0 %v920_v19  ;;  %v1005_v5 = vld [vmem:[#allocation7 + $0x478] sm:$0xff]  ;;  %v1184_v17 = vld [vmem:[#allocation7 + $0xa10] sm:$0xff] }
 0x109   : > { %1666 = vmatmul.f32.gmra.mxu0 %v4565_v23  ;;  %1786 = vmatpush.msrb.mxu1 %v1039_v20  ;;  %v880_v19 = vld [vmem:[#allocation7 + $0x90] sm:$0xff] }
 0x10a   : > { %1808 = vmatpush.msra.mxu2 %v1139_v29  ;;  %1834 = vmatpush.msrb.mxu3 %v1219_v31  ;;  %v1000_v20 = vld [vmem:[#allocation7 + $0x450] sm:$0xff] }
 0x10b   : > { %1857 = vmatpush.msrb.mxu0 %v915_v35  ;;  %1689 = vmatmul.f32.gmra.mxu1 %v4560_v7  ;;  %v1100_v29 = vld [vmem:[#allocation7 + $0x770] sm:$0xff]  ;;  %v875_v35 = vld [vmem:[#allocation7 + $0x68] sm:$0xff] }
 0x10c   : > { %1712 = vmatmul.f32.vlgmr.msrb.gmra.mxu2 %v4567_v26  ;;  %1738 = vmatmul.f32.vlgmr.msra.gmra.mxu3 %v4536_v33  ;;  %v1180_v31 = vld [vmem:[#allocation7 + $0x9f0] sm:$0xff] }
 0x10d   : > { %1787 = vmatpush.msrb.mxu1 %v1034_v36  ;;  %1809 = vmatpush.msra.mxu2 %v1134_v37  ;;  %v995_v36 = vld [vmem:[#allocation7 + $0x428] sm:$0xff] }
 0x10e   : > { %1835 = vmatpush.msrb.mxu3 %v1214_v39  ;;  %1858 = vmatpush.msrb.mxu0 %v910_v41  ;;  %v1095_v37 = vld [vmem:[#allocation7 + $0x748] sm:$0xff]  ;;  %v870_v41 = vld [vmem:[#allocation7 + $0x40] sm:$0xff] }
 0x10f   : > { %1788 = vmatpush.msrb.mxu1 %v1029_v42  ;;  %1810 = vmatpush.msra.mxu2 %v1129_v44  ;;  %v1175_v39 = vld [vmem:[#allocation7 + $0x9c8] sm:$0xff]  ;;  %v990_v42 = vld [vmem:[#allocation7 + $0x400] sm:$0xff] }
 0x110   : > { %1836 = vmatpush.msrb.mxu3 %v1209_v45  ;;  %1859 = vmatpush.msrb.mxu0 %v905_v46  ;;  %v1090_v44 = vld [vmem:[#allocation7 + $0x720] sm:$0xff]  ;;  %v865_v46 = vld [vmem:[#allocation7 + $0x18] sm:$0xff] }
 0x111   : > { %1789 = vmatpush.msrb.mxu1 %v1024_v27  ;;  %1811 = vmatpush.msra.mxu2 %v1124_v48  ;;  %v1170_v45 = vld [vmem:[#allocation7 + $0x9a0] sm:$0xff]  ;;  %v985_v27 = vld [vmem:[#allocation7 + $0x3d8] sm:$0xff] }
 0x112   : > { %1837 = vmatpush.msrb.mxu3 %v1204_v49  ;;  %1860 = vmatpush.msrb.mxu0 %v900_v50  ;;  %v1085_v48 = vld [vmem:[#allocation7 + $0x6f8] sm:$0xff]  ;;  %v1260_v50 = vld [vmem:[#allocation7 + $0xc70] sm:$0xff] }
 0x113   : > { %1764 = vmatmul.f32.vlgmr.msra.gmra.mxu0 %v4543_v40  ;;  %1878 = vmatpush.msra.mxu1 %v1020_v51  ;;  %v1165_v49 = vld [vmem:[#allocation7 + $0x978] sm:$0xff]  ;;  %v980_v51 = vld [vmem:[#allocation7 + $0x3b0] sm:$0xff] }
 0x114   : > { %1812 = vmatpush.msra.mxu2 %v1119_v56  ;;  %1838 = vmatpush.msrb.mxu3 %v1199_v57  ;;  %v1080_v56 = vld [vmem:[#allocation7 + $0x6d0] sm:$0xff] }
 0x115   : > { %1861 = vmatpush.msrb.mxu0 %v895_v58  ;;  %1692 = vmatmul.f32.gmra.mxu1 %v4572_v47  ;;  %v1160_v57 = vld [vmem:[#allocation7 + $0x950] sm:$0xff]  ;;  %v1255_v58 = vld [vmem:[#allocation7 + $0xc48] sm:$0xff] }
 0x116   : > { %1715 = vmatmul.f32.gmra.mxu2 %v4575_v53  ;;  %1741 = vmatmul.f32.gmra.mxu3 %v4538_v34 }
 0x117   : > { %1879 = vmatpush.msra.mxu1 %v1015_v59  ;;  %1813 = vmatpush.msra.mxu2 %v1114_v60  ;;  %v975_v59 = vld [vmem:[#allocation7 + $0x388] sm:$0xff] }
 0x118   : > { %1839 = vmatpush.msrb.mxu3 %v1194_v61  ;;  %1862 = vmatpush.msrb.mxu0 %v890_v62  ;;  %v1075_v60 = vld [vmem:[#allocation7 + $0x6a8] sm:$0xff]  ;;  %v1250_v62 = vld [vmem:[#allocation7 + $0xc20] sm:$0xff] }
 0x119   : > { %1880 = vmatpush.msra.mxu1 %v1010_v63  ;;  %1814 = vmatpush.msra.mxu2 %v1109_v1  ;;  %v1155_v61 = vld [vmem:[#allocation7 + $0x928] sm:$0xff]  ;;  %v970_v63 = vld [vmem:[#allocation7 + $0x360] sm:$0xff] }
 0x11a   : > { %1840 = vmatpush.msrb.mxu3 %v1189_v2  ;;  %1863 = vmatpush.msrb.mxu0 %v885_v3  ;;  %v1070_v1 = vld [vmem:[#allocation7 + $0x680] sm:$0xff]  ;;  %v1245_v3 = vld [vmem:[#allocation7 + $0xbf8] sm:$0xff] }
 0x11b   : > { %1881 = vmatpush.msra.mxu1 %v1005_v5  ;;  %1815 = vmatpush.msra.mxu2 %v1104_v15  ;;  %v1150_v2 = vld [vmem:[#allocation7 + $0x900] sm:$0xff]  ;;  %v965_v5 = vld [vmem:[#allocation7 + $0x338] sm:$0xff] }
 0x11c   : > { %1841 = vmatpush.msrb.mxu3 %v1184_v17  ;;  %1864 = vmatpush.msrb.mxu0 %v880_v19  ;;  %v1065_v15 = vld [vmem:[#allocation7 + $0x658] sm:$0xff]  ;;  %v1240_v19 = vld [vmem:[#allocation7 + $0xbd0] sm:$0xff] }
 0x11d   : > { %1767 = vmatmul.f32.gmra.mxu0 %v4553_v54  ;;  %1882 = vmatpush.msra.mxu1 %v1000_v20  ;;  %v1145_v17 = vld [vmem:[#allocation7 + $0x8d8] sm:$0xff]  ;;  %v960_v20 = vld [vmem:[#allocation7 + $0x310] sm:$0xff] }
 0x11e   : > { %1904 = vmatpush.msrb.mxu2 %v1100_v29  ;;  %1930 = vmatpush.msra.mxu3 %v1180_v31  ;;  %v1060_v29 = vld [vmem:[#allocation7 + $0x630] sm:$0xff] }
 0x11f   : > { %1865 = vmatpush.msrb.mxu0 %v875_v35  ;;  %1718 = vmatmul.f32.gmra.mxu2 %v4581_v24  ;;  %v1140_v31 = vld [vmem:[#allocation7 + $0x8b0] sm:$0xff]  ;;  %v1235_v35 = vld [vmem:[#allocation7 + $0xba8] sm:$0xff] }
 0x120   : > { %1744 = vmatmul.f32.gmra.mxu3 %v4541_v38  ;;  %1790 = vmatmul.f32.vlgmr.msrb.gmra.mxu1 %v4545_v43 }
 0x121   : > { %1883 = vmatpush.msra.mxu1 %v995_v36  ;;  %1905 = vmatpush.msrb.mxu2 %v1095_v37  ;;  %v955_v36 = vld [vmem:[#allocation7 + $0x2e8] sm:$0xff] }
 0x122   : > { %1931 = vmatpush.msra.mxu3 %v1175_v39  ;;  %1866 = vmatpush.msrb.mxu0 %v870_v41  ;;  %v1055_v37 = vld [vmem:[#allocation7 + $0x608] sm:$0xff]  ;;  %v1230_v41 = vld [vmem:[#allocation7 + $0xb80] sm:$0xff] }
 0x123   : > { %1884 = vmatpush.msra.mxu1 %v990_v42  ;;  %1906 = vmatpush.msrb.mxu2 %v1090_v44  ;;  %v1135_v39 = vld [vmem:[#allocation7 + $0x888] sm:$0xff]  ;;  %v950_v42 = vld [vmem:[#allocation7 + $0x2c0] sm:$0xff] }
 0x124   : > { %1932 = vmatpush.msra.mxu3 %v1170_v45  ;;  %1867 = vmatpush.msrb.mxu0 %v865_v46  ;;  %v1050_v44 = vld [vmem:[#allocation7 + $0x5e0] sm:$0xff]  ;;  %v1225_v46 = vld [vmem:[#allocation7 + $0xb58] sm:$0xff] }
 0x125   : > { %1885 = vmatpush.msra.mxu1 %v985_v27  ;;  %1907 = vmatpush.msrb.mxu2 %v1085_v48  ;;  %v1130_v45 = vld [vmem:[#allocation7 + $0x860] sm:$0xff]  ;;  %v945_v27 = vld [vmem:[#allocation7 + $0x298] sm:$0xff] }
 0x126   : > { %1933 = vmatpush.msra.mxu3 %v1165_v49  ;;  %1956 = vmatpush.msra.mxu0 %v1260_v50  ;;  %v1045_v48 = vld [vmem:[#allocation7 + $0x5b8] sm:$0xff]  ;;  %v1220_v50 = vld [vmem:[#allocation7 + $0xb30] sm:$0xff] }
 0x127   : > { %1770 = vmatmul.f32.gmra.mxu0 %v4562_v22  ;;  %1886 = vmatpush.msra.mxu1 %v980_v51  ;;  %v1125_v49 = vld [vmem:[#allocation7 + $0x838] sm:$0xff] }
 0x128   : > { %1908 = vmatpush.msrb.mxu2 %v1080_v56  ;;  %1934 = vmatpush.msra.mxu3 %v1160_v57  ;;  %v941_v51 = vld [vmem:[#allocation7 + $0x278] sm:$0xff]  ;;  %v1040_v56 = vld [vmem:[#allocation7 + $0x590] sm:$0xff] }
 0x129   : > { %1957 = vmatpush.msra.mxu0 %v1255_v58  ;;  %1793 = vmatmul.f32.gmra.mxu1 %v4555_v55  ;;  %v1120_v57 = vld [vmem:[#allocation7 + $0x810] sm:$0xff]  ;;  %v1215_v58 = vld [vmem:[#allocation7 + $0xb08] sm:$0xff] }
 0x12a   : > { %1816 = vmatmul.f32.vlgmr.msra.gmra.mxu2 %v4550_v52  ;;  %1842 = vmatmul.f32.vlgmr.msrb.gmra.mxu3 %v4567_v26 }
 0x12b   : > { %1887 = vmatpush.msra.mxu1 %v975_v59  ;;  %1909 = vmatpush.msrb.mxu2 %v1075_v60  ;;  %v936_v59 = vld [vmem:[#allocation7 + $0x250] sm:$0xff]  ;;  %v1035_v60 = vld [vmem:[#allocation7 + $0x568] sm:$0xff] }
 0x12c   : > { %1935 = vmatpush.msra.mxu3 %v1155_v61  ;;  %1958 = vmatpush.msra.mxu0 %v1250_v62  ;;  %v1115_v61 = vld [vmem:[#allocation7 + $0x7e8] sm:$0xff]  ;;  %v1210_v62 = vld [vmem:[#allocation7 + $0xae0] sm:$0xff] }
 0x12d   : > { %1888 = vmatpush.msra.mxu1 %v970_v63  ;;  %1910 = vmatpush.msrb.mxu2 %v1070_v1  ;;  %v931_v63 = vld [vmem:[#allocation7 + $0x228] sm:$0xff]  ;;  %v1030_v1 = vld [vmem:[#allocation7 + $0x540] sm:$0xff] }
 0x12e   : > { %1936 = vmatpush.msra.mxu3 %v1150_v2  ;;  %1959 = vmatpush.msra.mxu0 %v1245_v3  ;;  %v1110_v2 = vld [vmem:[#allocation7 + $0x7c0] sm:$0xff]  ;;  %v1205_v3 = vld [vmem:[#allocation7 + $0xab8] sm:$0xff] }
 0x12f   : > { %1889 = vmatpush.msra.mxu1 %v965_v5  ;;  %1911 = vmatpush.msrb.mxu2 %v1065_v15  ;;  %v926_v5 = vld [vmem:[#allocation7 + $0x200] sm:$0xff]  ;;  %v1025_v15 = vld [vmem:[#allocation7 + $0x518] sm:$0xff] }
 0x130   : > { %1937 = vmatpush.msra.mxu3 %v1145_v17  ;;  %1960 = vmatpush.msra.mxu0 %v1240_v19  ;;  %v1105_v17 = vld [vmem:[#allocation7 + $0x798] sm:$0xff]  ;;  %v1200_v19 = vld [vmem:[#allocation7 + $0xa90] sm:$0xff] }
 0x131   : > { %1868 = vmatmul.f32.vlgmr.msrb.gmra.mxu0 %v4536_v33  ;;  %1890 = vmatpush.msra.mxu1 %v960_v20  ;;  %v921_v20 = vld [vmem:[#allocation7 + $0x1d8] sm:$0xff] }
 0x132   : > { %1912 = vmatpush.msrb.mxu2 %v1060_v29  ;;  %1938 = vmatpush.msra.mxu3 %v1140_v31  ;;  %v1021_v29 = vld [vmem:[#allocation7 + $0x4f8] sm:$0xff] }
 0x133   : > { %1961 = vmatpush.msra.mxu0 %v1235_v35  ;;  %1796 = vmatmul.f32.gmra.mxu1 %v4565_v23  ;;  %v1101_v31 = vld [vmem:[#allocation7 + $0x778] sm:$0xff] }
 0x134   : > { %1819 = vmatmul.f32.gmra.mxu2 %v4560_v7  ;;  %1845 = vmatmul.f32.gmra.mxu3 %v4575_v53 }
 0x135   : > { %1891 = vmatpush.msra.mxu1 %v955_v36  ;;  %1913 = vmatpush.msrb.mxu2 %v1055_v37  ;;  %v1195_v36 = vld [vmem:[#allocation7 + $0xa68] sm:$0xff]  ;;  %v916_v37 = vld [vmem:[#allocation7 + $0x1b0] sm:$0xff] }
 0x136   : > { %1939 = vmatpush.msra.mxu3 %v1135_v39  ;;  %1962 = vmatpush.msra.mxu0 %v1230_v41  ;;  %v1016_v39 = vld [vmem:[#allocation7 + $0x4d0] sm:$0xff] }
 0x137   : > { %1892 = vmatpush.msra.mxu1 %v950_v42  ;;  %1914 = vmatpush.msrb.mxu2 %v1050_v44  ;;  %v1096_v41 = vld [vmem:[#allocation7 + $0x750] sm:$0xff]  ;;  %v1190_v42 = vld [vmem:[#allocation7 + $0xa40] sm:$0xff]  ;;  %v911_v44 = vld [vmem:[#allocation7 + $0x188] sm:$0xff] }
 0x138   : > { %1940 = vmatpush.msra.mxu3 %v1130_v45  ;;  %1963 = vmatpush.msra.mxu0 %v1225_v46  ;;  %v1011_v45 = vld [vmem:[#allocation7 + $0x4a8] sm:$0xff] }
 0x139   : > { %1893 = vmatpush.msra.mxu1 %v945_v27  ;;  %1915 = vmatpush.msrb.mxu2 %v1045_v48  ;;  %v1091_v46 = vld [vmem:[#allocation7 + $0x728] sm:$0xff]  ;;  %v1185_v27 = vld [vmem:[#allocation7 + $0xa18] sm:$0xff]  ;;  %v906_v48 = vld [vmem:[#allocation7 + $0x160] sm:$0xff] }
 0x13a   : > { %1941 = vmatpush.msra.mxu3 %v1125_v49  ;;  %1964 = vmatpush.msra.mxu0 %v1220_v50  ;;  %v1006_v49 = vld [vmem:[#allocation7 + $0x480] sm:$0xff] }
 0x13b   : > { %1982 = vmatpush.msrb.mxu1 %v941_v51  ;;  %1871 = vmatmul.f32.gmra.mxu0 %v4538_v34  ;;  %v1086_v50 = vld [vmem:[#allocation7 + $0x700] sm:$0xff]  ;;  %v1181_v51 = vld [vmem:[#allocation7 + $0x9f8] sm:$0xff] }
 0x13c   : > { %1916 = vmatpush.msrb.mxu2 %v1040_v56  ;;  %1942 = vmatpush.msra.mxu3 %v1120_v57  ;;  %v901_v56 = vld [vmem:[#allocation7 + $0x138] sm:$0xff] }
 0x13d   : > { %1965 = vmatpush.msra.mxu0 %v1215_v58  ;;  %1983 = vmatpush.msrb.mxu1 %v936_v59  ;;  %v1001_v57 = vld [vmem:[#allocation7 + $0x458] sm:$0xff]  ;;  %v1176_v59 = vld [vmem:[#allocation7 + $0x9d0] sm:$0xff] }
 0x13e   : > { %1822 = vmatmul.f32.gmra.mxu2 %v4572_v47  ;;  %1848 = vmatmul.f32.gmra.mxu3 %v4581_v24  ;;  %v1081_v58 = vld [vmem:[#allocation7 + $0x6d8] sm:$0xff] }
 0x13f   : > { %1894 = vmatmul.f32.vlgmr.msra.gmra.mxu1 %v4543_v40  ;;  %1917 = vmatpush.msrb.mxu2 %v1035_v60 }
 0x140   : > { %1943 = vmatpush.msra.mxu3 %v1115_v61  ;;  %1966 = vmatpush.msra.mxu0 %v1210_v62  ;;  %v896_v61 = vld [vmem:[#allocation7 + $0x110] sm:$0xff] }
 0x141   : > { %1984 = vmatpush.msrb.mxu1 %v931_v63  ;;  %1918 = vmatpush.msrb.mxu2 %v1030_v1  ;;  %v996_v62 = vld [vmem:[#allocation7 + $0x430] sm:$0xff]  ;;  %v1171_v1 = vld [vmem:[#allocation7 + $0x9a8] sm:$0xff] }
 0x142   : > { %1944 = vmatpush.msra.mxu3 %v1110_v2  ;;  %1967 = vmatpush.msra.mxu0 %v1205_v3  ;;  %v1076_v63 = vld [vmem:[#allocation7 + $0x6b0] sm:$0xff]  ;;  %v891_v2 = vld [vmem:[#allocation7 + $0xe8] sm:$0xff] }
 0x143   : > { %1985 = vmatpush.msrb.mxu1 %v926_v5  ;;  %1919 = vmatpush.msrb.mxu2 %v1025_v15  ;;  %v4614_v35 = vpop.f32.mrf.mxu1  ;;  %v991_v3 = vld [vmem:[#allocation7 + $0x408] sm:$0xff]  ;;  %v1166_v15 = vld [vmem:[#allocation7 + $0x980] sm:$0xff] }
 0x144   : > { %1945 = vmatpush.msra.mxu3 %v1105_v17  ;;  %1968 = vmatpush.msra.mxu0 %v1200_v19  ;;  %v1071_v5 = vld [vmem:[#allocation7 + $0x688] sm:$0xff] }
 0x145   : > { %1986 = vmatpush.msrb.mxu1 %v921_v20  ;;  %2008 = vmatpush.msra.mxu2 %v1021_v29  ;;  %v886_v20 = vld [vmem:[#allocation7 + $0xc0] sm:$0xff] }
 0x146   : > { %2034 = vmatpush.msrb.mxu3 %v1101_v31  ;;  %1874 = vmatmul.f32.gmra.mxu0 %v4541_v38  ;;  %v986_v29 = vld [vmem:[#allocation7 + $0x3e0] sm:$0xff] }
 0x147   : > { %1969 = vmatpush.msra.mxu0 %v1195_v36  ;;  %1987 = vmatpush.msrb.mxu1 %v916_v37  ;;  %v1066_v36 = vld [vmem:[#allocation7 + $0x660] sm:$0xff]  ;;  %v1161_v37 = vld [vmem:[#allocation7 + $0x958] sm:$0xff] }
 0x148   : > { %2009 = vmatpush.msra.mxu2 %v1016_v39  ;;  %2035 = vmatpush.msrb.mxu3 %v1096_v41  ;;  %v881_v41 = vld [vmem:[#allocation7 + $0x98] sm:$0xff] }
 0x149   : > { %1897 = vmatmul.f32.gmra.mxu1 %v4553_v54  ;;  %1920 = vmatmul.f32.vlgmr.msrb.gmra.mxu2 %v4545_v43 }
 0x14a   : > { %1946 = vmatmul.f32.vlgmr.msra.gmra.mxu3 %v4550_v52  ;;  %1970 = vmatpush.msra.mxu0 %v1190_v42  ;;  %v981_v42 = vld [vmem:[#allocation7 + $0x3b8] sm:$0xff] }
 0x14b   : > { %1988 = vmatpush.msrb.mxu1 %v911_v44  ;;  %2010 = vmatpush.msra.mxu2 %v1011_v45  ;;  %v4620_v60 = vpop.f32.mrf.mxu1  ;;  %v1061_v44 = vld [vmem:[#allocation7 + $0x638] sm:$0xff]  ;;  %v1156_v45 = vld [vmem:[#allocation7 + $0x930] sm:$0xff] }
 0x14c   : > { %2036 = vmatpush.msrb.mxu3 %v1091_v46  ;;  %1971 = vmatpush.msra.mxu0 %v1185_v27  ;;  %v876_v46 = vld [vmem:[#allocation7 + $0x70] sm:$0xff] }
 0x14d   : > { %1989 = vmatpush.msrb.mxu1 %v906_v48  ;;  %2011 = vmatpush.msra.mxu2 %v1006_v49  ;;  %v976_v27 = vld [vmem:[#allocation7 + $0x390] sm:$0xff]  ;;  %v4643_v49 = vld [vmem:[%s4640_s20 + $0x8] sm:$0xff] }
 0x14e   : > { %2037 = vmatpush.msrb.mxu3 %v1086_v50  ;;  %2060 = vmatpush.msrb.mxu0 %v1181_v51  ;;  %v1056_v48 = vld [vmem:[#allocation7 + $0x610] sm:$0xff]  ;;  %v1151_v50 = vld [vmem:[#allocation7 + $0x908] sm:$0xff]  ;;  %2674 = vst.msk [vmem:[#allocation3 + $0x28] sm:$0xff] %vm2672_vm3, %v4643_v49 }
 0x14f   : > { %1990 = vmatpush.msrb.mxu1 %v901_v56  ;;  %2012 = vmatpush.msra.mxu2 %v1001_v57  ;;  %v871_v51 = vld [vmem:[#allocation7 + $0x48] sm:$0xff] }
 0x150   : > { %2038 = vmatpush.msrb.mxu3 %v1081_v58  ;;  %2061 = vmatpush.msrb.mxu0 %v1176_v59  ;;  %v971_v57 = vld [vmem:[#allocation7 + $0x368] sm:$0xff] }
 0x151   : > { %1972 = vmatmul.f32.vlgmr.msra.gmra.mxu0 %v4567_v26  ;;  %1991 = vmatpush.msrb.mxu1 %v896_v61  ;;  %v4624_v17 = vpop.f32.mrf.mxu2  ;;  %v1051_v58 = vld [vmem:[#allocation7 + $0x5e8] sm:$0xff]  ;;  %v1146_v61 = vld [vmem:[#allocation7 + $0x8e0] sm:$0xff] }
 0x152   : > { %2013 = vmatpush.msra.mxu2 %v996_v62  ;;  %2039 = vmatpush.msrb.mxu3 %v1076_v63  ;;  %v4626_v19 = vpop.f32.mrf.mxu3  ;;  %v4631_v31 = vpop.f32.mrf.mxu0  ;;  %v866_v62 = vld [vmem:[#allocation7 + $0x20] sm:$0xff] }
 0x153   : > { %2062 = vmatpush.msrb.mxu0 %v1171_v1  ;;  %1900 = vmatmul.f32.gmra.mxu1 %v4562_v22  ;;  %v966_v63 = vld [vmem:[#allocation7 + $0x340] sm:$0xff] }
 0x154   : > { %1923 = vmatmul.f32.gmra.mxu2 %v4555_v55  ;;  %1949 = vmatmul.f32.gmra.mxu3 %v4560_v7  ;;  %v4633_v39 = vpop.f32.mrf.mxu1  ;;  %v1046_v1 = vld [vmem:[#allocation7 + $0x5c0] sm:$0xff] }
 0x155   : > { %1992 = vmatpush.msrb.mxu1 %v891_v2  ;;  %2014 = vmatpush.msra.mxu2 %v991_v3  ;;  %v1141_v3 = vld [vmem:[#allocation7 + $0x8b8] sm:$0xff] }
 0x156   : > { %2040 = vmatpush.msrb.mxu3 %v1071_v5  ;;  %2063 = vmatpush.msrb.mxu0 %v1166_v15  ;;  %v1261_v15 = vld [vmem:[#allocation7 + $0xc78] sm:$0xff] }
 0x157   : > { %1993 = vmatpush.msrb.mxu1 %v886_v20  ;;  %2015 = vmatpush.msra.mxu2 %v986_v29  ;;  %v961_v20 = vld [vmem:[#allocation7 + $0x318] sm:$0xff] }
 0x158   : > { %2041 = vmatpush.msrb.mxu3 %v1066_v36  ;;  %2064 = vmatpush.msrb.mxu0 %v1161_v37  ;;  %v1041_v36 = vld [vmem:[#allocation7 + $0x598] sm:$0xff]  ;;  %v1136_v37 = vld [vmem:[#allocation7 + $0x890] sm:$0xff] }
 0x159   : > { %1994 = vmatpush.msrb.mxu1 %v881_v41  ;;  %2016 = vmatpush.msra.mxu2 %v981_v42  ;;  %v2252_v41 = vld [vmem:[%s737_s2 + $0x8] sm:$0xff]  ;;  %v1256_v42 = vld [vmem:[#allocation7 + $0xc50] sm:$0xff] }
 0x15a   : > { %2042 = vmatpush.msrb.mxu3 %v1061_v44  ;;  %2065 = vmatpush.msrb.mxu0 %v1156_v45  ;;  %v4680_v44 = vld [vmem:[%s4640_s20] sm:$0xff]  ;;  %2676 = vst.msk [vmem:[#allocation3 + $0x30] sm:$0xff] %vm2672_vm3, %v2252_v41 }
 0x15b   : > { %1975 = vmatmul.f32.gmra.mxu0 %v4575_v53  ;;  %1995 = vmatpush.msrb.mxu1 %v876_v46  ;;  %v1508_v56 = vpop.f32.mrf.mxu2  ;;  %v1534_v59 = vpop.f32.mrf.mxu3  ;;  %v1036_v45 = vld [vmem:[#allocation7 + $0x570] sm:$0xff]  ;;  %2673 = vst.msk [vmem:[#allocation3] sm:$0xff] %vm2672_vm3, %v4680_v44 }
 0x15c   : > { %2017 = vmatpush.msra.mxu2 %v976_v27  ;;  %2043 = vmatpush.msrb.mxu3 %v1056_v48  ;;  %v4658_v2 = vpop.f32.mrf.mxu0  ;;  %v1509_v29 = vadd.f32 %v1508_v56, %v4620_v60  ;;  %v956_v60 = vld [vmem:[#allocation7 + $0x2f0] sm:$0xff]  ;;  %v2254_v27 = vmul.f32 %v4643_v49, %v4643_v49  ;;  %v1251_v48 = vld [vmem:[#allocation7 + $0xc28] sm:$0xff]  ;;  %v2256_v56 = vmul.f32 %v2252_v41, %v2252_v41 }
 0x15d   : > { %2066 = vmatpush.msrb.mxu0 %v1151_v50  ;;  %1926 = vmatmul.f32.gmra.mxu2 %v4565_v23  ;;  %v2251_v46 = vld [vmem:[%s737_s2] sm:$0xff] }
 0x15e   : > { %1952 = vmatmul.f32.gmra.mxu3 %v4572_v47  ;;  %1996 = vmatpush.msrb.mxu1 %v871_v51  ;;  %v1535_v50 = vadd.f32 %v1534_v59, %v1509_v29  ;;  %v1126_v59 = vld [vmem:[#allocation7 + $0x840] sm:$0xff]  ;;  %2675 = vst.msk [vmem:[#allocation3 + $0x8] sm:$0xff] %vm2672_vm3, %v2251_v46 }
 0x15f   : > { %2018 = vmatpush.msra.mxu2 %v971_v57  ;;  %2044 = vmatpush.msrb.mxu3 %v1051_v58  ;;  %v4667_v5 = vpop.f32.mrf.mxu1  ;;  %v951_v57 = vld [vmem:[#allocation7 + $0x2c8] sm:$0xff]  ;;  %2678 = vst.msk [vmem:[#allocation3 + $0x38] sm:$0xff] %vm2672_vm3, %v2254_v27  ;;  %v2258_v27 = vmul.f32 %v2252_v41, %v4643_v49  ;;  %v1106_v41 = vld [vmem:[#allocation7 + $0x7a0] sm:$0xff] }
 0x160   : > { %2067 = vmatpush.msrb.mxu0 %v1146_v61  ;;  %1997 = vmatpush.msrb.mxu1 %v866_v62  ;;  %v1031_v58 = vld [vmem:[#allocation7 + $0x548] sm:$0xff]  ;;  %v2253_v61 = vmul.f32 %v4680_v44, %v4680_v44  ;;  %v1246_v62 = vld [vmem:[#allocation7 + $0xc00] sm:$0xff]  ;;  %v1561_v29 = vadd.f32 %v4658_v2, %v1535_v50  ;;  %2680 = vst.msk [vmem:[#allocation3 + $0x40] sm:$0xff] %vm2672_vm3, %v2256_v56  ;;  %v2688_v2 = vld [vmem:[#allocation3 + $0x28] sm:$0xff] }
 0x161   : > { %2019 = vmatpush.msra.mxu2 %v966_v63  ;;  %2045 = vmatpush.msrb.mxu3 %v1046_v1  ;;  %v2255_v1 = vmul.f32 %v2251_v46, %v2251_v46  ;;  %v1236_v50 = vld [vmem:[#allocation7 + $0xbb0] sm:$0xff]  ;;  %2682 = vst.msk [vmem:[#allocation3 + $0x48] sm:$0xff] %vm2672_vm3, %v2258_v27  ;;  %v2257_v56 = vmul.f32 %v2251_v46, %v4680_v44  ;;  %v1231_v49 = vld [vmem:[#allocation7 + $0xb88] sm:$0xff]  ;;  %v1221_v46 = vld [vmem:[#allocation7 + $0xb38] sm:$0xff] }
 0x162   : > { %2068 = vmatpush.msrb.mxu0 %v1141_v3  ;;  %1998 = vmatmul.f32.vlgmr.msrb.gmra.mxu1 %v4536_v33  ;;  %v1131_v33 = vld [vmem:[#allocation7 + $0x868] sm:$0xff]  ;;  %v946_v3 = vld [vmem:[#allocation7 + $0x2a0] sm:$0xff]  ;;  %2677 = vst.msk [vmem:[#allocation3 + $0x10] sm:$0xff] %vm2672_vm3, %v2253_v61 }
 0x163   : > { %2086 = vmatpush.msra.mxu1 %v1261_v15  ;;  %2020 = vmatpush.msra.mxu2 %v961_v20  ;;  %v1026_v15 = vld [vmem:[#allocation7 + $0x520] sm:$0xff]  ;;  %2679 = vst.msk [vmem:[#allocation3 + $0x18] sm:$0xff] %vm2672_vm3, %v2255_v1 }
 0x164   : > { %2046 = vmatpush.msrb.mxu3 %v1041_v36  ;;  %2069 = vmatpush.msrb.mxu0 %v1136_v37  ;;  %v1511_v51 = vpop.f32.mrf.mxu2  ;;  %2681 = vst.msk [vmem:[#allocation3 + $0x20] sm:$0xff] %vm2672_vm3, %v2257_v56  ;;  %v1186_v27 = vld [vmem:[#allocation7 + $0xa20] sm:$0xff] }
 0x165   : > { %1978 = vmatmul.f32.gmra.mxu0 %v4581_v24  ;;  %2087 = vmatpush.msra.mxu1 %v1256_v42  ;;  %v1512_v0 = vadd.f32 %v1511_v51, %v4633_v39  ;;  %v1537_v63 = vpop.f32.mrf.mxu3  ;;  %v1121_v39 = vld [vmem:[#allocation7 + $0x818] sm:$0xff]  ;;  %v1111_v51 = vld [vmem:[#allocation7 + $0x7c8] sm:$0xff] }
 0x166   : > { %2021 = vmatpush.msra.mxu2 %v956_v60  ;;  %2047 = vmatpush.msrb.mxu3 %v1036_v45  ;;  %v1563_v36 = vpop.f32.mrf.mxu0  ;;  %v1241_v60 = vld [vmem:[#allocation7 + $0xbd8] sm:$0xff]  ;;  %v1116_v45 = vld [vmem:[#allocation7 + $0x7f0] sm:$0xff] }
 0x167   : > { %2070 = vmatpush.msrb.mxu0 %v1131_v33  ;;  %2088 = vmatpush.msra.mxu1 %v1251_v48  ;;  %v1538_v20 = vadd.f32 %v1537_v63, %v1512_v0  ;;  %v2689_v48 = vld [vmem:[#allocation3 + $0x30] sm:$0xff]  ;;  %v2691_v0 = vld [vmem:[#allocation3 + $0x40] sm:$0xff] }
 0x168   : > { %2022 = vmatpush.msra.mxu2 %v951_v57  ;;  %2048 = vmatpush.msrb.mxu3 %v1031_v58  ;;  %v2683_v57 = vld [vmem:[#allocation3] sm:$0xff]  ;;  %v2684_v58 = vld [vmem:[#allocation3 + $0x8] sm:$0xff] }
 0x169   : > { %2071 = vmatpush.msrb.mxu0 %v1126_v59  ;;  %2089 = vmatpush.msra.mxu1 %v1246_v62  ;;  %v1564_v37 = vadd.f32 %v1563_v36, %v1538_v20  ;;  %v1586_v42 = vpop.f32.mrf.mxu1  ;;  %v2685_v63 = vld [vmem:[#allocation3 + $0x10] sm:$0xff] }
 0x16a   : > { %2023 = vmatpush.msra.mxu2 %v946_v3  ;;  %2049 = vmatpush.msrb.mxu3 %v1026_v15  ;;  %v4698_v33 = vadd.f32 %v1586_v42, %v1561_v29  ;;  %v2686_v1 = vld [vmem:[#allocation3 + $0x18] sm:$0xff]  ;;  %v1216_v3 = vld [vmem:[#allocation7 + $0xb10] sm:$0xff]  ;;  %v1201_v29 = vld [vmem:[#allocation7 + $0xa98] sm:$0xff] }
 0x16b   : > { %2072 = vmatpush.msrb.mxu0 %v1121_v39  ;;  %2001 = vmatmul.f32.gmra.mxu1 %v4538_v34  ;;  %v2690_v34 = vld [vmem:[#allocation3 + $0x38] sm:$0xff]  ;;  %v1206_v39 = vld [vmem:[#allocation7 + $0xac0] sm:$0xff] }
 0x16c   : > { %2024 = vmatmul.f32.vlgmr.msra.gmra.mxu2 %v4543_v40  ;;  %2050 = vmatmul.f32.vlgmr.msrb.gmra.mxu3 %v4545_v43  ;;  %v1226_v43 = vld [vmem:[#allocation7 + $0xb60] sm:$0xff] }
 0x16d   : > { %2090 = vmatpush.msra.mxu1 %v1241_v60  ;;  %2073 = vmatpush.msrb.mxu0 %v1116_v45 }
 0x16e   : > { %2710 = vmatpush.msrb.mxu2 %v2688_v2  ;;  %2730 = vmatpush.msra.mxu3 %v2689_v48 }
 0x16f   : > { %2091 = vmatpush.msra.mxu1 %v1236_v50  ;;  %2074 = vmatpush.msrb.mxu0 %v1111_v51  ;;  %v1609_v40 = vpop.f32.mrf.mxu2  ;;  %v1506_v51 = vadd.f32 %v4624_v17, %v4614_v35 }
 0x170   : > { %2711 = vmatpush.msrb.mxu2 %v2683_v57  ;;  %2731 = vmatpush.msra.mxu3 %v2684_v58  ;;  %v1635_v61 = vpop.f32.mrf.mxu3  ;;  %v1661_v59 = vpop.f32.mrf.mxu0 }
 0x171   : > { %2092 = vmatpush.msra.mxu1 %v1231_v49  ;;  %2075 = vmatpush.msrb.mxu0 %v1106_v41  ;;  %v1636_v44 = vadd.f32 %v1635_v61, %v1609_v40  ;;  %v1532_v41 = vadd.f32 %v4626_v19, %v1506_v51 }
 0x172   : > { %2076 = vmatmul.f32.vlgmr.msrb.gmra.mxu0 %v4550_v52  ;;  %2750 = vmatpush.msra.mxu2 %v2690_v34  ;;  %v1211_v52 = vld [vmem:[#allocation7 + $0xae8] sm:$0xff] }
 0x173   : > { %2093 = vmatpush.msra.mxu1 %v1226_v43  ;;  %2770 = vmatpush.msrb.mxu3 %v2691_v0  ;;  %v1662_v62 = vadd.f32 %v1661_v59, %v1636_v44 }
 0x174   : > { %2004 = vmatmul.f32.gmra.mxu1 %v4541_v38  ;;  %2027 = vmatmul.f32.gmra.mxu2 %v4553_v54  ;;  %v1589_v15 = vpop.f32.mrf.mxu1  ;;  %v1196_v54 = vld [vmem:[#allocation7 + $0xa70] sm:$0xff] }
 0x175   : > { %2053 = vmatmul.f32.gmra.mxu3 %v4555_v55  ;;  %2094 = vmatpush.msra.mxu1 %v1221_v46  ;;  %v4712_v20 = vadd.f32 %v1589_v15, %v1564_v37  ;;  %v1191_v37 = vld [vmem:[#allocation7 + $0xa48] sm:$0xff] }
 0x176   : > { %2751 = vmatpush.msra.mxu2 %v2685_v63  ;;  %2771 = vmatpush.msrb.mxu3 %v2686_v1  ;;  %v2336_v46 = vld [vmem:[%s6429_s14 + $0x258] sm:$0xff] }
 0x177   : > { %2095 = vmatpush.msra.mxu1 %v1216_v3  ;;  %2796 = vmatpush.msra.mxu0 %v2336_v46  ;;  %v2481_v46 = vld [vmem:[%s6429_s14 + $0x6e0] sm:$0xff] }
 0x179   : > { %2096 = vmatpush.msra.mxu1 %v1211_v52  ;;  %v2331_v52 = vld [vmem:[%s6429_s14 + $0x230] sm:$0xff] }
 0x17a   : > { %2079 = vmatmul.f32.gmra.mxu0 %v4560_v7  ;;  %v1612_v36 = vpop.f32.mrf.mxu2  ;;  %v2260_v7 = vld [vmem:[%s6428_s13] sm:$0xff] }
 0x17b   : > { %2097 = vmatpush.msra.mxu1 %v1206_v39  ;;  %v1638_v38 = vpop.f32.mrf.mxu3  ;;  %v2411_v39 = vld [vmem:[%s6429_s14 + $0x4b0] sm:$0xff]  ;;  %2797 = vmatpush.msra.mxu0 %v2331_v52  ;;  %v2376_v52 = vld [vmem:[%s6429_s14 + $0x398] sm:$0xff] }
 0x17c   : > { %2030 = vmatmul.f32.gmra.mxu2 %v4562_v22  ;;  %v1639_v42 = vadd.f32 %v1638_v38, %v1612_v36  ;;  %v1664_v55 = vpop.f32.mrf.mxu0  ;;  %v2692_v22 = vld [vmem:[#allocation3 + $0x48] sm:$0xff] }
 0x17d   : > { %2056 = vmatmul.f32.gmra.mxu3 %v4565_v23  ;;  %2098 = vmatpush.msra.mxu1 %v1201_v29  ;;  %v2687_v23 = vld [vmem:[#allocation3 + $0x20] sm:$0xff]  ;;  %v2326_v29 = vld [vmem:[%s6429_s14 + $0x208] sm:$0xff] }
 0x17e   : > { %v1665_v60 = vadd.f32 %v1664_v55, %v1639_v42  ;;  %v2406_v38 = vld [vmem:[%s6429_s14 + $0x488] sm:$0xff]  ;;  %v2321_v42 = vld [vmem:[%s6429_s14 + $0x1e0] sm:$0xff]  ;;  %2798 = vmatpush.msra.mxu0 %v2326_v29  ;;  %v2556_v29 = vld [vmem:[%s6429_s14 + $0x938] sm:$0xff] }
 0x17f   : > { %2099 = vmatpush.msra.mxu1 %v1196_v54  ;;  %v1687_v45 = vpop.f32.mrf.mxu1  ;;  %v2401_v55 = vld [vmem:[%s6429_s14 + $0x460] sm:$0xff] }
 0x180   : > { %v1688_v2 = vadd.f32 %v1687_v45, %v1662_v62  ;;  %2799 = vmatpush.msra.mxu0 %v2321_v42  ;;  %v2471_v42 = vld [vmem:[%s6429_s14 + $0x690] sm:$0xff] }
 0x181   : > { %2100 = vmatpush.msra.mxu1 %v1191_v37  ;;  %v2496_v37 = vld [vmem:[%s6429_s14 + $0x758] sm:$0xff] }
 0x182   : > { %2082 = vmatmul.f32.gmra.mxu0 %v4572_v47 }
 0x183   : > { %2101 = vmatpush.msra.mxu1 %v1186_v27  ;;  %v2316_v27 = vld [vmem:[%s6429_s14 + $0x1b8] sm:$0xff] }
 0x184   : > { %2102 = vmatmul.f32.vlgmr.msra.gmra.mxu1 %v4567_v26  ;;  %4006 = vmatmul.msk.f32.vlgmr.msrb.gmra.mxu2 %vm2672_vm3, %v2260_v7  ;;  %v1615_v48 = vpop.f32.mrf.mxu2  ;;  %v1558_v26 = vadd.f32 %v4631_v31, %v1532_v41  ;;  %v2571_v41 = vld [vmem:[%s6429_s14 + $0x9b0] sm:$0xff] }
 0x185   : > { %4007 = vmatmul.msk.f32.vlgmr.msra.gmra.mxu3 %vm2672_vm3, %v2260_v7  ;;  %2790 = vmatpush.msrb.mxu2 %v2692_v22  ;;  %v1641_v50 = vpop.f32.mrf.mxu3 }
 0x186   : > { %v1642_v56 = vadd.f32 %v1641_v50, %v1615_v48  ;;  %v1667_v57 = vpop.f32.mrf.mxu0  ;;  %v1584_v40 = vadd.f32 %v4667_v5, %v1558_v26  ;;  %2836 = vmatpush.msra.mxu3 %v2496_v37  ;;  %2800 = vmatpush.msra.mxu0 %v2316_v27  ;;  %v2306_v26 = vld [vmem:[%s6429_s14 + $0x168] sm:$0xff] }
 0x187   : > { %2791 = vmatpush.msrb.mxu2 %v2687_v23  ;;  %v2466_v27 = vld [vmem:[%s6429_s14 + $0x668] sm:$0xff] }
 0x188   : > { %v1668_v58 = vadd.f32 %v1667_v57, %v1642_v56  ;;  %v1690_v47 = vpop.f32.mrf.mxu1  ;;  %v2112_v48 = vmul.f32 %v1584_v40, %v1584_v40 }
 0x189   : > { %v1691_v49 = vadd.f32 %v1690_v47, %v1665_v60  ;;  %v2576_v60 = vld [vmem:[%s6429_s14 + $0x9d8] sm:$0xff]  ;;  %v2391_v47 = vld [vmem:[%s6429_s14 + $0x410] sm:$0xff] }
 0x18c   : > { %2105 = vmatmul.f32.gmra.mxu1 %v4575_v53  ;;  %4008 = vmatmul.msk.f32.vlgmr.msra.gmra.mxu2 %vm2672_vm3, %v2260_v7 }
 0x18d   : > { %4009 = vmatmul.msk.f32.vlgmr.msrb.gmra.mxu3 %vm2672_vm3, %v2260_v7  ;;  %2856 = vmatpush.msra.mxu2 %v2576_v60  ;;  %v2286_v60 = vld [vmem:[%s6429_s14 + $0xc8] sm:$0xff] }
 0x18f   : > { %v1713_v34 = vpop.f32.mrf.mxu2  ;;  %v1739_v17 = vpop.f32.mrf.mxu3  ;;  %2857 = vmatpush.msra.mxu2 %v2571_v41  ;;  %v2536_v41 = vld [vmem:[%s6429_s14 + $0x898] sm:$0xff] }
 0x190   : > { %v4732_v35 = vadd.f32 %v1713_v34, %v1688_v2  ;;  %v1765_v53 = vpop.f32.mrf.mxu0  ;;  %v2396_v2 = vld [vmem:[%s6429_s14 + $0x438] sm:$0xff]  ;;  %v2386_v34 = vld [vmem:[%s6429_s14 + $0x3e8] sm:$0xff] }
 0x191   : > { %v1766_v54 = vadd.f32 %v1765_v53, %v1739_v17  ;;  %v2566_v17 = vld [vmem:[%s6429_s14 + $0x988] sm:$0xff] }
 0x192   : > { %v4735_v43 = vmul.f32 %v4732_v35, %v1584_v40  ;;  %v1693_v5 = vpop.f32.mrf.mxu1  ;;  %v2486_v40 = vld [vmem:[%s6429_s14 + $0x708] sm:$0xff]  ;;  %2858 = vmatpush.msra.mxu2 %v2566_v17  ;;  %v2451_v17 = vld [vmem:[%s6429_s14 + $0x5f0] sm:$0xff] }
 0x193   : > { %v1694_v59 = vadd.f32 %v1693_v5, %v1668_v58  ;;  %v2311_v58 = vld [vmem:[%s6429_s14 + $0x190] sm:$0xff]  ;;  %v2381_v5 = vld [vmem:[%s6429_s14 + $0x3c0] sm:$0xff] }
 0x194   : > { %2108 = vmatmul.f32.gmra.mxu1 %v4581_v24  ;;  %4010 = vmatmul.msk.f32.vlgmr.msrb.gmra.mxu2 %vm2672_vm3, %v2260_v7  ;;  %v2416_v24 = vld [vmem:[%s6429_s14 + $0x4d8] sm:$0xff]  ;;  %vm3488_vm3 = vcmask 27648  }
 0x195   : > { %2816 = vmatpush.msrb.mxu1 %v2416_v24  ;;  %2801 = vmatpush.msra.mxu0 %v2311_v58  ;;  %v2561_v24 = vld [vmem:[%s6429_s14 + $0x960] sm:$0xff]  ;;  %v2276_v58 = vld [vmem:[%s6429_s14 + $0x78] sm:$0xff] }
 0x196   : > { %2859 = vmatpush.msra.mxu2 %v2561_v24  ;;  %v2346_v24 = vld [vmem:[%s6429_s14 + $0x2a8] sm:$0xff] }
 0x197   : > { %2817 = vmatpush.msrb.mxu1 %v2411_v39  ;;  %2802 = vmatpush.msra.mxu0 %v2306_v26  ;;  %v2476_v39 = vld [vmem:[%s6429_s14 + $0x6b8] sm:$0xff] }
 0x198   : > { %2860 = vmatpush.msra.mxu2 %v2556_v29  ;;  %v2261_v29 = vld [vmem:[%s6429_s14] sm:$0xff] }
 0x199   : > { %v1716_v19 = vpop.f32.mrf.mxu2  ;;  %v4741_v61 = vpop.f32.mrf.mxu3  ;;  %2818 = vmatpush.msrb.mxu1 %v2406_v38  ;;  %v2291_v38 = vld [vmem:[%s6429_s14 + $0xf0] sm:$0xff] }
 0x19a   : > { %v4739_v0 = vadd.f32 %v1716_v19, %v1691_v49  ;;  %v4747_v44 = vpop.f32.mrf.mxu0  ;;  %v2491_v49 = vld [vmem:[%s6429_s14 + $0x730] sm:$0xff]  ;;  %v2301_v19 = vld [vmem:[%s6429_s14 + $0x140] sm:$0xff] }
 0x19b   : > { %2819 = vmatpush.msrb.mxu1 %v2401_v55  ;;  %2837 = vmatpush.msra.mxu3 %v2491_v49  ;;  %v2551_v55 = vld [vmem:[%s6429_s14 + $0x910] sm:$0xff]  ;;  %v2456_v49 = vld [vmem:[%s6429_s14 + $0x618] sm:$0xff] }
 0x19c   : > { %v4745_v31 = vmul.f32 %v4739_v0, %v4698_v33  ;;  %2803 = vmatpush.msra.mxu0 %v2301_v19  ;;  %2861 = vmatpush.msra.mxu2 %v2551_v55  ;;  %v2531_v19 = vld [vmem:[%s6429_s14 + $0x870] sm:$0xff]  ;;  %v2656_v55 = vld [vmem:[%s6429_s14 + $0xc58] sm:$0xff] }
 0x19d   : > { %v1791_v36 = vpop.f32.mrf.mxu1  ;;  %2820 = vmatpush.msrb.mxu1 %v2396_v2  ;;  %2838 = vmatpush.msra.mxu3 %v2486_v40  ;;  %v2546_v2 = vld [vmem:[%s6429_s14 + $0x8e8] sm:$0xff]  ;;  %v2351_v40 = vld [vmem:[%s6429_s14 + $0x2d0] sm:$0xff] }
 0x19e   : > { %v1792_v45 = vadd.f32 %v1791_v36, %v1766_v54  ;;  %v2371_v54 = vld [vmem:[%s6429_s14 + $0x370] sm:$0xff]  ;;  %2862 = vmatpush.msra.mxu2 %v2546_v2 }
 0x19f   : > { %2821 = vmatpush.msrb.mxu1 %v2391_v47  ;;  %2839 = vmatpush.msra.mxu3 %v2481_v46  ;;  %v2356_v47 = vld [vmem:[%s6429_s14 + $0x2f8] sm:$0xff]  ;;  %v2266_v46 = vld [vmem:[%s6429_s14 + $0x28] sm:$0xff] }
 0x1a1   : > { %2822 = vmatpush.msrb.mxu1 %v2386_v34  ;;  %2840 = vmatpush.msra.mxu3 %v2476_v39  ;;  %v2271_v34 = vld [vmem:[%s6429_s14 + $0x50] sm:$0xff] }
 0x1a2   : > { %v1719_v62 = vpop.f32.mrf.mxu2 }
 0x1a3   : > { %v4755_v63 = vadd.f32 %v1719_v62, %v1694_v59  ;;  %v4761_v3 = vpop.f32.mrf.mxu3  ;;  %2823 = vmatpush.msrb.mxu1 %v2381_v5  ;;  %v2296_v62 = vld [vmem:[%s6429_s14 + $0x118] sm:$0xff]  ;;  %2841 = vmatpush.msra.mxu3 %v2471_v42  ;;  %v2521_v42 = vld [vmem:[%s6429_s14 + $0x820] sm:$0xff] }
 0x1a4   : > { %v4763_v15 = vpop.f32.mrf.mxu0  ;;  %2804 = vmatpush.msra.mxu0 %v2296_v62  ;;  %v2446_v62 = vld [vmem:[%s6429_s14 + $0x5c8] sm:$0xff] }
 0x1a5   : > { %v4759_v1 = vmul.f32 %v4755_v63, %v4712_v20  ;;  %2824 = vmatpush.msrb.mxu1 %v2376_v52  ;;  %2842 = vmatpush.msra.mxu3 %v2466_v27  ;;  %v2526_v52 = vld [vmem:[%s6429_s14 + $0x848] sm:$0xff]  ;;  %v2516_v27 = vld [vmem:[%s6429_s14 + $0x7f8] sm:$0xff] }
 0x1a6   : > { %v4799_v57 = vpop.f32.mrf.mxu1  ;;  %2805 = vmatpush.msra.mxu0 %v2291_v38  ;;  %v2341_v38 = vld [vmem:[%s6429_s14 + $0x280] sm:$0xff] }
 0x1a7   : > { %2825 = vmatpush.msrb.mxu1 %v2371_v54  ;;  %v2441_v54 = vld [vmem:[%s6429_s14 + $0x5a0] sm:$0xff] }
 0x1a8   : > { %2806 = vmatpush.msra.mxu0 %v2286_v60  ;;  %v2337_v60 = vld [vmem:[%s6429_s14 + $0x260] sm:$0xff] }
 0x1ad   : > { %v1817_v7 = vpop.f32.mrf.mxu2  ;;  %v1843_v23 = vpop.f32.mrf.mxu3 }
 0x1ae   : > { %v1818_v22 = vadd.f32 %v1817_v7, %v1792_v45  ;;  %v4797_v56 = vpop.f32.mrf.mxu0  ;;  %v2366_v45 = vld [vmem:[%s6429_s14 + $0x348] sm:$0xff]  ;;  %v2281_v7 = vld [vmem:[%s6429_s14 + $0xa0] sm:$0xff] }
 0x1af   : > { %2826 = vmatpush.msrb.mxu1 %v2366_v45  ;;  %2807 = vmatpush.msra.mxu0 %v2281_v7  ;;  %v2436_v45 = vld [vmem:[%s6429_s14 + $0x578] sm:$0xff]  ;;  %v2651_v7 = vld [vmem:[%s6429_s14 + $0xc30] sm:$0xff] }
 0x1b0   : > { %v1844_v50 = vadd.f32 %v1843_v23, %v1818_v22  ;;  %v4867_v37 = vpop.f32.mrf.mxu1  ;;  %v2361_v22 = vld [vmem:[%s6429_s14 + $0x320] sm:$0xff] }
 0x1b1   : > { %v2461_v23 = vld [vmem:[%s6429_s14 + $0x640] sm:$0xff]  ;;  %2827 = vmatpush.msrb.mxu1 %v2361_v22  ;;  %2808 = vmatpush.msra.mxu0 %v2276_v58  ;;  %v2332_v22 = vld [vmem:[%s6429_s14 + $0x238] sm:$0xff] }
 0x1b2   : > { %v4795_v51 = vsub.f32 %v1844_v50, %v2112_v48  ;;  %v2541_v48 = vld [vmem:[%s6429_s14 + $0x8c0] sm:$0xff]  ;;  %2843 = vmatpush.msra.mxu3 %v2461_v23 }
 0x1b3   : > { %2863 = vmatpush.msra.mxu2 %v2541_v48  ;;  %2828 = vmatpush.msrb.mxu1 %v2356_v47  ;;  %v2431_v48 = vld [vmem:[%s6429_s14 + $0x550] sm:$0xff]  ;;  %v2646_v47 = vld [vmem:[%s6429_s14 + $0xc08] sm:$0xff] }
 0x1b4   : > { %2844 = vmatpush.msra.mxu3 %v2456_v49  ;;  %2809 = vmatpush.msra.mxu0 %v2271_v34  ;;  %v2327_v49 = vld [vmem:[%s6429_s14 + $0x210] sm:$0xff]  ;;  %v2426_v34 = vld [vmem:[%s6429_s14 + $0x528] sm:$0xff] }
 0x1b5   : > { %2864 = vmatpush.msra.mxu2 %v2536_v41  ;;  %2829 = vmatpush.msrb.mxu1 %v2351_v40  ;;  %v2506_v40 = vld [vmem:[%s6429_s14 + $0x7a8] sm:$0xff] }
 0x1b6   : > { %2845 = vmatpush.msra.mxu3 %v2451_v17  ;;  %2810 = vmatpush.msra.mxu0 %v2266_v46  ;;  %v2322_v46 = vld [vmem:[%s6429_s14 + $0x1e8] sm:$0xff] }
 0x1b7   : > { %v4825_v53 = vpop.f32.mrf.mxu2  ;;  %v4839_v59 = vpop.f32.mrf.mxu3  ;;  %2865 = vmatpush.msra.mxu2 %v2531_v19  ;;  %2830 = vmatpush.msrb.mxu1 %v2346_v24  ;;  %v2641_v19 = vld [vmem:[%s6429_s14 + $0xbe0] sm:$0xff]  ;;  %v1769_v24 = vadd.f32 %v4747_v44, %v4741_v61  ;;  %v2636_v61 = vld [vmem:[%s6429_s14 + $0xbb8] sm:$0xff] }
 0x1b8   : > { %v4853_v36 = vpop.f32.mrf.mxu0  ;;  %2846 = vmatpush.msra.mxu3 %v2446_v62  ;;  %2811 = vmatpush.msra.mxu0 %v2261_v29  ;;  %v2118_v29 = vmul.f32 %v4732_v35, %v4732_v35  ;;  %v2317_v44 = vld [vmem:[%s6429_s14 + $0x1c0] sm:$0xff] }
 0x1b9   : > { %2866 = vmatpush.msra.mxu2 %v2526_v52  ;;  %2831 = vmatpush.msrb.mxu1 %v2341_v38  ;;  %v2421_v52 = vld [vmem:[%s6429_s14 + $0x500] sm:$0xff] }
 0x1ba   : > { %2847 = vmatpush.msra.mxu3 %v2441_v54  ;;  %2876 = vmatpush.msrb.mxu0 %v2656_v55  ;;  %v2417_v54 = vld [vmem:[%s6429_s14 + $0x4e0] sm:$0xff] }
 0x1bb   : > { %2867 = vmatpush.msra.mxu2 %v2521_v42  ;;  %2896 = vmatpush.msra.mxu1 %v2337_v60  ;;  %v1795_v42 = vadd.f32 %v4799_v57, %v1769_v24  ;;  %v2497_v35 = vld [vmem:[%s6429_s14 + $0x760] sm:$0xff]  ;;  %v2412_v57 = vld [vmem:[%s6429_s14 + $0x4b8] sm:$0xff]  ;;  %v2482_v24 = vld [vmem:[%s6429_s14 + $0x6e8] sm:$0xff] }
 0x1bc   : > { %v1895_v39 = vpop.f32.mrf.mxu1  ;;  %2848 = vmatpush.msra.mxu3 %v2436_v45  ;;  %2877 = vmatpush.msrb.mxu0 %v2651_v7  ;;  %v2631_v45 = vld [vmem:[%s6429_s14 + $0xb90] sm:$0xff]  ;;  %v2492_v7 = vld [vmem:[%s6429_s14 + $0x738] sm:$0xff] }
 0x1bd   : > { %v1896_v2 = vadd.f32 %v1895_v39, %v4797_v56  ;;  %2868 = vmatpush.msra.mxu2 %v2516_v27  ;;  %v2511_v56 = vld [vmem:[%s6429_s14 + $0x7d0] sm:$0xff]  ;;  %2897 = vmatpush.msra.mxu1 %v2332_v22  ;;  %v2501_v39 = vld [vmem:[%s6429_s14 + $0x780] sm:$0xff]  ;;  %v2312_v27 = vld [vmem:[%s6429_s14 + $0x198] sm:$0xff] }
 0x1be   : > { %2849 = vmatpush.msra.mxu3 %v2431_v48  ;;  %2878 = vmatpush.msrb.mxu0 %v2646_v47  ;;  %v2626_v22 = vld [vmem:[%s6429_s14 + $0xb68] sm:$0xff]  ;;  %v2149_v48 = vmax.f32 %v4795_v51, 0.0  ;;  %v2487_v47 = vld [vmem:[%s6429_s14 + $0x710] sm:$0xff] }
 0x1bf   : > { %2869 = vmatpush.msra.mxu2 %v2511_v56  ;;  %2898 = vmatpush.msra.mxu1 %v2327_v49 }
 0x1c0   : > { %2850 = vmatpush.msra.mxu3 %v2426_v34  ;;  %2879 = vmatpush.msrb.mxu0 %v2641_v19 }
 0x1c1   : > { %v4893_v50 = vpop.f32.mrf.mxu2  ;;  %v4907_v26 = vpop.f32.mrf.mxu3  ;;  %2870 = vmatpush.msra.mxu2 %v2506_v40  ;;  %2899 = vmatpush.msra.mxu1 %v2322_v46  ;;  %v2302_v40 = vld [vmem:[%s6429_s14 + $0x148] sm:$0xff] }
 0x1c2   : > { %2851 = vmatpush.msra.mxu3 %v2421_v52  ;;  %2880 = vmatpush.msrb.mxu0 %v2636_v61  ;;  %v2616_v52 = vld [vmem:[%s6429_s14 + $0xb18] sm:$0xff] }
 0x1c3   : > { %v4921_v5 = vpop.f32.mrf.mxu0  ;;  %2871 = vmatpush.msra.mxu2 %v2501_v39  ;;  %2900 = vmatpush.msra.mxu1 %v2317_v44  ;;  %v2397_v39 = vld [vmem:[%s6429_s14 + $0x440] sm:$0xff]  ;;  %v2611_v44 = vld [vmem:[%s6429_s14 + $0xaf0] sm:$0xff] }
 0x1c4   : > { %2916 = vmatpush.msrb.mxu3 %v2417_v54  ;;  %2881 = vmatpush.msrb.mxu0 %v2631_v45  ;;  %v2392_v54 = vld [vmem:[%s6429_s14 + $0x418] sm:$0xff]  ;;  %v2606_v45 = vld [vmem:[%s6429_s14 + $0xac8] sm:$0xff] }
 0x1c5   : > { %2936 = vmatpush.msrb.mxu2 %v2497_v35  ;;  %2901 = vmatpush.msra.mxu1 %v2312_v27  ;;  %v2287_v27 = vld [vmem:[%s6429_s14 + $0xd0] sm:$0xff] }
 0x1c6   : > { %v1898_v55 = vpop.f32.mrf.mxu1  ;;  %2917 = vmatpush.msrb.mxu3 %v2412_v57  ;;  %2882 = vmatpush.msrb.mxu0 %v2626_v22 }
 0x1c7   : > { %v1899_v49 = vadd.f32 %v1898_v55, %v4853_v36  ;;  %2937 = vmatpush.msrb.mxu2 %v2492_v7 }
 0x1c9   : > { %2938 = vmatpush.msrb.mxu2 %v2487_v47 }
 0x1cb   : > { %2939 = vmatpush.msrb.mxu2 %v2482_v24 }
 0x1cc   : > { %v1921_v23 = vpop.f32.mrf.mxu2 }
 0x1cd   : > { %v1922_v58 = vadd.f32 %v1921_v23, %v1896_v2  ;;  %v1947_v41 = vpop.f32.mrf.mxu3  ;;  %v1821_v2 = vadd.f32 %v4825_v53, %v1795_v42  ;;  %v2307_v23 = vld [vmem:[%s6429_s14 + $0x170] sm:$0xff]  ;;  %v2119_v42 = vmul.f32 %v4739_v0, %v4739_v0 }
 0x1ce   : > { %v1973_v62 = vpop.f32.mrf.mxu0  ;;  %2902 = vmatpush.msra.mxu1 %v2307_v23  ;;  %v2387_v0 = vld [vmem:[%s6429_s14 + $0x3f0] sm:$0xff]  ;;  %v2282_v23 = vld [vmem:[%s6429_s14 + $0xa8] sm:$0xff] }
 0x1cf   : > { %v1948_v17 = vadd.f32 %v1947_v41, %v1922_v58  ;;  %v2407_v58 = vld [vmem:[%s6429_s14 + $0x490] sm:$0xff]  ;;  %v1847_v36 = vadd.f32 %v4839_v59, %v1821_v2  ;;  %v2297_v59 = vld [vmem:[%s6429_s14 + $0x120] sm:$0xff] }
 0x1d0   : > { %2918 = vmatpush.msrb.mxu3 %v2407_v58  ;;  %2903 = vmatpush.msra.mxu1 %v2302_v40  ;;  %v1901_v35 = vpop.f32.mrf.mxu1  ;;  %v2467_v2 = vld [vmem:[%s6429_s14 + $0x670] sm:$0xff] }
 0x1d1   : > { %v1974_v38 = vadd.f32 %v1973_v62, %v1948_v17  ;;  %v2402_v17 = vld [vmem:[%s6429_s14 + $0x468] sm:$0xff]  ;;  %v1772_v62 = vadd.f32 %v4763_v15, %v4761_v3  ;;  %v1902_v22 = vadd.f32 %v1901_v35, %v4921_v5 }
 0x1d2   : > { %2919 = vmatpush.msrb.mxu3 %v2402_v17  ;;  %2904 = vmatpush.msra.mxu1 %v2297_v59  ;;  %v2596_v17 = vld [vmem:[%s6429_s14 + $0xa78] sm:$0xff] }
 0x1d3   : > { %v2121_v60 = vsub.f32 %v1974_v38, %v2118_v29  ;;  %v2113_v29 = vmul.f32 %v4698_v33, %v4698_v33  ;;  %v2477_v38 = vld [vmem:[%s6429_s14 + $0x6c0] sm:$0xff]  ;;  %v1798_v61 = vadd.f32 %v4867_v37, %v1772_v62  ;;  %v2292_v33 = vld [vmem:[%s6429_s14 + $0xf8] sm:$0xff] }
 0x1d4   : > { %2920 = vmatpush.msrb.mxu3 %v2397_v39  ;;  %2940 = vmatpush.msrb.mxu2 %v2477_v38  ;;  %v2457_v62 = vld [vmem:[%s6429_s14 + $0x620] sm:$0xff]  ;;  %v2591_v39 = vld [vmem:[%s6429_s14 + $0xa50] sm:$0xff] }
 0x1d5   : > { %v5034_v56 = vadd.f32 %v2121_v60, %v4795_v51  ;;  %v2152_v53 = vmax.f32 %v2121_v60, 0.0  ;;  %v2621_v51 = vld [vmem:[%s6429_s14 + $0xb40] sm:$0xff]  ;;  %v2116_v55 = vsub.f32 %v1847_v36, %v2113_v29  ;;  %v2472_v60 = vld [vmem:[%s6429_s14 + $0x698] sm:$0xff]  ;;  %v1824_v57 = vadd.f32 %v4893_v50, %v1798_v61  ;;  %2905 = vmatpush.msra.mxu1 %v2292_v33 }
 0x1d6   : > { %2883 = vmatpush.msrb.mxu0 %v2621_v51  ;;  %2921 = vmatpush.msrb.mxu3 %v2392_v54  ;;  %v2601_v50 = vld [vmem:[%s6429_s14 + $0xaa0] sm:$0xff]  ;;  %v2272_v29 = vld [vmem:[%s6429_s14 + $0x58] sm:$0xff] }
 0x1d7   : > { %v5043_v41 = vmul.f32 %v2152_v53, %v2149_v48  ;;  %v1924_v34 = vpop.f32.mrf.mxu2  ;;  %v1950_v46 = vpop.f32.mrf.mxu3  ;;  %2941 = vmatpush.msrb.mxu2 %v2472_v60  ;;  %2906 = vmatpush.msra.mxu1 %v2287_v27  ;;  %v2382_v48 = vld [vmem:[%s6429_s14 + $0x3c8] sm:$0xff]  ;;  %v2150_v58 = vmax.f32 %v2116_v55, 0.0  ;;  %v1850_v51 = vadd.f32 %v4907_v26, %v1824_v57  ;;  %v2277_v36 = vld [vmem:[%s6429_s14 + $0x80] sm:$0xff] }
 0x1d8   : > { %v1925_v19 = vadd.f32 %v1924_v34, %v1899_v49  ;;  %v1976_v15 = vpop.f32.mrf.mxu0  ;;  %2884 = vmatpush.msrb.mxu0 %v2616_v52  ;;  %2922 = vmatpush.msrb.mxu3 %v2387_v0  ;;  %v2462_v34 = vld [vmem:[%s6429_s14 + $0x648] sm:$0xff]  ;;  %v2114_v52 = vmul.f32 %v4712_v20, %v4712_v20  ;;  %v2120_v20 = vmul.f32 %v4755_v63, %v4755_v63 }
 0x1d9   : > { %4123 = vrsqrt.f32 %v5043_v41  ;;  %2942 = vmatpush.msrb.mxu2 %v2467_v2  ;;  %2907 = vmatpush.msra.mxu1 %v2282_v23  ;;  %v2586_v63 = vld [vmem:[%s6429_s14 + $0xa28] sm:$0xff]  ;;  %v2357_v23 = vld [vmem:[%s6429_s14 + $0x300] sm:$0xff]  ;;  %vm2165_vm5 = vcmp.eq.f32.partialorder %v5043_v41, inf  ;;  %vm2167_vm6 = vcmp.eq.f32.partialorder %v5043_v41, 0.0 }
 0x1da   : > { %v1951_v3 = vadd.f32 %v1950_v46, %v1925_v19  ;;  %2885 = vmatpush.msrb.mxu0 %v2611_v44  ;;  %v2377_v19 = vld [vmem:[%s6429_s14 + $0x3a0] sm:$0xff]  ;;  %2923 = vmatpush.msrb.mxu3 %v2382_v48  ;;  %v2452_v44 = vld [vmem:[%s6429_s14 + $0x5f8] sm:$0xff]  ;;  %v2117_v33 = vsub.f32 %v1850_v51, %v2114_v52  ;;  %v2262_v27 = vld [vmem:[%s6429_s14 + $0x8] sm:$0xff] }
 0x1db   : > { %2943 = vmatpush.msrb.mxu2 %v2462_v34  ;;  %2908 = vmatpush.msra.mxu1 %v2277_v36  ;;  %v2362_v57 = vld [vmem:[%s6429_s14 + $0x328] sm:$0xff]  ;;  %v2437_v48 = vld [vmem:[%s6429_s14 + $0x580] sm:$0xff]  ;;  %v2352_v51 = vld [vmem:[%s6429_s14 + $0x2d8] sm:$0xff]  ;;  %v787_v36 = vmul.f32 0.0, %v4427_v11 }
 0x1dc   : > { %v1977_v37 = vadd.f32 %v1976_v15, %v1951_v3  ;;  %2886 = vmatpush.msrb.mxu0 %v2606_v45  ;;  %v2372_v3 = vld [vmem:[%s6429_s14 + $0x378] sm:$0xff]  ;;  %2924 = vmatpush.msrb.mxu3 %v2377_v19  ;;  %v2581_v45 = vld [vmem:[%s6429_s14 + $0xa00] sm:$0xff]  ;;  %v2442_v0 = vld [vmem:[%s6429_s14 + $0x5a8] sm:$0xff]  ;;  %v2151_v2 = vmax.f32 %v2117_v33, 0.0 }
 0x1dd   : > { %2944 = vmatpush.msrb.mxu2 %v2457_v62  ;;  %2909 = vmatpush.msra.mxu1 %v2272_v29  ;;  %v2347_v11 = vld [vmem:[%s6429_s14 + $0x2b0] sm:$0xff] }
 0x1de   : > { %v2122_v7 = vsub.f32 %v1977_v37, %v2119_v42  ;;  %2887 = vmatpush.msrb.mxu0 %v2601_v50  ;;  %v2267_v42 = vld [vmem:[%s6429_s14 + $0x30] sm:$0xff]  ;;  %2925 = vmatpush.msrb.mxu3 %v2372_v3  ;;  %v791_v3 = vadd.f32 0.5, %v787_v36 }
 0x1df   : > { %v5113_v53 = vpop.eup %4123  ;;  %v5151_v38 = vpop.f32.mrf.mxu1  ;;  %2945 = vmatpush.msrb.mxu2 %v2452_v44  ;;  %v2447_v37 = vld [vmem:[%s6429_s14 + $0x5d0] sm:$0xff]  ;;  %2910 = vmatpush.msra.mxu1 %v2267_v42  ;;  %v2342_v44 = vld [vmem:[%s6429_s14 + $0x288] sm:$0xff] }
 0x1e0   : > { %v5115_v47 = vadd.f32 %v2122_v7, %v2116_v55  ;;  %v2153_v5 = vmax.f32 %v2122_v7, 0.0  ;;  %v1927_v49 = vpop.f32.mrf.mxu2  ;;  %v2159_v46 = vmul.f32 %v5113_v53, %v5043_v41  ;;  %2888 = vmatpush.msrb.mxu0 %v2596_v17  ;;  %v2367_v55 = vld [vmem:[%s6429_s14 + $0x350] sm:$0xff]  ;;  %v3353_v17 = vld [vmem:[%s5189_s22] sm:$0xff] }
 0x1e1   : > { %v1928_v40 = vadd.f32 %v1927_v49, %v1902_v22  ;;  %v1953_v26 = vpop.f32.mrf.mxu3  ;;  %2926 = vmatpush.msrb.mxu3 %v2367_v55  ;;  %2946 = vmatpush.msrb.mxu2 %v2447_v37  ;;  %v2427_v52 = vld [vmem:[%s6429_s14 + $0x530] sm:$0xff] }
 0x1e2   : > { %v5132_v24 = vmul.f32 %v2153_v5, %v2150_v58  ;;  %v2160_v15 = vmul.f32 %v5113_v53, %v2159_v46  ;;  %v1979_v61 = vpop.f32.mrf.mxu0  ;;  %2889 = vmatpush.msrb.mxu0 %v2591_v39  ;;  %2911 = vmatpush.msra.mxu1 %v2262_v27  ;;  %v785_v58 = vmul.f32 0.0, %v4446_v16  ;;  %v786_v5 = vmul.f32 0.0, %v4436_v13  ;;  %v3359_v46 = vld [vmem:[%s6431_s15] sm:$0xff] }
 0x1e3   : > { %v1954_v59 = vadd.f32 %v1953_v26, %v1928_v40  ;;  %2927 = vmatpush.msrb.mxu3 %v2362_v57  ;;  %2947 = vmatpush.msrb.mxu2 %v2442_v0  ;;  %v2432_v40 = vld [vmem:[%s6429_s14 + $0x558] sm:$0xff]  ;;  %v788_v39 = vmul.f32 0.0, %v4420_v9 }
 0x1e4   : > { %4125 = vrsqrt.f32 %v5132_v24  ;;  %v2161_v35 = vmul.f32 0.5, %v2160_v15  ;;  %2890 = vmatpush.msrb.mxu0 %v2586_v63  ;;  %v789_v16 = vadd.f32 0.5, %v785_v58  ;;  %v790_v19 = vadd.f32 0.5, %v786_v5 }
 0x1e5   : > { %v1980_v54 = vadd.f32 %v1979_v61, %v1954_v59  ;;  %2928 = vmatpush.msrb.mxu3 %v2357_v23  ;;  %2948 = vmatpush.msrb.mxu2 %v2437_v48  ;;  %v3360_v59 = vmul.f32 %v3359_v46, %v3353_v17  ;;  %v792_v9 = vadd.f32 0.5, %v788_v39  ;;  %v795_v63 = vmul.f32 %v791_v3, %v791_v3 }
 0x1e6   : > { %2891 = vmatpush.msrb.mxu0 %v2581_v45  ;;  %v2162_v50 = vsub.f32 1.5, %v2161_v35  ;;  %v793_v15 = vmul.f32 %v789_v16, %v789_v16  ;;  %v2168_v46 = vand.u32 2147483648, %v5043_v41  ;;  %vm2177_vm7 = vcmp.eq.f32.partialorder %v5132_v24, inf }
 0x1e7   : > { %v2123_v60 = vsub.f32 %v1980_v54, %v2120_v20  ;;  %2929 = vmatpush.msrb.mxu3 %v2352_v51  ;;  %2949 = vmatpush.msrb.mxu2 %v2432_v40  ;;  %v794_v20 = vmul.f32 %v790_v19, %v790_v19  ;;  %v3362_v61 = vsel %vm3361_vm4, %v3360_v59, 0.0  ;;  %v796_v37 = vmul.f32 %v792_v9, %v792_v9 }
 0x1e8   : > { %v2163_v26 = vmul.f32 %v5113_v53, %v2162_v50  ;;  %v5218_v62 = vpop.f32.mrf.mxu1  ;;  %3363 = vadd.xlane.f32.xlu1 %v3362_v61  ;;  %v838_v42 = vmul.f32 %v793_v15, %v4460_v21  ;;  %v797_v35 = vmul.f32 %v793_v15, %v4500_v32  ;;  %v840_v57 = vmul.f32 %v795_v63, %v4442_v14 }
 0x1e9   : > { %v5182_v7 = vadd.f32 %v2123_v60, %v2117_v33  ;;  %v2154_v22 = vmax.f32 %v2123_v60, 0.0  ;;  %2930 = vmatpush.msrb.mxu3 %v2347_v11  ;;  %2950 = vmatpush.msrb.mxu2 %v2427_v52  ;;  %v2422_v33 = vld [vmem:[%s6429_s14 + $0x508] sm:$0xff]  ;;  %v839_v55 = vmul.f32 %v794_v20, %v4452_v18  ;;  %v798_v60 = vmul.f32 %v794_v20, %v4491_v30 }
 0x1ea   : > { %v5199_v49 = vpop.eup %4125  ;;  %v2164_v45 = vmul.f32 %v2163_v26, %v5043_v41  ;;  %v842_v0 = vsel %vm801_vm1, %v838_v42, 0.0  ;;  %v799_v21 = vmul.f32 %v795_v63, %v4486_v28  ;;  %v841_v32 = vmul.f32 %v796_v37, %v4432_v12 }
 0x1eb   : > { %v5201_v34 = vmul.f32 %v2154_v22, %v2151_v2  ;;  %v2171_v13 = vmul.f32 %v5199_v49, %v5132_v24  ;;  %2931 = vmatpush.msrb.mxu3 %v2342_v44  ;;  %2951 = vmatpush.msrb.mxu2 %v2422_v33  ;;  %v843_v2 = vsel %vm801_vm1, %v839_v55, 0.0  ;;  %v800_v50 = vmul.f32 %v796_v37, %v4476_v25 }
 0x1ec   : > { %v844_v22 = vadd.f32 %v843_v2, %v842_v0  ;;  %v845_v30 = vsel %vm801_vm1, %v840_v57, 0.0  ;;  %v802_v23 = vsel %vm801_vm1, %v797_v35, 0.0  ;;  %v803_v14 = vsel %vm801_vm1, %v798_v60, 0.0 }
 0x1ed   : > { %4127 = vrsqrt.f32 %v5201_v34  ;;  %v2172_v54 = vmul.f32 %v5199_v49, %v2171_v13  ;;  %v805_v48 = vsel %vm801_vm1, %v799_v21, 0.0  ;;  %v847_v28 = vsel %vm801_vm1, %v841_v32, 0.0 }
 0x1ee   : > { %v846_v58 = vadd.f32 %v845_v30, %v844_v22  ;;  %v804_v5 = vadd.f32 %v803_v14, %v802_v23  ;;  %v2166_v12 = vsel %vm2165_vm5, %v5043_v41, %v2164_v45  ;;  %v807_v40 = vsel %vm801_vm1, %v800_v50, 0.0 }
 0x1ef   : > { %v2025_v29 = vpop.f32.mrf.mxu2  ;;  %v2051_v53 = vpop.f32.mrf.mxu3  ;;  %v2173_v27 = vmul.f32 0.5, %v2172_v54  ;;  %v5263_v59 = vstv %s5227_s26  ;;  %v818_v9 = vmul.f32 %v793_v15, %v4425_v10  ;;  %v819_v41 = vmul.f32 %v794_v20, %v4418_v8 }
 0x1f0   : > { %v2026_v25 = vadd.f32 %v2025_v29, %v5151_v38  ;;  %v848_v19 = vadd.f32 %v847_v28, %v846_v58  ;;  %v806_v13 = vadd.f32 %v805_v48, %v804_v5  ;;  %v5265_v38 = vstv %s2194_s1  ;;  %v2077_v61 = vpop.f32.mrf.mxu0  ;;  %s6190_s1 = sld [smem:[#allocation4 + $0x1]] }
 0x1f1   : > { %v2174_v17 = vsub.f32 1.5, %v2173_v27  ;;  %v2005_v26 = vpop.f32.mrf.mxu1  ;;  %v2169_v29 = vsel %vm2167_vm6, %v2168_v46, %v2166_v12  ;;  %v2180_v55 = vand.u32 2147483648, %v5132_v24  ;;  %v822_v35 = vsel %vm801_vm1, %v818_v9, 0.0 }
 0x1f2   : > { %849 = vadd.xlane.f32.xlu1 %v848_v19  ;;  %v808_v39 = vadd.f32 %v807_v40, %v806_v13  ;;  %v2052_v3 = vadd.f32 %v2051_v53, %v2026_v25  ;;  %v2199_v42 = vadd.f32 %v5265_v38, %v2169_v29  ;;  %v820_v53 = vmul.f32 %v795_v63, %v4413_v6  ;;  %v2652_v13 = vld [vmem:[%s6429_s14 + $0xc38] sm:$0xff] }
 0x1f3   : > { %v4128_v18 = vpop.eup %4127  ;;  %v2175_v11 = vmul.f32 %v5199_v49, %v2174_v17  ;;  %v2140_v49 = vadd.f32 %v5034_v56, %v5263_v59  ;;  %v823_v8 = vsel %vm801_vm1, %v819_v41, 0.0  ;;  %v821_v27 = vmul.f32 %v796_v37, %v4404_v4 }
 0x1f4   : > { %v2183_v36 = vmul.f32 %v4128_v18, %v5201_v34  ;;  %809 = vadd.xlane.f32.xlu0 %v808_v39  ;;  %v2078_v60 = vadd.f32 %v2077_v61, %v2052_v3  ;;  %v824_v57 = vadd.f32 %v823_v8, %v822_v35  ;;  %v825_v0 = vsel %vm801_vm1, %v820_v53, 0.0  ;;  %v2647_v39 = vld [vmem:[%s6429_s14 + $0xc10] sm:$0xff]  ;;  %v2562_v61 = vld [vmem:[%s6429_s14 + $0x968] sm:$0xff]  ;;  %v2557_v53 = vld [vmem:[%s6429_s14 + $0x940] sm:$0xff] }
 0x1f5   : > { %v2176_v44 = vmul.f32 %v2175_v11, %v5132_v24  ;;  %vm2179_vm8 = vcmp.eq.f32.partialorder %v5132_v24, 0.0  ;;  %4129 = vrcp.f32 %v2199_v42  ;;  %v827_v32 = vsel %vm801_vm1, %v821_v27, 0.0  ;;  %v2637_v35 = vld [vmem:[%s6429_s14 + $0xbc0] sm:$0xff] }
 0x1f6   : > { %v2184_v52 = vmul.f32 %v4128_v18, %v2183_v36  ;;  %v826_v21 = vadd.f32 %v825_v0, %v824_v57  ;;  %4131 = vrcp.f32 %v2140_v49  ;;  %vm2189_vm9 = vcmp.eq.f32.partialorder %v5201_v34, inf  ;;  %v2552_v57 = vld [vmem:[%s6429_s14 + $0x918] sm:$0xff]  ;;  %s3324_s23 = smul.f32 0.5, %s6190_s1 }
 0x1f7   : > { %v2028_v51 = vpop.f32.mrf.mxu2  ;;  %v2178_v10 = vsel %vm2177_vm7, %v5132_v24, %v2176_v44  ;;  %v2577_v24 = vld [vmem:[%s6429_s14 + $0x9e0] sm:$0xff]  ;;  %v2141_v48 = vadd.f32 %v5115_v47, %v5263_v59  ;;  %v2192_v5 = vand.u32 2147483648, %v5201_v34  ;;  %v2208_v12 = vlaneseq  ;;  %v2572_v47 = vld [vmem:[%s6429_s14 + $0x9b8] sm:$0xff] }
 0x1f8   : > { %v2054_v16 = vpop.f32.mrf.mxu3  ;;  %v2185_v33 = vmul.f32 0.5, %v2184_v52  ;;  %v2029_v56 = vadd.f32 %v2028_v51, %v5218_v62  ;;  %v2181_v63 = vsel %vm2179_vm8, %v2180_v55, %v2178_v10  ;;  %v828_v50 = vadd.f32 %v827_v32, %v826_v21  ;;  %v2080_v4 = vpop.f32.mrf.mxu0  ;;  %v2632_v0 = vld [vmem:[%s6429_s14 + $0xb98] sm:$0xff] }
 0x1f9   : > { %v2200_v37 = vadd.f32 %v5265_v38, %v2181_v63  ;;  %vm2191_vm10 = vcmp.eq.f32.partialorder %v5201_v34, 0.0  ;;  %v5319_v29 = vand.u32 127, %v2208_v12  ;;  %v5325_v44 = vshrl.u32 %v2208_v12, 7  ;;  %v2413_v63 = vld [vmem:[%s6429_s14 + $0x4c0] sm:$0xff]  ;;  %v2403_v12 = vld [vmem:[%s6429_s14 + $0x470] sm:$0xff] }
 0x1fa   : > { %v2186_v54 = vsub.f32 1.5, %v2185_v33  ;;  %v2055_v22 = vadd.f32 %v2054_v16, %v2029_v56  ;;  %v2642_v33 = vld [vmem:[%s6429_s14 + $0xbe8] sm:$0xff] }
 0x1fb   : > { %v4130_v14 = vpop.eup %4129  ;;  %4133 = vrcp.f32 %v2200_v37  ;;  %vm2217_vm11 = vcmp.lt.s32.totalorder %v5319_v29, 22  ;;  %v2211_v56 = vadd.s32 16, %v5325_v44  ;;  %v2328_v37 = vld [vmem:[%s6429_s14 + $0x218] sm:$0xff]  ;;  %vm3330_vm0 = vcmp.lt.s32.totalorder %v5325_v44, 6 }
 0x1fc   : > { %v2187_v15 = vmul.f32 %v4128_v18, %v2186_v54  ;;  %829 = vadd.xlane.f32.xlu0 %v828_v50  ;;  %v2081_v25 = vadd.f32 %v2080_v4, %v2055_v22  ;;  %v4132_v16 = vpop.eup %4131  ;;  %4135 = vrcp.f32 %v2141_v48  ;;  %v2547_v22 = vld [vmem:[%s6429_s14 + $0x8f0] sm:$0xff]  ;;  %vm3331_vm1 = vcmp.lt.s32.totalorder %v5319_v29, 6 }
 0x1fd   : > { %vm2216_vm12 = vcmp.lt.s32.totalorder %v2211_v56, 22  ;;  %v2592_v56 = vld [vmem:[%s6429_s14 + $0xa58] sm:$0xff]  ;;  %vm3332_vm2 = vmand %vm3330_vm0, %vm3331_vm1  ;;  %vm3734_vm0 = vcmp.eq.s32.totalorder %v5319_v29, 0  ;;  %vm3742_vm1 = vcmp.eq.s32.totalorder %v5319_v29, 2 }
 0x1fe   : > { %v2188_v18 = vmul.f32 %v2187_v15, %v5201_v34  ;;  %v2418_v15 = vld [vmem:[%s6429_s14 + $0x4e8] sm:$0xff]  ;;  %vm5408_vm13 = vmand %vm2216_vm12, %vm2217_vm11 }
 0x1ff   : > { %v2031_v45 = vpop.f32.mrf.mxu2 }
 0x200   : > { %v2057_v20 = vpop.f32.mrf.mxu3  ;;  %v2190_v28 = vsel %vm2189_vm9, %v5201_v34, %v2188_v18  ;;  %v2032_v51 = vadd.f32 %v2031_v45, %v2005_v26  ;;  %v2567_v26 = vld [vmem:[%s6429_s14 + $0x990] sm:$0xff]  ;;  %v2083_v42 = vpop.f32.mrf.mxu0 }
 0x201   : > { %v2103_v2 = vpop.f32.mrf.mxu1  ;;  %v2193_v11 = vsel %vm2191_vm10, %v2192_v5, %v2190_v28  ;;  %v4134_v54 = vpop.eup %4133  ;;  %v2323_v5 = vld [vmem:[%s6429_s14 + $0x1f0] sm:$0xff]  ;;  %vm3615_vm10 = vcmask 9216  }
 0x202   : > { %v2104_v6 = vadd.f32 %v2103_v2, %v2078_v60  ;;  %v2058_v3 = vadd.f32 %v2057_v20, %v2032_v51  ;;  %v2201_v9 = vadd.f32 %v5265_v38, %v2193_v11  ;;  %v4136_v20 = vpop.eup %4135  ;;  %v2537_v51 = vld [vmem:[%s6429_s14 + $0x8a0] sm:$0xff] }
 0x204   : > { %v2127_v62 = vsub.f32 %v2104_v6, %v4735_v43  ;;  %v2657_v43 = vld [vmem:[%s6429_s14 + $0xc60] sm:$0xff]  ;;  %v2084_v60 = vadd.f32 %v2083_v42, %v2058_v3  ;;  %4137 = vrcp.f32 %v2201_v9  ;;  %v2607_v9 = vld [vmem:[%s6429_s14 + $0xad0] sm:$0xff]  ;;  %v2602_v42 = vld [vmem:[%s6429_s14 + $0xaa8] sm:$0xff] }
 0x205   : > { %v2333_v6 = vld [vmem:[%s6429_s14 + $0x240] sm:$0xff] }
 0x206   : > { %v2130_v30 = vmul.f32 2.0, %v2127_v62  ;;  %v2196_v23 = vadd.f32 %v5265_v38, %v2127_v62  ;;  %v2627_v62 = vld [vmem:[%s6429_s14 + $0xb70] sm:$0xff] }
 0x207   : > { %v5294_v58 = vpop.f32.mrf.mxu2 }
 0x208   : > { %v2134_v40 = vadd.f32 %v5263_v59, %v2130_v30  ;;  %v5302_v17 = vpop.f32.mrf.mxu3  ;;  %2812 = vmatmul.f32.vlgmr.msra.gmra.mxu0 %v5294_v58  ;;  %v2205_v36 = vmul.f32 %v4130_v14, %v2196_v23  ;;  %v2408_v30 = vld [vmem:[%s6429_s14 + $0x498] sm:$0xff]  ;;  %v2622_v14 = vld [vmem:[%s6429_s14 + $0xb48] sm:$0xff] }
 0x209   : > { %v2106_v19 = vpop.f32.mrf.mxu1  ;;  %2832 = vmatmul.f32.vlgmr.msrb.gmra.mxu1 %v5302_v17  ;;  %2956 = vmatpush.msra.mxu0 %v2577_v24 }
 0x20a   : > { %v2107_v46 = vadd.f32 %v2106_v19, %v2081_v25  ;;  %2976 = vmatpush.msrb.mxu1 %v2657_v43  ;;  %v2146_v52 = vmul.f32 %v4132_v16, %v2134_v40  ;;  %v2235_v21 = vsel %vm2217_vm11, %v2205_v36, 0.0  ;;  %v4138_v25 = vpop.eup %4137  ;;  %v2617_v40 = vld [vmem:[%s6429_s14 + $0xb20] sm:$0xff] }
 0x20b   : > { %2957 = vmatpush.msra.mxu0 %v2572_v47  ;;  %v2318_v47 = vld [vmem:[%s6429_s14 + $0x1c8] sm:$0xff] }
 0x20c   : > { %v2128_v34 = vsub.f32 %v2107_v46, %v4745_v31  ;;  %2977 = vmatpush.msrb.mxu1 %v2652_v13  ;;  %v2142_v31 = vadd.f32 %v5182_v7, %v5263_v59  ;;  %v2338_v7 = vld [vmem:[%s6429_s14 + $0x268] sm:$0xff]  ;;  %v2221_v23 = vsel %vm2217_vm11, %v2146_v52, 0.0  ;;  %v2612_v52 = vld [vmem:[%s6429_s14 + $0xaf8] sm:$0xff] }
 0x20d   : > { %2958 = vmatpush.msra.mxu0 %v2567_v26  ;;  %v2398_v13 = vld [vmem:[%s6429_s14 + $0x448] sm:$0xff]  ;;  %v2532_v26 = vld [vmem:[%s6429_s14 + $0x878] sm:$0xff] }
 0x20e   : > { %v2131_v41 = vmul.f32 2.0, %v2128_v34  ;;  %v2197_v49 = vadd.f32 %v5265_v38, %v2128_v34  ;;  %2978 = vmatpush.msrb.mxu1 %v2647_v39  ;;  %4139 = vrcp.f32 %v2142_v31  ;;  %v2313_v39 = vld [vmem:[%s6429_s14 + $0x1a0] sm:$0xff]  ;;  %v2522_v31 = vld [vmem:[%s6429_s14 + $0x828] sm:$0xff] }
 0x20f   : > { %2959 = vmatpush.msra.mxu0 %v2562_v61  ;;  %v5334_v55 = vpop.f32.mrf.mxu2  ;;  %v2393_v34 = vld [vmem:[%s6429_s14 + $0x420] sm:$0xff]  ;;  %v2527_v61 = vld [vmem:[%s6429_s14 + $0x850] sm:$0xff] }
 0x210   : > { %v2135_v45 = vadd.f32 %v5263_v59, %v2131_v41  ;;  %2979 = vmatpush.msrb.mxu1 %v2642_v33  ;;  %v5344_v10 = vpop.f32.mrf.mxu3  ;;  %2852 = vmatmul.f32.vlgmr.msra.gmra.mxu3 %v5334_v55  ;;  %v2206_v8 = vmul.f32 %v4134_v54, %v2197_v49  ;;  %v2308_v41 = vld [vmem:[%s6429_s14 + $0x178] sm:$0xff] }
 0x211   : > { %v2109_v27 = vpop.f32.mrf.mxu1  ;;  %2872 = vmatmul.f32.vlgmr.msra.gmra.mxu2 %v5344_v10  ;;  %2912 = vmatmul.f32.vlgmr.msra.gmra.mxu1 %v5294_v58  ;;  %v2388_v54 = vld [vmem:[%s6429_s14 + $0x3f8] sm:$0xff] }
 0x212   : > { %v2110_v2 = vadd.f32 %v2109_v27, %v2084_v60  ;;  %2960 = vmatpush.msra.mxu0 %v2557_v53  ;;  %2980 = vmatpush.msrb.mxu1 %v2637_v35  ;;  %v2236_v32 = vsel %vm2217_vm11, %v2206_v8, 0.0  ;;  %v2147_v18 = vmul.f32 %v4136_v20, %v2135_v45  ;;  %v2303_v53 = vld [vmem:[%s6429_s14 + $0x150] sm:$0xff]  ;;  %v2517_v60 = vld [vmem:[%s6429_s14 + $0x800] sm:$0xff]  ;;  %v2512_v8 = vld [vmem:[%s6429_s14 + $0x7d8] sm:$0xff] }
 0x213   : > { %2996 = vmatpush.msra.mxu3 %v2338_v7  ;;  %3016 = vmatpush.msra.mxu2 %v2418_v15  ;;  %v2238_v50 = vadd.f32 %v2236_v32, %v2235_v21  ;;  %v2383_v35 = vld [vmem:[%s6429_s14 + $0x3d0] sm:$0xff]  ;;  %v2597_v45 = vld [vmem:[%s6429_s14 + $0xa80] sm:$0xff]  ;;  %v2298_v7 = vld [vmem:[%s6429_s14 + $0x128] sm:$0xff] }
 0x214   : > { %v2129_v4 = vsub.f32 %v2110_v2, %v4759_v1  ;;  %2961 = vmatpush.msra.mxu0 %v2552_v57  ;;  %2981 = vmatpush.msrb.mxu1 %v2632_v0  ;;  %v2222_v24 = vsel %vm2217_vm11, %v2147_v18, 0.0  ;;  %v2542_v1 = vld [vmem:[%s6429_s14 + $0x8c8] sm:$0xff]  ;;  %v4140_v19 = vpop.eup %4139  ;;  %v2293_v20 = vld [vmem:[%s6429_s14 + $0x100] sm:$0xff]  ;;  %v2507_v57 = vld [vmem:[%s6429_s14 + $0x7b0] sm:$0xff] }
 0x215   : > { %2997 = vmatpush.msra.mxu3 %v2333_v6  ;;  %3017 = vmatpush.msra.mxu2 %v2413_v63  ;;  %v2224_v48 = vadd.f32 %v2222_v24, %v2221_v23  ;;  %v2378_v15 = vld [vmem:[%s6429_s14 + $0x3a8] sm:$0xff]  ;;  %v2373_v27 = vld [vmem:[%s6429_s14 + $0x380] sm:$0xff]  ;;  %v2587_v0 = vld [vmem:[%s6429_s14 + $0xa30] sm:$0xff] }
 0x216   : > { %v2132_v43 = vmul.f32 2.0, %v2129_v4  ;;  %v2198_v28 = vadd.f32 %v5265_v38, %v2129_v4  ;;  %2962 = vmatpush.msra.mxu0 %v2547_v22  ;;  %2982 = vmatpush.msrb.mxu1 %v2627_v62  ;;  %v2288_v2 = vld [vmem:[%s6429_s14 + $0xd8] sm:$0xff]  ;;  %v2502_v63 = vld [vmem:[%s6429_s14 + $0x788] sm:$0xff]  ;;  %v2283_v32 = vld [vmem:[%s6429_s14 + $0xb0] sm:$0xff] }
 0x217   : > { %2998 = vmatpush.msra.mxu3 %v2328_v37  ;;  %3018 = vmatpush.msra.mxu2 %v2408_v30  ;;  %v5422_v46 = vpop.f32.mrf.mxu2  ;;  %v2368_v6 = vld [vmem:[%s6429_s14 + $0x358] sm:$0xff]  ;;  %v2582_v21 = vld [vmem:[%s6429_s14 + $0xa08] sm:$0xff]  ;;  %v2363_v18 = vld [vmem:[%s6429_s14 + $0x330] sm:$0xff] }
 0x218   : > { %2963 = vmatpush.msra.mxu0 %v2542_v1  ;;  %2983 = vmatpush.msrb.mxu1 %v2622_v14  ;;  %v2207_v36 = vmul.f32 %v4138_v25, %v2198_v28  ;;  %v2136_v16 = vadd.f32 %v5263_v59, %v2132_v43  ;;  %v2498_v22 = vld [vmem:[%s6429_s14 + $0x768] sm:$0xff]  ;;  %v2493_v37 = vld [vmem:[%s6429_s14 + $0x740] sm:$0xff]  ;;  %v2488_v1 = vld [vmem:[%s6429_s14 + $0x718] sm:$0xff] }
 0x219   : > { %2999 = vmatpush.msra.mxu3 %v2323_v5  ;;  %3019 = vmatpush.msra.mxu2 %v2403_v12  ;;  %v2578_v62 = vld [vmem:[%s6429_s14 + $0x9e8] sm:$0xff]  ;;  %v2573_v30 = vld [vmem:[%s6429_s14 + $0x9c0] sm:$0xff]  ;;  %v2568_v14 = vld [vmem:[%s6429_s14 + $0x998] sm:$0xff] }
 0x21a   : > { %2932 = vmatmul.f32.vlgmr.msrb.gmra.mxu3 %v5302_v17  ;;  %2964 = vmatpush.msra.mxu0 %v2537_v51  ;;  %v2237_v11 = vsel %vm5408_vm13, %v2207_v36, 0.0  ;;  %v2148_v59 = vmul.f32 %v4140_v19, %v2136_v16  ;;  %v2358_v4 = vld [vmem:[%s6429_s14 + $0x308] sm:$0xff]  ;;  %v2273_v23 = vld [vmem:[%s6429_s14 + $0x60] sm:$0xff]  ;;  %v2348_v43 = vld [vmem:[%s6429_s14 + $0x2b8] sm:$0xff] }
 0x21b   : > { %2984 = vmatpush.msrb.mxu1 %v2617_v40  ;;  %3000 = vmatpush.msra.mxu3 %v2318_v47  ;;  %v2239_v3 = vadd.f32 %v2238_v50, %v2237_v11  ;;  %v2278_v50 = vld [vmem:[%s6429_s14 + $0x88] sm:$0xff]  ;;  %v2353_v24 = vld [vmem:[%s6429_s14 + $0x2e0] sm:$0xff]  ;;  %v2483_v28 = vld [vmem:[%s6429_s14 + $0x6f0] sm:$0xff] }
 0x21c   : > { %3020 = vmatpush.msra.mxu2 %v2398_v13  ;;  %2892 = vmatmul.f32.vlgmr.msrb.gmra.mxu0 %v5422_v46  ;;  %v2223_v33 = vsel %vm5408_vm13, %v2148_v59, 0.0  ;;  %v2563_v5 = vld [vmem:[%s6429_s14 + $0x970] sm:$0xff]  ;;  %v2478_v51 = vld [vmem:[%s6429_s14 + $0x6c8] sm:$0xff]  ;;  %v2473_v36 = vld [vmem:[%s6429_s14 + $0x6a0] sm:$0xff] }
 0x21d   : > { %2952 = vmatmul.f32.vlgmr.msrb.gmra.mxu2 %v5334_v55  ;;  %2965 = vmatpush.msra.mxu0 %v2532_v26  ;;  %v2225_v49 = vadd.f32 %v2224_v48, %v2223_v33  ;;  %v2268_v48 = vld [vmem:[%s6429_s14 + $0x38] sm:$0xff]  ;;  %v2263_v12 = vld [vmem:[%s6429_s14 + $0x10] sm:$0xff]  ;;  %v2558_v38 = vld [vmem:[%s6429_s14 + $0x948] sm:$0xff] }
 0x21e   : > { %2985 = vmatpush.msrb.mxu1 %v2612_v52  ;;  %3001 = vmatpush.msra.mxu3 %v2313_v39  ;;  %v2343_v25 = vld [vmem:[%s6429_s14 + $0x290] sm:$0xff]  ;;  %v2658_v40 = vld [vmem:[%s6429_s14 + $0xc68] sm:$0xff]  ;;  %v2553_v16 = vld [vmem:[%s6429_s14 + $0x920] sm:$0xff] }
 0x21f   : > { %3021 = vmatpush.msra.mxu2 %v2393_v34  ;;  %2966 = vmatpush.msra.mxu0 %v2527_v61  ;;  %v2339_v47 = vld [vmem:[%s6429_s14 + $0x270] sm:$0xff]  ;;  %v2653_v19 = vld [vmem:[%s6429_s14 + $0xc40] sm:$0xff]  ;;  %v2334_v13 = vld [vmem:[%s6429_s14 + $0x248] sm:$0xff] }
 0x220   : > { %2986 = vmatpush.msrb.mxu1 %v2607_v9  ;;  %3002 = vmatpush.msra.mxu3 %v2308_v41  ;;  %v2468_v26 = vld [vmem:[%s6429_s14 + $0x678] sm:$0xff]  ;;  %v2329_v52 = vld [vmem:[%s6429_s14 + $0x220] sm:$0xff]  ;;  %v2463_v39 = vld [vmem:[%s6429_s14 + $0x650] sm:$0xff] }
 0x221   : > { %3022 = vmatpush.msra.mxu2 %v2388_v54  ;;  %2240 = vadd.xlane.f32.xlu2 %v2239_v3  ;;  %v2548_v11 = vld [vmem:[%s6429_s14 + $0x8f8] sm:$0xff]  ;;  %v2543_v3 = vld [vmem:[%s6429_s14 + $0x8d0] sm:$0xff]  ;;  %v2458_v33 = vld [vmem:[%s6429_s14 + $0x628] sm:$0xff] }
 0x222   : > { %2967 = vmatpush.msra.mxu0 %v2522_v31  ;;  %2987 = vmatpush.msrb.mxu1 %v2602_v42  ;;  %v2648_v59 = vld [vmem:[%s6429_s14 + $0xc18] sm:$0xff]  ;;  %v2643_v34 = vld [vmem:[%s6429_s14 + $0xbf0] sm:$0xff]  ;;  %v2538_v9 = vld [vmem:[%s6429_s14 + $0x8a8] sm:$0xff] }
 0x223   : > { %3003 = vmatpush.msra.mxu3 %v2303_v53  ;;  %3023 = vmatpush.msra.mxu2 %v2383_v35  ;;  %v2324_v61 = vld [vmem:[%s6429_s14 + $0x1f8] sm:$0xff]  ;;  %v2638_v41 = vld [vmem:[%s6429_s14 + $0xbc8] sm:$0xff]  ;;  %v2453_v54 = vld [vmem:[%s6429_s14 + $0x600] sm:$0xff] }
 0x224   : > { %2226 = vadd.xlane.f32.xlu1 %v2225_v49  ;;  %2968 = vmatpush.msra.mxu0 %v2517_v60  ;;  %v2319_v49 = vld [vmem:[%s6429_s14 + $0x1d0] sm:$0xff]  ;;  %v2533_v31 = vld [vmem:[%s6429_s14 + $0x880] sm:$0xff]  ;;  %v2314_v53 = vld [vmem:[%s6429_s14 + $0x1a8] sm:$0xff] }
 0x225   : > { %2988 = vmatpush.msrb.mxu1 %v2597_v45  ;;  %3004 = vmatpush.msra.mxu3 %v2298_v7  ;;  %v2633_v42 = vld [vmem:[%s6429_s14 + $0xba0] sm:$0xff]  ;;  %v2448_v35 = vld [vmem:[%s6429_s14 + $0x5d8] sm:$0xff] }
 0x226   : > { %3024 = vmatpush.msra.mxu2 %v2378_v15  ;;  %2969 = vmatpush.msra.mxu0 %v2512_v8  ;;  %v2528_v60 = vld [vmem:[%s6429_s14 + $0x858] sm:$0xff]  ;;  %v2309_v7 = vld [vmem:[%s6429_s14 + $0x180] sm:$0xff]  ;;  %v2443_v15 = vld [vmem:[%s6429_s14 + $0x5b0] sm:$0xff] }
 0x227   : > { %2989 = vmatpush.msrb.mxu1 %v2592_v56  ;;  %3005 = vmatpush.msra.mxu3 %v2293_v20  ;;  %v2628_v45 = vld [vmem:[%s6429_s14 + $0xb78] sm:$0xff]  ;;  %v2523_v8 = vld [vmem:[%s6429_s14 + $0x830] sm:$0xff] }
 0x228   : > { %3025 = vmatpush.msra.mxu2 %v2373_v27  ;;  %2970 = vmatpush.msra.mxu0 %v2507_v57  ;;  %v2623_v56 = vld [vmem:[%s6429_s14 + $0xb50] sm:$0xff]  ;;  %v2304_v20 = vld [vmem:[%s6429_s14 + $0x158] sm:$0xff]  ;;  %v2438_v27 = vld [vmem:[%s6429_s14 + $0x588] sm:$0xff] }
 0x229   : > { %2990 = vmatpush.msrb.mxu1 %v2587_v0  ;;  %3006 = vmatpush.msra.mxu3 %v2288_v2  ;;  %v2518_v57 = vld [vmem:[%s6429_s14 + $0x808] sm:$0xff]  ;;  %v2299_v2 = vld [vmem:[%s6429_s14 + $0x130] sm:$0xff] }
 0x22a   : > { %3026 = vmatpush.msra.mxu2 %v2368_v6  ;;  %2971 = vmatpush.msra.mxu0 %v2502_v63  ;;  %v2618_v0 = vld [vmem:[%s6429_s14 + $0xb28] sm:$0xff]  ;;  %v2433_v6 = vld [vmem:[%s6429_s14 + $0x560] sm:$0xff] }
 0x22b   : > { %2991 = vmatpush.msrb.mxu1 %v2582_v21  ;;  %3007 = vmatpush.msra.mxu3 %v2283_v32  ;;  %v2513_v63 = vld [vmem:[%s6429_s14 + $0x7e0] sm:$0xff]  ;;  %v2294_v32 = vld [vmem:[%s6429_s14 + $0x108] sm:$0xff] }
 0x22c   : > { %3027 = vmatpush.msra.mxu2 %v2363_v18  ;;  %2972 = vmatmul.f32.vlgmr.msra.gmra.mxu0 %v5344_v10  ;;  %v2613_v21 = vld [vmem:[%s6429_s14 + $0xb00] sm:$0xff]  ;;  %v2428_v18 = vld [vmem:[%s6429_s14 + $0x538] sm:$0xff] }
 0x22d   : > { %2992 = vmatmul.f32.vlgmr.msrb.gmra.mxu1 %v5422_v46  ;;  %3036 = vmatpush.msrb.mxu0 %v2498_v22  ;;  %v2508_v22 = vld [vmem:[%s6429_s14 + $0x7b8] sm:$0xff] }
 0x22e   : > { %3056 = vmatpush.msra.mxu1 %v2578_v62  ;;  %3008 = vmatpush.msra.mxu3 %v2278_v50  ;;  %v2608_v62 = vld [vmem:[%s6429_s14 + $0xad8] sm:$0xff]  ;;  %v2289_v50 = vld [vmem:[%s6429_s14 + $0xe0] sm:$0xff] }
 0x22f   : > { %3028 = vmatpush.msra.mxu2 %v2358_v4  ;;  %3037 = vmatpush.msrb.mxu0 %v2493_v37  ;;  %v2423_v4 = vld [vmem:[%s6429_s14 + $0x510] sm:$0xff] }
 0x230   : > { %3057 = vmatpush.msra.mxu1 %v2573_v30  ;;  %3009 = vmatpush.msra.mxu3 %v2273_v23  ;;  %v2503_v37 = vld [vmem:[%s6429_s14 + $0x790] sm:$0xff]  ;;  %v2284_v23 = vld [vmem:[%s6429_s14 + $0xb8] sm:$0xff] }
 0x231   : > { %3029 = vmatpush.msra.mxu2 %v2353_v24  ;;  %3038 = vmatpush.msrb.mxu0 %v2488_v1  ;;  %v2603_v30 = vld [vmem:[%s6429_s14 + $0xab0] sm:$0xff] }
 0x232   : > { %3058 = vmatpush.msra.mxu1 %v2568_v14  ;;  %3010 = vmatpush.msra.mxu3 %v2268_v48  ;;  %v2419_v24 = vld [vmem:[%s6429_s14 + $0x4f0] sm:$0xff]  ;;  %v2598_v14 = vld [vmem:[%s6429_s14 + $0xa88] sm:$0xff] }
 0x233   : > { %3030 = vmatpush.msra.mxu2 %v2348_v43  ;;  %3039 = vmatpush.msrb.mxu0 %v2483_v28  ;;  %v2499_v1 = vld [vmem:[%s6429_s14 + $0x770] sm:$0xff]  ;;  %v2414_v43 = vld [vmem:[%s6429_s14 + $0x4c8] sm:$0xff] }
 0x234   : > { %3059 = vmatpush.msra.mxu1 %v2563_v5  ;;  %3011 = vmatpush.msra.mxu3 %v2263_v12  ;;  %v2279_v48 = vld [vmem:[%s6429_s14 + $0x90] sm:$0xff]  ;;  %v2494_v28 = vld [vmem:[%s6429_s14 + $0x748] sm:$0xff]  ;;  %v2593_v5 = vld [vmem:[%s6429_s14 + $0xa60] sm:$0xff] }
 0x235   : > { %3031 = vmatpush.msra.mxu2 %v2343_v25  ;;  %3012 = vmatmul.f32.vlgmr.msra.gmra.mxu3 %v5294_v58  ;;  %v2274_v12 = vld [vmem:[%s6429_s14 + $0x68] sm:$0xff]  ;;  %v2409_v25 = vld [vmem:[%s6429_s14 + $0x4a0] sm:$0xff] }
 0x236   : > { %3032 = vmatmul.f32.vlgmr.msra.gmra.mxu2 %v5302_v17  ;;  %3040 = vmatpush.msrb.mxu0 %v2478_v51  ;;  %v2489_v51 = vld [vmem:[%s6429_s14 + $0x720] sm:$0xff] }
 0x237   : > { %3060 = vmatpush.msra.mxu1 %v2558_v38  ;;  %3076 = vmatpush.msrb.mxu3 %v2658_v40  ;;  %v2588_v38 = vld [vmem:[%s6429_s14 + $0xa38] sm:$0xff]  ;;  %v2269_v40 = vld [vmem:[%s6429_s14 + $0x40] sm:$0xff] }
 0x238   : > { %3096 = vmatpush.msrb.mxu2 %v2339_v47  ;;  %3041 = vmatpush.msrb.mxu0 %v2473_v36  ;;  %v2404_v47 = vld [vmem:[%s6429_s14 + $0x478] sm:$0xff] }
 0x239   : > { %3061 = vmatpush.msra.mxu1 %v2553_v16  ;;  %3077 = vmatpush.msrb.mxu3 %v2653_v19  ;;  %v2484_v36 = vld [vmem:[%s6429_s14 + $0x6f8] sm:$0xff]  ;;  %v2583_v16 = vld [vmem:[%s6429_s14 + $0xa10] sm:$0xff] }
 0x23a   : > { %3097 = vmatpush.msrb.mxu2 %v2334_v13  ;;  %3042 = vmatpush.msrb.mxu0 %v2468_v26  ;;  %v2264_v19 = vld [vmem:[%s6429_s14 + $0x18] sm:$0xff]  ;;  %v2399_v13 = vld [vmem:[%s6429_s14 + $0x450] sm:$0xff] }
 0x23b   : > { %3062 = vmatpush.msra.mxu1 %v2548_v11  ;;  %3078 = vmatpush.msrb.mxu3 %v2648_v59  ;;  %v2479_v26 = vld [vmem:[%s6429_s14 + $0x6d0] sm:$0xff] }
 0x23c   : > { %3098 = vmatpush.msrb.mxu2 %v2329_v52  ;;  %3043 = vmatpush.msrb.mxu0 %v2463_v39  ;;  %v2579_v11 = vld [vmem:[%s6429_s14 + $0x9f0] sm:$0xff]  ;;  %v2394_v52 = vld [vmem:[%s6429_s14 + $0x428] sm:$0xff] }
 0x23d   : > { %3063 = vmatpush.msra.mxu1 %v2543_v3  ;;  %3079 = vmatpush.msrb.mxu3 %v2643_v34  ;;  %v2659_v59 = vld [vmem:[%s6429_s14 + $0xc70] sm:$0xff]  ;;  %v2474_v39 = vld [vmem:[%s6429_s14 + $0x6a8] sm:$0xff] }
 0x23e   : > { %3099 = vmatpush.msrb.mxu2 %v2324_v61  ;;  %3044 = vmatpush.msrb.mxu0 %v2458_v33  ;;  %v2574_v3 = vld [vmem:[%s6429_s14 + $0x9c8] sm:$0xff]  ;;  %v2389_v61 = vld [vmem:[%s6429_s14 + $0x400] sm:$0xff] }
 0x23f   : > { %3064 = vmatpush.msra.mxu1 %v2538_v9  ;;  %3080 = vmatpush.msrb.mxu3 %v2638_v41  ;;  %v2654_v34 = vld [vmem:[%s6429_s14 + $0xc48] sm:$0xff]  ;;  %v2469_v33 = vld [vmem:[%s6429_s14 + $0x680] sm:$0xff] }
 0x240   : > { %3100 = vmatpush.msrb.mxu2 %v2319_v49  ;;  %3045 = vmatpush.msrb.mxu0 %v2453_v54  ;;  %v2569_v9 = vld [vmem:[%s6429_s14 + $0x9a0] sm:$0xff]  ;;  %v2384_v49 = vld [vmem:[%s6429_s14 + $0x3d8] sm:$0xff] }
 0x241   : > { %3065 = vmatpush.msra.mxu1 %v2533_v31  ;;  %3081 = vmatpush.msrb.mxu3 %v2633_v42  ;;  %v2649_v41 = vld [vmem:[%s6429_s14 + $0xc20] sm:$0xff]  ;;  %v2464_v54 = vld [vmem:[%s6429_s14 + $0x658] sm:$0xff] }
 0x242   : > { %3101 = vmatpush.msrb.mxu2 %v2314_v53  ;;  %3046 = vmatpush.msrb.mxu0 %v2448_v35  ;;  %v2564_v31 = vld [vmem:[%s6429_s14 + $0x978] sm:$0xff]  ;;  %v2379_v53 = vld [vmem:[%s6429_s14 + $0x3b0] sm:$0xff] }
 0x243   : > { %3066 = vmatpush.msra.mxu1 %v2528_v60  ;;  %3082 = vmatpush.msrb.mxu3 %v2628_v45  ;;  %v2644_v42 = vld [vmem:[%s6429_s14 + $0xbf8] sm:$0xff]  ;;  %v2459_v35 = vld [vmem:[%s6429_s14 + $0x630] sm:$0xff] }
 0x244   : > { %3102 = vmatpush.msrb.mxu2 %v2309_v7  ;;  %3047 = vmatpush.msrb.mxu0 %v2443_v15  ;;  %v2559_v60 = vld [vmem:[%s6429_s14 + $0x950] sm:$0xff]  ;;  %v2374_v7 = vld [vmem:[%s6429_s14 + $0x388] sm:$0xff] }
 0x245   : > { %3067 = vmatpush.msra.mxu1 %v2523_v8  ;;  %3083 = vmatpush.msrb.mxu3 %v2623_v56  ;;  %v2639_v45 = vld [vmem:[%s6429_s14 + $0xbd0] sm:$0xff]  ;;  %v2454_v15 = vld [vmem:[%s6429_s14 + $0x608] sm:$0xff] }
 0x246   : > { %3103 = vmatpush.msrb.mxu2 %v2304_v20  ;;  %3048 = vmatpush.msrb.mxu0 %v2438_v27  ;;  %v2554_v8 = vld [vmem:[%s6429_s14 + $0x928] sm:$0xff]  ;;  %v2369_v20 = vld [vmem:[%s6429_s14 + $0x360] sm:$0xff] }
 0x247   : > { %3068 = vmatpush.msra.mxu1 %v2518_v57  ;;  %3084 = vmatpush.msrb.mxu3 %v2618_v0  ;;  %v2634_v56 = vld [vmem:[%s6429_s14 + $0xba8] sm:$0xff]  ;;  %v2449_v27 = vld [vmem:[%s6429_s14 + $0x5e0] sm:$0xff] }
 0x248   : > { %3104 = vmatpush.msrb.mxu2 %v2299_v2  ;;  %3049 = vmatpush.msrb.mxu0 %v2433_v6  ;;  %v2549_v57 = vld [vmem:[%s6429_s14 + $0x900] sm:$0xff]  ;;  %v2364_v2 = vld [vmem:[%s6429_s14 + $0x338] sm:$0xff] }
 0x249   : > { %3069 = vmatpush.msra.mxu1 %v2513_v63  ;;  %3085 = vmatpush.msrb.mxu3 %v2613_v21  ;;  %v2629_v0 = vld [vmem:[%s6429_s14 + $0xb80] sm:$0xff]  ;;  %v2444_v6 = vld [vmem:[%s6429_s14 + $0x5b8] sm:$0xff] }
 0x24a   : > { %3105 = vmatpush.msrb.mxu2 %v2294_v32  ;;  %3050 = vmatpush.msrb.mxu0 %v2428_v18  ;;  %v2544_v63 = vld [vmem:[%s6429_s14 + $0x8d8] sm:$0xff]  ;;  %v2359_v32 = vld [vmem:[%s6429_s14 + $0x310] sm:$0xff] }
 0x24b   : > { %3070 = vmatpush.msra.mxu1 %v2508_v22  ;;  %3086 = vmatpush.msrb.mxu3 %v2608_v62  ;;  %v2624_v21 = vld [vmem:[%s6429_s14 + $0xb58] sm:$0xff]  ;;  %v2439_v18 = vld [vmem:[%s6429_s14 + $0x590] sm:$0xff] }
 0x24c   : > { %3106 = vmatpush.msrb.mxu2 %v2289_v50  ;;  %3051 = vmatpush.msrb.mxu0 %v2423_v4  ;;  %v2539_v22 = vld [vmem:[%s6429_s14 + $0x8b0] sm:$0xff]  ;;  %v2354_v50 = vld [vmem:[%s6429_s14 + $0x2e8] sm:$0xff] }
 0x24d   : > { %3071 = vmatpush.msra.mxu1 %v2503_v37  ;;  %3087 = vmatpush.msrb.mxu3 %v2603_v30  ;;  %v2619_v62 = vld [vmem:[%s6429_s14 + $0xb30] sm:$0xff]  ;;  %v2434_v4 = vld [vmem:[%s6429_s14 + $0x568] sm:$0xff] }
 0x24e   : > { %3107 = vmatpush.msrb.mxu2 %v2284_v23  ;;  %3052 = vmatmul.f32.vlgmr.msrb.gmra.mxu0 %v5334_v55  ;;  %v2534_v37 = vld [vmem:[%s6429_s14 + $0x888] sm:$0xff]  ;;  %v2349_v23 = vld [vmem:[%s6429_s14 + $0x2c0] sm:$0xff] }
 0x24f   : > { %3072 = vmatmul.f32.vlgmr.msra.gmra.mxu1 %v5344_v10  ;;  %3116 = vmatpush.msra.mxu0 %v2419_v24  ;;  %v2614_v30 = vld [vmem:[%s6429_s14 + $0xb08] sm:$0xff]  ;;  %v2429_v24 = vld [vmem:[%s6429_s14 + $0x540] sm:$0xff] }
 0x250   : > { %3136 = vmatpush.msrb.mxu1 %v2499_v1  ;;  %3088 = vmatpush.msrb.mxu3 %v2598_v14  ;;  %v2529_v1 = vld [vmem:[%s6429_s14 + $0x860] sm:$0xff] }
 0x251   : > { %3108 = vmatpush.msrb.mxu2 %v2279_v48  ;;  %3117 = vmatpush.msra.mxu0 %v2414_v43  ;;  %v2609_v14 = vld [vmem:[%s6429_s14 + $0xae0] sm:$0xff]  ;;  %v2344_v48 = vld [vmem:[%s6429_s14 + $0x298] sm:$0xff] }
 0x252   : > { %3137 = vmatpush.msrb.mxu1 %v2494_v28  ;;  %3089 = vmatpush.msrb.mxu3 %v2593_v5  ;;  %v2424_v43 = vld [vmem:[%s6429_s14 + $0x518] sm:$0xff] }
 0x253   : > { %3109 = vmatpush.msrb.mxu2 %v2274_v12  ;;  %3118 = vmatpush.msra.mxu0 %v2409_v25  ;;  %v2524_v28 = vld [vmem:[%s6429_s14 + $0x838] sm:$0xff] }
 0x254   : > { %3138 = vmatpush.msrb.mxu1 %v2489_v51  ;;  %3090 = vmatpush.msrb.mxu3 %v2588_v38  ;;  %v2604_v5 = vld [vmem:[%s6429_s14 + $0xab8] sm:$0xff]  ;;  %v2519_v51 = vld [vmem:[%s6429_s14 + $0x810] sm:$0xff] }
 0x255   : > { %3110 = vmatpush.msrb.mxu2 %v2269_v40  ;;  %3119 = vmatpush.msra.mxu0 %v2404_v47  ;;  %v2340_v12 = vld [vmem:[%s6429_s14 + $0x278] sm:$0xff]  ;;  %v2599_v38 = vld [vmem:[%s6429_s14 + $0xa90] sm:$0xff] }
 0x256   : > { %3139 = vmatpush.msrb.mxu1 %v2484_v36  ;;  %3091 = vmatpush.msrb.mxu3 %v2583_v16  ;;  %v2420_v25 = vld [vmem:[%s6429_s14 + $0x4f8] sm:$0xff]  ;;  %v2335_v40 = vld [vmem:[%s6429_s14 + $0x250] sm:$0xff]  ;;  %v2514_v36 = vld [vmem:[%s6429_s14 + $0x7e8] sm:$0xff] }
 0x257   : > { %3111 = vmatpush.msrb.mxu2 %v2264_v19  ;;  %3092 = vmatmul.f32.vlgmr.msrb.gmra.mxu3 %v5422_v46  ;;  %v2415_v47 = vld [vmem:[%s6429_s14 + $0x4d0] sm:$0xff]  ;;  %v2594_v19 = vld [vmem:[%s6429_s14 + $0xa68] sm:$0xff] }
 0x258   : > { %3112 = vmatmul.f32.vlgmr.msrb.gmra.mxu2 %v5294_v58  ;;  %3120 = vmatpush.msra.mxu0 %v2399_v13  ;;  %v2330_v13 = vld [vmem:[%s6429_s14 + $0x228] sm:$0xff] }
 0x259   : > { %3140 = vmatpush.msrb.mxu1 %v2479_v26  ;;  %3156 = vmatpush.msra.mxu3 %v2579_v11  ;;  %v2410_v26 = vld [vmem:[%s6429_s14 + $0x4a8] sm:$0xff]  ;;  %v2509_v11 = vld [vmem:[%s6429_s14 + $0x7c0] sm:$0xff] }
 0x25a   : > { %3176 = vmatpush.msra.mxu2 %v2659_v59  ;;  %3121 = vmatpush.msra.mxu0 %v2394_v52  ;;  %v2589_v59 = vld [vmem:[%s6429_s14 + $0xa40] sm:$0xff] }
 0x25b   : > { %3141 = vmatpush.msrb.mxu1 %v2474_v39  ;;  %3157 = vmatpush.msra.mxu3 %v2574_v3  ;;  %v5930_v16 = vpop.xlane.xlu1 %3363  ;;  %v2325_v52 = vld [vmem:[%s6429_s14 + $0x200] sm:$0xff]  ;;  %v2504_v3 = vld [vmem:[%s6429_s14 + $0x798] sm:$0xff] }
 0x25c   : > { %3177 = vmatpush.msra.mxu2 %v2654_v34  ;;  %3122 = vmatpush.msra.mxu0 %v2389_v61  ;;  %v2405_v39 = vld [vmem:[%s6429_s14 + $0x480] sm:$0xff]  ;;  %v2584_v34 = vld [vmem:[%s6429_s14 + $0xa18] sm:$0xff] }
 0x25d   : > { %3142 = vmatpush.msrb.mxu1 %v2469_v33  ;;  %3158 = vmatpush.msra.mxu3 %v2569_v9  ;;  %v2320_v61 = vld [vmem:[%s6429_s14 + $0x1d8] sm:$0xff] }
 0x25e   : > { %3178 = vmatpush.msra.mxu2 %v2649_v41  ;;  %3123 = vmatpush.msra.mxu0 %v2384_v49  ;;  %v2400_v9 = vld [vmem:[%s6429_s14 + $0x458] sm:$0xff] }
 0x25f   : > { %3143 = vmatpush.msrb.mxu1 %v2464_v54  ;;  %3159 = vmatpush.msra.mxu3 %v2564_v31  ;;  %v2500_v41 = vld [vmem:[%s6429_s14 + $0x778] sm:$0xff]  ;;  %v2315_v54 = vld [vmem:[%s6429_s14 + $0x1b0] sm:$0xff] }
 0x260   : > { %3179 = vmatpush.msra.mxu2 %v2644_v42  ;;  %3124 = vmatpush.msra.mxu0 %v2379_v53  ;;  %v2580_v49 = vld [vmem:[%s6429_s14 + $0x9f8] sm:$0xff]  ;;  %v2395_v31 = vld [vmem:[%s6429_s14 + $0x430] sm:$0xff] }
 0x261   : > { %3144 = vmatpush.msrb.mxu1 %v2459_v35  ;;  %3160 = vmatpush.msra.mxu3 %v2559_v60  ;;  %v2495_v42 = vld [vmem:[%s6429_s14 + $0x750] sm:$0xff]  ;;  %v2310_v35 = vld [vmem:[%s6429_s14 + $0x188] sm:$0xff] }
 0x262   : > { %3180 = vmatpush.msra.mxu2 %v2639_v45  ;;  %3125 = vmatpush.msra.mxu0 %v2374_v7  ;;  %v2575_v53 = vld [vmem:[%s6429_s14 + $0x9d0] sm:$0xff]  ;;  %v2390_v45 = vld [vmem:[%s6429_s14 + $0x408] sm:$0xff] }
 0x263   : > { %3145 = vmatpush.msrb.mxu1 %v2454_v15  ;;  %3161 = vmatpush.msra.mxu3 %v2554_v8  ;;  %v2490_v7 = vld [vmem:[%s6429_s14 + $0x728] sm:$0xff] }
 0x264   : > { %3181 = vmatpush.msra.mxu2 %v2634_v56  ;;  %3126 = vmatpush.msra.mxu0 %v2369_v20  ;;  %v2570_v56 = vld [vmem:[%s6429_s14 + $0x9a8] sm:$0xff]  ;;  %v2305_v20 = vld [vmem:[%s6429_s14 + $0x160] sm:$0xff] }
 0x265   : > { %3146 = vmatpush.msrb.mxu1 %v2449_v27  ;;  %3162 = vmatpush.msra.mxu3 %v2549_v57  ;;  %v850_v60 = vpop.xlane.xlu1 %849  ;;  %v2385_v27 = vld [vmem:[%s6429_s14 + $0x3e0] sm:$0xff] }
 0x266   : > { %3182 = vmatpush.msra.mxu2 %v2629_v0  ;;  %3127 = vmatpush.msra.mxu0 %v2364_v2  ;;  %v851_v15 = vrot.slane %v850_v60, 4  ;;  %v2485_v57 = vld [vmem:[%s6429_s14 + $0x700] sm:$0xff]  ;;  %v2300_v2 = vld [vmem:[%s6429_s14 + $0x138] sm:$0xff] }
 0x267   : > { %3147 = vmatpush.msrb.mxu1 %v2444_v6  ;;  %3163 = vmatpush.msra.mxu3 %v2544_v63  ;;  %v810_v33 = vpop.xlane.xlu0 %809  ;;  %v2565_v0 = vld [vmem:[%s6429_s14 + $0x980] sm:$0xff]  ;;  %v2380_v6 = vld [vmem:[%s6429_s14 + $0x3b8] sm:$0xff] }
 0x268   : > { %3183 = vmatpush.msra.mxu2 %v2624_v21  ;;  %3128 = vmatpush.msra.mxu0 %v2359_v32  ;;  %v811_v8 = vrot.slane %v810_v33, 4  ;;  %v2480_v63 = vld [vmem:[%s6429_s14 + $0x6d8] sm:$0xff]  ;;  %v852_v21 = vadd.f32 %v851_v15, %v850_v60  ;;  %v2345_v60 = vld [vmem:[%s6429_s14 + $0x2a0] sm:$0xff] }
 0x269   : > { %3148 = vmatpush.msrb.mxu1 %v2439_v18  ;;  %3164 = vmatpush.msra.mxu3 %v2539_v22  ;;  %v2560_v22 = vld [vmem:[%s6429_s14 + $0x958] sm:$0xff] }
 0x26a   : > { %3184 = vmatpush.msra.mxu2 %v2619_v62  ;;  %3129 = vmatpush.msra.mxu0 %v2354_v50  ;;  %v812_v32 = vadd.f32 %v811_v8, %v810_v33  ;;  %v2295_v62 = vld [vmem:[%s6429_s14 + $0x110] sm:$0xff]  ;;  %v2660_v15 = vld [vmem:[%s6429_s14 + $0xc78] sm:$0xff] }
 0x26b   : > { %3149 = vmatpush.msrb.mxu1 %v2434_v4  ;;  %3165 = vmatpush.msra.mxu3 %v2534_v37  ;;  %v2375_v4 = vld [vmem:[%s6429_s14 + $0x390] sm:$0xff]  ;;  %v2440_v8 = vld [vmem:[%s6429_s14 + $0x598] sm:$0xff] }
 0x26c   : > { %3185 = vmatpush.msra.mxu2 %v2614_v30  ;;  %3130 = vmatpush.msra.mxu0 %v2349_v23  ;;  %v2475_v37 = vld [vmem:[%s6429_s14 + $0x6b0] sm:$0xff]  ;;  %v2290_v23 = vld [vmem:[%s6429_s14 + $0xe8] sm:$0xff] }
 0x26d   : > { %3150 = vmatpush.msrb.mxu1 %v2429_v24  ;;  %3166 = vmatpush.msra.mxu3 %v2529_v1  ;;  %v2555_v30 = vld [vmem:[%s6429_s14 + $0x930] sm:$0xff]  ;;  %v2370_v1 = vld [vmem:[%s6429_s14 + $0x368] sm:$0xff] }
 0x26e   : > { %3186 = vmatpush.msra.mxu2 %v2609_v14  ;;  %3131 = vmatpush.msra.mxu0 %v2344_v48  ;;  %v2470_v14 = vld [vmem:[%s6429_s14 + $0x688] sm:$0xff]  ;;  %v853_v48 = vrot.slane %v852_v21, 2  ;;  %v2535_v33 = vld [vmem:[%s6429_s14 + $0x890] sm:$0xff] }
 0x26f   : > { %3151 = vmatpush.msrb.mxu1 %v2424_v43  ;;  %3167 = vmatpush.msra.mxu3 %v2524_v28  ;;  %v830_v18 = vpop.xlane.xlu0 %829  ;;  %v813_v43 = vrot.slane %v812_v32, 2  ;;  %v2550_v28 = vld [vmem:[%s6429_s14 + $0x908] sm:$0xff] }
 0x270   : > { %3187 = vmatpush.msra.mxu2 %v2604_v5  ;;  %3132 = vmatmul.f32.vlgmr.msra.gmra.mxu0 %v5302_v17  ;;  %v831_v50 = vrot.slane %v830_v18, 4  ;;  %v2285_v5 = vld [vmem:[%s6429_s14 + $0xc0] sm:$0xff] }
 0x271   : > { %3152 = vmatmul.f32.vlgmr.msrb.gmra.mxu1 %v5334_v55  ;;  %3196 = vmatpush.msrb.mxu0 %v2340_v12 }
 0x272   : > { %3216 = vmatpush.msra.mxu1 %v2420_v25  ;;  %3168 = vmatpush.msra.mxu3 %v2519_v51  ;;  %v832_v24 = vadd.f32 %v831_v50, %v830_v18  ;;  %v2365_v25 = vld [vmem:[%s6429_s14 + $0x340] sm:$0xff]  ;;  %v2640_v50 = vld [vmem:[%s6429_s14 + $0xbd8] sm:$0xff] }
 0x273   : > { %3188 = vmatpush.msra.mxu2 %v2599_v38  ;;  %3197 = vmatpush.msrb.mxu0 %v2335_v40  ;;  %v2465_v51 = vld [vmem:[%s6429_s14 + $0x660] sm:$0xff]  ;;  %v2280_v40 = vld [vmem:[%s6429_s14 + $0x98] sm:$0xff] }
 0x274   : > { %3217 = vmatpush.msra.mxu1 %v2415_v47  ;;  %3169 = vmatpush.msra.mxu3 %v2514_v36  ;;  %v833_v12 = vrot.slane %v832_v24, 2  ;;  %v2545_v38 = vld [vmem:[%s6429_s14 + $0x8e0] sm:$0xff]  ;;  %v2360_v47 = vld [vmem:[%s6429_s14 + $0x318] sm:$0xff] }
 0x275   : > { %3189 = vmatpush.msra.mxu2 %v2594_v19  ;;  %3198 = vmatpush.msrb.mxu0 %v2330_v13  ;;  %v2460_v36 = vld [vmem:[%s6429_s14 + $0x638] sm:$0xff]  ;;  %v814_v19 = vadd.f32 %v813_v43, %v812_v32  ;;  %v2505_v32 = vld [vmem:[%s6429_s14 + $0x7a0] sm:$0xff] }
 0x276   : > { %3218 = vmatpush.msra.mxu1 %v2410_v26  ;;  %3170 = vmatpush.msra.mxu3 %v2509_v11  ;;  %v834_v13 = vadd.f32 %v833_v12, %v832_v24  ;;  %v854_v26 = vadd.f32 %v853_v48, %v852_v21  ;;  %v2540_v11 = vld [vmem:[%s6429_s14 + $0x8b8] sm:$0xff]  ;;  %v2425_v21 = vld [vmem:[%s6429_s14 + $0x520] sm:$0xff] }
 0x277   : > { %3190 = vmatpush.msra.mxu2 %v2589_v59  ;;  %3199 = vmatpush.msrb.mxu0 %v2325_v52  ;;  %v2275_v59 = vld [vmem:[%s6429_s14 + $0x70] sm:$0xff]  ;;  %v2625_v48 = vld [vmem:[%s6429_s14 + $0xb60] sm:$0xff]  ;;  %v2620_v43 = vld [vmem:[%s6429_s14 + $0xb38] sm:$0xff] }
 0x278   : > { %3219 = vmatpush.msra.mxu1 %v2405_v39  ;;  %3171 = vmatpush.msra.mxu3 %v2504_v3  ;;  %v2355_v52 = vld [vmem:[%s6429_s14 + $0x2f0] sm:$0xff]  ;;  %v815_v3 = vrot.slane %v814_v19, 1 }
 0x279   : > { %3191 = vmatpush.msra.mxu2 %v2584_v34  ;;  %3172 = vmatmul.f32.vlgmr.msra.gmra.mxu3 %v5344_v10  ;;  %v2455_v39 = vld [vmem:[%s6429_s14 + $0x610] sm:$0xff]  ;;  %v835_v34 = vrot.slane %v834_v13, 1 }
 0x27a   : > { %3192 = vmatmul.f32.vlgmr.msra.gmra.mxu2 %v5422_v46  ;;  %3200 = vmatpush.msrb.mxu0 %v2320_v61  ;;  %v855_v61 = vrot.slane %v854_v26, 1 }
 0x27b   : > { %3220 = vmatpush.msra.mxu1 %v2400_v9  ;;  %3236 = vmatpush.msrb.mxu3 %v2500_v41  ;;  %v2270_v9 = vld [vmem:[%s6429_s14 + $0x48] sm:$0xff] }
 0x27c   : > { %3256 = vmatpush.msrb.mxu2 %v2580_v49  ;;  %3201 = vmatpush.msrb.mxu0 %v2315_v54  ;;  %v2350_v41 = vld [vmem:[%s6429_s14 + $0x2c8] sm:$0xff]  ;;  %v816_v54 = vadd.f32 %v815_v3, %v814_v19 }
 0x27d   : > { %3221 = vmatpush.msra.mxu1 %v2395_v31  ;;  %3237 = vmatpush.msrb.mxu3 %v2495_v42  ;;  %v2450_v49 = vld [vmem:[%s6429_s14 + $0x5e8] sm:$0xff]  ;;  %v836_v31 = vadd.f32 %v835_v34, %v834_v13  ;;  %v856_v42 = vadd.f32 %v855_v61, %v854_v26 }
 0x27e   : > { %3257 = vmatpush.msrb.mxu2 %v2575_v53  ;;  %3202 = vmatpush.msrb.mxu0 %v2310_v35  ;;  %v2530_v53 = vld [vmem:[%s6429_s14 + $0x868] sm:$0xff]  ;;  %v2265_v35 = vld [vmem:[%s6429_s14 + $0x20] sm:$0xff]  ;;  %4028 = vpush %v816_v54 }
 0x27f   : > { %3222 = vmatpush.msra.mxu1 %v2390_v45  ;;  %3238 = vmatpush.msrb.mxu3 %v2490_v7  ;;  %v2445_v45 = vld [vmem:[%s6429_s14 + $0x5c0] sm:$0xff]  ;;  %4030 = vpush %v836_v31 }
 0x280   : > { %3258 = vmatpush.msrb.mxu2 %v2570_v56  ;;  %3203 = vmatpush.msrb.mxu0 %v2305_v20  ;;  %v2525_v7 = vld [vmem:[%s6429_s14 + $0x840] sm:$0xff]  ;;  %4032 = vpush %v856_v42  ;;  %v2520_v56 = vld [vmem:[%s6429_s14 + $0x818] sm:$0xff]  ;;  %v2655_v20 = vld [vmem:[%s6429_s14 + $0xc50] sm:$0xff] }
 0x281   : > { %3223 = vmatpush.msra.mxu1 %v2385_v27  ;;  %3239 = vmatpush.msrb.mxu3 %v2485_v57  ;;  %v2435_v27 = vld [vmem:[%s6429_s14 + $0x570] sm:$0xff] }
 0x282   : > { %3259 = vmatpush.msrb.mxu2 %v2565_v0  ;;  %3204 = vmatpush.msrb.mxu0 %v2300_v2  ;;  %v2515_v57 = vld [vmem:[%s6429_s14 + $0x7f0] sm:$0xff]  ;;  %v2510_v2 = vld [vmem:[%s6429_s14 + $0x7c8] sm:$0xff] }
 0x283   : > { %3224 = vmatpush.msra.mxu1 %v2380_v6  ;;  %3240 = vmatpush.msrb.mxu3 %v2480_v63  ;;  %v2645_v63 = vld [vmem:[%s6429_s14 + $0xc00] sm:$0xff] }
 0x284   : > { %3260 = vmatpush.msrb.mxu2 %v2560_v22  ;;  %3205 = vmatpush.msrb.mxu0 %v2295_v62 }
 0x285   : > { %3225 = vmatpush.msra.mxu1 %v2375_v4  ;;  %3241 = vmatpush.msrb.mxu3 %v2475_v37  ;;  %v2813_v19 = vpop.f32.mrf.mxu0 }
 0x286   : > { %3261 = vmatpush.msrb.mxu2 %v2555_v30  ;;  %3206 = vmatpush.msrb.mxu0 %v2290_v23  ;;  %v2635_v30 = vld [vmem:[%s6429_s14 + $0xbb0] sm:$0xff]  ;;  %v2833_v13 = vpop.f32.mrf.mxu1 }
 0x287   : > { %3226 = vmatpush.msra.mxu1 %v2370_v1  ;;  %3242 = vmatpush.msrb.mxu3 %v2470_v14  ;;  %v2630_v1 = vld [vmem:[%s6429_s14 + $0xb88] sm:$0xff] }
 0x288   : > { %3262 = vmatpush.msrb.mxu2 %v2550_v28  ;;  %3207 = vmatpush.msrb.mxu0 %v2285_v5  ;;  %v2615_v5 = vld [vmem:[%s6429_s14 + $0xb10] sm:$0xff] }
 0x289   : > { %3227 = vmatpush.msra.mxu1 %v2365_v25  ;;  %3243 = vmatpush.msrb.mxu3 %v2465_v51  ;;  %v2610_v25 = vld [vmem:[%s6429_s14 + $0xae8] sm:$0xff]  ;;  %v2605_v51 = vld [vmem:[%s6429_s14 + $0xac0] sm:$0xff] }
 0x28a   : > { %3263 = vmatpush.msrb.mxu2 %v2545_v38  ;;  %3208 = vmatpush.msrb.mxu0 %v2280_v40  ;;  %v2600_v38 = vld [vmem:[%s6429_s14 + $0xa98] sm:$0xff]  ;;  %v2595_v40 = vld [vmem:[%s6429_s14 + $0xa70] sm:$0xff] }
 0x28b   : > { %3228 = vmatpush.msra.mxu1 %v2360_v47  ;;  %3244 = vmatpush.msrb.mxu3 %v2460_v36  ;;  %v2590_v47 = vld [vmem:[%s6429_s14 + $0xa48] sm:$0xff]  ;;  %v2585_v36 = vld [vmem:[%s6429_s14 + $0xa20] sm:$0xff] }
 0x28c   : > { %3264 = vmatpush.msrb.mxu2 %v2540_v11  ;;  %3209 = vmatpush.msrb.mxu0 %v2275_v59 }
 0x28d   : > { %3229 = vmatpush.msra.mxu1 %v2355_v52  ;;  %3245 = vmatpush.msrb.mxu3 %v2455_v39 }
 0x28e   : > { %3265 = vmatpush.msrb.mxu2 %v2535_v33  ;;  %3210 = vmatpush.msrb.mxu0 %v2270_v9  ;;  %v2913_v52 = vpop.f32.mrf.mxu1 }
 0x28f   : > { %3230 = vmatpush.msra.mxu1 %v2350_v41  ;;  %3246 = vmatpush.msrb.mxu3 %v2450_v49  ;;  %v2834_v49 = vadd.f32 %v2833_v13, %v2813_v19  ;;  %v3325_v13 = vstv %s3324_s23 }
 0x290   : > { %3266 = vmatpush.msrb.mxu2 %v2530_v53  ;;  %3211 = vmatpush.msrb.mxu0 %v2265_v35 }
 0x291   : > { %3231 = vmatpush.msra.mxu1 %v2345_v60  ;;  %3247 = vmatpush.msrb.mxu3 %v2445_v45 }
 0x292   : > { %3267 = vmatpush.msrb.mxu2 %v2525_v7  ;;  %3212 = vmatmul.f32.vlgmr.msrb.gmra.mxu0 %v5294_v58  ;;  %v2650_v58 = vld [vmem:[%s6429_s14 + $0xc28] sm:$0xff] }
 0x293   : > { %3232 = vmatmul.f32.vlgmr.msra.gmra.mxu1 %v5302_v17  ;;  %3276 = vmatpush.msra.mxu0 %v2660_v15  ;;  %v2430_v17 = vld [vmem:[%s6429_s14 + $0x548] sm:$0xff]  ;;  %v2853_v26 = vpop.f32.mrf.mxu3 }
 0x294   : > { %3248 = vmatpush.msrb.mxu3 %v2440_v8  ;;  %3268 = vmatpush.msrb.mxu2 %v2520_v56  ;;  %v2241_v0 = vpop.xlane.xlu2 %2240  ;;  %v2873_v11 = vpop.f32.mrf.mxu2  ;;  %v2854_v54 = vadd.f32 %v2853_v26, %v2834_v49 }
 0x295   : > { %3277 = vmatpush.msra.mxu0 %v2655_v20  ;;  %v2242_v6 = vrot.slane %v2241_v0, 4 }
 0x296   : > { %3249 = vmatpush.msrb.mxu3 %v2435_v27  ;;  %3269 = vmatpush.msrb.mxu2 %v2515_v57  ;;  %v2874_v60 = vadd.f32 %v2873_v11, %v2854_v54 }
 0x297   : > { %3278 = vmatpush.msra.mxu0 %v2650_v58  ;;  %v2243_v18 = vadd.f32 %v2242_v6, %v2241_v0  ;;  %v2227_v22 = vpop.xlane.xlu1 %2226 }
 0x298   : > { %3250 = vmatpush.msrb.mxu3 %v2430_v17  ;;  %3270 = vmatpush.msrb.mxu2 %v2510_v2  ;;  %v2228_v62 = vrot.slane %v2227_v22, 4 }
 0x299   : > { %3279 = vmatpush.msra.mxu0 %v2645_v63  ;;  %v2244_v4 = vrot.slane %v2243_v18, 2  ;;  %v2893_v59 = vpop.f32.mrf.mxu0 }
 0x29a   : > { %3251 = vmatpush.msrb.mxu3 %v2425_v21  ;;  %3271 = vmatpush.msrb.mxu2 %v2505_v32  ;;  %v2229_v37 = vadd.f32 %v2228_v62, %v2227_v22  ;;  %v2894_v20 = vadd.f32 %v2893_v59, %v2874_v60  ;;  %v3303_v59 = vstv %s6190_s1 }
 0x29b   : > { %3252 = vmatmul.f32.vlgmr.msrb.gmra.mxu3 %v5334_v55  ;;  %3272 = vmatmul.f32.vlgmr.msrb.gmra.mxu2 %v5344_v10  ;;  %v2245_v23 = vadd.f32 %v2244_v4, %v2243_v18 }
 0x29c   : > { %3280 = vmatpush.msra.mxu0 %v2640_v50  ;;  %v2230_v24 = vrot.slane %v2229_v37, 2  ;;  %v3296_v6 = vmul.f32 %v2894_v20, %v2894_v20 }
 0x29d   : > { %v2246_v55 = vrot.slane %v2245_v23, 1  ;;  %v2933_v39 = vpop.f32.mrf.mxu3 }
 0x29e   : > { %3281 = vmatpush.msra.mxu0 %v2635_v30  ;;  %v2231_v14 = vadd.f32 %v2230_v24, %v2229_v37  ;;  %v2934_v31 = vadd.f32 %v2933_v39, %v2913_v52 }
 0x29f   : > { %v2247_v12 = vadd.f32 %v2246_v55, %v2245_v23 }
 0x2a0   : > { %3282 = vmatpush.msra.mxu0 %v2630_v1  ;;  %v2232_v10 = vrot.slane %v2231_v14, 1  ;;  %v2953_v34 = vpop.f32.mrf.mxu2 }
 0x2a1   : > { %v2954_v45 = vadd.f32 %v2953_v34, %v2934_v31 }
 0x2a2   : > { %3283 = vmatpush.msra.mxu0 %v2625_v48  ;;  %v2233_v28 = vadd.f32 %v2232_v10, %v2231_v14  ;;  %v3354_v14 = vld [vmem:[%s745_s29] sm:$0xff] }
 0x2a3   : > { %v3356_v55 = vmul.f32 %v3354_v14, %v3354_v14  ;;  %v4165_v10 = vld [vmem:[%s6431_s15] sm:$0xff] }
 0x2a4   : > { %3284 = vmatpush.msra.mxu0 %v2620_v43  ;;  %4034 = vpush %v2233_v28 }
 0x2a5   : > { %4036 = vpush %v2247_v12  ;;  %v3394_v43 = vmul.f32 %v4165_v10, %v3356_v55 }
 0x2a6   : > { %3285 = vmatpush.msra.mxu0 %v2615_v5 }
 0x2a7   : > { %v3395_v5 = vsel %vm3361_vm4, %v3394_v43, 0.0 }
 0x2a8   : > { %3286 = vmatpush.msra.mxu0 %v2610_v25  ;;  %3396 = vadd.xlane.f32.xlu1 %v3395_v5 }
 0x2a9   : > { %v2973_v3 = vpop.f32.mrf.mxu0 }
 0x2aa   : > { %3287 = vmatpush.msra.mxu0 %v2605_v51  ;;  %v2993_v61 = vpop.f32.mrf.mxu1  ;;  %v2974_v8 = vadd.f32 %v2973_v3, %v2954_v45 }
 0x2ac   : > { %3288 = vmatpush.msra.mxu0 %v2600_v38  ;;  %v2994_v58 = vadd.f32 %v2993_v61, %v2974_v8 }
 0x2ae   : > { %3289 = vmatpush.msra.mxu0 %v2595_v40  ;;  %v3298_v32 = vmul.f32 %v2994_v58, %v2994_v58 }
 0x2af   : > { %s6218_s30 = spop %4028 }
 0x2b0   : > { %3290 = vmatpush.msra.mxu0 %v2590_v47  ;;  %s6220_s0 = spop %4030 }
 0x2b1   : > { %s6222_s1 = spop %4032 }
 0x2b2   : > { %3291 = vmatpush.msra.mxu0 %v2585_v36 }
 0x2b3   : > { %3292 = vmatmul.f32.vlgmr.msra.gmra.mxu0 %v5422_v46 }
 0x2b8   : > { %v3013_v33 = vpop.f32.mrf.mxu3 }
 0x2b9   : > { %v3033_v41 = vpop.f32.mrf.mxu2 }
 0x2ba   : > { %v3034_v53 = vadd.f32 %v3033_v41, %v3013_v33  ;;  %v3300_v33 = vmul.f32 %v2994_v58, %v2894_v20 }
 0x2cb   : > { %v3053_v9 = vpop.f32.mrf.mxu0 }
 0x2cc   : > { %v3073_v42 = vpop.f32.mrf.mxu1  ;;  %v3054_v7 = vadd.f32 %v3053_v9, %v3034_v53 }
 0x2ce   : > { %v3074_v27 = vadd.f32 %v3073_v42, %v3054_v7 }
 0x2d5   : > { %s6224_s23 = spop %4034 }
 0x2da   : > { %v3093_v35 = vpop.f32.mrf.mxu3 }
 0x2db   : > { %v3113_v15 = vpop.f32.mrf.mxu2  ;;  %v3094_v0 = vadd.f32 %v3093_v35, %v3074_v27  ;;  %v4166_v35 = vld [vmem:[%s5189_s22] sm:$0xff]  ;;  %s3986_s22 = sshll.u32 %s6443_s19, 2 }
 0x2dc   : > { %v3357_v27 = vmul.f32 %v4166_v35, %v3354_v14  ;;  %s749_s2 = scalar_lea.vmem %s6435_s7, %s3986_s22  ;;  %s753_s26 = scalar_lea.vmem %s6436_s8, %s3986_s22 }
 0x2dd   : > { %v3297_v18 = vsub.f32 %v3094_v0, %v3296_v6  ;;  %v3365_v0 = vrot.slane %v5930_v16, 4  ;;  %v3486_v6 = vld [vmem:[%s6399_s16] sm:$0xf]  ;;  %s6226_s22 = spop %4036  ;;  %s6402_s7 = smov 0.0  }
 0x2df   : > { %v3309_v50 = vmax.f32 %v3297_v18, 0.0 }
 0x2ed   : > { %v3133_v46 = vpop.f32.mrf.mxu0 }
 0x2ee   : > { %v3134_v56 = vadd.f32 %v3133_v46, %v3113_v15  ;;  %v3153_v57 = vpop.f32.mrf.mxu1  ;;  %v3355_v46 = vmul.f32 %v4166_v35, %v4166_v35 }
 0x2f0   : > { %v3154_v17 = vadd.f32 %v3153_v57, %v3134_v56  ;;  %v3383_v8 = vmul.f32 %v4165_v10, %v3355_v46  ;;  %v3372_v56 = vmul.f32 %v4165_v10, %v3354_v14  ;;  %v3405_v57 = vmul.f32 %v4165_v10, %v3357_v27 }
 0x2f2   : > { %v3384_v44 = vsel %vm3361_vm4, %v3383_v8, 0.0  ;;  %v3373_v20 = vsel %vm3361_vm4, %v3372_v56, 0.0  ;;  %v3406_v58 = vsel %vm3361_vm4, %v3405_v57, 0.0 }
 0x2fc   : > { %v3173_v2 = vpop.f32.mrf.mxu3 }
 0x2fd   : > { %v3174_v63 = vadd.f32 %v3173_v2, %v3154_v17  ;;  %v3193_v21 = vpop.f32.mrf.mxu2  ;;  %v3366_v17 = vadd.f32 %v3365_v0, %v5930_v16  ;;  %v3480_v2 = vld [vmem:[%s749_s2] sm:$0xf] }
 0x2ff   : > { %v3194_v22 = vadd.f32 %v3193_v21, %v3174_v63  ;;  %v3487_v21 = vmul.f32 %v3486_v6, %v3480_v2 }
 0x301   : > { %v3299_v62 = vsub.f32 %v3194_v22, %v3298_v32  ;;  %v3481_v32 = vld [vmem:[%s753_s26] sm:$0xf] }
 0x303   : > { %v3310_v4 = vmax.f32 %v3299_v62, 0.0  ;;  %v3305_v26 = vadd.f32 %v3299_v62, %v3297_v18  ;;  %v3482_v18 = vmul.f32 %v3480_v2, %v3480_v2  ;;  %v3499_v62 = vmul.f32 %v3486_v6, %v3481_v32 }
 0x305   : > { %v3311_v37 = vmul.f32 %v3310_v4, %v3309_v50  ;;  %v3306_v3 = vadd.f32 %v3305_v26, %v3303_v59  ;;  %v3483_v50 = vmul.f32 %v3481_v32, %v3481_v32  ;;  %v3484_v4 = vmul.f32 %v3481_v32, %v3480_v2 }
 0x306   : > { %v3500_v14 = vsel %vm3488_vm3, %v3499_v62, 0.0 }
 0x307   : > { %4141 = vrsqrt.f32 %v3311_v37  ;;  %vm3319_vm14 = vcmp.eq.f32.partialorder %v3311_v37, inf  ;;  %v3322_v40 = vand.u32 2147483648, %v3311_v37  ;;  %vm3321_vm15 = vcmp.eq.f32.partialorder %v3311_v37, 0.0  ;;  %3501 = vadd.xlane.f32.xlu1 %v3500_v14 }
 0x308   : > { %v3521_v43 = vmul.f32 %v3486_v6, %v3483_v50 }
 0x30d   : > { %v4142_v30 = vpop.eup %4141 }
 0x30e   : > { %v3313_v23 = vmul.f32 %v4142_v30, %v3311_v37 }
 0x30f   : > { %v3213_v25 = vpop.f32.mrf.mxu0 }
 0x310   : > { %v3314_v24 = vmul.f32 %v4142_v30, %v3313_v23  ;;  %v3233_v51 = vpop.f32.mrf.mxu1  ;;  %v3510_v23 = vmul.f32 %v3486_v6, %v3482_v18 }
 0x311   : > { %v3234_v36 = vadd.f32 %v3233_v51, %v3213_v25 }
 0x312   : > { %v3315_v1 = vmul.f32 0.5, %v3314_v24  ;;  %v3367_v24 = vrot.slane %v3366_v17, 2  ;;  %v3511_v10 = vsel %vm3488_vm3, %v3510_v23, 0.0 }
 0x314   : > { %v3316_v48 = vsub.f32 1.5, %v3315_v1  ;;  %v3368_v25 = vadd.f32 %v3367_v24, %v3366_v17 }
 0x316   : > { %v3317_v28 = vmul.f32 %v4142_v30, %v3316_v48  ;;  %v3489_v30 = vsel %vm3488_vm3, %v3487_v21, 0.0 }
 0x318   : > { %v3318_v12 = vmul.f32 %v3317_v28, %v3311_v37  ;;  %v3532_v28 = vmul.f32 %v3486_v6, %v3484_v4 }
 0x31a   : > { %v3320_v38 = vsel %vm3319_vm14, %v3311_v37, %v3318_v12 }
 0x31b   : > { %v3323_v19 = vsel %vm3321_vm15, %v3322_v40, %v3320_v38  ;;  %v3397_v63 = vpop.xlane.xlu1 %3396  ;;  %vm3738_vm15 = vcmp.eq.s32.totalorder %v5319_v29, 1 }
 0x31c   : > { %v3327_v52 = vadd.f32 %v3325_v13, %v3323_v19  ;;  %v3398_v1 = vrot.slane %v3397_v63, 4  ;;  %v3533_v19 = vsel %vm3488_vm3, %v3532_v28, 0.0 }
 0x31d   : > { %3534 = vadd.xlane.f32.xlu1 %v3533_v19 }
 0x31e   : > { %v3253_v47 = vpop.f32.mrf.mxu3  ;;  %v3273_v39 = vpop.f32.mrf.mxu2  ;;  %4143 = vrcp.f32 %v3327_v52  ;;  %v3399_v38 = vadd.f32 %v3398_v1, %v3397_v63  ;;  %v3369_v52 = vrot.slane %v3368_v25, 1 }
 0x31f   : > { %v3254_v11 = vadd.f32 %v3253_v47, %v3234_v36  ;;  %4145 = vrcp.f32 %v3306_v3  ;;  %v3522_v47 = vsel %vm3488_vm3, %v3521_v43, 0.0 }
 0x321   : > { %v3274_v34 = vadd.f32 %v3273_v39, %v3254_v11  ;;  %v3400_v39 = vrot.slane %v3399_v38, 2 }
 0x324   : > { %v4144_v31 = vpop.eup %4143 }
 0x325   : > { %v4146_v60 = vpop.eup %4145 }
 0x330   : > { %v3293_v61 = vpop.f32.mrf.mxu0 }
 0x331   : > { %v3294_v9 = vadd.f32 %v3293_v61, %v3274_v34 }
 0x333   : > { %v3301_v41 = vsub.f32 %v3294_v9, %v3300_v33 }
 0x335   : > { %v3302_v49 = vmul.f32 2.0, %v3301_v41  ;;  %v3326_v54 = vadd.f32 %v3325_v13, %v3301_v41 }
 0x337   : > { %v3329_v42 = vmul.f32 %v4144_v31, %v3326_v54  ;;  %v3304_v53 = vadd.f32 %v3303_v59, %v3302_v49  ;;  %v3370_v31 = vadd.f32 %v3369_v52, %v3368_v25  ;;  %v3613_v25 = vld [vmem:[%s6400_s17] sm:$0x3] }
 0x339   : > { %v3343_v45 = vsel %vm3332_vm2, %v3329_v42, 0.0  ;;  %v3308_v7 = vmul.f32 %v4146_v60, %v3304_v53  ;;  %v3401_v53 = vadd.f32 %v3400_v39, %v3399_v38 }
 0x33a   : > { %3344 = vadd.xlane.f32.xlu0 %v3343_v45 }
 0x33b   : > { %v3333_v15 = vsel %vm3332_vm2, %v3308_v7, 0.0 }
 0x33c   : > { %3334 = vadd.xlane.f32.xlu2 %v3333_v15  ;;  %v3402_v15 = vrot.slane %v3401_v53, 1 }
 0x33e   : > { %v3403_v27 = vadd.f32 %v3402_v15, %v3401_v53 }
 0x342   : > { %3385 = vadd.xlane.f32.xlu0 %v3384_v44 }
 0x344   : > { %3374 = vadd.xlane.f32.xlu2 %v3373_v20 }
 0x34a   : > { %3490 = vadd.xlane.f32.xlu0 %v3489_v30 }
 0x34c   : > { %3407 = vadd.xlane.f32.xlu2 %v3406_v58 }
 0x352   : > { %3523 = vadd.xlane.f32.xlu0 %v3522_v47 }
 0x354   : > { %3512 = vadd.xlane.f32.xlu2 %v3511_v10 }
 0x37a   : > { %v3502_v28 = vpop.xlane.xlu1 %3501 }
 0x390   : > { %v3535_v52 = vpop.xlane.xlu1 %3534 }
 0x3ad   : > { %v3345_v22 = vpop.xlane.xlu0 %3344 }
 0x3ae   : > { %v3346_v37 = vrot.slane %v3345_v22, 4 }
 0x3af   : > { %v3335_v16 = vpop.xlane.xlu2 %3334 }
 0x3b0   : > { %v3347_v48 = vadd.f32 %v3346_v37, %v3345_v22  ;;  %v3336_v55 = vrot.slane %v3335_v16, 4 }
 0x3b2   : > { %v3348_v5 = vrot.slane %v3347_v48, 2  ;;  %v3337_v12 = vadd.f32 %v3336_v55, %v3335_v16 }
 0x3b4   : > { %v3338_v51 = vrot.slane %v3337_v12, 2  ;;  %v3349_v40 = vadd.f32 %v3348_v5, %v3347_v48 }
 0x3b5   : > { %v3386_v36 = vpop.xlane.xlu0 %3385 }
 0x3b6   : > { %v3387_v13 = vrot.slane %v3386_v36, 4  ;;  %v3339_v26 = vadd.f32 %v3338_v51, %v3337_v12  ;;  %v3350_v59 = vrot.slane %v3349_v40, 1 }
 0x3b7   : > { %v3375_v11 = vpop.xlane.xlu2 %3374 }
 0x3b8   : > { %v3388_v3 = vadd.f32 %v3387_v13, %v3386_v36  ;;  %v3376_v34 = vrot.slane %v3375_v11, 4  ;;  %v3340_v61 = vrot.slane %v3339_v26, 1  ;;  %v3351_v49 = vadd.f32 %v3350_v59, %v3349_v40 }
 0x3ba   : > { %v3389_v33 = vrot.slane %v3388_v3, 2  ;;  %v3377_v9 = vadd.f32 %v3376_v34, %v3375_v11  ;;  %v3341_v41 = vadd.f32 %v3340_v61, %v3339_v26 }
 0x3bc   : > { %v3378_v54 = vrot.slane %v3377_v9, 2  ;;  %4038 = vpush %v3341_v41  ;;  %v3390_v42 = vadd.f32 %v3389_v33, %v3388_v3 }
 0x3bd   : > { %4040 = vpush %v3351_v49  ;;  %v3491_v5 = vpop.xlane.xlu0 %3490  ;;  %v3536_v49 = vrot.slane %v3535_v52, 4 }
 0x3be   : > { %4042 = vpush %v3370_v31  ;;  %v3379_v35 = vadd.f32 %v3378_v54, %v3377_v9  ;;  %v3391_v60 = vrot.slane %v3390_v42, 1  ;;  %v3492_v34 = vrot.slane %v3491_v5, 4  ;;  %v3503_v9 = vrot.slane %v3502_v28, 4 }
 0x3bf   : > { %v3408_v46 = vpop.xlane.xlu2 %3407 }
 0x3c0   : > { %v3409_v45 = vrot.slane %v3408_v46, 4  ;;  %v3380_v7 = vrot.slane %v3379_v35, 1  ;;  %v3392_v44 = vadd.f32 %v3391_v60, %v3390_v42  ;;  %v3493_v53 = vadd.f32 %v3492_v34, %v3491_v5 }
 0x3c2   : > { %v3410_v8 = vadd.f32 %v3409_v45, %v3408_v46  ;;  %v3381_v56 = vadd.f32 %v3380_v7, %v3379_v35  ;;  %v3504_v46 = vadd.f32 %v3503_v9, %v3502_v28  ;;  %v3537_v45 = vadd.f32 %v3536_v49, %v3535_v52 }
 0x3c3   : > { %v3494_v15 = vrot.slane %v3493_v53, 2  ;;  %v3735_v28 = vstv %s6226_s22 }
 0x3c4   : > { %v3411_v20 = vrot.slane %v3410_v8, 2  ;;  %4044 = vpush %v3381_v56 }
 0x3c5   : > { %4046 = vpush %v3392_v44  ;;  %v3524_v61 = vpop.xlane.xlu0 %3523 }
 0x3c6   : > { %4048 = vpush %v3403_v27  ;;  %v3412_v57 = vadd.f32 %v3411_v20, %v3410_v8  ;;  %v3525_v31 = vrot.slane %v3524_v61, 4  ;;  %v3505_v8 = vrot.slane %v3504_v46, 2  ;;  %v3538_v20 = vrot.slane %v3537_v45, 2 }
 0x3c7   : > { %v3513_v59 = vpop.xlane.xlu2 %3512 }
 0x3c8   : > { %v3413_v58 = vrot.slane %v3412_v57, 1  ;;  %v3514_v41 = vrot.slane %v3513_v59, 4  ;;  %v3526_v7 = vadd.f32 %v3525_v31, %v3524_v61 }
 0x3ca   : > { %v3414_v0 = vadd.f32 %v3413_v58, %v3412_v57  ;;  %v3515_v60 = vadd.f32 %v3514_v41, %v3513_v59  ;;  %v3527_v57 = vrot.slane %v3526_v7, 2  ;;  %v3495_v58 = vadd.f32 %v3494_v15, %v3493_v53 }
 0x3cc   : > { %4050 = vpush %v3414_v0  ;;  %v3516_v44 = vrot.slane %v3515_v60, 2 }
 0x3ed   : > { %s6228_s20 = spop %4038 }
 0x3ee   : > { %s6230_s21 = spop %4040 }
 0x3ef   : > { %s6232_s2 = spop %4042 }
 0x3f0   : > { %s3416_s25 = smul.f32 %s6232_s2, %s6232_s2 }
 0x3f5   : > { %s6238_s26 = spop %4044 }
 0x3f6   : > { %s3418_s28 = smul.f32 %s6238_s26, %s6238_s26  ;;  %s4047_s29 = spop %4046 }
 0x3f7   : > { %s3420_s3 = smul.f32 %s6238_s26, %s6232_s2  ;;  %s3417_s4 = ssub.f32 %s4047_s29, %s3416_s25 }
 0x3f8   : > { %s4049_s5 = spop %4048  ;;  %s3460_s26 = smul.f32 0.5, %s6234_s24 }
 0x3f9   : > { %s3419_s6 = ssub.f32 %s4049_s5, %s3418_s28  ;;  %s3443_s8 = smax.f32 %s6402_s7, %s3417_s4 }
 0x3fb   : > { %s3424_s11 = sadd.f32 %s3419_s6, %s3417_s4  ;;  %s3444_s12 = smax.f32 %s6402_s7, %s3419_s6 }
 0x3fc   : > { %s3445_s13 = smul.f32 %s3444_s12, %s3443_s8  ;;  %s3988_s6 = sshll.u32 %s6443_s19, 1 }
 0x3fd   : > { %s3425_s14 = sadd.f32 %s6234_s24, %s3424_s11  ;;  %s4051_s4 = spop %4050 }
 0x3fe   : > { %v3446_v17 = vstv %s3445_s13  ;;  %s6250_s5 = ssub.f32 %s4051_s4, %s3420_s3  ;;  %s757_s12 = scalar_lea.vmem %s6437_s9, %s3988_s6 }
 0x3ff   : > { %v3426_v2 = vstv %s3425_s14  ;;  %4147 = vrsqrt.f32 %v3446_v17  ;;  %vm3454_vm8 = vcmp.eq.f32.partialorder %v3446_v17, inf  ;;  %v3457_v55 = vand.u32 2147483648, %v3446_v17  ;;  %s761_s28 = scalar_lea.vmem %s6438_s10, %s3988_s6  ;;  %v3607_v12 = vld [vmem:[%s757_s12] sm:$0x3]  ;;  %s6285_s12 = sld [smem:[#allocation4 + $0x3]] }
 0x400   : > { %4149 = vrcp.f32 %v3426_v2  ;;  %v3438_v62 = vand.u32 2147483648, %v3426_v2  ;;  %v3436_v37 = vand.u32 2147483647, %v3426_v2  ;;  %vm3432_vm5 = vweird.f32 %v3426_v2  ;;  %s3422_s13 = smul.f32 2.0, %s6250_s5  ;;  %v3608_v38 = vld [vmem:[%s761_s28] sm:$0x3]  ;;  %s3461_s8 = sadd.f32 %s3460_s26, %s6250_s5 }
 0x401   : > { %vm3456_vm9 = vcmp.eq.f32.partialorder %v3446_v17, 0.0  ;;  %v3614_v51 = vmul.f32 %v3613_v25, %v3607_v12  ;;  %v3609_v40 = vmul.f32 %v3607_v12, %v3607_v12  ;;  %v3626_v47 = vmul.f32 %v3613_v25, %v3608_v38 }
 0x402   : > { %v3439_v24 = vor.u32 1.1754944e-38, %v3438_v62  ;;  %vm3437_vm7 = vcmp.eq.f32.partialorder %v3436_v37, 8.507059e+37  ;;  %s6264_s3 = sadd.f32 %s6234_s24, %s3422_s13  ;;  %v3610_v36 = vmul.f32 %v3608_v38, %v3608_v38  ;;  %v3611_v19 = vmul.f32 %v3608_v38, %v3607_v12 }
 0x403   : > { %v3616_v13 = vsel %vm3615_vm10, %v3614_v51, 0.0  ;;  %v3637_v26 = vmul.f32 %v3613_v25, %v3609_v40  ;;  %v3627_v11 = vsel %vm3615_vm10, %v3626_v47, 0.0  ;;  %v3736_v12 = vsel %vm3734_vm0, %v3735_v28, 0.0 }
 0x404   : > { %3617 = vadd.xlane.f32.xlu2 %v3616_v13  ;;  %3628 = vadd.xlane.f32.xlu0 %v3627_v11  ;;  %v3648_v39 = vmul.f32 %v3613_v25, %v3610_v36  ;;  %v3659_v33 = vmul.f32 %v3613_v25, %v3611_v19 }
 0x405   : > { %v4148_v6 = vpop.eup %4147  ;;  %v3638_v3 = vsel %vm3615_vm10, %v3637_v26, 0.0 }
 0x406   : > { %v4150_v63 = vpop.eup %4149  ;;  %v3448_v21 = vmul.f32 %v4148_v6, %v3446_v17  ;;  %3639 = vadd.xlane.f32.xlu1 %v3638_v3  ;;  %v3649_v42 = vsel %vm3615_vm10, %v3648_v39, 0.0  ;;  %v3660_v35 = vsel %vm3615_vm10, %v3659_v33, 0.0 }
 0x407   : > { %v3428_v32 = vmul.f32 %v4150_v63, %v3426_v2  ;;  %vm3433_vm4 = vweird.f32 %v4150_v63 }
 0x408   : > { %v3449_v18 = vmul.f32 %v4148_v6, %v3448_v21  ;;  %vm3434_vm6 = vmor %vm3432_vm5, %vm3433_vm4 }
 0x409   : > { %v3429_v22 = vsub.f32 1.0, %v3428_v32 }
 0x40a   : > { %v3450_v50 = vmul.f32 0.5, %v3449_v18  ;;  %v3528_v18 = vadd.f32 %v3527_v57, %v3526_v7 }
 0x40b   : > { %v3430_v4 = vmul.f32 %v4150_v63, %v3429_v22  ;;  %v3496_v22 = vrot.slane %v3495_v58, 1 }
 0x40c   : > { %v3451_v30 = vsub.f32 1.5, %v3450_v50  ;;  %3650 = vadd.xlane.f32.xlu2 %v3649_v42  ;;  %3661 = vadd.xlane.f32.xlu0 %v3660_v35 }
 0x40d   : > { %v3431_v23 = vadd.f32 %v4150_v63, %v3430_v4 }
 0x40e   : > { %v3452_v16 = vmul.f32 %v4148_v6, %v3451_v30  ;;  %v3517_v6 = vadd.f32 %v3516_v44, %v3515_v60 }
 0x40f   : > { %v3435_v1 = vsel %vm3434_vm6, %v4150_v63, %v3431_v23  ;;  %v3539_v63 = vadd.f32 %v3538_v20, %v3537_v45 }
 0x410   : > { %v3440_v14 = vsel %vm3437_vm7, %v3439_v24, %v3435_v1  ;;  %v3453_v48 = vmul.f32 %v3452_v16, %v3446_v17  ;;  %v3518_v37 = vrot.slane %v3517_v6, 1  ;;  %v3529_v24 = vrot.slane %v3528_v18, 1 }
 0x411   : > { %4052 = vpush %v3440_v14  ;;  %v3540_v30 = vrot.slane %v3539_v63, 1  ;;  %v3497_v1 = vadd.f32 %v3496_v22, %v3495_v58 }
 0x412   : > { %v3455_v10 = vsel %vm3454_vm8, %v3446_v17, %v3453_v48  ;;  %v3506_v17 = vadd.f32 %v3505_v8, %v3504_v46  ;;  %v3519_v48 = vadd.f32 %v3518_v37, %v3517_v6 }
 0x413   : > { %v3458_v43 = vsel %vm3456_vm9, %v3457_v55, %v3455_v10  ;;  %v3541_v55 = vadd.f32 %v3540_v30, %v3539_v63  ;;  %v3530_v10 = vadd.f32 %v3529_v24, %v3528_v18 }
 0x414   : > { %4054 = vpush %v3458_v43  ;;  %v3507_v50 = vrot.slane %v3506_v17, 1  ;;  %v3739_v43 = vstv %s6230_s21 }
 0x415   : > { %v3740_v5 = vsel %vm3738_vm15, %v3739_v43, 0.0 }
 0x416   : > { %v3508_v14 = vadd.f32 %v3507_v50, %v3506_v17  ;;  %v3741_v25 = vadd.f32 %v3740_v5, %v3736_v12 }
 0x442   : > { %s6266_s2 = spop %4052 }
 0x445   : > { %s4055_s4 = spop %4054 }
 0x446   : > { %s3462_s6 = sadd.f32 %s4055_s4, %s3460_s26  ;;  %s6439_s26 = smov 0.0  }
 0x448   : > { %v3463_v54 = vstv %s3462_s6 }
 0x449   : > { %4151 = vrcp.f32 %v3463_v54  ;;  %v3475_v2 = vand.u32 2147483648, %v3463_v54  ;;  %v3473_v32 = vand.u32 2147483647, %v3463_v54  ;;  %vm3469_vm12 = vweird.f32 %v3463_v54 }
 0x44b   : > { %v3476_v4 = vor.u32 1.1754944e-38, %v3475_v2  ;;  %vm3474_vm14 = vcmp.eq.f32.partialorder %v3473_v32, 8.507059e+37 }
 0x44f   : > { %v4152_v56 = vpop.eup %4151 }
 0x450   : > { %v3465_v27 = vmul.f32 %v4152_v56, %v3463_v54  ;;  %vm3470_vm11 = vweird.f32 %v4152_v56 }
 0x451   : > { %vm3471_vm13 = vmor %vm3469_vm12, %vm3470_vm11  ;;  %vm3746_vm12 = vcmp.eq.s32.totalorder %v5319_v29, 3 }
 0x452   : > { %v3466_v0 = vsub.f32 1.0, %v3465_v27 }
 0x454   : > { %v3467_v21 = vmul.f32 %v4152_v56, %v3466_v0 }
 0x456   : > { %v3468_v62 = vadd.f32 %v4152_v56, %v3467_v21 }
 0x458   : > { %v3472_v23 = vsel %vm3471_vm13, %v4152_v56, %v3468_v62 }
 0x459   : > { %v3477_v16 = vsel %vm3474_vm14, %v3476_v4, %v3472_v23 }
 0x45a   : > { %4056 = vpush %v3477_v16 }
 0x45b   : > { %4058 = vpush %v3497_v1 }
 0x45c   : > { %4060 = vpush %v3508_v14 }
 0x45d   : > { %4062 = vpush %v3519_v48 }
 0x45e   : > { %4064 = vpush %v3530_v10 }
 0x45f   : > { %4066 = vpush %v3541_v55 }
 0x477   : > { %v3629_v60 = vpop.xlane.xlu0 %3628  ;;  %v3618_v45 = vpop.xlane.xlu2 %3617 }
 0x478   : > { %v3619_v8 = vrot.slane %v3618_v45, 4  ;;  %v3630_v44 = vrot.slane %v3629_v60, 4 }
 0x479   : > { %v3640_v7 = vpop.xlane.xlu1 %3639 }
 0x47a   : > { %v3641_v20 = vrot.slane %v3640_v7, 4  ;;  %v3620_v0 = vadd.f32 %v3619_v8, %v3618_v45  ;;  %v3631_v17 = vadd.f32 %v3630_v44, %v3629_v60 }
 0x47c   : > { %v3642_v2 = vadd.f32 %v3641_v20, %v3640_v7  ;;  %v3621_v21 = vrot.slane %v3620_v0, 2  ;;  %v3632_v32 = vrot.slane %v3631_v17, 2 }
 0x47e   : > { %v3643_v22 = vrot.slane %v3642_v2, 2  ;;  %v3622_v37 = vadd.f32 %v3621_v21, %v3620_v0  ;;  %v3633_v23 = vadd.f32 %v3632_v32, %v3631_v17 }
 0x47f   : > { %v3662_v15 = vpop.xlane.xlu0 %3661  ;;  %v3651_v56 = vpop.xlane.xlu2 %3650 }
 0x480   : > { %v3663_v27 = vrot.slane %v3662_v15, 4  ;;  %v3652_v58 = vrot.slane %v3651_v56, 4  ;;  %v3644_v24 = vadd.f32 %v3643_v22, %v3642_v2  ;;  %v3623_v10 = vrot.slane %v3622_v37, 1 }
 0x481   : > { %v3634_v28 = vrot.slane %v3633_v23, 1  ;;  %v3755_v22 = vstv %s6224_s23 }
 0x482   : > { %v3664_v6 = vadd.f32 %v3663_v27, %v3662_v15  ;;  %v3653_v63 = vadd.f32 %v3652_v58, %v3651_v56  ;;  %v3645_v12 = vrot.slane %v3644_v24, 1 }
 0x484   : > { %v3665_v62 = vrot.slane %v3664_v6, 2  ;;  %v3654_v4 = vrot.slane %v3653_v63, 2 }
 0x486   : > { %v3666_v16 = vadd.f32 %v3665_v62, %v3664_v6  ;;  %v3655_v14 = vadd.f32 %v3654_v4, %v3653_v63  ;;  %v3759_v4 = vstv %s6228_s20 }
 0x48b   : > { %s4057_s11 = spop %4056 }
 0x48c   : > { %s3479_s13 = smul.f32 %s4057_s11, %s3461_s8  ;;  %s6288_s14 = spop %4058 }
 0x48d   : > { %s3543_s25 = smul.f32 %s6288_s14, %s6288_s14  ;;  %s6292_s21 = spop %4060 }
 0x48e   : > { %v3743_v51 = vstv %s3479_s13  ;;  %s3545_s22 = smul.f32 %s6292_s21, %s6292_s21  ;;  %s4063_s24 = spop %4062 }
 0x48f   : > { %v3744_v38 = vsel %vm3742_vm1, %v3743_v51, 0.0  ;;  %s3547_s5 = smul.f32 %s6292_s21, %s6288_s14  ;;  %s3544_s28 = ssub.f32 %s4063_s24, %s3543_s25 }
 0x490   : > { %v6298_v40 = vadd.f32 %v3744_v38, %v3741_v25  ;;  %s4065_s29 = spop %4064  ;;  %v3667_v25 = vrot.slane %v3666_v16, 1  ;;  %v3656_v38 = vrot.slane %v3655_v14, 1 }
 0x491   : > { %s3570_s4 = smax.f32 %s6439_s26, %s3544_s28  ;;  %s3546_s6 = ssub.f32 %s4065_s29, %s3545_s22 }
 0x493   : > { %s3551_s8 = sadd.f32 %s3546_s6, %s3544_s28  ;;  %s3571_s11 = smax.f32 %s6439_s26, %s3546_s6 }
 0x494   : > { %s3572_s7 = smul.f32 %s3571_s11, %s3570_s4  ;;  %s6322_s4 = sld [smem:[#allocation4 + $0x4]] }
 0x495   : > { %s3552_s9 = sadd.f32 %s6285_s12, %s3551_s8  ;;  %s3587_s28 = smul.f32 0.5, %s6285_s12 }
 0x496   : > { %v3573_v47 = vstv %s3572_s7 }
 0x497   : > { %v3553_v36 = vstv %s3552_s9  ;;  %4153 = vrsqrt.f32 %v3573_v47  ;;  %vm3581_vm6 = vcmp.eq.f32.partialorder %v3573_v47, inf  ;;  %v3584_v53 = vand.u32 2147483648, %v3573_v47  ;;  %s4067_s9 = spop %4066 }
 0x498   : > { %4155 = vrcp.f32 %v3553_v36  ;;  %v3565_v39 = vand.u32 2147483648, %v3553_v36  ;;  %v3563_v61 = vand.u32 2147483647, %v3553_v36  ;;  %vm3559_vm3 = vweird.f32 %v3553_v36  ;;  %s6306_s7 = ssub.f32 %s4067_s9, %s3547_s5 }
 0x499   : > { %vm3583_vm7 = vcmp.eq.f32.partialorder %v3573_v47, 0.0 }
 0x49a   : > { %v3566_v41 = vor.u32 1.1754944e-38, %v3565_v39  ;;  %vm3564_vm5 = vcmp.eq.f32.partialorder %v3563_v61, 8.507059e+37  ;;  %s3549_s13 = smul.f32 2.0, %s6306_s7  ;;  %s3588_s21 = sadd.f32 %s3587_s28, %s6306_s7 }
 0x49c   : > { %s6310_s25 = sadd.f32 %s6285_s12, %s3549_s13 }
 0x49d   : > { %v4154_v19 = vpop.eup %4153 }
 0x49e   : > { %v4156_v13 = vpop.eup %4155  ;;  %v3575_v26 = vmul.f32 %v4154_v19, %v3573_v47 }
 0x49f   : > { %v3555_v11 = vmul.f32 %v4156_v13, %v3553_v36  ;;  %vm3560_vm2 = vweird.f32 %v4156_v13  ;;  %v3624_v36 = vadd.f32 %v3623_v10, %v3622_v37 }
 0x4a0   : > { %v3576_v59 = vmul.f32 %v4154_v19, %v3575_v26  ;;  %vm3561_vm4 = vmor %vm3559_vm3, %vm3560_vm2  ;;  %v3668_v26 = vadd.f32 %v3667_v25, %v3666_v16  ;;  %v3779_v25 = vstv %s6220_s0 }
 0x4a1   : > { %v3556_v52 = vsub.f32 1.0, %v3555_v11  ;;  %v3657_v11 = vadd.f32 %v3656_v38, %v3655_v14 }
 0x4a2   : > { %v3577_v3 = vmul.f32 0.5, %v3576_v59 }
 0x4a3   : > { %v3557_v34 = vmul.f32 %v4156_v13, %v3556_v52 }
 0x4a4   : > { %v3578_v33 = vsub.f32 1.5, %v3577_v3 }
 0x4a5   : > { %v3558_v9 = vadd.f32 %v4156_v13, %v3557_v34 }
 0x4a6   : > { %v3579_v49 = vmul.f32 %v4154_v19, %v3578_v33  ;;  %v3635_v19 = vadd.f32 %v3634_v28, %v3633_v23  ;;  %v3775_v28 = vstv %s6218_s30 }
 0x4a7   : > { %v3562_v54 = vsel %vm3561_vm4, %v4156_v13, %v3558_v9  ;;  %v3646_v13 = vadd.f32 %v3645_v12, %v3644_v24 }
 0x4a8   : > { %v3567_v31 = vsel %vm3564_vm5, %v3566_v41, %v3562_v54  ;;  %v3580_v42 = vmul.f32 %v3579_v49, %v3573_v47 }
 0x4a9   : > { %4068 = vpush %v3567_v31 }
 0x4aa   : > { %v3582_v35 = vsel %vm3581_vm6, %v3573_v47, %v3580_v42 }
 0x4ab   : > { %v3585_v46 = vsel %vm3583_vm7, %v3584_v53, %v3582_v35  ;;  %vm3750_vm7 = vcmp.eq.s32.totalorder %v5319_v29, 4 }
 0x4ac   : > { %4070 = vpush %v3585_v46 }
 0x4da   : > { %s6312_s22 = spop %4068 }
 0x4db   : > { %s6441_s23 = smul.f32 %s6312_s22, %s6310_s25 }
 0x4dd   : > { %s4071_s29 = spop %4070 }
 0x4de   : > { %s3589_s14 = sadd.f32 %s4071_s29, %s3587_s28 }
 0x4e0   : > { %v3590_v57 = vstv %s3589_s14 }
 0x4e1   : > { %4157 = vrcp.f32 %v3590_v57  ;;  %v3602_v1 = vand.u32 2147483648, %v3590_v57  ;;  %v3600_v55 = vand.u32 2147483647, %v3590_v57  ;;  %vm3596_vm9 = vweird.f32 %v3590_v57 }
 0x4e3   : > { %v3603_v5 = vor.u32 1.1754944e-38, %v3602_v1  ;;  %vm3601_vm11 = vcmp.eq.f32.partialorder %v3600_v55, 8.507059e+37  ;;  %v3767_v1 = vstv %s6441_s23 }
 0x4e7   : > { %v4158_v18 = vpop.eup %4157 }
 0x4e8   : > { %v3592_v50 = vmul.f32 %v4158_v18, %v3590_v57  ;;  %vm3597_vm8 = vweird.f32 %v4158_v18 }
 0x4e9   : > { %vm3598_vm10 = vmor %vm3596_vm9, %vm3597_vm8  ;;  %vm3754_vm8 = vcmp.eq.s32.totalorder %v5319_v29, 5  ;;  %vm3758_vm9 = vcmp.eq.s32.totalorder %v5319_v29, 6 }
 0x4ea   : > { %v3593_v30 = vsub.f32 1.0, %v3592_v50  ;;  %v3760_v16 = vsel %vm3758_vm9, %v3759_v4, 0.0 }
 0x4ec   : > { %v3594_v48 = vmul.f32 %v4158_v18, %v3593_v30  ;;  %v3756_v30 = vsel %vm3754_vm8, %v3755_v22, 0.0 }
 0x4ee   : > { %v3595_v43 = vadd.f32 %v4158_v18, %v3594_v48 }
 0x4f0   : > { %v3599_v51 = vsel %vm3598_vm10, %v4158_v18, %v3595_v43  ;;  %vm3762_vm10 = vcmp.eq.s32.totalorder %v5319_v29, 7 }
 0x4f1   : > { %v3604_v47 = vsel %vm3601_vm11, %v3603_v5, %v3599_v51  ;;  %vm3766_vm11 = vcmp.eq.s32.totalorder %v5319_v29, 8 }
 0x4f2   : > { %4072 = vpush %v3604_v47  ;;  %v3768_v43 = vsel %vm3766_vm11, %v3767_v1, 0.0  ;;  %v3783_v47 = vstv %s6222_s1 }
 0x4f3   : > { %4074 = vpush %v3624_v36 }
 0x4f4   : > { %4076 = vpush %v3635_v19 }
 0x4f5   : > { %4078 = vpush %v3646_v13 }
 0x4f6   : > { %4080 = vpush %v3657_v11 }
 0x4f7   : > { %4082 = vpush %v3668_v26 }
 0x523   : > { %s4073_s5 = spop %4072 }
 0x524   : > { %s3606_s6 = smul.f32 %s4073_s5, %s3588_s21  ;;  %s6325_s8 = spop %4074 }
 0x525   : > { %s3670_s11 = smul.f32 %s6325_s8, %s6325_s8  ;;  %s6329_s9 = spop %4076 }
 0x526   : > { %v3747_v59 = vstv %s3606_s6  ;;  %s3672_s12 = smul.f32 %s6329_s9, %s6329_s9  ;;  %s4079_s7 = spop %4078 }
 0x527   : > { %v3748_v52 = vsel %vm3746_vm12, %v3747_v59, 0.0  ;;  %s3674_s13 = smul.f32 %s6329_s9, %s6325_s8  ;;  %s3671_s28 = ssub.f32 %s4079_s7, %s3670_s11  ;;  %vm3770_vm12 = vcmp.eq.s32.totalorder %v5319_v29, 9 }
 0x528   : > { %v6336_v39 = vadd.f32 %v3748_v52, %v6298_v40  ;;  %s4081_s29 = spop %4080 }
 0x529   : > { %s3697_s14 = smax.f32 %s6439_s26, %s3671_s28  ;;  %s3673_s21 = ssub.f32 %s4081_s29, %s3672_s12 }
 0x52a   : > { %s3714_s12 = smul.f32 0.5, %s6322_s4 }
 0x52b   : > { %s3678_s5 = sadd.f32 %s3673_s21, %s3671_s28  ;;  %s3698_s24 = smax.f32 %s6439_s26, %s3673_s21 }
 0x52c   : > { %s3699_s10 = smul.f32 %s3698_s24, %s3697_s14 }
 0x52d   : > { %s3679_s15 = sadd.f32 %s6322_s4, %s3678_s5 }
 0x52e   : > { %v3700_v3 = vstv %s3699_s10  ;;  %s4083_s10 = spop %4082 }
 0x52f   : > { %v3680_v34 = vstv %s3679_s15  ;;  %4159 = vrsqrt.f32 %v3700_v3  ;;  %vm3708_vm1 = vcmp.eq.f32.partialorder %v3700_v3, inf  ;;  %v3711_v56 = vand.u32 2147483648, %v3700_v3  ;;  %s3675_s15 = ssub.f32 %s4083_s10, %s3674_s13  ;;  %s6440_s13 = smul.f32 %s6266_s2, %s6264_s3 }
 0x530   : > { %4161 = vrcp.f32 %v3680_v34  ;;  %v3692_v54 = vand.u32 2147483648, %v3680_v34  ;;  %v3690_v53 = vand.u32 2147483647, %v3680_v34  ;;  %vm3686_vm14 = vweird.f32 %v3680_v34  ;;  %s764_s2 = scalar_lea.vmem %s6401_s18, %s6443_s19 }
 0x531   : > { %vm3710_vm2 = vcmp.eq.f32.partialorder %v3700_v3, 0.0  ;;  %s3676_s26 = smul.f32 2.0, %s3675_s15  ;;  %v3763_v23 = vstv %s6440_s13 }
 0x532   : > { %v3693_v60 = vor.u32 1.1754944e-38, %v3692_v54  ;;  %vm3691_vm0 = vcmp.eq.f32.partialorder %v3690_v53, 8.507059e+37  ;;  %v3764_v48 = vsel %vm3762_vm10, %v3763_v23, 0.0 }
 0x533   : > { %s6345_s24 = sadd.f32 %s6322_s4, %s3676_s26 }
 0x534   : > { %s3715_s4 = sadd.f32 %s3714_s12, %s3675_s15 }
 0x535   : > { %v4160_v61 = vpop.eup %4159 }
 0x536   : > { %v4162_v33 = vpop.eup %4161  ;;  %v3702_v9 = vmul.f32 %v4160_v61, %v3700_v3 }
 0x537   : > { %v3682_v41 = vmul.f32 %v4162_v33, %v3680_v34  ;;  %vm3687_vm13 = vweird.f32 %v4162_v33 }
 0x538   : > { %v3703_v49 = vmul.f32 %v4160_v61, %v3702_v9  ;;  %vm3688_vm15 = vmor %vm3686_vm14, %vm3687_vm13  ;;  %vm3774_vm13 = vcmp.eq.s32.totalorder %v5319_v29, 10  ;;  %vm3778_vm14 = vcmp.eq.s32.totalorder %v5319_v29, 11 }
 0x539   : > { %v3683_v40 = vsub.f32 1.0, %v3682_v41  ;;  %v3776_v38 = vsel %vm3774_vm13, %v3775_v28, 0.0  ;;  %v3780_v19 = vsel %vm3778_vm14, %v3779_v25, 0.0 }
 0x53a   : > { %v3704_v31 = vmul.f32 0.5, %v3703_v49 }
 0x53b   : > { %v3684_v42 = vmul.f32 %v4162_v33, %v3683_v40 }
 0x53c   : > { %v3705_v35 = vsub.f32 1.5, %v3704_v31 }
 0x53d   : > { %v3685_v46 = vadd.f32 %v4162_v33, %v3684_v42 }
 0x53e   : > { %v3706_v45 = vmul.f32 %v4160_v61, %v3705_v35 }
 0x53f   : > { %v3689_v7 = vsel %vm3688_vm15, %v4162_v33, %v3685_v46  ;;  %vm3782_vm15 = vcmp.eq.s32.totalorder %v5319_v29, 12 }
 0x540   : > { %v3694_v15 = vsel %vm3691_vm0, %v3693_v60, %v3689_v7  ;;  %v3707_v8 = vmul.f32 %v3706_v45, %v3700_v3  ;;  %v3784_v26 = vsel %vm3782_vm15, %v3783_v47, 0.0  ;;  %vm3786_vm0 = vcmask 122880  }
 0x541   : > { %4084 = vpush %v3694_v15 }
 0x542   : > { %v3709_v44 = vsel %vm3708_vm1, %v3700_v3, %v3707_v8 }
 0x543   : > { %v3712_v20 = vsel %vm3710_vm2, %v3711_v56, %v3709_v44 }
 0x544   : > { %4086 = vpush %v3712_v20 }
 0x572   : > { %s6347_s6 = spop %4084 }
 0x573   : > { %s3696_s11 = smul.f32 %s6347_s6, %s6345_s24 }
 0x575   : > { %s4087_s7 = spop %4086  ;;  %v3771_v55 = vstv %s3696_s11 }
 0x576   : > { %s3716_s28 = sadd.f32 %s4087_s7, %s3714_s12  ;;  %v3772_v12 = vsel %vm3770_vm12, %v3771_v55, 0.0 }
 0x578   : > { %v3717_v27 = vstv %s3716_s28 }
 0x579   : > { %4163 = vrcp.f32 %v3717_v27  ;;  %v3729_v17 = vand.u32 2147483648, %v3717_v27  ;;  %v3727_v6 = vand.u32 2147483647, %v3717_v27  ;;  %vm3723_vm4 = vweird.f32 %v3717_v27 }
 0x57b   : > { %v3730_v21 = vor.u32 1.1754944e-38, %v3729_v17  ;;  %vm3728_vm6 = vcmp.eq.f32.partialorder %v3727_v6, 8.507059e+37 }
 0x57f   : > { %v4164_v57 = vpop.eup %4163 }
 0x580   : > { %v3719_v58 = vmul.f32 %v4164_v57, %v3717_v27  ;;  %vm3724_vm3 = vweird.f32 %v4164_v57 }
 0x581   : > { %vm3725_vm5 = vmor %vm3723_vm4, %vm3724_vm3 }
 0x582   : > { %v3720_v0 = vsub.f32 1.0, %v3719_v58 }
 0x584   : > { %v3721_v2 = vmul.f32 %v4164_v57, %v3720_v0 }
 0x586   : > { %v3722_v63 = vadd.f32 %v4164_v57, %v3721_v2 }
 0x588   : > { %v3726_v32 = vsel %vm3725_vm5, %v4164_v57, %v3722_v63 }
 0x589   : > { %v3731_v18 = vsel %vm3728_vm6, %v3730_v21, %v3726_v32 }
 0x58a   : > { %4088 = vpush %v3731_v18 }
 0x5bb   : > { %s4089_s8 = spop %4088 }
 0x5bc   : > { %s3733_s9 = smul.f32 %s4089_s8, %s3715_s4 }
 0x5be   : > { %v3751_v62 = vstv %s3733_s9 }
 0x5bf   : > { %v3752_v50 = vsel %vm3750_vm7, %v3751_v62, 0.0 }
 0x5c0   : > { %v3753_v37 = vadd.f32 %v3752_v50, %v6336_v39 }
 0x5c2   : > { %v3757_v24 = vadd.f32 %v3756_v30, %v3753_v37 }
 0x5c4   : > { %v3761_v14 = vadd.f32 %v3760_v16, %v3757_v24 }
 0x5c6   : > { %v3765_v10 = vadd.f32 %v3764_v48, %v3761_v14 }
 0x5c8   : > { %v3769_v5 = vadd.f32 %v3768_v43, %v3765_v10 }
 0x5ca   : > { %v3773_v51 = vadd.f32 %v3772_v12, %v3769_v5 }
 0x5cc   : > { %v3777_v36 = vadd.f32 %v3776_v38, %v3773_v51 }
 0x5ce   : > { %v3781_v13 = vadd.f32 %v3780_v19, %v3777_v36 }
 0x5d0   : > { %v3785_v11 = vadd.f32 %v3784_v26, %v3781_v13 }
 0x5d2   : > { %3787 = vst.msk [vmem:[%s764_s2] sm:$0x1] %vm3786_vm0, %v3785_v11 }
 0x5d3 PF: > { %s30_s27 = sadd.s32 1, %s4226_s27  }
 0x5d4   : > { %p27_p7 = scmp.ge.s32.totalorder %s30_s27, 4  }
 0x5d6   :  { %29 = sbr.rel (!%p27_p7) target bundleno = 19 (0x13), region = 159 }
 0x5db   :  { %3805 = vsyncpa [#allocation5], 1 }
 0x5dc   :  { %3807 = vsyncpa [#allocation5 + $0x1], 1 }
 0x5dd   :  { %3808 = vsyncpa [#allocation6], 1 }
 0x5de   :  { %3810 = vsyncpa [#allocation6 + $0x1], 1 }

</bundles_post_ra>
